<compile_context>
chip_gen: v7x
topology: tpu7x:2x2x1
jax: 0.10.0
libtpu: 0.0.40
codegen_flags: <defaults>
</compile_context>

<pallas_src>
import functools

import jax
import jax.numpy as jnp
from jax import lax
from jax.experimental import pallas as pl
from jax.experimental.pallas import tpu as pltpu


# bf16 MXU operands (f32 accumulation) per the v6e/v7x review guidance.
MATMUL_DTYPE = jnp.bfloat16


# ----------------------------------------------------------------------------
# In-kernel helpers (operate on VMEM-resident values / refs)
# ----------------------------------------------------------------------------

def _dot(a, b, dims=((1,), (0,))):
    """2-D matmul with bf16 operands and f32 accumulation.

    `dims` are the contracting dims of (lhs, rhs); using dot_general lets us
    contract a non-minor dim directly (no explicit in-kernel transpose).
    """
    return lax.dot_general(
        a.astype(MATMUL_DTYPE), b.astype(MATMUL_DTYPE),
        dimension_numbers=(dims, ((), ())),
        preferred_element_type=jnp.float32)


def _layernorm(x, g, b, eps=1e-5):
    mu = jnp.mean(x, axis=-1, keepdims=True)
    xc = x - mu
    var = jnp.mean(xc * xc, axis=-1, keepdims=True)
    return xc * lax.rsqrt(var + eps) * g + b


def _softmax_rows(s):
    s = s - jnp.max(s, axis=-1, keepdims=True)
    p = jnp.exp(s)
    return p * pl.reciprocal(jnp.sum(p, axis=-1, keepdims=True), approx=True)


def _revin_embed(x, w_ref, b_ref, n_norm):
    """RevIN (instance norm over time of the first n_norm columns) + inverted
    embedding.  x: (L, C) with C = n_vars + n_mark (host-concatenated); the
    mark columns pass through un-normalized (lane-mask select).  The token
    matrix is produced with a single dot_general contracting the time dim:
    tokens = [xn ; mark]^T @ W + b  ->  (C, D)."""
    mean = jnp.mean(x, axis=0, keepdims=True)                       # (1, C)
    xc = x - mean
    std = jnp.sqrt(jnp.mean(xc * xc, axis=0, keepdims=True) + 1e-5)  # pop. var, eps inside sqrt
    col = lax.broadcasted_iota(jnp.int32, x.shape, 1)
    xn = jnp.where(col < n_norm, xc / std, x)
    tok = _dot(xn, w_ref[...], dims=((0,), (0,))) + b_ref[...]       # (C, D)
    return tok, mean, std


def _mha(xq, xkv, r, pre, layer, q_rows, kv_rows):
    """Multi-head softmax attention with per-head weight tiles.

    xq: (Mq, D) flattened block of query tokens, xkv: (Mkv, D) key/value tokens.
    r[pre+'wq'/'wk'/'wv']: (n_layers, H, D, E), biases (n_layers, H, 1, E);
    r[pre+'wo']: (n_layers, H, E, D), r[pre+'bo']: (n_layers, 1, D).
    The per-head concat is folded into the output projection (sum over heads);
    the attention scale is pre-folded into wq/bq on the host.
    q_rows / kv_rows: static (start, length) row ranges per sample.
    """
    wq, bq = r[pre + "wq"], r[pre + "bq"]
    wk, bk = r[pre + "wk"], r[pre + "bk"]
    wv, bv = r[pre + "wv"], r[pre + "bv"]
    wo, bo = r[pre + "wo"], r[pre + "bo"]
    n_heads = wq.shape[1]
    ctx = [None] * len(q_rows)
    for h in range(n_heads):
        qh = _dot(xq, wq[layer, h]) + bq[layer, h]        # (Mq, E)
        kh = _dot(xkv, wk[layer, h]) + bk[layer, h]       # (Mkv, E)
        vh = _dot(xkv, wv[layer, h]) + bv[layer, h]       # (Mkv, E)
        woh = wo[layer, h]                                # (E, D)
        for s, ((q0, ql), (k0, kl)) in enumerate(zip(q_rows, kv_rows)):
            scores = _dot(qh[q0:q0 + ql], kh[k0:k0 + kl], dims=((1,), (1,)))
            probs = _softmax_rows(scores)                 # (ql, kl)
            o = _dot(_dot(probs, vh[k0:k0 + kl]), woh)    # (ql, D)
            ctx[s] = o if ctx[s] is None else ctx[s] + o
    out = ctx[0] if len(ctx) == 1 else jnp.concatenate(ctx, axis=0)
    return out + bo[layer]


def _encoder_stack(x, r, pre, rows):
    """All EncoderLayers + the encoder's final LayerNorm, on a flattened slab."""
    n_layers = r[pre + "wq"].shape[0]
    for l in range(n_layers):
        attn = _mha(x, x, r, pre, l, rows, rows)
        x = _layernorm(x + attn, r[pre + "ln1_g"][l], r[pre + "ln1_b"][l])
        y = jnp.maximum(_dot(x, r[pre + "wff1"][l]) + r[pre + "bff1"][l], 0.0)
        y = _dot(y, r[pre + "wff2"][l]) + r[pre + "bff2"][l]
        x = _layernorm(x + y, r[pre + "ln2_g"][l], r[pre + "ln2_b"][l])
    return _layernorm(x, r[pre + "norm_g"][...], r[pre + "norm_b"][...])


def _mm_block(xw, xm, r, w_rows, m_rows):
    # TODO(synk): BMAttentionBlock/BMAttentionLayer/BMAttention source was not
    # provided; reconstructed as residual cross-modal attention (water queries,
    # mete keys/values) followed by residual self-attention, with the two given
    # LayerNorms applied after each stage.
    x = xw
    for l in range(r["bm_wq"].shape[0]):
        x = x + _mha(x, xm, r, "bm_", l, w_rows, m_rows)
    x = _layernorm(x, r["mm_n1_g"][...], r["mm_n1_b"][...])
    for l in range(r["sa_wq"].shape[0]):
        x = x + _mha(x, x, r, "sa_", l, w_rows, w_rows)
    return _layernorm(x, r["mm_n2_g"][...], r["mm_n2_b"][...])


# ----------------------------------------------------------------------------
# The single fused kernel
# ----------------------------------------------------------------------------

def _immtst_kernel(*refs, names, b_blk, n_water, n_mete):
    r = dict(zip(names, refs))          # all input refs (zip stops before out)
    out_ref = refs[-1]                  # (b_blk, pred_len, n_water)
    c_w = r["xw"].shape[2]              # n_water + n_mark
    c_m = r["xm"].shape[2]              # n_mete  + n_mark

    # 1) RevIN + inverted embedding per sample; token matrices are stacked into
    #    a flattened (b_blk * n_tok, d_model) slab so QKV/FFN/LN matmuls get
    #    the whole sample block in the MXU M dimension.
    tok_w, tok_m, mean_w, std_w = [], [], [], []
    for s in range(b_blk):
        t, mu, sd = _revin_embed(r["xw"][s], r["w_emb_w"], r["w_emb_b"], n_water)
        tok_w.append(t); mean_w.append(mu); std_w.append(sd)
        t, _, _ = _revin_embed(r["xm"][s], r["m_emb_w"], r["m_emb_b"], n_mete)
        tok_m.append(t)
    xw = tok_w[0] if b_blk == 1 else jnp.concatenate(tok_w, axis=0)
    xm = tok_m[0] if b_blk == 1 else jnp.concatenate(tok_m, axis=0)
    w_rows = [(s * c_w, c_w) for s in range(b_blk)]
    m_rows = [(s * c_m, c_m) for s in range(b_blk)]

    # 2) Per-modality encoders (all layers + final LayerNorm fused).
    xw = _encoder_stack(xw, r, "w_", w_rows)
    xm = _encoder_stack(xm, r, "m_", m_rows)

    # 3) Multimodal block (cross-modal + self attention + both LayerNorms).
    xw = _mm_block(xw, xm, r, w_rows, m_rows)

    # 4) Projector + RevIN de-normalization.  proj_w is kept in nn.Linear's
    #    native (pred_len, d_model) layout so the NT dot emits (pred_len, N)
    #    directly == .permute(0, 2, 1)[:, :, :N]; no in-kernel transpose of the
    #    decoder output, and mean/std broadcast naturally along lanes.
    for s in range(b_blk):
        h = xw[s * c_w: s * c_w + n_water, :]                       # (N, D)
        dec = _dot(r["proj_w"][...], h, dims=((1,), (1,))) + r["proj_b"][...]
        out_ref[s] = dec * std_w[s][:, :n_water] + mean_w[s][:, :n_water]


# ----------------------------------------------------------------------------
# Host-side wrapper
# ----------------------------------------------------------------------------

def _zero_index_map(*_, ndim):
    return (0,) * ndim


def _flatten_params(params):
    """Fixed operand order for the fused call.  Matmul weight stacks are cast
    to bf16 host-side (halves weight bytes HBM->VMEM); biases / LayerNorm
    params stay f32."""
    entries = [
        ("w_emb_w", params["w_emb"]["w"], True),
        ("w_emb_b", params["w_emb"]["b"], False),
        ("m_emb_w", params["m_emb"]["w"], True),
        ("m_emb_b", params["m_emb"]["b"], False),
    ]
    enc_keys = ("wq", "bq", "wk", "bk", "wv", "bv", "wo", "bo",
                "wff1", "bff1", "wff2", "bff2",
                "ln1_g", "ln1_b", "ln2_g", "ln2_b", "norm_g", "norm_b")
    for prefix, enc in (("w_", params["water_encoder"]),
                        ("m_", params["mete_encoder"])):
        for k in enc_keys:
            entries.append((prefix + k, enc[k], k.startswith("w")))
    mm_keys = ("bm_wq", "bm_bq", "bm_wk", "bm_bk", "bm_wv", "bm_bv", "bm_wo", "bm_bo",
               "sa_wq", "sa_bq", "sa_wk", "sa_bk", "sa_wv", "sa_bv", "sa_wo", "sa_bo",
               "mm_n1_g", "mm_n1_b", "mm_n2_g", "mm_n2_b")
    for k in mm_keys:
        entries.append((k, params["mm"][k], "_w" in k))
    entries.append(("proj_w", params["proj"]["w"], True))
    entries.append(("proj_b", params["proj"]["b"], False))

    names, arrays = [], []
    for name, arr, is_w in entries:
        names.append(name)
        arrays.append(arr.astype(MATMUL_DTYPE) if is_w else arr)
    return names, arrays


def immtst_forward(params, water_enc, water_mark, mete_enc, mete_mark, pred_len):
    B, _, n_water = water_enc.shape
    n_mete = mete_enc.shape[2]

    # Host-side concat of [x ; x_mark] along the variable axis -> one in-kernel
    # matmul + one store per sample for the embedding.
    xw_all = jnp.concatenate([water_enc, water_mark], axis=2)   # (B, L, Nw+Nm)
    xm_all = jnp.concatenate([mete_enc, mete_mark], axis=2)     # (B, L, Ne+Nm)

    # Batch blocking: keep >=2 grid steps so both v7x TensorCores get work,
    # while flattening b_blk samples into the matmul M dimension per step.
    n_blocks = 2 if (B % 2 == 0 and B >= 2) else 1
    b_blk = B // n_blocks

    p_names, p_arrays = _flatten_params(params)
    names = tuple(["xw", "xm"] + p_names)
    arrays = [xw_all, xm_all] + p_arrays

    in_specs = []
    for name, arr in zip(names, arrays):
        if name in ("xw", "xm"):
            in_specs.append(
                pl.BlockSpec((b_blk,) + arr.shape[1:], lambda i: (i, 0, 0)))
        else:
            in_specs.append(
                pl.BlockSpec(arr.shape,
                             functools.partial(_zero_index_map, ndim=arr.ndim)))

    kern = functools.partial(_immtst_kernel, names=names, b_blk=b_blk,
                             n_water=n_water, n_mete=n_mete)
    return pl.pallas_call(
        kern,
        out_shape=jax.ShapeDtypeStruct((B, pred_len, n_water), jnp.float32),
        grid=(n_blocks,),
        in_specs=in_specs,
        out_specs=pl.BlockSpec((b_blk, pred_len, n_water), lambda i: (i, 0, 0)),
        compiler_params=pltpu.CompilerParams(dimension_semantics=("parallel",)),
    )(*arrays)
    # NOTE: dec[:, -pred_len:, :] in the reference is a no-op (projector already
    # emits exactly pred_len steps).


# ----------------------------------------------------------------------------
# Deterministic parameter construction (per-head weight tiles, scale folded)
# ----------------------------------------------------------------------------

def _init_linear(key, din, dout):
    kw, kb = jax.random.split(key)
    w = jax.random.normal(kw, (din, dout), jnp.float32) * 0.05
    b = jax.random.normal(kb, (1, dout), jnp.float32) * 0.01
    return w, b


def _split_heads_in(w, b, n_heads):
    """(D, D) projection -> per-head (H, D, E) tiles; bias -> (H, 1, E)."""
    d_in, d_out = w.shape
    e = d_out // n_heads
    wh = w.reshape(d_in, n_heads, e).transpose(1, 0, 2)
    bh = b.reshape(n_heads, e)[:, None, :]
    return wh, bh


def _init_attn_layer(key, d_model, n_heads):
    e = d_model // n_heads
    scale = 1.0 / (e ** 0.5)
    ks = jax.random.split(key, 4)
    wq, bq = _init_linear(ks[0], d_model, d_model)
    wqh, bqh = _split_heads_in(wq * scale, bq * scale, n_heads)   # fold 1/sqrt(E)
    wk, bk = _init_linear(ks[1], d_model, d_model)
    wkh, bkh = _split_heads_in(wk, bk, n_heads)
    wv, bv = _init_linear(ks[2], d_model, d_model)
    wvh, bvh = _split_heads_in(wv, bv, n_heads)
    wo, bo = _init_linear(ks[3], d_model, d_model)
    woh = wo.reshape(n_heads, e, d_model)                         # (H, E, D)
    return wqh, bqh, wkh, bkh, wvh, bvh, woh, bo


def init_encoder_params(key, n_layers, d_model, d_ff, n_heads):
    keys = ("wq", "bq", "wk", "bk", "wv", "bv", "wo", "bo",
            "wff1", "bff1", "wff2", "bff2")
    stacks = {k: [] for k in keys}
    for k in jax.random.split(key, n_layers):
        ka, k1, k2 = jax.random.split(k, 3)
        attn = _init_attn_layer(ka, d_model, n_heads)
        wff1, bff1 = _init_linear(k1, d_model, d_ff)
        wff2, bff2 = _init_linear(k2, d_ff, d_model)
        for nm, v in zip(keys, attn + (wff1, bff1, wff2, bff2)):
            stacks[nm].append(v)
    p = {k: jnp.stack(v) for k, v in stacks.items()}
    p["ln1_g"] = jnp.ones((n_layers, 1, d_model), jnp.float32)
    p["ln1_b"] = jnp.zeros((n_layers, 1, d_model), jnp.float32)
    p["ln2_g"] = jnp.ones((n_layers, 1, d_model), jnp.float32)
    p["ln2_b"] = jnp.zeros((n_layers, 1, d_model), jnp.float32)
    p["norm_g"] = jnp.ones((1, d_model), jnp.float32)
    p["norm_b"] = jnp.zeros((1, d_model), jnp.float32)
    return p


def init_mm_params(key, b_layers, ba_layers, d_model, n_heads):
    def attn_stack(k, n, pre):
        keys = tuple(pre + x for x in ("wq", "bq", "wk", "bk", "wv", "bv", "wo", "bo"))
        stacks = {kk: [] for kk in keys}
        for kk in jax.random.split(k, n):
            for nm, v in zip(keys, _init_attn_layer(kk, d_model, n_heads)):
                stacks[nm].append(v)
        return {kk: jnp.stack(v) for kk, v in stacks.items()}

    kb, ka = jax.random.split(key)
    p = {}
    p.update(attn_stack(kb, b_layers, "bm_"))
    p.update(attn_stack(ka, ba_layers, "sa_"))
    p["mm_n1_g"] = jnp.ones((1, d_model), jnp.float32)
    p["mm_n1_b"] = jnp.zeros((1, d_model), jnp.float32)
    p["mm_n2_g"] = jnp.ones((1, d_model), jnp.float32)
    p["mm_n2_b"] = jnp.zeros((1, d_model), jnp.float32)
    return p


def init_params(key, water_seq_len, mete_seq_len, d_model, d_ff, pred_len,
                n_heads, ew_layers, em_layers, b_layers, ba_layers):
    ks = jax.random.split(key, 6)
    w_emb_w, w_emb_b = _init_linear(ks[0], water_seq_len, d_model)
    m_emb_w, m_emb_b = _init_linear(ks[1], mete_seq_len, d_model)
    pw, pb = _init_linear(ks[5], d_model, pred_len)
    return {
        "w_emb": {"w": w_emb_w, "b": w_emb_b},
        "m_emb": {"w": m_emb_w, "b": m_emb_b},
        "water_encoder": init_encoder_params(ks[2], ew_layers, d_model, d_ff, n_heads),
        "mete_encoder": init_encoder_params(ks[3], em_layers, d_model, d_ff, n_heads),
        "mm": init_mm_params(ks[4], b_layers, ba_layers, d_model, n_heads),
        # projector kept in nn.Linear's native (pred_len, d_model) layout; bias
        # stored as a (pred_len, 1) column for the (pred_len, N) output orientation.
        "proj": {"w": pw.T, "b": pb.reshape(pred_len, 1)},
    }


# ----------------------------------------------------------------------------
# Main
# ----------------------------------------------------------------------------

if __name__ == "__main__":
    # small config
    B = 2
    WATER_SEQ_LEN = 16
    METE_SEQ_LEN = 16
    N_WATER = 4        # water variables
    N_METE = 5         # meteorological variables
    N_MARK = 4         # time features (freq='h')
    D_MODEL = 32       # NOTE: <128 lanes -> lane under-utilization at toy size
    N_HEADS = 4
    D_FF = 64
    PRED_LEN = 8
    EW_LAYERS = EM_LAYERS = B_LAYERS = BA_LAYERS = 1

    root = jax.random.PRNGKey(0)
    k_param, k_w, k_wm, k_m, k_mm = jax.random.split(root, 5)

    params = init_params(k_param, WATER_SEQ_LEN, METE_SEQ_LEN, D_MODEL, D_FF,
                         PRED_LEN, N_HEADS, EW_LAYERS, EM_LAYERS,
                         B_LAYERS, BA_LAYERS)

    water_enc = jax.random.normal(k_w, (B, WATER_SEQ_LEN, N_WATER), jnp.float32)
    water_mark = jax.random.normal(k_wm, (B, WATER_SEQ_LEN, N_MARK), jnp.float32)
    mete_enc = jax.random.normal(k_m, (B, METE_SEQ_LEN, N_METE), jnp.float32)
    mete_mark = jax.random.normal(k_mm, (B, METE_SEQ_LEN, N_MARK), jnp.float32)

    forward = jax.jit(functools.partial(immtst_forward, pred_len=PRED_LEN))
    out = forward(params, water_enc, water_mark, mete_enc, mete_mark)
    out = jax.block_until_ready(out)
    assert out.shape == (B, PRED_LEN, N_WATER), out.shape
    print("KERNEL_OK")
</pallas_src>

<mosaic_0001>
module attributes {stable_mosaic.version = 11 : i64} {
  func.func @_immtst_kernel(%arg0: i32, %arg1: memref<1x16x8xf32, #tpu.memory_space<vmem>>, %arg2: memref<1x16x9xf32, #tpu.memory_space<vmem>>, %arg3: memref<16x32xbf16, #tpu.memory_space<vmem>>, %arg4: memref<1x32xf32, #tpu.memory_space<vmem>>, %arg5: memref<16x32xbf16, #tpu.memory_space<vmem>>, %arg6: memref<1x32xf32, #tpu.memory_space<vmem>>, %arg7: memref<1x4x32x8xbf16, #tpu.memory_space<vmem>>, %arg8: memref<1x4x1x8xf32, #tpu.memory_space<vmem>>, %arg9: memref<1x4x32x8xbf16, #tpu.memory_space<vmem>>, %arg10: memref<1x4x1x8xf32, #tpu.memory_space<vmem>>, %arg11: memref<1x4x32x8xbf16, #tpu.memory_space<vmem>>, %arg12: memref<1x4x1x8xf32, #tpu.memory_space<vmem>>, %arg13: memref<1x4x8x32xbf16, #tpu.memory_space<vmem>>, %arg14: memref<1x1x32xf32, #tpu.memory_space<vmem>>, %arg15: memref<1x32x64xbf16, #tpu.memory_space<vmem>>, %arg16: memref<1x1x64xf32, #tpu.memory_space<vmem>>, %arg17: memref<1x64x32xbf16, #tpu.memory_space<vmem>>, %arg18: memref<1x1x32xf32, #tpu.memory_space<vmem>>, %arg19: memref<1x1x32xf32, #tpu.memory_space<vmem>>, %arg20: memref<1x1x32xf32, #tpu.memory_space<vmem>>, %arg21: memref<1x1x32xf32, #tpu.memory_space<vmem>>, %arg22: memref<1x1x32xf32, #tpu.memory_space<vmem>>, %arg23: memref<1x32xf32, #tpu.memory_space<vmem>>, %arg24: memref<1x32xf32, #tpu.memory_space<vmem>>, %arg25: memref<1x4x32x8xbf16, #tpu.memory_space<vmem>>, %arg26: memref<1x4x1x8xf32, #tpu.memory_space<vmem>>, %arg27: memref<1x4x32x8xbf16, #tpu.memory_space<vmem>>, %arg28: memref<1x4x1x8xf32, #tpu.memory_space<vmem>>, %arg29: memref<1x4x32x8xbf16, #tpu.memory_space<vmem>>, %arg30: memref<1x4x1x8xf32, #tpu.memory_space<vmem>>, %arg31: memref<1x4x8x32xbf16, #tpu.memory_space<vmem>>, %arg32: memref<1x1x32xf32, #tpu.memory_space<vmem>>, %arg33: memref<1x32x64xbf16, #tpu.memory_space<vmem>>, %arg34: memref<1x1x64xf32, #tpu.memory_space<vmem>>, %arg35: memref<1x64x32xbf16, #tpu.memory_space<vmem>>, %arg36: memref<1x1x32xf32, #tpu.memory_space<vmem>>, %arg37: memref<1x1x32xf32, #tpu.memory_space<vmem>>, %arg38: memref<1x1x32xf32, #tpu.memory_space<vmem>>, %arg39: memref<1x1x32xf32, #tpu.memory_space<vmem>>, %arg40: memref<1x1x32xf32, #tpu.memory_space<vmem>>, %arg41: memref<1x32xf32, #tpu.memory_space<vmem>>, %arg42: memref<1x32xf32, #tpu.memory_space<vmem>>, %arg43: memref<1x4x32x8xbf16, #tpu.memory_space<vmem>>, %arg44: memref<1x4x1x8xf32, #tpu.memory_space<vmem>>, %arg45: memref<1x4x32x8xbf16, #tpu.memory_space<vmem>>, %arg46: memref<1x4x1x8xf32, #tpu.memory_space<vmem>>, %arg47: memref<1x4x32x8xbf16, #tpu.memory_space<vmem>>, %arg48: memref<1x4x1x8xf32, #tpu.memory_space<vmem>>, %arg49: memref<1x4x8x32xbf16, #tpu.memory_space<vmem>>, %arg50: memref<1x1x32xf32, #tpu.memory_space<vmem>>, %arg51: memref<1x4x32x8xbf16, #tpu.memory_space<vmem>>, %arg52: memref<1x4x1x8xf32, #tpu.memory_space<vmem>>, %arg53: memref<1x4x32x8xbf16, #tpu.memory_space<vmem>>, %arg54: memref<1x4x1x8xf32, #tpu.memory_space<vmem>>, %arg55: memref<1x4x32x8xbf16, #tpu.memory_space<vmem>>, %arg56: memref<1x4x1x8xf32, #tpu.memory_space<vmem>>, %arg57: memref<1x4x8x32xbf16, #tpu.memory_space<vmem>>, %arg58: memref<1x1x32xf32, #tpu.memory_space<vmem>>, %arg59: memref<1x32xf32, #tpu.memory_space<vmem>>, %arg60: memref<1x32xf32, #tpu.memory_space<vmem>>, %arg61: memref<1x32xf32, #tpu.memory_space<vmem>>, %arg62: memref<1x32xf32, #tpu.memory_space<vmem>>, %arg63: memref<8x32xbf16, #tpu.memory_space<vmem>>, %arg64: memref<8x1xf32, #tpu.memory_space<vmem>>, %arg65: memref<1x8x4xf32, #tpu.memory_space<vmem>>) attributes {dimension_semantics = [#tpu.dimension_semantics<parallel>], iteration_bounds = array<i64: 2>, scalar_prefetch = 0 : i64, scratch_operands = 0 : i64, tpu.core_type = #tpu.core_type<tc>, window_params = [{transform_indices = @transform_0, window_bounds = array<i64: 1, 16, 8>}, {transform_indices = @transform_1, window_bounds = array<i64: 1, 16, 9>}, {pipeline_mode = #tpu.pipeline_mode<synchronous>, transform_indices = @transform_2, window_bounds = array<i64: 16, 32>}, {pipeline_mode = #tpu.pipeline_mode<synchronous>, transform_indices = @transform_3, window_bounds = array<i64: 1, 32>}, {pipeline_mode = #tpu.pipeline_mode<synchronous>, transform_indices = @transform_4, window_bounds = array<i64: 16, 32>}, {pipeline_mode = #tpu.pipeline_mode<synchronous>, transform_indices = @transform_5, window_bounds = array<i64: 1, 32>}, {pipeline_mode = #tpu.pipeline_mode<synchronous>, transform_indices = @transform_6, window_bounds = array<i64: 1, 4, 32, 8>}, {pipeline_mode = #tpu.pipeline_mode<synchronous>, transform_indices = @transform_7, window_bounds = array<i64: 1, 4, 1, 8>}, {pipeline_mode = #tpu.pipeline_mode<synchronous>, transform_indices = @transform_8, window_bounds = array<i64: 1, 4, 32, 8>}, {pipeline_mode = #tpu.pipeline_mode<synchronous>, transform_indices = @transform_9, window_bounds = array<i64: 1, 4, 1, 8>}, {pipeline_mode = #tpu.pipeline_mode<synchronous>, transform_indices = @transform_10, window_bounds = array<i64: 1, 4, 32, 8>}, {pipeline_mode = #tpu.pipeline_mode<synchronous>, transform_indices = @transform_11, window_bounds = array<i64: 1, 4, 1, 8>}, {pipeline_mode = #tpu.pipeline_mode<synchronous>, transform_indices = @transform_12, window_bounds = array<i64: 1, 4, 8, 32>}, {pipeline_mode = #tpu.pipeline_mode<synchronous>, transform_indices = @transform_13, window_bounds = array<i64: 1, 1, 32>}, {pipeline_mode = #tpu.pipeline_mode<synchronous>, transform_indices = @transform_14, window_bounds = array<i64: 1, 32, 64>}, {pipeline_mode = #tpu.pipeline_mode<synchronous>, transform_indices = @transform_15, window_bounds = array<i64: 1, 1, 64>}, {pipeline_mode = #tpu.pipeline_mode<synchronous>, transform_indices = @transform_16, window_bounds = array<i64: 1, 64, 32>}, {pipeline_mode = #tpu.pipeline_mode<synchronous>, transform_indices = @transform_17, window_bounds = array<i64: 1, 1, 32>}, {pipeline_mode = #tpu.pipeline_mode<synchronous>, transform_indices = @transform_18, window_bounds = array<i64: 1, 1, 32>}, {pipeline_mode = #tpu.pipeline_mode<synchronous>, transform_indices = @transform_19, window_bounds = array<i64: 1, 1, 32>}, {pipeline_mode = #tpu.pipeline_mode<synchronous>, transform_indices = @transform_20, window_bounds = array<i64: 1, 1, 32>}, {pipeline_mode = #tpu.pipeline_mode<synchronous>, transform_indices = @transform_21, window_bounds = array<i64: 1, 1, 32>}, {pipeline_mode = #tpu.pipeline_mode<synchronous>, transform_indices = @transform_22, window_bounds = array<i64: 1, 32>}, {pipeline_mode = #tpu.pipeline_mode<synchronous>, transform_indices = @transform_23, window_bounds = array<i64: 1, 32>}, {pipeline_mode = #tpu.pipeline_mode<synchronous>, transform_indices = @transform_24, window_bounds = array<i64: 1, 4, 32, 8>}, {pipeline_mode = #tpu.pipeline_mode<synchronous>, transform_indices = @transform_25, window_bounds = array<i64: 1, 4, 1, 8>}, {pipeline_mode = #tpu.pipeline_mode<synchronous>, transform_indices = @transform_26, window_bounds = array<i64: 1, 4, 32, 8>}, {pipeline_mode = #tpu.pipeline_mode<synchronous>, transform_indices = @transform_27, window_bounds = array<i64: 1, 4, 1, 8>}, {pipeline_mode = #tpu.pipeline_mode<synchronous>, transform_indices = @transform_28, window_bounds = array<i64: 1, 4, 32, 8>}, {pipeline_mode = #tpu.pipeline_mode<synchronous>, transform_indices = @transform_29, window_bounds = array<i64: 1, 4, 1, 8>}, {pipeline_mode = #tpu.pipeline_mode<synchronous>, transform_indices = @transform_30, window_bounds = array<i64: 1, 4, 8, 32>}, {pipeline_mode = #tpu.pipeline_mode<synchronous>, transform_indices = @transform_31, window_bounds = array<i64: 1, 1, 32>}, {pipeline_mode = #tpu.pipeline_mode<synchronous>, transform_indices = @transform_32, window_bounds = array<i64: 1, 32, 64>}, {pipeline_mode = #tpu.pipeline_mode<synchronous>, transform_indices = @transform_33, window_bounds = array<i64: 1, 1, 64>}, {pipeline_mode = #tpu.pipeline_mode<synchronous>, transform_indices = @transform_34, window_bounds = array<i64: 1, 64, 32>}, {pipeline_mode = #tpu.pipeline_mode<synchronous>, transform_indices = @transform_35, window_bounds = array<i64: 1, 1, 32>}, {pipeline_mode = #tpu.pipeline_mode<synchronous>, transform_indices = @transform_36, window_bounds = array<i64: 1, 1, 32>}, {pipeline_mode = #tpu.pipeline_mode<synchronous>, transform_indices = @transform_37, window_bounds = array<i64: 1, 1, 32>}, {pipeline_mode = #tpu.pipeline_mode<synchronous>, transform_indices = @transform_38, window_bounds = array<i64: 1, 1, 32>}, {pipeline_mode = #tpu.pipeline_mode<synchronous>, transform_indices = @transform_39, window_bounds = array<i64: 1, 1, 32>}, {pipeline_mode = #tpu.pipeline_mode<synchronous>, transform_indices = @transform_40, window_bounds = array<i64: 1, 32>}, {pipeline_mode = #tpu.pipeline_mode<synchronous>, transform_indices = @transform_41, window_bounds = array<i64: 1, 32>}, {pipeline_mode = #tpu.pipeline_mode<synchronous>, transform_indices = @transform_42, window_bounds = array<i64: 1, 4, 32, 8>}, {pipeline_mode = #tpu.pipeline_mode<synchronous>, transform_indices = @transform_43, window_bounds = array<i64: 1, 4, 1, 8>}, {pipeline_mode = #tpu.pipeline_mode<synchronous>, transform_indices = @transform_44, window_bounds = array<i64: 1, 4, 32, 8>}, {pipeline_mode = #tpu.pipeline_mode<synchronous>, transform_indices = @transform_45, window_bounds = array<i64: 1, 4, 1, 8>}, {pipeline_mode = #tpu.pipeline_mode<synchronous>, transform_indices = @transform_46, window_bounds = array<i64: 1, 4, 32, 8>}, {pipeline_mode = #tpu.pipeline_mode<synchronous>, transform_indices = @transform_47, window_bounds = array<i64: 1, 4, 1, 8>}, {pipeline_mode = #tpu.pipeline_mode<synchronous>, transform_indices = @transform_48, window_bounds = array<i64: 1, 4, 8, 32>}, {pipeline_mode = #tpu.pipeline_mode<synchronous>, transform_indices = @transform_49, window_bounds = array<i64: 1, 1, 32>}, {pipeline_mode = #tpu.pipeline_mode<synchronous>, transform_indices = @transform_50, window_bounds = array<i64: 1, 4, 32, 8>}, {pipeline_mode = #tpu.pipeline_mode<synchronous>, transform_indices = @transform_51, window_bounds = array<i64: 1, 4, 1, 8>}, {pipeline_mode = #tpu.pipeline_mode<synchronous>, transform_indices = @transform_52, window_bounds = array<i64: 1, 4, 32, 8>}, {pipeline_mode = #tpu.pipeline_mode<synchronous>, transform_indices = @transform_53, window_bounds = array<i64: 1, 4, 1, 8>}, {pipeline_mode = #tpu.pipeline_mode<synchronous>, transform_indices = @transform_54, window_bounds = array<i64: 1, 4, 32, 8>}, {pipeline_mode = #tpu.pipeline_mode<synchronous>, transform_indices = @transform_55, window_bounds = array<i64: 1, 4, 1, 8>}, {pipeline_mode = #tpu.pipeline_mode<synchronous>, transform_indices = @transform_56, window_bounds = array<i64: 1, 4, 8, 32>}, {pipeline_mode = #tpu.pipeline_mode<synchronous>, transform_indices = @transform_57, window_bounds = array<i64: 1, 1, 32>}, {pipeline_mode = #tpu.pipeline_mode<synchronous>, transform_indices = @transform_58, window_bounds = array<i64: 1, 32>}, {pipeline_mode = #tpu.pipeline_mode<synchronous>, transform_indices = @transform_59, window_bounds = array<i64: 1, 32>}, {pipeline_mode = #tpu.pipeline_mode<synchronous>, transform_indices = @transform_60, window_bounds = array<i64: 1, 32>}, {pipeline_mode = #tpu.pipeline_mode<synchronous>, transform_indices = @transform_61, window_bounds = array<i64: 1, 32>}, {pipeline_mode = #tpu.pipeline_mode<synchronous>, transform_indices = @transform_62, window_bounds = array<i64: 8, 32>}, {pipeline_mode = #tpu.pipeline_mode<synchronous>, transform_indices = @transform_63, window_bounds = array<i64: 8, 1>}, {transform_indices = @transform_64, window_bounds = array<i64: 1, 8, 4>}]} {
    %c0 = arith.constant 0 : index
    %c0_0 = arith.constant 0 : index
    %c0_1 = arith.constant 0 : index
    %0 = vector.load %arg1[%c0, %c0_0, %c0_1] : memref<1x16x8xf32, #tpu.memory_space<vmem>>, vector<1x16x8xf32>
    %1 = vector.shape_cast %0 : vector<1x16x8xf32> to vector<16x8xf32>
    %cst = arith.constant dense<0.000000e+00> : vector<8xf32>
    %2 = vector.multi_reduction <add>, %1, %cst [0] : vector<16x8xf32> to vector<8xf32>
    %3 = vector.shape_cast %2 : vector<8xf32> to vector<1x8xf32>
    %cst_2 = arith.constant 1.600000e+01 : f32
    %4 = vector.broadcast %cst_2 : f32 to vector<1x8xf32>
    %5 = arith.divf %3, %4 : vector<1x8xf32>
    %6 = vector.broadcast %5 : vector<1x8xf32> to vector<16x8xf32>
    %7 = arith.subf %1, %6 : vector<16x8xf32>
    %8 = arith.mulf %7, %7 : vector<16x8xf32>
    %cst_3 = arith.constant dense<0.000000e+00> : vector<8xf32>
    %9 = vector.multi_reduction <add>, %8, %cst_3 [0] : vector<16x8xf32> to vector<8xf32>
    %10 = vector.shape_cast %9 : vector<8xf32> to vector<1x8xf32>
    %cst_4 = arith.constant 1.600000e+01 : f32
    %11 = vector.broadcast %cst_4 : f32 to vector<1x8xf32>
    %12 = arith.divf %10, %11 : vector<1x8xf32>
    %cst_5 = arith.constant 9.99999974E-6 : f32
    %13 = vector.broadcast %cst_5 : f32 to vector<1x8xf32>
    %14 = arith.addf %12, %13 : vector<1x8xf32>
    %15 = math.sqrt %14 : vector<1x8xf32>
    %16 = tpu.iota {dimensions = array<i32: 1>} : vector<16x8xi32>
    %c4_i32 = arith.constant 4 : i32
    %17 = vector.broadcast %c4_i32 : i32 to vector<16x8xi32>
    %18 = arith.cmpi slt, %16, %17 : vector<16x8xi32>
    %19 = vector.broadcast %15 : vector<1x8xf32> to vector<16x8xf32>
    %20 = arith.divf %7, %19 : vector<16x8xf32>
    %21 = arith.select %18, %20, %1 : vector<16x8xi1>, vector<16x8xf32>
    %c0_6 = arith.constant 0 : index
    %c0_7 = arith.constant 0 : index
    %22 = vector.load %arg3[%c0_6, %c0_7] : memref<16x32xbf16, #tpu.memory_space<vmem>>, vector<16x32xbf16>
    %23 = arith.truncf %21 : vector<16x8xf32> to vector<16x8xbf16>
    %cst_8 = arith.constant dense<0.000000e+00> : vector<8x32xf32>
    %24 = tpu.matmul %23, %22, %cst_8 {dimension_numbers = #tpu.dot_dimension_numbers<[0], [0], [1], [1], [0, 1, 1, 1], [], []>} : vector<16x8xbf16>, vector<16x32xbf16>, vector<8x32xf32> -> vector<8x32xf32>
    %c0_9 = arith.constant 0 : index
    %c0_10 = arith.constant 0 : index
    %25 = vector.load %arg4[%c0_9, %c0_10] : memref<1x32xf32, #tpu.memory_space<vmem>>, vector<1x32xf32>
    %26 = vector.broadcast %25 : vector<1x32xf32> to vector<8x32xf32>
    %27 = arith.addf %24, %26 : vector<8x32xf32>
    %c0_11 = arith.constant 0 : index
    %c0_12 = arith.constant 0 : index
    %c0_13 = arith.constant 0 : index
    %28 = vector.load %arg2[%c0_11, %c0_12, %c0_13] : memref<1x16x9xf32, #tpu.memory_space<vmem>>, vector<1x16x9xf32>
    %29 = vector.shape_cast %28 : vector<1x16x9xf32> to vector<16x9xf32>
    %cst_14 = arith.constant dense<0.000000e+00> : vector<9xf32>
    %30 = vector.multi_reduction <add>, %29, %cst_14 [0] : vector<16x9xf32> to vector<9xf32>
    %31 = vector.shape_cast %30 : vector<9xf32> to vector<1x9xf32>
    %cst_15 = arith.constant 1.600000e+01 : f32
    %32 = vector.broadcast %cst_15 : f32 to vector<1x9xf32>
    %33 = arith.divf %31, %32 : vector<1x9xf32>
    %34 = vector.broadcast %33 : vector<1x9xf32> to vector<16x9xf32>
    %35 = arith.subf %29, %34 : vector<16x9xf32>
    %36 = arith.mulf %35, %35 : vector<16x9xf32>
    %cst_16 = arith.constant dense<0.000000e+00> : vector<9xf32>
    %37 = vector.multi_reduction <add>, %36, %cst_16 [0] : vector<16x9xf32> to vector<9xf32>
    %38 = vector.shape_cast %37 : vector<9xf32> to vector<1x9xf32>
    %cst_17 = arith.constant 1.600000e+01 : f32
    %39 = vector.broadcast %cst_17 : f32 to vector<1x9xf32>
    %40 = arith.divf %38, %39 : vector<1x9xf32>
    %cst_18 = arith.constant 9.99999974E-6 : f32
    %41 = vector.broadcast %cst_18 : f32 to vector<1x9xf32>
    %42 = arith.addf %40, %41 : vector<1x9xf32>
    %43 = math.sqrt %42 : vector<1x9xf32>
    %44 = tpu.iota {dimensions = array<i32: 1>} : vector<16x9xi32>
    %c5_i32 = arith.constant 5 : i32
    %45 = vector.broadcast %c5_i32 : i32 to vector<16x9xi32>
    %46 = arith.cmpi slt, %44, %45 : vector<16x9xi32>
    %47 = vector.broadcast %43 : vector<1x9xf32> to vector<16x9xf32>
    %48 = arith.divf %35, %47 : vector<16x9xf32>
    %49 = arith.select %46, %48, %29 : vector<16x9xi1>, vector<16x9xf32>
    %c0_19 = arith.constant 0 : index
    %c0_20 = arith.constant 0 : index
    %50 = vector.load %arg5[%c0_19, %c0_20] : memref<16x32xbf16, #tpu.memory_space<vmem>>, vector<16x32xbf16>
    %51 = arith.truncf %49 : vector<16x9xf32> to vector<16x9xbf16>
    %cst_21 = arith.constant dense<0.000000e+00> : vector<9x32xf32>
    %52 = tpu.matmul %51, %50, %cst_21 {dimension_numbers = #tpu.dot_dimension_numbers<[0], [0], [1], [1], [0, 1, 1, 1], [], []>} : vector<16x9xbf16>, vector<16x32xbf16>, vector<9x32xf32> -> vector<9x32xf32>
    %c0_22 = arith.constant 0 : index
    %c0_23 = arith.constant 0 : index
    %53 = vector.load %arg6[%c0_22, %c0_23] : memref<1x32xf32, #tpu.memory_space<vmem>>, vector<1x32xf32>
    %54 = vector.broadcast %53 : vector<1x32xf32> to vector<9x32xf32>
    %55 = arith.addf %52, %54 : vector<9x32xf32>
    %c0_24 = arith.constant 0 : index
    %c0_25 = arith.constant 0 : index
    %c0_26 = arith.constant 0 : index
    %c0_27 = arith.constant 0 : index
    %56 = vector.load %arg7[%c0_24, %c0_25, %c0_26, %c0_27] : memref<1x4x32x8xbf16, #tpu.memory_space<vmem>>, vector<1x1x32x8xbf16>
    %57 = vector.shape_cast %56 : vector<1x1x32x8xbf16> to vector<32x8xbf16>
    %58 = arith.truncf %27 : vector<8x32xf32> to vector<8x32xbf16>
    %cst_28 = arith.constant dense<0.000000e+00> : vector<8x8xf32>
    %59 = tpu.matmul %58, %57, %cst_28 {dimension_numbers = #tpu.dot_dimension_numbers<[1], [0], [0], [1], [0, 0, 1, 1], [], []>} : vector<8x32xbf16>, vector<32x8xbf16>, vector<8x8xf32> -> vector<8x8xf32>
    %c0_29 = arith.constant 0 : index
    %c0_30 = arith.constant 0 : index
    %c0_31 = arith.constant 0 : index
    %c0_32 = arith.constant 0 : index
    %60 = vector.load %arg8[%c0_29, %c0_30, %c0_31, %c0_32] : memref<1x4x1x8xf32, #tpu.memory_space<vmem>>, vector<1x1x1x8xf32>
    %61 = vector.shape_cast %60 : vector<1x1x1x8xf32> to vector<1x8xf32>
    %62 = vector.broadcast %61 : vector<1x8xf32> to vector<8x8xf32>
    %63 = arith.addf %59, %62 : vector<8x8xf32>
    %c0_33 = arith.constant 0 : index
    %c0_34 = arith.constant 0 : index
    %c0_35 = arith.constant 0 : index
    %c0_36 = arith.constant 0 : index
    %64 = vector.load %arg9[%c0_33, %c0_34, %c0_35, %c0_36] : memref<1x4x32x8xbf16, #tpu.memory_space<vmem>>, vector<1x1x32x8xbf16>
    %65 = vector.shape_cast %64 : vector<1x1x32x8xbf16> to vector<32x8xbf16>
    %66 = arith.truncf %27 : vector<8x32xf32> to vector<8x32xbf16>
    %cst_37 = arith.constant dense<0.000000e+00> : vector<8x8xf32>
    %67 = tpu.matmul %66, %65, %cst_37 {dimension_numbers = #tpu.dot_dimension_numbers<[1], [0], [0], [1], [0, 0, 1, 1], [], []>} : vector<8x32xbf16>, vector<32x8xbf16>, vector<8x8xf32> -> vector<8x8xf32>
    %c0_38 = arith.constant 0 : index
    %c0_39 = arith.constant 0 : index
    %c0_40 = arith.constant 0 : index
    %c0_41 = arith.constant 0 : index
    %68 = vector.load %arg10[%c0_38, %c0_39, %c0_40, %c0_41] : memref<1x4x1x8xf32, #tpu.memory_space<vmem>>, vector<1x1x1x8xf32>
    %69 = vector.shape_cast %68 : vector<1x1x1x8xf32> to vector<1x8xf32>
    %70 = vector.broadcast %69 : vector<1x8xf32> to vector<8x8xf32>
    %71 = arith.addf %67, %70 : vector<8x8xf32>
    %c0_42 = arith.constant 0 : index
    %c0_43 = arith.constant 0 : index
    %c0_44 = arith.constant 0 : index
    %c0_45 = arith.constant 0 : index
    %72 = vector.load %arg11[%c0_42, %c0_43, %c0_44, %c0_45] : memref<1x4x32x8xbf16, #tpu.memory_space<vmem>>, vector<1x1x32x8xbf16>
    %73 = vector.shape_cast %72 : vector<1x1x32x8xbf16> to vector<32x8xbf16>
    %74 = arith.truncf %27 : vector<8x32xf32> to vector<8x32xbf16>
    %cst_46 = arith.constant dense<0.000000e+00> : vector<8x8xf32>
    %75 = tpu.matmul %74, %73, %cst_46 {dimension_numbers = #tpu.dot_dimension_numbers<[1], [0], [0], [1], [0, 0, 1, 1], [], []>} : vector<8x32xbf16>, vector<32x8xbf16>, vector<8x8xf32> -> vector<8x8xf32>
    %c0_47 = arith.constant 0 : index
    %c0_48 = arith.constant 0 : index
    %c0_49 = arith.constant 0 : index
    %c0_50 = arith.constant 0 : index
    %76 = vector.load %arg12[%c0_47, %c0_48, %c0_49, %c0_50] : memref<1x4x1x8xf32, #tpu.memory_space<vmem>>, vector<1x1x1x8xf32>
    %77 = vector.shape_cast %76 : vector<1x1x1x8xf32> to vector<1x8xf32>
    %78 = vector.broadcast %77 : vector<1x8xf32> to vector<8x8xf32>
    %79 = arith.addf %75, %78 : vector<8x8xf32>
    %c0_51 = arith.constant 0 : index
    %c0_52 = arith.constant 0 : index
    %c0_53 = arith.constant 0 : index
    %c0_54 = arith.constant 0 : index
    %80 = vector.load %arg13[%c0_51, %c0_52, %c0_53, %c0_54] : memref<1x4x8x32xbf16, #tpu.memory_space<vmem>>, vector<1x1x8x32xbf16>
    %81 = vector.shape_cast %80 : vector<1x1x8x32xbf16> to vector<8x32xbf16>
    %82 = arith.truncf %63 : vector<8x8xf32> to vector<8x8xbf16>
    %83 = arith.truncf %71 : vector<8x8xf32> to vector<8x8xbf16>
    %cst_55 = arith.constant dense<0.000000e+00> : vector<8x8xf32>
    %84 = tpu.matmul %82, %83, %cst_55 {dimension_numbers = #tpu.dot_dimension_numbers<[1], [1], [0], [0], [0, 0, 1, 0], [], []>} : vector<8x8xbf16>, vector<8x8xbf16>, vector<8x8xf32> -> vector<8x8xf32>
    %cst_56 = arith.constant dense<0xFF800000> : vector<8xf32>
    %85 = vector.multi_reduction <maximumf>, %84, %cst_56 [1] : vector<8x8xf32> to vector<8xf32>
    %86 = vector.shape_cast %85 : vector<8xf32> to vector<8x1xf32>
    %87 = vector.broadcast %86 : vector<8x1xf32> to vector<8x8xf32>
    %88 = arith.subf %84, %87 : vector<8x8xf32>
    %89 = math.exp %88 : vector<8x8xf32>
    %cst_57 = arith.constant dense<0.000000e+00> : vector<8xf32>
    %90 = vector.multi_reduction <add>, %89, %cst_57 [1] : vector<8x8xf32> to vector<8xf32>
    %91 = vector.shape_cast %90 : vector<8xf32> to vector<8x1xf32>
    %92 = tpu.reciprocal %91 {approx = true} : vector<8x1xf32> -> vector<8x1xf32>
    %93 = vector.broadcast %92 : vector<8x1xf32> to vector<8x8xf32>
    %94 = arith.mulf %89, %93 : vector<8x8xf32>
    %95 = arith.truncf %94 : vector<8x8xf32> to vector<8x8xbf16>
    %96 = arith.truncf %79 : vector<8x8xf32> to vector<8x8xbf16>
    %cst_58 = arith.constant dense<0.000000e+00> : vector<8x8xf32>
    %97 = tpu.matmul %95, %96, %cst_58 {dimension_numbers = #tpu.dot_dimension_numbers<[1], [0], [0], [1], [0, 0, 1, 1], [], []>} : vector<8x8xbf16>, vector<8x8xbf16>, vector<8x8xf32> -> vector<8x8xf32>
    %98 = arith.truncf %97 : vector<8x8xf32> to vector<8x8xbf16>
    %cst_59 = arith.constant dense<0.000000e+00> : vector<8x32xf32>
    %99 = tpu.matmul %98, %81, %cst_59 {dimension_numbers = #tpu.dot_dimension_numbers<[1], [0], [0], [1], [0, 0, 1, 1], [], []>} : vector<8x8xbf16>, vector<8x32xbf16>, vector<8x32xf32> -> vector<8x32xf32>
    %c0_60 = arith.constant 0 : index
    %c1 = arith.constant 1 : index
    %c0_61 = arith.constant 0 : index
    %c0_62 = arith.constant 0 : index
    %100 = vector.load %arg7[%c0_60, %c1, %c0_61, %c0_62] : memref<1x4x32x8xbf16, #tpu.memory_space<vmem>>, vector<1x1x32x8xbf16>
    %101 = vector.shape_cast %100 : vector<1x1x32x8xbf16> to vector<32x8xbf16>
    %102 = arith.truncf %27 : vector<8x32xf32> to vector<8x32xbf16>
    %cst_63 = arith.constant dense<0.000000e+00> : vector<8x8xf32>
    %103 = tpu.matmul %102, %101, %cst_63 {dimension_numbers = #tpu.dot_dimension_numbers<[1], [0], [0], [1], [0, 0, 1, 1], [], []>} : vector<8x32xbf16>, vector<32x8xbf16>, vector<8x8xf32> -> vector<8x8xf32>
    %c0_64 = arith.constant 0 : index
    %c1_65 = arith.constant 1 : index
    %c0_66 = arith.constant 0 : index
    %c0_67 = arith.constant 0 : index
    %104 = vector.load %arg8[%c0_64, %c1_65, %c0_66, %c0_67] : memref<1x4x1x8xf32, #tpu.memory_space<vmem>>, vector<1x1x1x8xf32>
    %105 = vector.shape_cast %104 : vector<1x1x1x8xf32> to vector<1x8xf32>
    %106 = vector.broadcast %105 : vector<1x8xf32> to vector<8x8xf32>
    %107 = arith.addf %103, %106 : vector<8x8xf32>
    %c0_68 = arith.constant 0 : index
    %c1_69 = arith.constant 1 : index
    %c0_70 = arith.constant 0 : index
    %c0_71 = arith.constant 0 : index
    %108 = vector.load %arg9[%c0_68, %c1_69, %c0_70, %c0_71] : memref<1x4x32x8xbf16, #tpu.memory_space<vmem>>, vector<1x1x32x8xbf16>
    %109 = vector.shape_cast %108 : vector<1x1x32x8xbf16> to vector<32x8xbf16>
    %110 = arith.truncf %27 : vector<8x32xf32> to vector<8x32xbf16>
    %cst_72 = arith.constant dense<0.000000e+00> : vector<8x8xf32>
    %111 = tpu.matmul %110, %109, %cst_72 {dimension_numbers = #tpu.dot_dimension_numbers<[1], [0], [0], [1], [0, 0, 1, 1], [], []>} : vector<8x32xbf16>, vector<32x8xbf16>, vector<8x8xf32> -> vector<8x8xf32>
    %c0_73 = arith.constant 0 : index
    %c1_74 = arith.constant 1 : index
    %c0_75 = arith.constant 0 : index
    %c0_76 = arith.constant 0 : index
    %112 = vector.load %arg10[%c0_73, %c1_74, %c0_75, %c0_76] : memref<1x4x1x8xf32, #tpu.memory_space<vmem>>, vector<1x1x1x8xf32>
    %113 = vector.shape_cast %112 : vector<1x1x1x8xf32> to vector<1x8xf32>
    %114 = vector.broadcast %113 : vector<1x8xf32> to vector<8x8xf32>
    %115 = arith.addf %111, %114 : vector<8x8xf32>
    %c0_77 = arith.constant 0 : index
    %c1_78 = arith.constant 1 : index
    %c0_79 = arith.constant 0 : index
    %c0_80 = arith.constant 0 : index
    %116 = vector.load %arg11[%c0_77, %c1_78, %c0_79, %c0_80] : memref<1x4x32x8xbf16, #tpu.memory_space<vmem>>, vector<1x1x32x8xbf16>
    %117 = vector.shape_cast %116 : vector<1x1x32x8xbf16> to vector<32x8xbf16>
    %118 = arith.truncf %27 : vector<8x32xf32> to vector<8x32xbf16>
    %cst_81 = arith.constant dense<0.000000e+00> : vector<8x8xf32>
    %119 = tpu.matmul %118, %117, %cst_81 {dimension_numbers = #tpu.dot_dimension_numbers<[1], [0], [0], [1], [0, 0, 1, 1], [], []>} : vector<8x32xbf16>, vector<32x8xbf16>, vector<8x8xf32> -> vector<8x8xf32>
    %c0_82 = arith.constant 0 : index
    %c1_83 = arith.constant 1 : index
    %c0_84 = arith.constant 0 : index
    %c0_85 = arith.constant 0 : index
    %120 = vector.load %arg12[%c0_82, %c1_83, %c0_84, %c0_85] : memref<1x4x1x8xf32, #tpu.memory_space<vmem>>, vector<1x1x1x8xf32>
    %121 = vector.shape_cast %120 : vector<1x1x1x8xf32> to vector<1x8xf32>
    %122 = vector.broadcast %121 : vector<1x8xf32> to vector<8x8xf32>
    %123 = arith.addf %119, %122 : vector<8x8xf32>
    %c0_86 = arith.constant 0 : index
    %c1_87 = arith.constant 1 : index
    %c0_88 = arith.constant 0 : index
    %c0_89 = arith.constant 0 : index
    %124 = vector.load %arg13[%c0_86, %c1_87, %c0_88, %c0_89] : memref<1x4x8x32xbf16, #tpu.memory_space<vmem>>, vector<1x1x8x32xbf16>
    %125 = vector.shape_cast %124 : vector<1x1x8x32xbf16> to vector<8x32xbf16>
    %126 = arith.truncf %107 : vector<8x8xf32> to vector<8x8xbf16>
    %127 = arith.truncf %115 : vector<8x8xf32> to vector<8x8xbf16>
    %cst_90 = arith.constant dense<0.000000e+00> : vector<8x8xf32>
    %128 = tpu.matmul %126, %127, %cst_90 {dimension_numbers = #tpu.dot_dimension_numbers<[1], [1], [0], [0], [0, 0, 1, 0], [], []>} : vector<8x8xbf16>, vector<8x8xbf16>, vector<8x8xf32> -> vector<8x8xf32>
    %cst_91 = arith.constant dense<0xFF800000> : vector<8xf32>
    %129 = vector.multi_reduction <maximumf>, %128, %cst_91 [1] : vector<8x8xf32> to vector<8xf32>
    %130 = vector.shape_cast %129 : vector<8xf32> to vector<8x1xf32>
    %131 = vector.broadcast %130 : vector<8x1xf32> to vector<8x8xf32>
    %132 = arith.subf %128, %131 : vector<8x8xf32>
    %133 = math.exp %132 : vector<8x8xf32>
    %cst_92 = arith.constant dense<0.000000e+00> : vector<8xf32>
    %134 = vector.multi_reduction <add>, %133, %cst_92 [1] : vector<8x8xf32> to vector<8xf32>
    %135 = vector.shape_cast %134 : vector<8xf32> to vector<8x1xf32>
    %136 = tpu.reciprocal %135 {approx = true} : vector<8x1xf32> -> vector<8x1xf32>
    %137 = vector.broadcast %136 : vector<8x1xf32> to vector<8x8xf32>
    %138 = arith.mulf %133, %137 : vector<8x8xf32>
    %139 = arith.truncf %138 : vector<8x8xf32> to vector<8x8xbf16>
    %140 = arith.truncf %123 : vector<8x8xf32> to vector<8x8xbf16>
    %cst_93 = arith.constant dense<0.000000e+00> : vector<8x8xf32>
    %141 = tpu.matmul %139, %140, %cst_93 {dimension_numbers = #tpu.dot_dimension_numbers<[1], [0], [0], [1], [0, 0, 1, 1], [], []>} : vector<8x8xbf16>, vector<8x8xbf16>, vector<8x8xf32> -> vector<8x8xf32>
    %142 = arith.truncf %141 : vector<8x8xf32> to vector<8x8xbf16>
    %cst_94 = arith.constant dense<0.000000e+00> : vector<8x32xf32>
    %143 = tpu.matmul %142, %125, %cst_94 {dimension_numbers = #tpu.dot_dimension_numbers<[1], [0], [0], [1], [0, 0, 1, 1], [], []>} : vector<8x8xbf16>, vector<8x32xbf16>, vector<8x32xf32> -> vector<8x32xf32>
    %144 = arith.addf %99, %143 : vector<8x32xf32>
    %c0_95 = arith.constant 0 : index
    %c2 = arith.constant 2 : index
    %c0_96 = arith.constant 0 : index
    %c0_97 = arith.constant 0 : index
    %145 = vector.load %arg7[%c0_95, %c2, %c0_96, %c0_97] : memref<1x4x32x8xbf16, #tpu.memory_space<vmem>>, vector<1x1x32x8xbf16>
    %146 = vector.shape_cast %145 : vector<1x1x32x8xbf16> to vector<32x8xbf16>
    %147 = arith.truncf %27 : vector<8x32xf32> to vector<8x32xbf16>
    %cst_98 = arith.constant dense<0.000000e+00> : vector<8x8xf32>
    %148 = tpu.matmul %147, %146, %cst_98 {dimension_numbers = #tpu.dot_dimension_numbers<[1], [0], [0], [1], [0, 0, 1, 1], [], []>} : vector<8x32xbf16>, vector<32x8xbf16>, vector<8x8xf32> -> vector<8x8xf32>
    %c0_99 = arith.constant 0 : index
    %c2_100 = arith.constant 2 : index
    %c0_101 = arith.constant 0 : index
    %c0_102 = arith.constant 0 : index
    %149 = vector.load %arg8[%c0_99, %c2_100, %c0_101, %c0_102] : memref<1x4x1x8xf32, #tpu.memory_space<vmem>>, vector<1x1x1x8xf32>
    %150 = vector.shape_cast %149 : vector<1x1x1x8xf32> to vector<1x8xf32>
    %151 = vector.broadcast %150 : vector<1x8xf32> to vector<8x8xf32>
    %152 = arith.addf %148, %151 : vector<8x8xf32>
    %c0_103 = arith.constant 0 : index
    %c2_104 = arith.constant 2 : index
    %c0_105 = arith.constant 0 : index
    %c0_106 = arith.constant 0 : index
    %153 = vector.load %arg9[%c0_103, %c2_104, %c0_105, %c0_106] : memref<1x4x32x8xbf16, #tpu.memory_space<vmem>>, vector<1x1x32x8xbf16>
    %154 = vector.shape_cast %153 : vector<1x1x32x8xbf16> to vector<32x8xbf16>
    %155 = arith.truncf %27 : vector<8x32xf32> to vector<8x32xbf16>
    %cst_107 = arith.constant dense<0.000000e+00> : vector<8x8xf32>
    %156 = tpu.matmul %155, %154, %cst_107 {dimension_numbers = #tpu.dot_dimension_numbers<[1], [0], [0], [1], [0, 0, 1, 1], [], []>} : vector<8x32xbf16>, vector<32x8xbf16>, vector<8x8xf32> -> vector<8x8xf32>
    %c0_108 = arith.constant 0 : index
    %c2_109 = arith.constant 2 : index
    %c0_110 = arith.constant 0 : index
    %c0_111 = arith.constant 0 : index
    %157 = vector.load %arg10[%c0_108, %c2_109, %c0_110, %c0_111] : memref<1x4x1x8xf32, #tpu.memory_space<vmem>>, vector<1x1x1x8xf32>
    %158 = vector.shape_cast %157 : vector<1x1x1x8xf32> to vector<1x8xf32>
    %159 = vector.broadcast %158 : vector<1x8xf32> to vector<8x8xf32>
    %160 = arith.addf %156, %159 : vector<8x8xf32>
    %c0_112 = arith.constant 0 : index
    %c2_113 = arith.constant 2 : index
    %c0_114 = arith.constant 0 : index
    %c0_115 = arith.constant 0 : index
    %161 = vector.load %arg11[%c0_112, %c2_113, %c0_114, %c0_115] : memref<1x4x32x8xbf16, #tpu.memory_space<vmem>>, vector<1x1x32x8xbf16>
    %162 = vector.shape_cast %161 : vector<1x1x32x8xbf16> to vector<32x8xbf16>
    %163 = arith.truncf %27 : vector<8x32xf32> to vector<8x32xbf16>
    %cst_116 = arith.constant dense<0.000000e+00> : vector<8x8xf32>
    %164 = tpu.matmul %163, %162, %cst_116 {dimension_numbers = #tpu.dot_dimension_numbers<[1], [0], [0], [1], [0, 0, 1, 1], [], []>} : vector<8x32xbf16>, vector<32x8xbf16>, vector<8x8xf32> -> vector<8x8xf32>
    %c0_117 = arith.constant 0 : index
    %c2_118 = arith.constant 2 : index
    %c0_119 = arith.constant 0 : index
    %c0_120 = arith.constant 0 : index
    %165 = vector.load %arg12[%c0_117, %c2_118, %c0_119, %c0_120] : memref<1x4x1x8xf32, #tpu.memory_space<vmem>>, vector<1x1x1x8xf32>
    %166 = vector.shape_cast %165 : vector<1x1x1x8xf32> to vector<1x8xf32>
    %167 = vector.broadcast %166 : vector<1x8xf32> to vector<8x8xf32>
    %168 = arith.addf %164, %167 : vector<8x8xf32>
    %c0_121 = arith.constant 0 : index
    %c2_122 = arith.constant 2 : index
    %c0_123 = arith.constant 0 : index
    %c0_124 = arith.constant 0 : index
    %169 = vector.load %arg13[%c0_121, %c2_122, %c0_123, %c0_124] : memref<1x4x8x32xbf16, #tpu.memory_space<vmem>>, vector<1x1x8x32xbf16>
    %170 = vector.shape_cast %169 : vector<1x1x8x32xbf16> to vector<8x32xbf16>
    %171 = arith.truncf %152 : vector<8x8xf32> to vector<8x8xbf16>
    %172 = arith.truncf %160 : vector<8x8xf32> to vector<8x8xbf16>
    %cst_125 = arith.constant dense<0.000000e+00> : vector<8x8xf32>
    %173 = tpu.matmul %171, %172, %cst_125 {dimension_numbers = #tpu.dot_dimension_numbers<[1], [1], [0], [0], [0, 0, 1, 0], [], []>} : vector<8x8xbf16>, vector<8x8xbf16>, vector<8x8xf32> -> vector<8x8xf32>
    %cst_126 = arith.constant dense<0xFF800000> : vector<8xf32>
    %174 = vector.multi_reduction <maximumf>, %173, %cst_126 [1] : vector<8x8xf32> to vector<8xf32>
    %175 = vector.shape_cast %174 : vector<8xf32> to vector<8x1xf32>
    %176 = vector.broadcast %175 : vector<8x1xf32> to vector<8x8xf32>
    %177 = arith.subf %173, %176 : vector<8x8xf32>
    %178 = math.exp %177 : vector<8x8xf32>
    %cst_127 = arith.constant dense<0.000000e+00> : vector<8xf32>
    %179 = vector.multi_reduction <add>, %178, %cst_127 [1] : vector<8x8xf32> to vector<8xf32>
    %180 = vector.shape_cast %179 : vector<8xf32> to vector<8x1xf32>
    %181 = tpu.reciprocal %180 {approx = true} : vector<8x1xf32> -> vector<8x1xf32>
    %182 = vector.broadcast %181 : vector<8x1xf32> to vector<8x8xf32>
    %183 = arith.mulf %178, %182 : vector<8x8xf32>
    %184 = arith.truncf %183 : vector<8x8xf32> to vector<8x8xbf16>
    %185 = arith.truncf %168 : vector<8x8xf32> to vector<8x8xbf16>
    %cst_128 = arith.constant dense<0.000000e+00> : vector<8x8xf32>
    %186 = tpu.matmul %184, %185, %cst_128 {dimension_numbers = #tpu.dot_dimension_numbers<[1], [0], [0], [1], [0, 0, 1, 1], [], []>} : vector<8x8xbf16>, vector<8x8xbf16>, vector<8x8xf32> -> vector<8x8xf32>
    %187 = arith.truncf %186 : vector<8x8xf32> to vector<8x8xbf16>
    %cst_129 = arith.constant dense<0.000000e+00> : vector<8x32xf32>
    %188 = tpu.matmul %187, %170, %cst_129 {dimension_numbers = #tpu.dot_dimension_numbers<[1], [0], [0], [1], [0, 0, 1, 1], [], []>} : vector<8x8xbf16>, vector<8x32xbf16>, vector<8x32xf32> -> vector<8x32xf32>
    %189 = arith.addf %144, %188 : vector<8x32xf32>
    %c0_130 = arith.constant 0 : index
    %c3 = arith.constant 3 : index
    %c0_131 = arith.constant 0 : index
    %c0_132 = arith.constant 0 : index
    %190 = vector.load %arg7[%c0_130, %c3, %c0_131, %c0_132] : memref<1x4x32x8xbf16, #tpu.memory_space<vmem>>, vector<1x1x32x8xbf16>
    %191 = vector.shape_cast %190 : vector<1x1x32x8xbf16> to vector<32x8xbf16>
    %192 = arith.truncf %27 : vector<8x32xf32> to vector<8x32xbf16>
    %cst_133 = arith.constant dense<0.000000e+00> : vector<8x8xf32>
    %193 = tpu.matmul %192, %191, %cst_133 {dimension_numbers = #tpu.dot_dimension_numbers<[1], [0], [0], [1], [0, 0, 1, 1], [], []>} : vector<8x32xbf16>, vector<32x8xbf16>, vector<8x8xf32> -> vector<8x8xf32>
    %c0_134 = arith.constant 0 : index
    %c3_135 = arith.constant 3 : index
    %c0_136 = arith.constant 0 : index
    %c0_137 = arith.constant 0 : index
    %194 = vector.load %arg8[%c0_134, %c3_135, %c0_136, %c0_137] : memref<1x4x1x8xf32, #tpu.memory_space<vmem>>, vector<1x1x1x8xf32>
    %195 = vector.shape_cast %194 : vector<1x1x1x8xf32> to vector<1x8xf32>
    %196 = vector.broadcast %195 : vector<1x8xf32> to vector<8x8xf32>
    %197 = arith.addf %193, %196 : vector<8x8xf32>
    %c0_138 = arith.constant 0 : index
    %c3_139 = arith.constant 3 : index
    %c0_140 = arith.constant 0 : index
    %c0_141 = arith.constant 0 : index
    %198 = vector.load %arg9[%c0_138, %c3_139, %c0_140, %c0_141] : memref<1x4x32x8xbf16, #tpu.memory_space<vmem>>, vector<1x1x32x8xbf16>
    %199 = vector.shape_cast %198 : vector<1x1x32x8xbf16> to vector<32x8xbf16>
    %200 = arith.truncf %27 : vector<8x32xf32> to vector<8x32xbf16>
    %cst_142 = arith.constant dense<0.000000e+00> : vector<8x8xf32>
    %201 = tpu.matmul %200, %199, %cst_142 {dimension_numbers = #tpu.dot_dimension_numbers<[1], [0], [0], [1], [0, 0, 1, 1], [], []>} : vector<8x32xbf16>, vector<32x8xbf16>, vector<8x8xf32> -> vector<8x8xf32>
    %c0_143 = arith.constant 0 : index
    %c3_144 = arith.constant 3 : index
    %c0_145 = arith.constant 0 : index
    %c0_146 = arith.constant 0 : index
    %202 = vector.load %arg10[%c0_143, %c3_144, %c0_145, %c0_146] : memref<1x4x1x8xf32, #tpu.memory_space<vmem>>, vector<1x1x1x8xf32>
    %203 = vector.shape_cast %202 : vector<1x1x1x8xf32> to vector<1x8xf32>
    %204 = vector.broadcast %203 : vector<1x8xf32> to vector<8x8xf32>
    %205 = arith.addf %201, %204 : vector<8x8xf32>
    %c0_147 = arith.constant 0 : index
    %c3_148 = arith.constant 3 : index
    %c0_149 = arith.constant 0 : index
    %c0_150 = arith.constant 0 : index
    %206 = vector.load %arg11[%c0_147, %c3_148, %c0_149, %c0_150] : memref<1x4x32x8xbf16, #tpu.memory_space<vmem>>, vector<1x1x32x8xbf16>
    %207 = vector.shape_cast %206 : vector<1x1x32x8xbf16> to vector<32x8xbf16>
    %208 = arith.truncf %27 : vector<8x32xf32> to vector<8x32xbf16>
    %cst_151 = arith.constant dense<0.000000e+00> : vector<8x8xf32>
    %209 = tpu.matmul %208, %207, %cst_151 {dimension_numbers = #tpu.dot_dimension_numbers<[1], [0], [0], [1], [0, 0, 1, 1], [], []>} : vector<8x32xbf16>, vector<32x8xbf16>, vector<8x8xf32> -> vector<8x8xf32>
    %c0_152 = arith.constant 0 : index
    %c3_153 = arith.constant 3 : index
    %c0_154 = arith.constant 0 : index
    %c0_155 = arith.constant 0 : index
    %210 = vector.load %arg12[%c0_152, %c3_153, %c0_154, %c0_155] : memref<1x4x1x8xf32, #tpu.memory_space<vmem>>, vector<1x1x1x8xf32>
    %211 = vector.shape_cast %210 : vector<1x1x1x8xf32> to vector<1x8xf32>
    %212 = vector.broadcast %211 : vector<1x8xf32> to vector<8x8xf32>
    %213 = arith.addf %209, %212 : vector<8x8xf32>
    %c0_156 = arith.constant 0 : index
    %c3_157 = arith.constant 3 : index
    %c0_158 = arith.constant 0 : index
    %c0_159 = arith.constant 0 : index
    %214 = vector.load %arg13[%c0_156, %c3_157, %c0_158, %c0_159] : memref<1x4x8x32xbf16, #tpu.memory_space<vmem>>, vector<1x1x8x32xbf16>
    %215 = vector.shape_cast %214 : vector<1x1x8x32xbf16> to vector<8x32xbf16>
    %216 = arith.truncf %197 : vector<8x8xf32> to vector<8x8xbf16>
    %217 = arith.truncf %205 : vector<8x8xf32> to vector<8x8xbf16>
    %cst_160 = arith.constant dense<0.000000e+00> : vector<8x8xf32>
    %218 = tpu.matmul %216, %217, %cst_160 {dimension_numbers = #tpu.dot_dimension_numbers<[1], [1], [0], [0], [0, 0, 1, 0], [], []>} : vector<8x8xbf16>, vector<8x8xbf16>, vector<8x8xf32> -> vector<8x8xf32>
    %cst_161 = arith.constant dense<0xFF800000> : vector<8xf32>
    %219 = vector.multi_reduction <maximumf>, %218, %cst_161 [1] : vector<8x8xf32> to vector<8xf32>
    %220 = vector.shape_cast %219 : vector<8xf32> to vector<8x1xf32>
    %221 = vector.broadcast %220 : vector<8x1xf32> to vector<8x8xf32>
    %222 = arith.subf %218, %221 : vector<8x8xf32>
    %223 = math.exp %222 : vector<8x8xf32>
    %cst_162 = arith.constant dense<0.000000e+00> : vector<8xf32>
    %224 = vector.multi_reduction <add>, %223, %cst_162 [1] : vector<8x8xf32> to vector<8xf32>
    %225 = vector.shape_cast %224 : vector<8xf32> to vector<8x1xf32>
    %226 = tpu.reciprocal %225 {approx = true} : vector<8x1xf32> -> vector<8x1xf32>
    %227 = vector.broadcast %226 : vector<8x1xf32> to vector<8x8xf32>
    %228 = arith.mulf %223, %227 : vector<8x8xf32>
    %229 = arith.truncf %228 : vector<8x8xf32> to vector<8x8xbf16>
    %230 = arith.truncf %213 : vector<8x8xf32> to vector<8x8xbf16>
    %cst_163 = arith.constant dense<0.000000e+00> : vector<8x8xf32>
    %231 = tpu.matmul %229, %230, %cst_163 {dimension_numbers = #tpu.dot_dimension_numbers<[1], [0], [0], [1], [0, 0, 1, 1], [], []>} : vector<8x8xbf16>, vector<8x8xbf16>, vector<8x8xf32> -> vector<8x8xf32>
    %232 = arith.truncf %231 : vector<8x8xf32> to vector<8x8xbf16>
    %cst_164 = arith.constant dense<0.000000e+00> : vector<8x32xf32>
    %233 = tpu.matmul %232, %215, %cst_164 {dimension_numbers = #tpu.dot_dimension_numbers<[1], [0], [0], [1], [0, 0, 1, 1], [], []>} : vector<8x8xbf16>, vector<8x32xbf16>, vector<8x32xf32> -> vector<8x32xf32>
    %234 = arith.addf %189, %233 : vector<8x32xf32>
    %c0_165 = arith.constant 0 : index
    %c0_166 = arith.constant 0 : index
    %c0_167 = arith.constant 0 : index
    %235 = vector.load %arg14[%c0_165, %c0_166, %c0_167] : memref<1x1x32xf32, #tpu.memory_space<vmem>>, vector<1x1x32xf32>
    %236 = vector.shape_cast %235 : vector<1x1x32xf32> to vector<1x32xf32>
    %237 = vector.broadcast %236 : vector<1x32xf32> to vector<8x32xf32>
    %238 = arith.addf %234, %237 : vector<8x32xf32>
    %239 = arith.addf %27, %238 : vector<8x32xf32>
    %c0_168 = arith.constant 0 : index
    %c0_169 = arith.constant 0 : index
    %c0_170 = arith.constant 0 : index
    %240 = vector.load %arg19[%c0_168, %c0_169, %c0_170] : memref<1x1x32xf32, #tpu.memory_space<vmem>>, vector<1x1x32xf32>
    %241 = vector.shape_cast %240 : vector<1x1x32xf32> to vector<1x32xf32>
    %c0_171 = arith.constant 0 : index
    %c0_172 = arith.constant 0 : index
    %c0_173 = arith.constant 0 : index
    %242 = vector.load %arg20[%c0_171, %c0_172, %c0_173] : memref<1x1x32xf32, #tpu.memory_space<vmem>>, vector<1x1x32xf32>
    %243 = vector.shape_cast %242 : vector<1x1x32xf32> to vector<1x32xf32>
    %cst_174 = arith.constant dense<0.000000e+00> : vector<8xf32>
    %244 = vector.multi_reduction <add>, %239, %cst_174 [1] : vector<8x32xf32> to vector<8xf32>
    %245 = vector.shape_cast %244 : vector<8xf32> to vector<8x1xf32>
    %cst_175 = arith.constant 3.200000e+01 : f32
    %246 = vector.broadcast %cst_175 : f32 to vector<8x1xf32>
    %247 = arith.divf %245, %246 : vector<8x1xf32>
    %248 = vector.broadcast %247 : vector<8x1xf32> to vector<8x32xf32>
    %249 = arith.subf %239, %248 : vector<8x32xf32>
    %250 = arith.mulf %249, %249 : vector<8x32xf32>
    %cst_176 = arith.constant dense<0.000000e+00> : vector<8xf32>
    %251 = vector.multi_reduction <add>, %250, %cst_176 [1] : vector<8x32xf32> to vector<8xf32>
    %252 = vector.shape_cast %251 : vector<8xf32> to vector<8x1xf32>
    %cst_177 = arith.constant 3.200000e+01 : f32
    %253 = vector.broadcast %cst_177 : f32 to vector<8x1xf32>
    %254 = arith.divf %252, %253 : vector<8x1xf32>
    %cst_178 = arith.constant 9.99999974E-6 : f32
    %255 = vector.broadcast %cst_178 : f32 to vector<8x1xf32>
    %256 = arith.addf %254, %255 : vector<8x1xf32>
    %257 = math.rsqrt %256 : vector<8x1xf32>
    %258 = vector.broadcast %257 : vector<8x1xf32> to vector<8x32xf32>
    %259 = arith.mulf %249, %258 : vector<8x32xf32>
    %260 = vector.broadcast %241 : vector<1x32xf32> to vector<8x32xf32>
    %261 = arith.mulf %259, %260 : vector<8x32xf32>
    %262 = vector.broadcast %243 : vector<1x32xf32> to vector<8x32xf32>
    %263 = arith.addf %261, %262 : vector<8x32xf32>
    %c0_179 = arith.constant 0 : index
    %c0_180 = arith.constant 0 : index
    %c0_181 = arith.constant 0 : index
    %264 = vector.load %arg15[%c0_179, %c0_180, %c0_181] : memref<1x32x64xbf16, #tpu.memory_space<vmem>>, vector<1x32x64xbf16>
    %265 = vector.shape_cast %264 : vector<1x32x64xbf16> to vector<32x64xbf16>
    %266 = arith.truncf %263 : vector<8x32xf32> to vector<8x32xbf16>
    %cst_182 = arith.constant dense<0.000000e+00> : vector<8x64xf32>
    %267 = tpu.matmul %266, %265, %cst_182 {dimension_numbers = #tpu.dot_dimension_numbers<[1], [0], [0], [1], [0, 0, 1, 1], [], []>} : vector<8x32xbf16>, vector<32x64xbf16>, vector<8x64xf32> -> vector<8x64xf32>
    %c0_183 = arith.constant 0 : index
    %c0_184 = arith.constant 0 : index
    %c0_185 = arith.constant 0 : index
    %268 = vector.load %arg16[%c0_183, %c0_184, %c0_185] : memref<1x1x64xf32, #tpu.memory_space<vmem>>, vector<1x1x64xf32>
    %269 = vector.shape_cast %268 : vector<1x1x64xf32> to vector<1x64xf32>
    %270 = vector.broadcast %269 : vector<1x64xf32> to vector<8x64xf32>
    %271 = arith.addf %267, %270 : vector<8x64xf32>
    %cst_186 = arith.constant 0.000000e+00 : f32
    %272 = vector.broadcast %cst_186 : f32 to vector<8x64xf32>
    %273 = arith.maximumf %271, %272 : vector<8x64xf32>
    %c0_187 = arith.constant 0 : index
    %c0_188 = arith.constant 0 : index
    %c0_189 = arith.constant 0 : index
    %274 = vector.load %arg17[%c0_187, %c0_188, %c0_189] : memref<1x64x32xbf16, #tpu.memory_space<vmem>>, vector<1x64x32xbf16>
    %275 = vector.shape_cast %274 : vector<1x64x32xbf16> to vector<64x32xbf16>
    %276 = arith.truncf %273 : vector<8x64xf32> to vector<8x64xbf16>
    %cst_190 = arith.constant dense<0.000000e+00> : vector<8x32xf32>
    %277 = tpu.matmul %276, %275, %cst_190 {dimension_numbers = #tpu.dot_dimension_numbers<[1], [0], [0], [1], [0, 0, 1, 1], [], []>} : vector<8x64xbf16>, vector<64x32xbf16>, vector<8x32xf32> -> vector<8x32xf32>
    %c0_191 = arith.constant 0 : index
    %c0_192 = arith.constant 0 : index
    %c0_193 = arith.constant 0 : index
    %278 = vector.load %arg18[%c0_191, %c0_192, %c0_193] : memref<1x1x32xf32, #tpu.memory_space<vmem>>, vector<1x1x32xf32>
    %279 = vector.shape_cast %278 : vector<1x1x32xf32> to vector<1x32xf32>
    %280 = vector.broadcast %279 : vector<1x32xf32> to vector<8x32xf32>
    %281 = arith.addf %277, %280 : vector<8x32xf32>
    %282 = arith.addf %263, %281 : vector<8x32xf32>
    %c0_194 = arith.constant 0 : index
    %c0_195 = arith.constant 0 : index
    %c0_196 = arith.constant 0 : index
    %283 = vector.load %arg21[%c0_194, %c0_195, %c0_196] : memref<1x1x32xf32, #tpu.memory_space<vmem>>, vector<1x1x32xf32>
    %284 = vector.shape_cast %283 : vector<1x1x32xf32> to vector<1x32xf32>
    %c0_197 = arith.constant 0 : index
    %c0_198 = arith.constant 0 : index
    %c0_199 = arith.constant 0 : index
    %285 = vector.load %arg22[%c0_197, %c0_198, %c0_199] : memref<1x1x32xf32, #tpu.memory_space<vmem>>, vector<1x1x32xf32>
    %286 = vector.shape_cast %285 : vector<1x1x32xf32> to vector<1x32xf32>
    %cst_200 = arith.constant dense<0.000000e+00> : vector<8xf32>
    %287 = vector.multi_reduction <add>, %282, %cst_200 [1] : vector<8x32xf32> to vector<8xf32>
    %288 = vector.shape_cast %287 : vector<8xf32> to vector<8x1xf32>
    %cst_201 = arith.constant 3.200000e+01 : f32
    %289 = vector.broadcast %cst_201 : f32 to vector<8x1xf32>
    %290 = arith.divf %288, %289 : vector<8x1xf32>
    %291 = vector.broadcast %290 : vector<8x1xf32> to vector<8x32xf32>
    %292 = arith.subf %282, %291 : vector<8x32xf32>
    %293 = arith.mulf %292, %292 : vector<8x32xf32>
    %cst_202 = arith.constant dense<0.000000e+00> : vector<8xf32>
    %294 = vector.multi_reduction <add>, %293, %cst_202 [1] : vector<8x32xf32> to vector<8xf32>
    %295 = vector.shape_cast %294 : vector<8xf32> to vector<8x1xf32>
    %cst_203 = arith.constant 3.200000e+01 : f32
    %296 = vector.broadcast %cst_203 : f32 to vector<8x1xf32>
    %297 = arith.divf %295, %296 : vector<8x1xf32>
    %cst_204 = arith.constant 9.99999974E-6 : f32
    %298 = vector.broadcast %cst_204 : f32 to vector<8x1xf32>
    %299 = arith.addf %297, %298 : vector<8x1xf32>
    %300 = math.rsqrt %299 : vector<8x1xf32>
    %301 = vector.broadcast %300 : vector<8x1xf32> to vector<8x32xf32>
    %302 = arith.mulf %292, %301 : vector<8x32xf32>
    %303 = vector.broadcast %284 : vector<1x32xf32> to vector<8x32xf32>
    %304 = arith.mulf %302, %303 : vector<8x32xf32>
    %305 = vector.broadcast %286 : vector<1x32xf32> to vector<8x32xf32>
    %306 = arith.addf %304, %305 : vector<8x32xf32>
    %c0_205 = arith.constant 0 : index
    %c0_206 = arith.constant 0 : index
    %307 = vector.load %arg23[%c0_205, %c0_206] : memref<1x32xf32, #tpu.memory_space<vmem>>, vector<1x32xf32>
    %c0_207 = arith.constant 0 : index
    %c0_208 = arith.constant 0 : index
    %308 = vector.load %arg24[%c0_207, %c0_208] : memref<1x32xf32, #tpu.memory_space<vmem>>, vector<1x32xf32>
    %cst_209 = arith.constant dense<0.000000e+00> : vector<8xf32>
    %309 = vector.multi_reduction <add>, %306, %cst_209 [1] : vector<8x32xf32> to vector<8xf32>
    %310 = vector.shape_cast %309 : vector<8xf32> to vector<8x1xf32>
    %cst_210 = arith.constant 3.200000e+01 : f32
    %311 = vector.broadcast %cst_210 : f32 to vector<8x1xf32>
    %312 = arith.divf %310, %311 : vector<8x1xf32>
    %313 = vector.broadcast %312 : vector<8x1xf32> to vector<8x32xf32>
    %314 = arith.subf %306, %313 : vector<8x32xf32>
    %315 = arith.mulf %314, %314 : vector<8x32xf32>
    %cst_211 = arith.constant dense<0.000000e+00> : vector<8xf32>
    %316 = vector.multi_reduction <add>, %315, %cst_211 [1] : vector<8x32xf32> to vector<8xf32>
    %317 = vector.shape_cast %316 : vector<8xf32> to vector<8x1xf32>
    %cst_212 = arith.constant 3.200000e+01 : f32
    %318 = vector.broadcast %cst_212 : f32 to vector<8x1xf32>
    %319 = arith.divf %317, %318 : vector<8x1xf32>
    %cst_213 = arith.constant 9.99999974E-6 : f32
    %320 = vector.broadcast %cst_213 : f32 to vector<8x1xf32>
    %321 = arith.addf %319, %320 : vector<8x1xf32>
    %322 = math.rsqrt %321 : vector<8x1xf32>
    %323 = vector.broadcast %322 : vector<8x1xf32> to vector<8x32xf32>
    %324 = arith.mulf %314, %323 : vector<8x32xf32>
    %325 = vector.broadcast %307 : vector<1x32xf32> to vector<8x32xf32>
    %326 = arith.mulf %324, %325 : vector<8x32xf32>
    %327 = vector.broadcast %308 : vector<1x32xf32> to vector<8x32xf32>
    %328 = arith.addf %326, %327 : vector<8x32xf32>
    %c0_214 = arith.constant 0 : index
    %c0_215 = arith.constant 0 : index
    %c0_216 = arith.constant 0 : index
    %c0_217 = arith.constant 0 : index
    %329 = vector.load %arg25[%c0_214, %c0_215, %c0_216, %c0_217] : memref<1x4x32x8xbf16, #tpu.memory_space<vmem>>, vector<1x1x32x8xbf16>
    %330 = vector.shape_cast %329 : vector<1x1x32x8xbf16> to vector<32x8xbf16>
    %331 = arith.truncf %55 : vector<9x32xf32> to vector<9x32xbf16>
    %cst_218 = arith.constant dense<0.000000e+00> : vector<9x8xf32>
    %332 = tpu.matmul %331, %330, %cst_218 {dimension_numbers = #tpu.dot_dimension_numbers<[1], [0], [0], [1], [0, 0, 1, 1], [], []>} : vector<9x32xbf16>, vector<32x8xbf16>, vector<9x8xf32> -> vector<9x8xf32>
    %c0_219 = arith.constant 0 : index
    %c0_220 = arith.constant 0 : index
    %c0_221 = arith.constant 0 : index
    %c0_222 = arith.constant 0 : index
    %333 = vector.load %arg26[%c0_219, %c0_220, %c0_221, %c0_222] : memref<1x4x1x8xf32, #tpu.memory_space<vmem>>, vector<1x1x1x8xf32>
    %334 = vector.shape_cast %333 : vector<1x1x1x8xf32> to vector<1x8xf32>
    %335 = vector.broadcast %334 : vector<1x8xf32> to vector<9x8xf32>
    %336 = arith.addf %332, %335 : vector<9x8xf32>
    %c0_223 = arith.constant 0 : index
    %c0_224 = arith.constant 0 : index
    %c0_225 = arith.constant 0 : index
    %c0_226 = arith.constant 0 : index
    %337 = vector.load %arg27[%c0_223, %c0_224, %c0_225, %c0_226] : memref<1x4x32x8xbf16, #tpu.memory_space<vmem>>, vector<1x1x32x8xbf16>
    %338 = vector.shape_cast %337 : vector<1x1x32x8xbf16> to vector<32x8xbf16>
    %339 = arith.truncf %55 : vector<9x32xf32> to vector<9x32xbf16>
    %cst_227 = arith.constant dense<0.000000e+00> : vector<9x8xf32>
    %340 = tpu.matmul %339, %338, %cst_227 {dimension_numbers = #tpu.dot_dimension_numbers<[1], [0], [0], [1], [0, 0, 1, 1], [], []>} : vector<9x32xbf16>, vector<32x8xbf16>, vector<9x8xf32> -> vector<9x8xf32>
    %c0_228 = arith.constant 0 : index
    %c0_229 = arith.constant 0 : index
    %c0_230 = arith.constant 0 : index
    %c0_231 = arith.constant 0 : index
    %341 = vector.load %arg28[%c0_228, %c0_229, %c0_230, %c0_231] : memref<1x4x1x8xf32, #tpu.memory_space<vmem>>, vector<1x1x1x8xf32>
    %342 = vector.shape_cast %341 : vector<1x1x1x8xf32> to vector<1x8xf32>
    %343 = vector.broadcast %342 : vector<1x8xf32> to vector<9x8xf32>
    %344 = arith.addf %340, %343 : vector<9x8xf32>
    %c0_232 = arith.constant 0 : index
    %c0_233 = arith.constant 0 : index
    %c0_234 = arith.constant 0 : index
    %c0_235 = arith.constant 0 : index
    %345 = vector.load %arg29[%c0_232, %c0_233, %c0_234, %c0_235] : memref<1x4x32x8xbf16, #tpu.memory_space<vmem>>, vector<1x1x32x8xbf16>
    %346 = vector.shape_cast %345 : vector<1x1x32x8xbf16> to vector<32x8xbf16>
    %347 = arith.truncf %55 : vector<9x32xf32> to vector<9x32xbf16>
    %cst_236 = arith.constant dense<0.000000e+00> : vector<9x8xf32>
    %348 = tpu.matmul %347, %346, %cst_236 {dimension_numbers = #tpu.dot_dimension_numbers<[1], [0], [0], [1], [0, 0, 1, 1], [], []>} : vector<9x32xbf16>, vector<32x8xbf16>, vector<9x8xf32> -> vector<9x8xf32>
    %c0_237 = arith.constant 0 : index
    %c0_238 = arith.constant 0 : index
    %c0_239 = arith.constant 0 : index
    %c0_240 = arith.constant 0 : index
    %349 = vector.load %arg30[%c0_237, %c0_238, %c0_239, %c0_240] : memref<1x4x1x8xf32, #tpu.memory_space<vmem>>, vector<1x1x1x8xf32>
    %350 = vector.shape_cast %349 : vector<1x1x1x8xf32> to vector<1x8xf32>
    %351 = vector.broadcast %350 : vector<1x8xf32> to vector<9x8xf32>
    %352 = arith.addf %348, %351 : vector<9x8xf32>
    %c0_241 = arith.constant 0 : index
    %c0_242 = arith.constant 0 : index
    %c0_243 = arith.constant 0 : index
    %c0_244 = arith.constant 0 : index
    %353 = vector.load %arg31[%c0_241, %c0_242, %c0_243, %c0_244] : memref<1x4x8x32xbf16, #tpu.memory_space<vmem>>, vector<1x1x8x32xbf16>
    %354 = vector.shape_cast %353 : vector<1x1x8x32xbf16> to vector<8x32xbf16>
    %355 = arith.truncf %336 : vector<9x8xf32> to vector<9x8xbf16>
    %356 = arith.truncf %344 : vector<9x8xf32> to vector<9x8xbf16>
    %cst_245 = arith.constant dense<0.000000e+00> : vector<9x9xf32>
    %357 = tpu.matmul %355, %356, %cst_245 {dimension_numbers = #tpu.dot_dimension_numbers<[1], [1], [0], [0], [0, 0, 1, 0], [], []>} : vector<9x8xbf16>, vector<9x8xbf16>, vector<9x9xf32> -> vector<9x9xf32>
    %cst_246 = arith.constant dense<0xFF800000> : vector<9xf32>
    %358 = vector.multi_reduction <maximumf>, %357, %cst_246 [1] : vector<9x9xf32> to vector<9xf32>
    %359 = vector.shape_cast %358 : vector<9xf32> to vector<9x1xf32>
    %360 = vector.broadcast %359 : vector<9x1xf32> to vector<9x9xf32>
    %361 = arith.subf %357, %360 : vector<9x9xf32>
    %362 = math.exp %361 : vector<9x9xf32>
    %cst_247 = arith.constant dense<0.000000e+00> : vector<9xf32>
    %363 = vector.multi_reduction <add>, %362, %cst_247 [1] : vector<9x9xf32> to vector<9xf32>
    %364 = vector.shape_cast %363 : vector<9xf32> to vector<9x1xf32>
    %365 = tpu.reciprocal %364 {approx = true} : vector<9x1xf32> -> vector<9x1xf32>
    %366 = vector.broadcast %365 : vector<9x1xf32> to vector<9x9xf32>
    %367 = arith.mulf %362, %366 : vector<9x9xf32>
    %368 = arith.truncf %367 : vector<9x9xf32> to vector<9x9xbf16>
    %369 = arith.truncf %352 : vector<9x8xf32> to vector<9x8xbf16>
    %cst_248 = arith.constant dense<0.000000e+00> : vector<9x8xf32>
    %370 = tpu.matmul %368, %369, %cst_248 {dimension_numbers = #tpu.dot_dimension_numbers<[1], [0], [0], [1], [0, 0, 1, 1], [], []>} : vector<9x9xbf16>, vector<9x8xbf16>, vector<9x8xf32> -> vector<9x8xf32>
    %371 = arith.truncf %370 : vector<9x8xf32> to vector<9x8xbf16>
    %cst_249 = arith.constant dense<0.000000e+00> : vector<9x32xf32>
    %372 = tpu.matmul %371, %354, %cst_249 {dimension_numbers = #tpu.dot_dimension_numbers<[1], [0], [0], [1], [0, 0, 1, 1], [], []>} : vector<9x8xbf16>, vector<8x32xbf16>, vector<9x32xf32> -> vector<9x32xf32>
    %c0_250 = arith.constant 0 : index
    %c1_251 = arith.constant 1 : index
    %c0_252 = arith.constant 0 : index
    %c0_253 = arith.constant 0 : index
    %373 = vector.load %arg25[%c0_250, %c1_251, %c0_252, %c0_253] : memref<1x4x32x8xbf16, #tpu.memory_space<vmem>>, vector<1x1x32x8xbf16>
    %374 = vector.shape_cast %373 : vector<1x1x32x8xbf16> to vector<32x8xbf16>
    %375 = arith.truncf %55 : vector<9x32xf32> to vector<9x32xbf16>
    %cst_254 = arith.constant dense<0.000000e+00> : vector<9x8xf32>
    %376 = tpu.matmul %375, %374, %cst_254 {dimension_numbers = #tpu.dot_dimension_numbers<[1], [0], [0], [1], [0, 0, 1, 1], [], []>} : vector<9x32xbf16>, vector<32x8xbf16>, vector<9x8xf32> -> vector<9x8xf32>
    %c0_255 = arith.constant 0 : index
    %c1_256 = arith.constant 1 : index
    %c0_257 = arith.constant 0 : index
    %c0_258 = arith.constant 0 : index
    %377 = vector.load %arg26[%c0_255, %c1_256, %c0_257, %c0_258] : memref<1x4x1x8xf32, #tpu.memory_space<vmem>>, vector<1x1x1x8xf32>
    %378 = vector.shape_cast %377 : vector<1x1x1x8xf32> to vector<1x8xf32>
    %379 = vector.broadcast %378 : vector<1x8xf32> to vector<9x8xf32>
    %380 = arith.addf %376, %379 : vector<9x8xf32>
    %c0_259 = arith.constant 0 : index
    %c1_260 = arith.constant 1 : index
    %c0_261 = arith.constant 0 : index
    %c0_262 = arith.constant 0 : index
    %381 = vector.load %arg27[%c0_259, %c1_260, %c0_261, %c0_262] : memref<1x4x32x8xbf16, #tpu.memory_space<vmem>>, vector<1x1x32x8xbf16>
    %382 = vector.shape_cast %381 : vector<1x1x32x8xbf16> to vector<32x8xbf16>
    %383 = arith.truncf %55 : vector<9x32xf32> to vector<9x32xbf16>
    %cst_263 = arith.constant dense<0.000000e+00> : vector<9x8xf32>
    %384 = tpu.matmul %383, %382, %cst_263 {dimension_numbers = #tpu.dot_dimension_numbers<[1], [0], [0], [1], [0, 0, 1, 1], [], []>} : vector<9x32xbf16>, vector<32x8xbf16>, vector<9x8xf32> -> vector<9x8xf32>
    %c0_264 = arith.constant 0 : index
    %c1_265 = arith.constant 1 : index
    %c0_266 = arith.constant 0 : index
    %c0_267 = arith.constant 0 : index
    %385 = vector.load %arg28[%c0_264, %c1_265, %c0_266, %c0_267] : memref<1x4x1x8xf32, #tpu.memory_space<vmem>>, vector<1x1x1x8xf32>
    %386 = vector.shape_cast %385 : vector<1x1x1x8xf32> to vector<1x8xf32>
    %387 = vector.broadcast %386 : vector<1x8xf32> to vector<9x8xf32>
    %388 = arith.addf %384, %387 : vector<9x8xf32>
    %c0_268 = arith.constant 0 : index
    %c1_269 = arith.constant 1 : index
    %c0_270 = arith.constant 0 : index
    %c0_271 = arith.constant 0 : index
    %389 = vector.load %arg29[%c0_268, %c1_269, %c0_270, %c0_271] : memref<1x4x32x8xbf16, #tpu.memory_space<vmem>>, vector<1x1x32x8xbf16>
    %390 = vector.shape_cast %389 : vector<1x1x32x8xbf16> to vector<32x8xbf16>
    %391 = arith.truncf %55 : vector<9x32xf32> to vector<9x32xbf16>
    %cst_272 = arith.constant dense<0.000000e+00> : vector<9x8xf32>
    %392 = tpu.matmul %391, %390, %cst_272 {dimension_numbers = #tpu.dot_dimension_numbers<[1], [0], [0], [1], [0, 0, 1, 1], [], []>} : vector<9x32xbf16>, vector<32x8xbf16>, vector<9x8xf32> -> vector<9x8xf32>
    %c0_273 = arith.constant 0 : index
    %c1_274 = arith.constant 1 : index
    %c0_275 = arith.constant 0 : index
    %c0_276 = arith.constant 0 : index
    %393 = vector.load %arg30[%c0_273, %c1_274, %c0_275, %c0_276] : memref<1x4x1x8xf32, #tpu.memory_space<vmem>>, vector<1x1x1x8xf32>
    %394 = vector.shape_cast %393 : vector<1x1x1x8xf32> to vector<1x8xf32>
    %395 = vector.broadcast %394 : vector<1x8xf32> to vector<9x8xf32>
    %396 = arith.addf %392, %395 : vector<9x8xf32>
    %c0_277 = arith.constant 0 : index
    %c1_278 = arith.constant 1 : index
    %c0_279 = arith.constant 0 : index
    %c0_280 = arith.constant 0 : index
    %397 = vector.load %arg31[%c0_277, %c1_278, %c0_279, %c0_280] : memref<1x4x8x32xbf16, #tpu.memory_space<vmem>>, vector<1x1x8x32xbf16>
    %398 = vector.shape_cast %397 : vector<1x1x8x32xbf16> to vector<8x32xbf16>
    %399 = arith.truncf %380 : vector<9x8xf32> to vector<9x8xbf16>
    %400 = arith.truncf %388 : vector<9x8xf32> to vector<9x8xbf16>
    %cst_281 = arith.constant dense<0.000000e+00> : vector<9x9xf32>
    %401 = tpu.matmul %399, %400, %cst_281 {dimension_numbers = #tpu.dot_dimension_numbers<[1], [1], [0], [0], [0, 0, 1, 0], [], []>} : vector<9x8xbf16>, vector<9x8xbf16>, vector<9x9xf32> -> vector<9x9xf32>
    %cst_282 = arith.constant dense<0xFF800000> : vector<9xf32>
    %402 = vector.multi_reduction <maximumf>, %401, %cst_282 [1] : vector<9x9xf32> to vector<9xf32>
    %403 = vector.shape_cast %402 : vector<9xf32> to vector<9x1xf32>
    %404 = vector.broadcast %403 : vector<9x1xf32> to vector<9x9xf32>
    %405 = arith.subf %401, %404 : vector<9x9xf32>
    %406 = math.exp %405 : vector<9x9xf32>
    %cst_283 = arith.constant dense<0.000000e+00> : vector<9xf32>
    %407 = vector.multi_reduction <add>, %406, %cst_283 [1] : vector<9x9xf32> to vector<9xf32>
    %408 = vector.shape_cast %407 : vector<9xf32> to vector<9x1xf32>
    %409 = tpu.reciprocal %408 {approx = true} : vector<9x1xf32> -> vector<9x1xf32>
    %410 = vector.broadcast %409 : vector<9x1xf32> to vector<9x9xf32>
    %411 = arith.mulf %406, %410 : vector<9x9xf32>
    %412 = arith.truncf %411 : vector<9x9xf32> to vector<9x9xbf16>
    %413 = arith.truncf %396 : vector<9x8xf32> to vector<9x8xbf16>
    %cst_284 = arith.constant dense<0.000000e+00> : vector<9x8xf32>
    %414 = tpu.matmul %412, %413, %cst_284 {dimension_numbers = #tpu.dot_dimension_numbers<[1], [0], [0], [1], [0, 0, 1, 1], [], []>} : vector<9x9xbf16>, vector<9x8xbf16>, vector<9x8xf32> -> vector<9x8xf32>
    %415 = arith.truncf %414 : vector<9x8xf32> to vector<9x8xbf16>
    %cst_285 = arith.constant dense<0.000000e+00> : vector<9x32xf32>
    %416 = tpu.matmul %415, %398, %cst_285 {dimension_numbers = #tpu.dot_dimension_numbers<[1], [0], [0], [1], [0, 0, 1, 1], [], []>} : vector<9x8xbf16>, vector<8x32xbf16>, vector<9x32xf32> -> vector<9x32xf32>
    %417 = arith.addf %372, %416 : vector<9x32xf32>
    %c0_286 = arith.constant 0 : index
    %c2_287 = arith.constant 2 : index
    %c0_288 = arith.constant 0 : index
    %c0_289 = arith.constant 0 : index
    %418 = vector.load %arg25[%c0_286, %c2_287, %c0_288, %c0_289] : memref<1x4x32x8xbf16, #tpu.memory_space<vmem>>, vector<1x1x32x8xbf16>
    %419 = vector.shape_cast %418 : vector<1x1x32x8xbf16> to vector<32x8xbf16>
    %420 = arith.truncf %55 : vector<9x32xf32> to vector<9x32xbf16>
    %cst_290 = arith.constant dense<0.000000e+00> : vector<9x8xf32>
    %421 = tpu.matmul %420, %419, %cst_290 {dimension_numbers = #tpu.dot_dimension_numbers<[1], [0], [0], [1], [0, 0, 1, 1], [], []>} : vector<9x32xbf16>, vector<32x8xbf16>, vector<9x8xf32> -> vector<9x8xf32>
    %c0_291 = arith.constant 0 : index
    %c2_292 = arith.constant 2 : index
    %c0_293 = arith.constant 0 : index
    %c0_294 = arith.constant 0 : index
    %422 = vector.load %arg26[%c0_291, %c2_292, %c0_293, %c0_294] : memref<1x4x1x8xf32, #tpu.memory_space<vmem>>, vector<1x1x1x8xf32>
    %423 = vector.shape_cast %422 : vector<1x1x1x8xf32> to vector<1x8xf32>
    %424 = vector.broadcast %423 : vector<1x8xf32> to vector<9x8xf32>
    %425 = arith.addf %421, %424 : vector<9x8xf32>
    %c0_295 = arith.constant 0 : index
    %c2_296 = arith.constant 2 : index
    %c0_297 = arith.constant 0 : index
    %c0_298 = arith.constant 0 : index
    %426 = vector.load %arg27[%c0_295, %c2_296, %c0_297, %c0_298] : memref<1x4x32x8xbf16, #tpu.memory_space<vmem>>, vector<1x1x32x8xbf16>
    %427 = vector.shape_cast %426 : vector<1x1x32x8xbf16> to vector<32x8xbf16>
    %428 = arith.truncf %55 : vector<9x32xf32> to vector<9x32xbf16>
    %cst_299 = arith.constant dense<0.000000e+00> : vector<9x8xf32>
    %429 = tpu.matmul %428, %427, %cst_299 {dimension_numbers = #tpu.dot_dimension_numbers<[1], [0], [0], [1], [0, 0, 1, 1], [], []>} : vector<9x32xbf16>, vector<32x8xbf16>, vector<9x8xf32> -> vector<9x8xf32>
    %c0_300 = arith.constant 0 : index
    %c2_301 = arith.constant 2 : index
    %c0_302 = arith.constant 0 : index
    %c0_303 = arith.constant 0 : index
    %430 = vector.load %arg28[%c0_300, %c2_301, %c0_302, %c0_303] : memref<1x4x1x8xf32, #tpu.memory_space<vmem>>, vector<1x1x1x8xf32>
    %431 = vector.shape_cast %430 : vector<1x1x1x8xf32> to vector<1x8xf32>
    %432 = vector.broadcast %431 : vector<1x8xf32> to vector<9x8xf32>
    %433 = arith.addf %429, %432 : vector<9x8xf32>
    %c0_304 = arith.constant 0 : index
    %c2_305 = arith.constant 2 : index
    %c0_306 = arith.constant 0 : index
    %c0_307 = arith.constant 0 : index
    %434 = vector.load %arg29[%c0_304, %c2_305, %c0_306, %c0_307] : memref<1x4x32x8xbf16, #tpu.memory_space<vmem>>, vector<1x1x32x8xbf16>
    %435 = vector.shape_cast %434 : vector<1x1x32x8xbf16> to vector<32x8xbf16>
    %436 = arith.truncf %55 : vector<9x32xf32> to vector<9x32xbf16>
    %cst_308 = arith.constant dense<0.000000e+00> : vector<9x8xf32>
    %437 = tpu.matmul %436, %435, %cst_308 {dimension_numbers = #tpu.dot_dimension_numbers<[1], [0], [0], [1], [0, 0, 1, 1], [], []>} : vector<9x32xbf16>, vector<32x8xbf16>, vector<9x8xf32> -> vector<9x8xf32>
    %c0_309 = arith.constant 0 : index
    %c2_310 = arith.constant 2 : index
    %c0_311 = arith.constant 0 : index
    %c0_312 = arith.constant 0 : index
    %438 = vector.load %arg30[%c0_309, %c2_310, %c0_311, %c0_312] : memref<1x4x1x8xf32, #tpu.memory_space<vmem>>, vector<1x1x1x8xf32>
    %439 = vector.shape_cast %438 : vector<1x1x1x8xf32> to vector<1x8xf32>
    %440 = vector.broadcast %439 : vector<1x8xf32> to vector<9x8xf32>
    %441 = arith.addf %437, %440 : vector<9x8xf32>
    %c0_313 = arith.constant 0 : index
    %c2_314 = arith.constant 2 : index
    %c0_315 = arith.constant 0 : index
    %c0_316 = arith.constant 0 : index
    %442 = vector.load %arg31[%c0_313, %c2_314, %c0_315, %c0_316] : memref<1x4x8x32xbf16, #tpu.memory_space<vmem>>, vector<1x1x8x32xbf16>
    %443 = vector.shape_cast %442 : vector<1x1x8x32xbf16> to vector<8x32xbf16>
    %444 = arith.truncf %425 : vector<9x8xf32> to vector<9x8xbf16>
    %445 = arith.truncf %433 : vector<9x8xf32> to vector<9x8xbf16>
    %cst_317 = arith.constant dense<0.000000e+00> : vector<9x9xf32>
    %446 = tpu.matmul %444, %445, %cst_317 {dimension_numbers = #tpu.dot_dimension_numbers<[1], [1], [0], [0], [0, 0, 1, 0], [], []>} : vector<9x8xbf16>, vector<9x8xbf16>, vector<9x9xf32> -> vector<9x9xf32>
    %cst_318 = arith.constant dense<0xFF800000> : vector<9xf32>
    %447 = vector.multi_reduction <maximumf>, %446, %cst_318 [1] : vector<9x9xf32> to vector<9xf32>
    %448 = vector.shape_cast %447 : vector<9xf32> to vector<9x1xf32>
    %449 = vector.broadcast %448 : vector<9x1xf32> to vector<9x9xf32>
    %450 = arith.subf %446, %449 : vector<9x9xf32>
    %451 = math.exp %450 : vector<9x9xf32>
    %cst_319 = arith.constant dense<0.000000e+00> : vector<9xf32>
    %452 = vector.multi_reduction <add>, %451, %cst_319 [1] : vector<9x9xf32> to vector<9xf32>
    %453 = vector.shape_cast %452 : vector<9xf32> to vector<9x1xf32>
    %454 = tpu.reciprocal %453 {approx = true} : vector<9x1xf32> -> vector<9x1xf32>
    %455 = vector.broadcast %454 : vector<9x1xf32> to vector<9x9xf32>
    %456 = arith.mulf %451, %455 : vector<9x9xf32>
    %457 = arith.truncf %456 : vector<9x9xf32> to vector<9x9xbf16>
    %458 = arith.truncf %441 : vector<9x8xf32> to vector<9x8xbf16>
    %cst_320 = arith.constant dense<0.000000e+00> : vector<9x8xf32>
    %459 = tpu.matmul %457, %458, %cst_320 {dimension_numbers = #tpu.dot_dimension_numbers<[1], [0], [0], [1], [0, 0, 1, 1], [], []>} : vector<9x9xbf16>, vector<9x8xbf16>, vector<9x8xf32> -> vector<9x8xf32>
    %460 = arith.truncf %459 : vector<9x8xf32> to vector<9x8xbf16>
    %cst_321 = arith.constant dense<0.000000e+00> : vector<9x32xf32>
    %461 = tpu.matmul %460, %443, %cst_321 {dimension_numbers = #tpu.dot_dimension_numbers<[1], [0], [0], [1], [0, 0, 1, 1], [], []>} : vector<9x8xbf16>, vector<8x32xbf16>, vector<9x32xf32> -> vector<9x32xf32>
    %462 = arith.addf %417, %461 : vector<9x32xf32>
    %c0_322 = arith.constant 0 : index
    %c3_323 = arith.constant 3 : index
    %c0_324 = arith.constant 0 : index
    %c0_325 = arith.constant 0 : index
    %463 = vector.load %arg25[%c0_322, %c3_323, %c0_324, %c0_325] : memref<1x4x32x8xbf16, #tpu.memory_space<vmem>>, vector<1x1x32x8xbf16>
    %464 = vector.shape_cast %463 : vector<1x1x32x8xbf16> to vector<32x8xbf16>
    %465 = arith.truncf %55 : vector<9x32xf32> to vector<9x32xbf16>
    %cst_326 = arith.constant dense<0.000000e+00> : vector<9x8xf32>
    %466 = tpu.matmul %465, %464, %cst_326 {dimension_numbers = #tpu.dot_dimension_numbers<[1], [0], [0], [1], [0, 0, 1, 1], [], []>} : vector<9x32xbf16>, vector<32x8xbf16>, vector<9x8xf32> -> vector<9x8xf32>
    %c0_327 = arith.constant 0 : index
    %c3_328 = arith.constant 3 : index
    %c0_329 = arith.constant 0 : index
    %c0_330 = arith.constant 0 : index
    %467 = vector.load %arg26[%c0_327, %c3_328, %c0_329, %c0_330] : memref<1x4x1x8xf32, #tpu.memory_space<vmem>>, vector<1x1x1x8xf32>
    %468 = vector.shape_cast %467 : vector<1x1x1x8xf32> to vector<1x8xf32>
    %469 = vector.broadcast %468 : vector<1x8xf32> to vector<9x8xf32>
    %470 = arith.addf %466, %469 : vector<9x8xf32>
    %c0_331 = arith.constant 0 : index
    %c3_332 = arith.constant 3 : index
    %c0_333 = arith.constant 0 : index
    %c0_334 = arith.constant 0 : index
    %471 = vector.load %arg27[%c0_331, %c3_332, %c0_333, %c0_334] : memref<1x4x32x8xbf16, #tpu.memory_space<vmem>>, vector<1x1x32x8xbf16>
    %472 = vector.shape_cast %471 : vector<1x1x32x8xbf16> to vector<32x8xbf16>
    %473 = arith.truncf %55 : vector<9x32xf32> to vector<9x32xbf16>
    %cst_335 = arith.constant dense<0.000000e+00> : vector<9x8xf32>
    %474 = tpu.matmul %473, %472, %cst_335 {dimension_numbers = #tpu.dot_dimension_numbers<[1], [0], [0], [1], [0, 0, 1, 1], [], []>} : vector<9x32xbf16>, vector<32x8xbf16>, vector<9x8xf32> -> vector<9x8xf32>
    %c0_336 = arith.constant 0 : index
    %c3_337 = arith.constant 3 : index
    %c0_338 = arith.constant 0 : index
    %c0_339 = arith.constant 0 : index
    %475 = vector.load %arg28[%c0_336, %c3_337, %c0_338, %c0_339] : memref<1x4x1x8xf32, #tpu.memory_space<vmem>>, vector<1x1x1x8xf32>
    %476 = vector.shape_cast %475 : vector<1x1x1x8xf32> to vector<1x8xf32>
    %477 = vector.broadcast %476 : vector<1x8xf32> to vector<9x8xf32>
    %478 = arith.addf %474, %477 : vector<9x8xf32>
    %c0_340 = arith.constant 0 : index
    %c3_341 = arith.constant 3 : index
    %c0_342 = arith.constant 0 : index
    %c0_343 = arith.constant 0 : index
    %479 = vector.load %arg29[%c0_340, %c3_341, %c0_342, %c0_343] : memref<1x4x32x8xbf16, #tpu.memory_space<vmem>>, vector<1x1x32x8xbf16>
    %480 = vector.shape_cast %479 : vector<1x1x32x8xbf16> to vector<32x8xbf16>
    %481 = arith.truncf %55 : vector<9x32xf32> to vector<9x32xbf16>
    %cst_344 = arith.constant dense<0.000000e+00> : vector<9x8xf32>
    %482 = tpu.matmul %481, %480, %cst_344 {dimension_numbers = #tpu.dot_dimension_numbers<[1], [0], [0], [1], [0, 0, 1, 1], [], []>} : vector<9x32xbf16>, vector<32x8xbf16>, vector<9x8xf32> -> vector<9x8xf32>
    %c0_345 = arith.constant 0 : index
    %c3_346 = arith.constant 3 : index
    %c0_347 = arith.constant 0 : index
    %c0_348 = arith.constant 0 : index
    %483 = vector.load %arg30[%c0_345, %c3_346, %c0_347, %c0_348] : memref<1x4x1x8xf32, #tpu.memory_space<vmem>>, vector<1x1x1x8xf32>
    %484 = vector.shape_cast %483 : vector<1x1x1x8xf32> to vector<1x8xf32>
    %485 = vector.broadcast %484 : vector<1x8xf32> to vector<9x8xf32>
    %486 = arith.addf %482, %485 : vector<9x8xf32>
    %c0_349 = arith.constant 0 : index
    %c3_350 = arith.constant 3 : index
    %c0_351 = arith.constant 0 : index
    %c0_352 = arith.constant 0 : index
    %487 = vector.load %arg31[%c0_349, %c3_350, %c0_351, %c0_352] : memref<1x4x8x32xbf16, #tpu.memory_space<vmem>>, vector<1x1x8x32xbf16>
    %488 = vector.shape_cast %487 : vector<1x1x8x32xbf16> to vector<8x32xbf16>
    %489 = arith.truncf %470 : vector<9x8xf32> to vector<9x8xbf16>
    %490 = arith.truncf %478 : vector<9x8xf32> to vector<9x8xbf16>
    %cst_353 = arith.constant dense<0.000000e+00> : vector<9x9xf32>
    %491 = tpu.matmul %489, %490, %cst_353 {dimension_numbers = #tpu.dot_dimension_numbers<[1], [1], [0], [0], [0, 0, 1, 0], [], []>} : vector<9x8xbf16>, vector<9x8xbf16>, vector<9x9xf32> -> vector<9x9xf32>
    %cst_354 = arith.constant dense<0xFF800000> : vector<9xf32>
    %492 = vector.multi_reduction <maximumf>, %491, %cst_354 [1] : vector<9x9xf32> to vector<9xf32>
    %493 = vector.shape_cast %492 : vector<9xf32> to vector<9x1xf32>
    %494 = vector.broadcast %493 : vector<9x1xf32> to vector<9x9xf32>
    %495 = arith.subf %491, %494 : vector<9x9xf32>
    %496 = math.exp %495 : vector<9x9xf32>
    %cst_355 = arith.constant dense<0.000000e+00> : vector<9xf32>
    %497 = vector.multi_reduction <add>, %496, %cst_355 [1] : vector<9x9xf32> to vector<9xf32>
    %498 = vector.shape_cast %497 : vector<9xf32> to vector<9x1xf32>
    %499 = tpu.reciprocal %498 {approx = true} : vector<9x1xf32> -> vector<9x1xf32>
    %500 = vector.broadcast %499 : vector<9x1xf32> to vector<9x9xf32>
    %501 = arith.mulf %496, %500 : vector<9x9xf32>
    %502 = arith.truncf %501 : vector<9x9xf32> to vector<9x9xbf16>
    %503 = arith.truncf %486 : vector<9x8xf32> to vector<9x8xbf16>
    %cst_356 = arith.constant dense<0.000000e+00> : vector<9x8xf32>
    %504 = tpu.matmul %502, %503, %cst_356 {dimension_numbers = #tpu.dot_dimension_numbers<[1], [0], [0], [1], [0, 0, 1, 1], [], []>} : vector<9x9xbf16>, vector<9x8xbf16>, vector<9x8xf32> -> vector<9x8xf32>
    %505 = arith.truncf %504 : vector<9x8xf32> to vector<9x8xbf16>
    %cst_357 = arith.constant dense<0.000000e+00> : vector<9x32xf32>
    %506 = tpu.matmul %505, %488, %cst_357 {dimension_numbers = #tpu.dot_dimension_numbers<[1], [0], [0], [1], [0, 0, 1, 1], [], []>} : vector<9x8xbf16>, vector<8x32xbf16>, vector<9x32xf32> -> vector<9x32xf32>
    %507 = arith.addf %462, %506 : vector<9x32xf32>
    %c0_358 = arith.constant 0 : index
    %c0_359 = arith.constant 0 : index
    %c0_360 = arith.constant 0 : index
    %508 = vector.load %arg32[%c0_358, %c0_359, %c0_360] : memref<1x1x32xf32, #tpu.memory_space<vmem>>, vector<1x1x32xf32>
    %509 = vector.shape_cast %508 : vector<1x1x32xf32> to vector<1x32xf32>
    %510 = vector.broadcast %509 : vector<1x32xf32> to vector<9x32xf32>
    %511 = arith.addf %507, %510 : vector<9x32xf32>
    %512 = arith.addf %55, %511 : vector<9x32xf32>
    %c0_361 = arith.constant 0 : index
    %c0_362 = arith.constant 0 : index
    %c0_363 = arith.constant 0 : index
    %513 = vector.load %arg37[%c0_361, %c0_362, %c0_363] : memref<1x1x32xf32, #tpu.memory_space<vmem>>, vector<1x1x32xf32>
    %514 = vector.shape_cast %513 : vector<1x1x32xf32> to vector<1x32xf32>
    %c0_364 = arith.constant 0 : index
    %c0_365 = arith.constant 0 : index
    %c0_366 = arith.constant 0 : index
    %515 = vector.load %arg38[%c0_364, %c0_365, %c0_366] : memref<1x1x32xf32, #tpu.memory_space<vmem>>, vector<1x1x32xf32>
    %516 = vector.shape_cast %515 : vector<1x1x32xf32> to vector<1x32xf32>
    %cst_367 = arith.constant dense<0.000000e+00> : vector<9xf32>
    %517 = vector.multi_reduction <add>, %512, %cst_367 [1] : vector<9x32xf32> to vector<9xf32>
    %518 = vector.shape_cast %517 : vector<9xf32> to vector<9x1xf32>
    %cst_368 = arith.constant 3.200000e+01 : f32
    %519 = vector.broadcast %cst_368 : f32 to vector<9x1xf32>
    %520 = arith.divf %518, %519 : vector<9x1xf32>
    %521 = vector.broadcast %520 : vector<9x1xf32> to vector<9x32xf32>
    %522 = arith.subf %512, %521 : vector<9x32xf32>
    %523 = arith.mulf %522, %522 : vector<9x32xf32>
    %cst_369 = arith.constant dense<0.000000e+00> : vector<9xf32>
    %524 = vector.multi_reduction <add>, %523, %cst_369 [1] : vector<9x32xf32> to vector<9xf32>
    %525 = vector.shape_cast %524 : vector<9xf32> to vector<9x1xf32>
    %cst_370 = arith.constant 3.200000e+01 : f32
    %526 = vector.broadcast %cst_370 : f32 to vector<9x1xf32>
    %527 = arith.divf %525, %526 : vector<9x1xf32>
    %cst_371 = arith.constant 9.99999974E-6 : f32
    %528 = vector.broadcast %cst_371 : f32 to vector<9x1xf32>
    %529 = arith.addf %527, %528 : vector<9x1xf32>
    %530 = math.rsqrt %529 : vector<9x1xf32>
    %531 = vector.broadcast %530 : vector<9x1xf32> to vector<9x32xf32>
    %532 = arith.mulf %522, %531 : vector<9x32xf32>
    %533 = vector.broadcast %514 : vector<1x32xf32> to vector<9x32xf32>
    %534 = arith.mulf %532, %533 : vector<9x32xf32>
    %535 = vector.broadcast %516 : vector<1x32xf32> to vector<9x32xf32>
    %536 = arith.addf %534, %535 : vector<9x32xf32>
    %c0_372 = arith.constant 0 : index
    %c0_373 = arith.constant 0 : index
    %c0_374 = arith.constant 0 : index
    %537 = vector.load %arg33[%c0_372, %c0_373, %c0_374] : memref<1x32x64xbf16, #tpu.memory_space<vmem>>, vector<1x32x64xbf16>
    %538 = vector.shape_cast %537 : vector<1x32x64xbf16> to vector<32x64xbf16>
    %539 = arith.truncf %536 : vector<9x32xf32> to vector<9x32xbf16>
    %cst_375 = arith.constant dense<0.000000e+00> : vector<9x64xf32>
    %540 = tpu.matmul %539, %538, %cst_375 {dimension_numbers = #tpu.dot_dimension_numbers<[1], [0], [0], [1], [0, 0, 1, 1], [], []>} : vector<9x32xbf16>, vector<32x64xbf16>, vector<9x64xf32> -> vector<9x64xf32>
    %c0_376 = arith.constant 0 : index
    %c0_377 = arith.constant 0 : index
    %c0_378 = arith.constant 0 : index
    %541 = vector.load %arg34[%c0_376, %c0_377, %c0_378] : memref<1x1x64xf32, #tpu.memory_space<vmem>>, vector<1x1x64xf32>
    %542 = vector.shape_cast %541 : vector<1x1x64xf32> to vector<1x64xf32>
    %543 = vector.broadcast %542 : vector<1x64xf32> to vector<9x64xf32>
    %544 = arith.addf %540, %543 : vector<9x64xf32>
    %cst_379 = arith.constant 0.000000e+00 : f32
    %545 = vector.broadcast %cst_379 : f32 to vector<9x64xf32>
    %546 = arith.maximumf %544, %545 : vector<9x64xf32>
    %c0_380 = arith.constant 0 : index
    %c0_381 = arith.constant 0 : index
    %c0_382 = arith.constant 0 : index
    %547 = vector.load %arg35[%c0_380, %c0_381, %c0_382] : memref<1x64x32xbf16, #tpu.memory_space<vmem>>, vector<1x64x32xbf16>
    %548 = vector.shape_cast %547 : vector<1x64x32xbf16> to vector<64x32xbf16>
    %549 = arith.truncf %546 : vector<9x64xf32> to vector<9x64xbf16>
    %cst_383 = arith.constant dense<0.000000e+00> : vector<9x32xf32>
    %550 = tpu.matmul %549, %548, %cst_383 {dimension_numbers = #tpu.dot_dimension_numbers<[1], [0], [0], [1], [0, 0, 1, 1], [], []>} : vector<9x64xbf16>, vector<64x32xbf16>, vector<9x32xf32> -> vector<9x32xf32>
    %c0_384 = arith.constant 0 : index
    %c0_385 = arith.constant 0 : index
    %c0_386 = arith.constant 0 : index
    %551 = vector.load %arg36[%c0_384, %c0_385, %c0_386] : memref<1x1x32xf32, #tpu.memory_space<vmem>>, vector<1x1x32xf32>
    %552 = vector.shape_cast %551 : vector<1x1x32xf32> to vector<1x32xf32>
    %553 = vector.broadcast %552 : vector<1x32xf32> to vector<9x32xf32>
    %554 = arith.addf %550, %553 : vector<9x32xf32>
    %555 = arith.addf %536, %554 : vector<9x32xf32>
    %c0_387 = arith.constant 0 : index
    %c0_388 = arith.constant 0 : index
    %c0_389 = arith.constant 0 : index
    %556 = vector.load %arg39[%c0_387, %c0_388, %c0_389] : memref<1x1x32xf32, #tpu.memory_space<vmem>>, vector<1x1x32xf32>
    %557 = vector.shape_cast %556 : vector<1x1x32xf32> to vector<1x32xf32>
    %c0_390 = arith.constant 0 : index
    %c0_391 = arith.constant 0 : index
    %c0_392 = arith.constant 0 : index
    %558 = vector.load %arg40[%c0_390, %c0_391, %c0_392] : memref<1x1x32xf32, #tpu.memory_space<vmem>>, vector<1x1x32xf32>
    %559 = vector.shape_cast %558 : vector<1x1x32xf32> to vector<1x32xf32>
    %cst_393 = arith.constant dense<0.000000e+00> : vector<9xf32>
    %560 = vector.multi_reduction <add>, %555, %cst_393 [1] : vector<9x32xf32> to vector<9xf32>
    %561 = vector.shape_cast %560 : vector<9xf32> to vector<9x1xf32>
    %cst_394 = arith.constant 3.200000e+01 : f32
    %562 = vector.broadcast %cst_394 : f32 to vector<9x1xf32>
    %563 = arith.divf %561, %562 : vector<9x1xf32>
    %564 = vector.broadcast %563 : vector<9x1xf32> to vector<9x32xf32>
    %565 = arith.subf %555, %564 : vector<9x32xf32>
    %566 = arith.mulf %565, %565 : vector<9x32xf32>
    %cst_395 = arith.constant dense<0.000000e+00> : vector<9xf32>
    %567 = vector.multi_reduction <add>, %566, %cst_395 [1] : vector<9x32xf32> to vector<9xf32>
    %568 = vector.shape_cast %567 : vector<9xf32> to vector<9x1xf32>
    %cst_396 = arith.constant 3.200000e+01 : f32
    %569 = vector.broadcast %cst_396 : f32 to vector<9x1xf32>
    %570 = arith.divf %568, %569 : vector<9x1xf32>
    %cst_397 = arith.constant 9.99999974E-6 : f32
    %571 = vector.broadcast %cst_397 : f32 to vector<9x1xf32>
    %572 = arith.addf %570, %571 : vector<9x1xf32>
    %573 = math.rsqrt %572 : vector<9x1xf32>
    %574 = vector.broadcast %573 : vector<9x1xf32> to vector<9x32xf32>
    %575 = arith.mulf %565, %574 : vector<9x32xf32>
    %576 = vector.broadcast %557 : vector<1x32xf32> to vector<9x32xf32>
    %577 = arith.mulf %575, %576 : vector<9x32xf32>
    %578 = vector.broadcast %559 : vector<1x32xf32> to vector<9x32xf32>
    %579 = arith.addf %577, %578 : vector<9x32xf32>
    %c0_398 = arith.constant 0 : index
    %c0_399 = arith.constant 0 : index
    %580 = vector.load %arg41[%c0_398, %c0_399] : memref<1x32xf32, #tpu.memory_space<vmem>>, vector<1x32xf32>
    %c0_400 = arith.constant 0 : index
    %c0_401 = arith.constant 0 : index
    %581 = vector.load %arg42[%c0_400, %c0_401] : memref<1x32xf32, #tpu.memory_space<vmem>>, vector<1x32xf32>
    %cst_402 = arith.constant dense<0.000000e+00> : vector<9xf32>
    %582 = vector.multi_reduction <add>, %579, %cst_402 [1] : vector<9x32xf32> to vector<9xf32>
    %583 = vector.shape_cast %582 : vector<9xf32> to vector<9x1xf32>
    %cst_403 = arith.constant 3.200000e+01 : f32
    %584 = vector.broadcast %cst_403 : f32 to vector<9x1xf32>
    %585 = arith.divf %583, %584 : vector<9x1xf32>
    %586 = vector.broadcast %585 : vector<9x1xf32> to vector<9x32xf32>
    %587 = arith.subf %579, %586 : vector<9x32xf32>
    %588 = arith.mulf %587, %587 : vector<9x32xf32>
    %cst_404 = arith.constant dense<0.000000e+00> : vector<9xf32>
    %589 = vector.multi_reduction <add>, %588, %cst_404 [1] : vector<9x32xf32> to vector<9xf32>
    %590 = vector.shape_cast %589 : vector<9xf32> to vector<9x1xf32>
    %cst_405 = arith.constant 3.200000e+01 : f32
    %591 = vector.broadcast %cst_405 : f32 to vector<9x1xf32>
    %592 = arith.divf %590, %591 : vector<9x1xf32>
    %cst_406 = arith.constant 9.99999974E-6 : f32
    %593 = vector.broadcast %cst_406 : f32 to vector<9x1xf32>
    %594 = arith.addf %592, %593 : vector<9x1xf32>
    %595 = math.rsqrt %594 : vector<9x1xf32>
    %596 = vector.broadcast %595 : vector<9x1xf32> to vector<9x32xf32>
    %597 = arith.mulf %587, %596 : vector<9x32xf32>
    %598 = vector.broadcast %580 : vector<1x32xf32> to vector<9x32xf32>
    %599 = arith.mulf %597, %598 : vector<9x32xf32>
    %600 = vector.broadcast %581 : vector<1x32xf32> to vector<9x32xf32>
    %601 = arith.addf %599, %600 : vector<9x32xf32>
    %c0_407 = arith.constant 0 : index
    %c0_408 = arith.constant 0 : index
    %c0_409 = arith.constant 0 : index
    %c0_410 = arith.constant 0 : index
    %602 = vector.load %arg43[%c0_407, %c0_408, %c0_409, %c0_410] : memref<1x4x32x8xbf16, #tpu.memory_space<vmem>>, vector<1x1x32x8xbf16>
    %603 = vector.shape_cast %602 : vector<1x1x32x8xbf16> to vector<32x8xbf16>
    %604 = arith.truncf %328 : vector<8x32xf32> to vector<8x32xbf16>
    %cst_411 = arith.constant dense<0.000000e+00> : vector<8x8xf32>
    %605 = tpu.matmul %604, %603, %cst_411 {dimension_numbers = #tpu.dot_dimension_numbers<[1], [0], [0], [1], [0, 0, 1, 1], [], []>} : vector<8x32xbf16>, vector<32x8xbf16>, vector<8x8xf32> -> vector<8x8xf32>
    %c0_412 = arith.constant 0 : index
    %c0_413 = arith.constant 0 : index
    %c0_414 = arith.constant 0 : index
    %c0_415 = arith.constant 0 : index
    %606 = vector.load %arg44[%c0_412, %c0_413, %c0_414, %c0_415] : memref<1x4x1x8xf32, #tpu.memory_space<vmem>>, vector<1x1x1x8xf32>
    %607 = vector.shape_cast %606 : vector<1x1x1x8xf32> to vector<1x8xf32>
    %608 = vector.broadcast %607 : vector<1x8xf32> to vector<8x8xf32>
    %609 = arith.addf %605, %608 : vector<8x8xf32>
    %c0_416 = arith.constant 0 : index
    %c0_417 = arith.constant 0 : index
    %c0_418 = arith.constant 0 : index
    %c0_419 = arith.constant 0 : index
    %610 = vector.load %arg45[%c0_416, %c0_417, %c0_418, %c0_419] : memref<1x4x32x8xbf16, #tpu.memory_space<vmem>>, vector<1x1x32x8xbf16>
    %611 = vector.shape_cast %610 : vector<1x1x32x8xbf16> to vector<32x8xbf16>
    %612 = arith.truncf %601 : vector<9x32xf32> to vector<9x32xbf16>
    %cst_420 = arith.constant dense<0.000000e+00> : vector<9x8xf32>
    %613 = tpu.matmul %612, %611, %cst_420 {dimension_numbers = #tpu.dot_dimension_numbers<[1], [0], [0], [1], [0, 0, 1, 1], [], []>} : vector<9x32xbf16>, vector<32x8xbf16>, vector<9x8xf32> -> vector<9x8xf32>
    %c0_421 = arith.constant 0 : index
    %c0_422 = arith.constant 0 : index
    %c0_423 = arith.constant 0 : index
    %c0_424 = arith.constant 0 : index
    %614 = vector.load %arg46[%c0_421, %c0_422, %c0_423, %c0_424] : memref<1x4x1x8xf32, #tpu.memory_space<vmem>>, vector<1x1x1x8xf32>
    %615 = vector.shape_cast %614 : vector<1x1x1x8xf32> to vector<1x8xf32>
    %616 = vector.broadcast %615 : vector<1x8xf32> to vector<9x8xf32>
    %617 = arith.addf %613, %616 : vector<9x8xf32>
    %c0_425 = arith.constant 0 : index
    %c0_426 = arith.constant 0 : index
    %c0_427 = arith.constant 0 : index
    %c0_428 = arith.constant 0 : index
    %618 = vector.load %arg47[%c0_425, %c0_426, %c0_427, %c0_428] : memref<1x4x32x8xbf16, #tpu.memory_space<vmem>>, vector<1x1x32x8xbf16>
    %619 = vector.shape_cast %618 : vector<1x1x32x8xbf16> to vector<32x8xbf16>
    %620 = arith.truncf %601 : vector<9x32xf32> to vector<9x32xbf16>
    %cst_429 = arith.constant dense<0.000000e+00> : vector<9x8xf32>
    %621 = tpu.matmul %620, %619, %cst_429 {dimension_numbers = #tpu.dot_dimension_numbers<[1], [0], [0], [1], [0, 0, 1, 1], [], []>} : vector<9x32xbf16>, vector<32x8xbf16>, vector<9x8xf32> -> vector<9x8xf32>
    %c0_430 = arith.constant 0 : index
    %c0_431 = arith.constant 0 : index
    %c0_432 = arith.constant 0 : index
    %c0_433 = arith.constant 0 : index
    %622 = vector.load %arg48[%c0_430, %c0_431, %c0_432, %c0_433] : memref<1x4x1x8xf32, #tpu.memory_space<vmem>>, vector<1x1x1x8xf32>
    %623 = vector.shape_cast %622 : vector<1x1x1x8xf32> to vector<1x8xf32>
    %624 = vector.broadcast %623 : vector<1x8xf32> to vector<9x8xf32>
    %625 = arith.addf %621, %624 : vector<9x8xf32>
    %c0_434 = arith.constant 0 : index
    %c0_435 = arith.constant 0 : index
    %c0_436 = arith.constant 0 : index
    %c0_437 = arith.constant 0 : index
    %626 = vector.load %arg49[%c0_434, %c0_435, %c0_436, %c0_437] : memref<1x4x8x32xbf16, #tpu.memory_space<vmem>>, vector<1x1x8x32xbf16>
    %627 = vector.shape_cast %626 : vector<1x1x8x32xbf16> to vector<8x32xbf16>
    %628 = arith.truncf %609 : vector<8x8xf32> to vector<8x8xbf16>
    %629 = arith.truncf %617 : vector<9x8xf32> to vector<9x8xbf16>
    %cst_438 = arith.constant dense<0.000000e+00> : vector<8x9xf32>
    %630 = tpu.matmul %628, %629, %cst_438 {dimension_numbers = #tpu.dot_dimension_numbers<[1], [1], [0], [0], [0, 0, 1, 0], [], []>} : vector<8x8xbf16>, vector<9x8xbf16>, vector<8x9xf32> -> vector<8x9xf32>
    %cst_439 = arith.constant dense<0xFF800000> : vector<8xf32>
    %631 = vector.multi_reduction <maximumf>, %630, %cst_439 [1] : vector<8x9xf32> to vector<8xf32>
    %632 = vector.shape_cast %631 : vector<8xf32> to vector<8x1xf32>
    %633 = vector.broadcast %632 : vector<8x1xf32> to vector<8x9xf32>
    %634 = arith.subf %630, %633 : vector<8x9xf32>
    %635 = math.exp %634 : vector<8x9xf32>
    %cst_440 = arith.constant dense<0.000000e+00> : vector<8xf32>
    %636 = vector.multi_reduction <add>, %635, %cst_440 [1] : vector<8x9xf32> to vector<8xf32>
    %637 = vector.shape_cast %636 : vector<8xf32> to vector<8x1xf32>
    %638 = tpu.reciprocal %637 {approx = true} : vector<8x1xf32> -> vector<8x1xf32>
    %639 = vector.broadcast %638 : vector<8x1xf32> to vector<8x9xf32>
    %640 = arith.mulf %635, %639 : vector<8x9xf32>
    %641 = arith.truncf %640 : vector<8x9xf32> to vector<8x9xbf16>
    %642 = arith.truncf %625 : vector<9x8xf32> to vector<9x8xbf16>
    %cst_441 = arith.constant dense<0.000000e+00> : vector<8x8xf32>
    %643 = tpu.matmul %641, %642, %cst_441 {dimension_numbers = #tpu.dot_dimension_numbers<[1], [0], [0], [1], [0, 0, 1, 1], [], []>} : vector<8x9xbf16>, vector<9x8xbf16>, vector<8x8xf32> -> vector<8x8xf32>
    %644 = arith.truncf %643 : vector<8x8xf32> to vector<8x8xbf16>
    %cst_442 = arith.constant dense<0.000000e+00> : vector<8x32xf32>
    %645 = tpu.matmul %644, %627, %cst_442 {dimension_numbers = #tpu.dot_dimension_numbers<[1], [0], [0], [1], [0, 0, 1, 1], [], []>} : vector<8x8xbf16>, vector<8x32xbf16>, vector<8x32xf32> -> vector<8x32xf32>
    %c0_443 = arith.constant 0 : index
    %c1_444 = arith.constant 1 : index
    %c0_445 = arith.constant 0 : index
    %c0_446 = arith.constant 0 : index
    %646 = vector.load %arg43[%c0_443, %c1_444, %c0_445, %c0_446] : memref<1x4x32x8xbf16, #tpu.memory_space<vmem>>, vector<1x1x32x8xbf16>
    %647 = vector.shape_cast %646 : vector<1x1x32x8xbf16> to vector<32x8xbf16>
    %648 = arith.truncf %328 : vector<8x32xf32> to vector<8x32xbf16>
    %cst_447 = arith.constant dense<0.000000e+00> : vector<8x8xf32>
    %649 = tpu.matmul %648, %647, %cst_447 {dimension_numbers = #tpu.dot_dimension_numbers<[1], [0], [0], [1], [0, 0, 1, 1], [], []>} : vector<8x32xbf16>, vector<32x8xbf16>, vector<8x8xf32> -> vector<8x8xf32>
    %c0_448 = arith.constant 0 : index
    %c1_449 = arith.constant 1 : index
    %c0_450 = arith.constant 0 : index
    %c0_451 = arith.constant 0 : index
    %650 = vector.load %arg44[%c0_448, %c1_449, %c0_450, %c0_451] : memref<1x4x1x8xf32, #tpu.memory_space<vmem>>, vector<1x1x1x8xf32>
    %651 = vector.shape_cast %650 : vector<1x1x1x8xf32> to vector<1x8xf32>
    %652 = vector.broadcast %651 : vector<1x8xf32> to vector<8x8xf32>
    %653 = arith.addf %649, %652 : vector<8x8xf32>
    %c0_452 = arith.constant 0 : index
    %c1_453 = arith.constant 1 : index
    %c0_454 = arith.constant 0 : index
    %c0_455 = arith.constant 0 : index
    %654 = vector.load %arg45[%c0_452, %c1_453, %c0_454, %c0_455] : memref<1x4x32x8xbf16, #tpu.memory_space<vmem>>, vector<1x1x32x8xbf16>
    %655 = vector.shape_cast %654 : vector<1x1x32x8xbf16> to vector<32x8xbf16>
    %656 = arith.truncf %601 : vector<9x32xf32> to vector<9x32xbf16>
    %cst_456 = arith.constant dense<0.000000e+00> : vector<9x8xf32>
    %657 = tpu.matmul %656, %655, %cst_456 {dimension_numbers = #tpu.dot_dimension_numbers<[1], [0], [0], [1], [0, 0, 1, 1], [], []>} : vector<9x32xbf16>, vector<32x8xbf16>, vector<9x8xf32> -> vector<9x8xf32>
    %c0_457 = arith.constant 0 : index
    %c1_458 = arith.constant 1 : index
    %c0_459 = arith.constant 0 : index
    %c0_460 = arith.constant 0 : index
    %658 = vector.load %arg46[%c0_457, %c1_458, %c0_459, %c0_460] : memref<1x4x1x8xf32, #tpu.memory_space<vmem>>, vector<1x1x1x8xf32>
    %659 = vector.shape_cast %658 : vector<1x1x1x8xf32> to vector<1x8xf32>
    %660 = vector.broadcast %659 : vector<1x8xf32> to vector<9x8xf32>
    %661 = arith.addf %657, %660 : vector<9x8xf32>
    %c0_461 = arith.constant 0 : index
    %c1_462 = arith.constant 1 : index
    %c0_463 = arith.constant 0 : index
    %c0_464 = arith.constant 0 : index
    %662 = vector.load %arg47[%c0_461, %c1_462, %c0_463, %c0_464] : memref<1x4x32x8xbf16, #tpu.memory_space<vmem>>, vector<1x1x32x8xbf16>
    %663 = vector.shape_cast %662 : vector<1x1x32x8xbf16> to vector<32x8xbf16>
    %664 = arith.truncf %601 : vector<9x32xf32> to vector<9x32xbf16>
    %cst_465 = arith.constant dense<0.000000e+00> : vector<9x8xf32>
    %665 = tpu.matmul %664, %663, %cst_465 {dimension_numbers = #tpu.dot_dimension_numbers<[1], [0], [0], [1], [0, 0, 1, 1], [], []>} : vector<9x32xbf16>, vector<32x8xbf16>, vector<9x8xf32> -> vector<9x8xf32>
    %c0_466 = arith.constant 0 : index
    %c1_467 = arith.constant 1 : index
    %c0_468 = arith.constant 0 : index
    %c0_469 = arith.constant 0 : index
    %666 = vector.load %arg48[%c0_466, %c1_467, %c0_468, %c0_469] : memref<1x4x1x8xf32, #tpu.memory_space<vmem>>, vector<1x1x1x8xf32>
    %667 = vector.shape_cast %666 : vector<1x1x1x8xf32> to vector<1x8xf32>
    %668 = vector.broadcast %667 : vector<1x8xf32> to vector<9x8xf32>
    %669 = arith.addf %665, %668 : vector<9x8xf32>
    %c0_470 = arith.constant 0 : index
    %c1_471 = arith.constant 1 : index
    %c0_472 = arith.constant 0 : index
    %c0_473 = arith.constant 0 : index
    %670 = vector.load %arg49[%c0_470, %c1_471, %c0_472, %c0_473] : memref<1x4x8x32xbf16, #tpu.memory_space<vmem>>, vector<1x1x8x32xbf16>
    %671 = vector.shape_cast %670 : vector<1x1x8x32xbf16> to vector<8x32xbf16>
    %672 = arith.truncf %653 : vector<8x8xf32> to vector<8x8xbf16>
    %673 = arith.truncf %661 : vector<9x8xf32> to vector<9x8xbf16>
    %cst_474 = arith.constant dense<0.000000e+00> : vector<8x9xf32>
    %674 = tpu.matmul %672, %673, %cst_474 {dimension_numbers = #tpu.dot_dimension_numbers<[1], [1], [0], [0], [0, 0, 1, 0], [], []>} : vector<8x8xbf16>, vector<9x8xbf16>, vector<8x9xf32> -> vector<8x9xf32>
    %cst_475 = arith.constant dense<0xFF800000> : vector<8xf32>
    %675 = vector.multi_reduction <maximumf>, %674, %cst_475 [1] : vector<8x9xf32> to vector<8xf32>
    %676 = vector.shape_cast %675 : vector<8xf32> to vector<8x1xf32>
    %677 = vector.broadcast %676 : vector<8x1xf32> to vector<8x9xf32>
    %678 = arith.subf %674, %677 : vector<8x9xf32>
    %679 = math.exp %678 : vector<8x9xf32>
    %cst_476 = arith.constant dense<0.000000e+00> : vector<8xf32>
    %680 = vector.multi_reduction <add>, %679, %cst_476 [1] : vector<8x9xf32> to vector<8xf32>
    %681 = vector.shape_cast %680 : vector<8xf32> to vector<8x1xf32>
    %682 = tpu.reciprocal %681 {approx = true} : vector<8x1xf32> -> vector<8x1xf32>
    %683 = vector.broadcast %682 : vector<8x1xf32> to vector<8x9xf32>
    %684 = arith.mulf %679, %683 : vector<8x9xf32>
    %685 = arith.truncf %684 : vector<8x9xf32> to vector<8x9xbf16>
    %686 = arith.truncf %669 : vector<9x8xf32> to vector<9x8xbf16>
    %cst_477 = arith.constant dense<0.000000e+00> : vector<8x8xf32>
    %687 = tpu.matmul %685, %686, %cst_477 {dimension_numbers = #tpu.dot_dimension_numbers<[1], [0], [0], [1], [0, 0, 1, 1], [], []>} : vector<8x9xbf16>, vector<9x8xbf16>, vector<8x8xf32> -> vector<8x8xf32>
    %688 = arith.truncf %687 : vector<8x8xf32> to vector<8x8xbf16>
    %cst_478 = arith.constant dense<0.000000e+00> : vector<8x32xf32>
    %689 = tpu.matmul %688, %671, %cst_478 {dimension_numbers = #tpu.dot_dimension_numbers<[1], [0], [0], [1], [0, 0, 1, 1], [], []>} : vector<8x8xbf16>, vector<8x32xbf16>, vector<8x32xf32> -> vector<8x32xf32>
    %690 = arith.addf %645, %689 : vector<8x32xf32>
    %c0_479 = arith.constant 0 : index
    %c2_480 = arith.constant 2 : index
    %c0_481 = arith.constant 0 : index
    %c0_482 = arith.constant 0 : index
    %691 = vector.load %arg43[%c0_479, %c2_480, %c0_481, %c0_482] : memref<1x4x32x8xbf16, #tpu.memory_space<vmem>>, vector<1x1x32x8xbf16>
    %692 = vector.shape_cast %691 : vector<1x1x32x8xbf16> to vector<32x8xbf16>
    %693 = arith.truncf %328 : vector<8x32xf32> to vector<8x32xbf16>
    %cst_483 = arith.constant dense<0.000000e+00> : vector<8x8xf32>
    %694 = tpu.matmul %693, %692, %cst_483 {dimension_numbers = #tpu.dot_dimension_numbers<[1], [0], [0], [1], [0, 0, 1, 1], [], []>} : vector<8x32xbf16>, vector<32x8xbf16>, vector<8x8xf32> -> vector<8x8xf32>
    %c0_484 = arith.constant 0 : index
    %c2_485 = arith.constant 2 : index
    %c0_486 = arith.constant 0 : index
    %c0_487 = arith.constant 0 : index
    %695 = vector.load %arg44[%c0_484, %c2_485, %c0_486, %c0_487] : memref<1x4x1x8xf32, #tpu.memory_space<vmem>>, vector<1x1x1x8xf32>
    %696 = vector.shape_cast %695 : vector<1x1x1x8xf32> to vector<1x8xf32>
    %697 = vector.broadcast %696 : vector<1x8xf32> to vector<8x8xf32>
    %698 = arith.addf %694, %697 : vector<8x8xf32>
    %c0_488 = arith.constant 0 : index
    %c2_489 = arith.constant 2 : index
    %c0_490 = arith.constant 0 : index
    %c0_491 = arith.constant 0 : index
    %699 = vector.load %arg45[%c0_488, %c2_489, %c0_490, %c0_491] : memref<1x4x32x8xbf16, #tpu.memory_space<vmem>>, vector<1x1x32x8xbf16>
    %700 = vector.shape_cast %699 : vector<1x1x32x8xbf16> to vector<32x8xbf16>
    %701 = arith.truncf %601 : vector<9x32xf32> to vector<9x32xbf16>
    %cst_492 = arith.constant dense<0.000000e+00> : vector<9x8xf32>
    %702 = tpu.matmul %701, %700, %cst_492 {dimension_numbers = #tpu.dot_dimension_numbers<[1], [0], [0], [1], [0, 0, 1, 1], [], []>} : vector<9x32xbf16>, vector<32x8xbf16>, vector<9x8xf32> -> vector<9x8xf32>
    %c0_493 = arith.constant 0 : index
    %c2_494 = arith.constant 2 : index
    %c0_495 = arith.constant 0 : index
    %c0_496 = arith.constant 0 : index
    %703 = vector.load %arg46[%c0_493, %c2_494, %c0_495, %c0_496] : memref<1x4x1x8xf32, #tpu.memory_space<vmem>>, vector<1x1x1x8xf32>
    %704 = vector.shape_cast %703 : vector<1x1x1x8xf32> to vector<1x8xf32>
    %705 = vector.broadcast %704 : vector<1x8xf32> to vector<9x8xf32>
    %706 = arith.addf %702, %705 : vector<9x8xf32>
    %c0_497 = arith.constant 0 : index
    %c2_498 = arith.constant 2 : index
    %c0_499 = arith.constant 0 : index
    %c0_500 = arith.constant 0 : index
    %707 = vector.load %arg47[%c0_497, %c2_498, %c0_499, %c0_500] : memref<1x4x32x8xbf16, #tpu.memory_space<vmem>>, vector<1x1x32x8xbf16>
    %708 = vector.shape_cast %707 : vector<1x1x32x8xbf16> to vector<32x8xbf16>
    %709 = arith.truncf %601 : vector<9x32xf32> to vector<9x32xbf16>
    %cst_501 = arith.constant dense<0.000000e+00> : vector<9x8xf32>
    %710 = tpu.matmul %709, %708, %cst_501 {dimension_numbers = #tpu.dot_dimension_numbers<[1], [0], [0], [1], [0, 0, 1, 1], [], []>} : vector<9x32xbf16>, vector<32x8xbf16>, vector<9x8xf32> -> vector<9x8xf32>
    %c0_502 = arith.constant 0 : index
    %c2_503 = arith.constant 2 : index
    %c0_504 = arith.constant 0 : index
    %c0_505 = arith.constant 0 : index
    %711 = vector.load %arg48[%c0_502, %c2_503, %c0_504, %c0_505] : memref<1x4x1x8xf32, #tpu.memory_space<vmem>>, vector<1x1x1x8xf32>
    %712 = vector.shape_cast %711 : vector<1x1x1x8xf32> to vector<1x8xf32>
    %713 = vector.broadcast %712 : vector<1x8xf32> to vector<9x8xf32>
    %714 = arith.addf %710, %713 : vector<9x8xf32>
    %c0_506 = arith.constant 0 : index
    %c2_507 = arith.constant 2 : index
    %c0_508 = arith.constant 0 : index
    %c0_509 = arith.constant 0 : index
    %715 = vector.load %arg49[%c0_506, %c2_507, %c0_508, %c0_509] : memref<1x4x8x32xbf16, #tpu.memory_space<vmem>>, vector<1x1x8x32xbf16>
    %716 = vector.shape_cast %715 : vector<1x1x8x32xbf16> to vector<8x32xbf16>
    %717 = arith.truncf %698 : vector<8x8xf32> to vector<8x8xbf16>
    %718 = arith.truncf %706 : vector<9x8xf32> to vector<9x8xbf16>
    %cst_510 = arith.constant dense<0.000000e+00> : vector<8x9xf32>
    %719 = tpu.matmul %717, %718, %cst_510 {dimension_numbers = #tpu.dot_dimension_numbers<[1], [1], [0], [0], [0, 0, 1, 0], [], []>} : vector<8x8xbf16>, vector<9x8xbf16>, vector<8x9xf32> -> vector<8x9xf32>
    %cst_511 = arith.constant dense<0xFF800000> : vector<8xf32>
    %720 = vector.multi_reduction <maximumf>, %719, %cst_511 [1] : vector<8x9xf32> to vector<8xf32>
    %721 = vector.shape_cast %720 : vector<8xf32> to vector<8x1xf32>
    %722 = vector.broadcast %721 : vector<8x1xf32> to vector<8x9xf32>
    %723 = arith.subf %719, %722 : vector<8x9xf32>
    %724 = math.exp %723 : vector<8x9xf32>
    %cst_512 = arith.constant dense<0.000000e+00> : vector<8xf32>
    %725 = vector.multi_reduction <add>, %724, %cst_512 [1] : vector<8x9xf32> to vector<8xf32>
    %726 = vector.shape_cast %725 : vector<8xf32> to vector<8x1xf32>
    %727 = tpu.reciprocal %726 {approx = true} : vector<8x1xf32> -> vector<8x1xf32>
    %728 = vector.broadcast %727 : vector<8x1xf32> to vector<8x9xf32>
    %729 = arith.mulf %724, %728 : vector<8x9xf32>
    %730 = arith.truncf %729 : vector<8x9xf32> to vector<8x9xbf16>
    %731 = arith.truncf %714 : vector<9x8xf32> to vector<9x8xbf16>
    %cst_513 = arith.constant dense<0.000000e+00> : vector<8x8xf32>
    %732 = tpu.matmul %730, %731, %cst_513 {dimension_numbers = #tpu.dot_dimension_numbers<[1], [0], [0], [1], [0, 0, 1, 1], [], []>} : vector<8x9xbf16>, vector<9x8xbf16>, vector<8x8xf32> -> vector<8x8xf32>
    %733 = arith.truncf %732 : vector<8x8xf32> to vector<8x8xbf16>
    %cst_514 = arith.constant dense<0.000000e+00> : vector<8x32xf32>
    %734 = tpu.matmul %733, %716, %cst_514 {dimension_numbers = #tpu.dot_dimension_numbers<[1], [0], [0], [1], [0, 0, 1, 1], [], []>} : vector<8x8xbf16>, vector<8x32xbf16>, vector<8x32xf32> -> vector<8x32xf32>
    %735 = arith.addf %690, %734 : vector<8x32xf32>
    %c0_515 = arith.constant 0 : index
    %c3_516 = arith.constant 3 : index
    %c0_517 = arith.constant 0 : index
    %c0_518 = arith.constant 0 : index
    %736 = vector.load %arg43[%c0_515, %c3_516, %c0_517, %c0_518] : memref<1x4x32x8xbf16, #tpu.memory_space<vmem>>, vector<1x1x32x8xbf16>
    %737 = vector.shape_cast %736 : vector<1x1x32x8xbf16> to vector<32x8xbf16>
    %738 = arith.truncf %328 : vector<8x32xf32> to vector<8x32xbf16>
    %cst_519 = arith.constant dense<0.000000e+00> : vector<8x8xf32>
    %739 = tpu.matmul %738, %737, %cst_519 {dimension_numbers = #tpu.dot_dimension_numbers<[1], [0], [0], [1], [0, 0, 1, 1], [], []>} : vector<8x32xbf16>, vector<32x8xbf16>, vector<8x8xf32> -> vector<8x8xf32>
    %c0_520 = arith.constant 0 : index
    %c3_521 = arith.constant 3 : index
    %c0_522 = arith.constant 0 : index
    %c0_523 = arith.constant 0 : index
    %740 = vector.load %arg44[%c0_520, %c3_521, %c0_522, %c0_523] : memref<1x4x1x8xf32, #tpu.memory_space<vmem>>, vector<1x1x1x8xf32>
    %741 = vector.shape_cast %740 : vector<1x1x1x8xf32> to vector<1x8xf32>
    %742 = vector.broadcast %741 : vector<1x8xf32> to vector<8x8xf32>
    %743 = arith.addf %739, %742 : vector<8x8xf32>
    %c0_524 = arith.constant 0 : index
    %c3_525 = arith.constant 3 : index
    %c0_526 = arith.constant 0 : index
    %c0_527 = arith.constant 0 : index
    %744 = vector.load %arg45[%c0_524, %c3_525, %c0_526, %c0_527] : memref<1x4x32x8xbf16, #tpu.memory_space<vmem>>, vector<1x1x32x8xbf16>
    %745 = vector.shape_cast %744 : vector<1x1x32x8xbf16> to vector<32x8xbf16>
    %746 = arith.truncf %601 : vector<9x32xf32> to vector<9x32xbf16>
    %cst_528 = arith.constant dense<0.000000e+00> : vector<9x8xf32>
    %747 = tpu.matmul %746, %745, %cst_528 {dimension_numbers = #tpu.dot_dimension_numbers<[1], [0], [0], [1], [0, 0, 1, 1], [], []>} : vector<9x32xbf16>, vector<32x8xbf16>, vector<9x8xf32> -> vector<9x8xf32>
    %c0_529 = arith.constant 0 : index
    %c3_530 = arith.constant 3 : index
    %c0_531 = arith.constant 0 : index
    %c0_532 = arith.constant 0 : index
    %748 = vector.load %arg46[%c0_529, %c3_530, %c0_531, %c0_532] : memref<1x4x1x8xf32, #tpu.memory_space<vmem>>, vector<1x1x1x8xf32>
    %749 = vector.shape_cast %748 : vector<1x1x1x8xf32> to vector<1x8xf32>
    %750 = vector.broadcast %749 : vector<1x8xf32> to vector<9x8xf32>
    %751 = arith.addf %747, %750 : vector<9x8xf32>
    %c0_533 = arith.constant 0 : index
    %c3_534 = arith.constant 3 : index
    %c0_535 = arith.constant 0 : index
    %c0_536 = arith.constant 0 : index
    %752 = vector.load %arg47[%c0_533, %c3_534, %c0_535, %c0_536] : memref<1x4x32x8xbf16, #tpu.memory_space<vmem>>, vector<1x1x32x8xbf16>
    %753 = vector.shape_cast %752 : vector<1x1x32x8xbf16> to vector<32x8xbf16>
    %754 = arith.truncf %601 : vector<9x32xf32> to vector<9x32xbf16>
    %cst_537 = arith.constant dense<0.000000e+00> : vector<9x8xf32>
    %755 = tpu.matmul %754, %753, %cst_537 {dimension_numbers = #tpu.dot_dimension_numbers<[1], [0], [0], [1], [0, 0, 1, 1], [], []>} : vector<9x32xbf16>, vector<32x8xbf16>, vector<9x8xf32> -> vector<9x8xf32>
    %c0_538 = arith.constant 0 : index
    %c3_539 = arith.constant 3 : index
    %c0_540 = arith.constant 0 : index
    %c0_541 = arith.constant 0 : index
    %756 = vector.load %arg48[%c0_538, %c3_539, %c0_540, %c0_541] : memref<1x4x1x8xf32, #tpu.memory_space<vmem>>, vector<1x1x1x8xf32>
    %757 = vector.shape_cast %756 : vector<1x1x1x8xf32> to vector<1x8xf32>
    %758 = vector.broadcast %757 : vector<1x8xf32> to vector<9x8xf32>
    %759 = arith.addf %755, %758 : vector<9x8xf32>
    %c0_542 = arith.constant 0 : index
    %c3_543 = arith.constant 3 : index
    %c0_544 = arith.constant 0 : index
    %c0_545 = arith.constant 0 : index
    %760 = vector.load %arg49[%c0_542, %c3_543, %c0_544, %c0_545] : memref<1x4x8x32xbf16, #tpu.memory_space<vmem>>, vector<1x1x8x32xbf16>
    %761 = vector.shape_cast %760 : vector<1x1x8x32xbf16> to vector<8x32xbf16>
    %762 = arith.truncf %743 : vector<8x8xf32> to vector<8x8xbf16>
    %763 = arith.truncf %751 : vector<9x8xf32> to vector<9x8xbf16>
    %cst_546 = arith.constant dense<0.000000e+00> : vector<8x9xf32>
    %764 = tpu.matmul %762, %763, %cst_546 {dimension_numbers = #tpu.dot_dimension_numbers<[1], [1], [0], [0], [0, 0, 1, 0], [], []>} : vector<8x8xbf16>, vector<9x8xbf16>, vector<8x9xf32> -> vector<8x9xf32>
    %cst_547 = arith.constant dense<0xFF800000> : vector<8xf32>
    %765 = vector.multi_reduction <maximumf>, %764, %cst_547 [1] : vector<8x9xf32> to vector<8xf32>
    %766 = vector.shape_cast %765 : vector<8xf32> to vector<8x1xf32>
    %767 = vector.broadcast %766 : vector<8x1xf32> to vector<8x9xf32>
    %768 = arith.subf %764, %767 : vector<8x9xf32>
    %769 = math.exp %768 : vector<8x9xf32>
    %cst_548 = arith.constant dense<0.000000e+00> : vector<8xf32>
    %770 = vector.multi_reduction <add>, %769, %cst_548 [1] : vector<8x9xf32> to vector<8xf32>
    %771 = vector.shape_cast %770 : vector<8xf32> to vector<8x1xf32>
    %772 = tpu.reciprocal %771 {approx = true} : vector<8x1xf32> -> vector<8x1xf32>
    %773 = vector.broadcast %772 : vector<8x1xf32> to vector<8x9xf32>
    %774 = arith.mulf %769, %773 : vector<8x9xf32>
    %775 = arith.truncf %774 : vector<8x9xf32> to vector<8x9xbf16>
    %776 = arith.truncf %759 : vector<9x8xf32> to vector<9x8xbf16>
    %cst_549 = arith.constant dense<0.000000e+00> : vector<8x8xf32>
    %777 = tpu.matmul %775, %776, %cst_549 {dimension_numbers = #tpu.dot_dimension_numbers<[1], [0], [0], [1], [0, 0, 1, 1], [], []>} : vector<8x9xbf16>, vector<9x8xbf16>, vector<8x8xf32> -> vector<8x8xf32>
    %778 = arith.truncf %777 : vector<8x8xf32> to vector<8x8xbf16>
    %cst_550 = arith.constant dense<0.000000e+00> : vector<8x32xf32>
    %779 = tpu.matmul %778, %761, %cst_550 {dimension_numbers = #tpu.dot_dimension_numbers<[1], [0], [0], [1], [0, 0, 1, 1], [], []>} : vector<8x8xbf16>, vector<8x32xbf16>, vector<8x32xf32> -> vector<8x32xf32>
    %780 = arith.addf %735, %779 : vector<8x32xf32>
    %c0_551 = arith.constant 0 : index
    %c0_552 = arith.constant 0 : index
    %c0_553 = arith.constant 0 : index
    %781 = vector.load %arg50[%c0_551, %c0_552, %c0_553] : memref<1x1x32xf32, #tpu.memory_space<vmem>>, vector<1x1x32xf32>
    %782 = vector.shape_cast %781 : vector<1x1x32xf32> to vector<1x32xf32>
    %783 = vector.broadcast %782 : vector<1x32xf32> to vector<8x32xf32>
    %784 = arith.addf %780, %783 : vector<8x32xf32>
    %785 = arith.addf %328, %784 : vector<8x32xf32>
    %c0_554 = arith.constant 0 : index
    %c0_555 = arith.constant 0 : index
    %786 = vector.load %arg59[%c0_554, %c0_555] : memref<1x32xf32, #tpu.memory_space<vmem>>, vector<1x32xf32>
    %c0_556 = arith.constant 0 : index
    %c0_557 = arith.constant 0 : index
    %787 = vector.load %arg60[%c0_556, %c0_557] : memref<1x32xf32, #tpu.memory_space<vmem>>, vector<1x32xf32>
    %cst_558 = arith.constant dense<0.000000e+00> : vector<8xf32>
    %788 = vector.multi_reduction <add>, %785, %cst_558 [1] : vector<8x32xf32> to vector<8xf32>
    %789 = vector.shape_cast %788 : vector<8xf32> to vector<8x1xf32>
    %cst_559 = arith.constant 3.200000e+01 : f32
    %790 = vector.broadcast %cst_559 : f32 to vector<8x1xf32>
    %791 = arith.divf %789, %790 : vector<8x1xf32>
    %792 = vector.broadcast %791 : vector<8x1xf32> to vector<8x32xf32>
    %793 = arith.subf %785, %792 : vector<8x32xf32>
    %794 = arith.mulf %793, %793 : vector<8x32xf32>
    %cst_560 = arith.constant dense<0.000000e+00> : vector<8xf32>
    %795 = vector.multi_reduction <add>, %794, %cst_560 [1] : vector<8x32xf32> to vector<8xf32>
    %796 = vector.shape_cast %795 : vector<8xf32> to vector<8x1xf32>
    %cst_561 = arith.constant 3.200000e+01 : f32
    %797 = vector.broadcast %cst_561 : f32 to vector<8x1xf32>
    %798 = arith.divf %796, %797 : vector<8x1xf32>
    %cst_562 = arith.constant 9.99999974E-6 : f32
    %799 = vector.broadcast %cst_562 : f32 to vector<8x1xf32>
    %800 = arith.addf %798, %799 : vector<8x1xf32>
    %801 = math.rsqrt %800 : vector<8x1xf32>
    %802 = vector.broadcast %801 : vector<8x1xf32> to vector<8x32xf32>
    %803 = arith.mulf %793, %802 : vector<8x32xf32>
    %804 = vector.broadcast %786 : vector<1x32xf32> to vector<8x32xf32>
    %805 = arith.mulf %803, %804 : vector<8x32xf32>
    %806 = vector.broadcast %787 : vector<1x32xf32> to vector<8x32xf32>
    %807 = arith.addf %805, %806 : vector<8x32xf32>
    %c0_563 = arith.constant 0 : index
    %c0_564 = arith.constant 0 : index
    %c0_565 = arith.constant 0 : index
    %c0_566 = arith.constant 0 : index
    %808 = vector.load %arg51[%c0_563, %c0_564, %c0_565, %c0_566] : memref<1x4x32x8xbf16, #tpu.memory_space<vmem>>, vector<1x1x32x8xbf16>
    %809 = vector.shape_cast %808 : vector<1x1x32x8xbf16> to vector<32x8xbf16>
    %810 = arith.truncf %807 : vector<8x32xf32> to vector<8x32xbf16>
    %cst_567 = arith.constant dense<0.000000e+00> : vector<8x8xf32>
    %811 = tpu.matmul %810, %809, %cst_567 {dimension_numbers = #tpu.dot_dimension_numbers<[1], [0], [0], [1], [0, 0, 1, 1], [], []>} : vector<8x32xbf16>, vector<32x8xbf16>, vector<8x8xf32> -> vector<8x8xf32>
    %c0_568 = arith.constant 0 : index
    %c0_569 = arith.constant 0 : index
    %c0_570 = arith.constant 0 : index
    %c0_571 = arith.constant 0 : index
    %812 = vector.load %arg52[%c0_568, %c0_569, %c0_570, %c0_571] : memref<1x4x1x8xf32, #tpu.memory_space<vmem>>, vector<1x1x1x8xf32>
    %813 = vector.shape_cast %812 : vector<1x1x1x8xf32> to vector<1x8xf32>
    %814 = vector.broadcast %813 : vector<1x8xf32> to vector<8x8xf32>
    %815 = arith.addf %811, %814 : vector<8x8xf32>
    %c0_572 = arith.constant 0 : index
    %c0_573 = arith.constant 0 : index
    %c0_574 = arith.constant 0 : index
    %c0_575 = arith.constant 0 : index
    %816 = vector.load %arg53[%c0_572, %c0_573, %c0_574, %c0_575] : memref<1x4x32x8xbf16, #tpu.memory_space<vmem>>, vector<1x1x32x8xbf16>
    %817 = vector.shape_cast %816 : vector<1x1x32x8xbf16> to vector<32x8xbf16>
    %818 = arith.truncf %807 : vector<8x32xf32> to vector<8x32xbf16>
    %cst_576 = arith.constant dense<0.000000e+00> : vector<8x8xf32>
    %819 = tpu.matmul %818, %817, %cst_576 {dimension_numbers = #tpu.dot_dimension_numbers<[1], [0], [0], [1], [0, 0, 1, 1], [], []>} : vector<8x32xbf16>, vector<32x8xbf16>, vector<8x8xf32> -> vector<8x8xf32>
    %c0_577 = arith.constant 0 : index
    %c0_578 = arith.constant 0 : index
    %c0_579 = arith.constant 0 : index
    %c0_580 = arith.constant 0 : index
    %820 = vector.load %arg54[%c0_577, %c0_578, %c0_579, %c0_580] : memref<1x4x1x8xf32, #tpu.memory_space<vmem>>, vector<1x1x1x8xf32>
    %821 = vector.shape_cast %820 : vector<1x1x1x8xf32> to vector<1x8xf32>
    %822 = vector.broadcast %821 : vector<1x8xf32> to vector<8x8xf32>
    %823 = arith.addf %819, %822 : vector<8x8xf32>
    %c0_581 = arith.constant 0 : index
    %c0_582 = arith.constant 0 : index
    %c0_583 = arith.constant 0 : index
    %c0_584 = arith.constant 0 : index
    %824 = vector.load %arg55[%c0_581, %c0_582, %c0_583, %c0_584] : memref<1x4x32x8xbf16, #tpu.memory_space<vmem>>, vector<1x1x32x8xbf16>
    %825 = vector.shape_cast %824 : vector<1x1x32x8xbf16> to vector<32x8xbf16>
    %826 = arith.truncf %807 : vector<8x32xf32> to vector<8x32xbf16>
    %cst_585 = arith.constant dense<0.000000e+00> : vector<8x8xf32>
    %827 = tpu.matmul %826, %825, %cst_585 {dimension_numbers = #tpu.dot_dimension_numbers<[1], [0], [0], [1], [0, 0, 1, 1], [], []>} : vector<8x32xbf16>, vector<32x8xbf16>, vector<8x8xf32> -> vector<8x8xf32>
    %c0_586 = arith.constant 0 : index
    %c0_587 = arith.constant 0 : index
    %c0_588 = arith.constant 0 : index
    %c0_589 = arith.constant 0 : index
    %828 = vector.load %arg56[%c0_586, %c0_587, %c0_588, %c0_589] : memref<1x4x1x8xf32, #tpu.memory_space<vmem>>, vector<1x1x1x8xf32>
    %829 = vector.shape_cast %828 : vector<1x1x1x8xf32> to vector<1x8xf32>
    %830 = vector.broadcast %829 : vector<1x8xf32> to vector<8x8xf32>
    %831 = arith.addf %827, %830 : vector<8x8xf32>
    %c0_590 = arith.constant 0 : index
    %c0_591 = arith.constant 0 : index
    %c0_592 = arith.constant 0 : index
    %c0_593 = arith.constant 0 : index
    %832 = vector.load %arg57[%c0_590, %c0_591, %c0_592, %c0_593] : memref<1x4x8x32xbf16, #tpu.memory_space<vmem>>, vector<1x1x8x32xbf16>
    %833 = vector.shape_cast %832 : vector<1x1x8x32xbf16> to vector<8x32xbf16>
    %834 = arith.truncf %815 : vector<8x8xf32> to vector<8x8xbf16>
    %835 = arith.truncf %823 : vector<8x8xf32> to vector<8x8xbf16>
    %cst_594 = arith.constant dense<0.000000e+00> : vector<8x8xf32>
    %836 = tpu.matmul %834, %835, %cst_594 {dimension_numbers = #tpu.dot_dimension_numbers<[1], [1], [0], [0], [0, 0, 1, 0], [], []>} : vector<8x8xbf16>, vector<8x8xbf16>, vector<8x8xf32> -> vector<8x8xf32>
    %cst_595 = arith.constant dense<0xFF800000> : vector<8xf32>
    %837 = vector.multi_reduction <maximumf>, %836, %cst_595 [1] : vector<8x8xf32> to vector<8xf32>
    %838 = vector.shape_cast %837 : vector<8xf32> to vector<8x1xf32>
    %839 = vector.broadcast %838 : vector<8x1xf32> to vector<8x8xf32>
    %840 = arith.subf %836, %839 : vector<8x8xf32>
    %841 = math.exp %840 : vector<8x8xf32>
    %cst_596 = arith.constant dense<0.000000e+00> : vector<8xf32>
    %842 = vector.multi_reduction <add>, %841, %cst_596 [1] : vector<8x8xf32> to vector<8xf32>
    %843 = vector.shape_cast %842 : vector<8xf32> to vector<8x1xf32>
    %844 = tpu.reciprocal %843 {approx = true} : vector<8x1xf32> -> vector<8x1xf32>
    %845 = vector.broadcast %844 : vector<8x1xf32> to vector<8x8xf32>
    %846 = arith.mulf %841, %845 : vector<8x8xf32>
    %847 = arith.truncf %846 : vector<8x8xf32> to vector<8x8xbf16>
    %848 = arith.truncf %831 : vector<8x8xf32> to vector<8x8xbf16>
    %cst_597 = arith.constant dense<0.000000e+00> : vector<8x8xf32>
    %849 = tpu.matmul %847, %848, %cst_597 {dimension_numbers = #tpu.dot_dimension_numbers<[1], [0], [0], [1], [0, 0, 1, 1], [], []>} : vector<8x8xbf16>, vector<8x8xbf16>, vector<8x8xf32> -> vector<8x8xf32>
    %850 = arith.truncf %849 : vector<8x8xf32> to vector<8x8xbf16>
    %cst_598 = arith.constant dense<0.000000e+00> : vector<8x32xf32>
    %851 = tpu.matmul %850, %833, %cst_598 {dimension_numbers = #tpu.dot_dimension_numbers<[1], [0], [0], [1], [0, 0, 1, 1], [], []>} : vector<8x8xbf16>, vector<8x32xbf16>, vector<8x32xf32> -> vector<8x32xf32>
    %c0_599 = arith.constant 0 : index
    %c1_600 = arith.constant 1 : index
    %c0_601 = arith.constant 0 : index
    %c0_602 = arith.constant 0 : index
    %852 = vector.load %arg51[%c0_599, %c1_600, %c0_601, %c0_602] : memref<1x4x32x8xbf16, #tpu.memory_space<vmem>>, vector<1x1x32x8xbf16>
    %853 = vector.shape_cast %852 : vector<1x1x32x8xbf16> to vector<32x8xbf16>
    %854 = arith.truncf %807 : vector<8x32xf32> to vector<8x32xbf16>
    %cst_603 = arith.constant dense<0.000000e+00> : vector<8x8xf32>
    %855 = tpu.matmul %854, %853, %cst_603 {dimension_numbers = #tpu.dot_dimension_numbers<[1], [0], [0], [1], [0, 0, 1, 1], [], []>} : vector<8x32xbf16>, vector<32x8xbf16>, vector<8x8xf32> -> vector<8x8xf32>
    %c0_604 = arith.constant 0 : index
    %c1_605 = arith.constant 1 : index
    %c0_606 = arith.constant 0 : index
    %c0_607 = arith.constant 0 : index
    %856 = vector.load %arg52[%c0_604, %c1_605, %c0_606, %c0_607] : memref<1x4x1x8xf32, #tpu.memory_space<vmem>>, vector<1x1x1x8xf32>
    %857 = vector.shape_cast %856 : vector<1x1x1x8xf32> to vector<1x8xf32>
    %858 = vector.broadcast %857 : vector<1x8xf32> to vector<8x8xf32>
    %859 = arith.addf %855, %858 : vector<8x8xf32>
    %c0_608 = arith.constant 0 : index
    %c1_609 = arith.constant 1 : index
    %c0_610 = arith.constant 0 : index
    %c0_611 = arith.constant 0 : index
    %860 = vector.load %arg53[%c0_608, %c1_609, %c0_610, %c0_611] : memref<1x4x32x8xbf16, #tpu.memory_space<vmem>>, vector<1x1x32x8xbf16>
    %861 = vector.shape_cast %860 : vector<1x1x32x8xbf16> to vector<32x8xbf16>
    %862 = arith.truncf %807 : vector<8x32xf32> to vector<8x32xbf16>
    %cst_612 = arith.constant dense<0.000000e+00> : vector<8x8xf32>
    %863 = tpu.matmul %862, %861, %cst_612 {dimension_numbers = #tpu.dot_dimension_numbers<[1], [0], [0], [1], [0, 0, 1, 1], [], []>} : vector<8x32xbf16>, vector<32x8xbf16>, vector<8x8xf32> -> vector<8x8xf32>
    %c0_613 = arith.constant 0 : index
    %c1_614 = arith.constant 1 : index
    %c0_615 = arith.constant 0 : index
    %c0_616 = arith.constant 0 : index
    %864 = vector.load %arg54[%c0_613, %c1_614, %c0_615, %c0_616] : memref<1x4x1x8xf32, #tpu.memory_space<vmem>>, vector<1x1x1x8xf32>
    %865 = vector.shape_cast %864 : vector<1x1x1x8xf32> to vector<1x8xf32>
    %866 = vector.broadcast %865 : vector<1x8xf32> to vector<8x8xf32>
    %867 = arith.addf %863, %866 : vector<8x8xf32>
    %c0_617 = arith.constant 0 : index
    %c1_618 = arith.constant 1 : index
    %c0_619 = arith.constant 0 : index
    %c0_620 = arith.constant 0 : index
    %868 = vector.load %arg55[%c0_617, %c1_618, %c0_619, %c0_620] : memref<1x4x32x8xbf16, #tpu.memory_space<vmem>>, vector<1x1x32x8xbf16>
    %869 = vector.shape_cast %868 : vector<1x1x32x8xbf16> to vector<32x8xbf16>
    %870 = arith.truncf %807 : vector<8x32xf32> to vector<8x32xbf16>
    %cst_621 = arith.constant dense<0.000000e+00> : vector<8x8xf32>
    %871 = tpu.matmul %870, %869, %cst_621 {dimension_numbers = #tpu.dot_dimension_numbers<[1], [0], [0], [1], [0, 0, 1, 1], [], []>} : vector<8x32xbf16>, vector<32x8xbf16>, vector<8x8xf32> -> vector<8x8xf32>
    %c0_622 = arith.constant 0 : index
    %c1_623 = arith.constant 1 : index
    %c0_624 = arith.constant 0 : index
    %c0_625 = arith.constant 0 : index
    %872 = vector.load %arg56[%c0_622, %c1_623, %c0_624, %c0_625] : memref<1x4x1x8xf32, #tpu.memory_space<vmem>>, vector<1x1x1x8xf32>
    %873 = vector.shape_cast %872 : vector<1x1x1x8xf32> to vector<1x8xf32>
    %874 = vector.broadcast %873 : vector<1x8xf32> to vector<8x8xf32>
    %875 = arith.addf %871, %874 : vector<8x8xf32>
    %c0_626 = arith.constant 0 : index
    %c1_627 = arith.constant 1 : index
    %c0_628 = arith.constant 0 : index
    %c0_629 = arith.constant 0 : index
    %876 = vector.load %arg57[%c0_626, %c1_627, %c0_628, %c0_629] : memref<1x4x8x32xbf16, #tpu.memory_space<vmem>>, vector<1x1x8x32xbf16>
    %877 = vector.shape_cast %876 : vector<1x1x8x32xbf16> to vector<8x32xbf16>
    %878 = arith.truncf %859 : vector<8x8xf32> to vector<8x8xbf16>
    %879 = arith.truncf %867 : vector<8x8xf32> to vector<8x8xbf16>
    %cst_630 = arith.constant dense<0.000000e+00> : vector<8x8xf32>
    %880 = tpu.matmul %878, %879, %cst_630 {dimension_numbers = #tpu.dot_dimension_numbers<[1], [1], [0], [0], [0, 0, 1, 0], [], []>} : vector<8x8xbf16>, vector<8x8xbf16>, vector<8x8xf32> -> vector<8x8xf32>
    %cst_631 = arith.constant dense<0xFF800000> : vector<8xf32>
    %881 = vector.multi_reduction <maximumf>, %880, %cst_631 [1] : vector<8x8xf32> to vector<8xf32>
    %882 = vector.shape_cast %881 : vector<8xf32> to vector<8x1xf32>
    %883 = vector.broadcast %882 : vector<8x1xf32> to vector<8x8xf32>
    %884 = arith.subf %880, %883 : vector<8x8xf32>
    %885 = math.exp %884 : vector<8x8xf32>
    %cst_632 = arith.constant dense<0.000000e+00> : vector<8xf32>
    %886 = vector.multi_reduction <add>, %885, %cst_632 [1] : vector<8x8xf32> to vector<8xf32>
    %887 = vector.shape_cast %886 : vector<8xf32> to vector<8x1xf32>
    %888 = tpu.reciprocal %887 {approx = true} : vector<8x1xf32> -> vector<8x1xf32>
    %889 = vector.broadcast %888 : vector<8x1xf32> to vector<8x8xf32>
    %890 = arith.mulf %885, %889 : vector<8x8xf32>
    %891 = arith.truncf %890 : vector<8x8xf32> to vector<8x8xbf16>
    %892 = arith.truncf %875 : vector<8x8xf32> to vector<8x8xbf16>
    %cst_633 = arith.constant dense<0.000000e+00> : vector<8x8xf32>
    %893 = tpu.matmul %891, %892, %cst_633 {dimension_numbers = #tpu.dot_dimension_numbers<[1], [0], [0], [1], [0, 0, 1, 1], [], []>} : vector<8x8xbf16>, vector<8x8xbf16>, vector<8x8xf32> -> vector<8x8xf32>
    %894 = arith.truncf %893 : vector<8x8xf32> to vector<8x8xbf16>
    %cst_634 = arith.constant dense<0.000000e+00> : vector<8x32xf32>
    %895 = tpu.matmul %894, %877, %cst_634 {dimension_numbers = #tpu.dot_dimension_numbers<[1], [0], [0], [1], [0, 0, 1, 1], [], []>} : vector<8x8xbf16>, vector<8x32xbf16>, vector<8x32xf32> -> vector<8x32xf32>
    %896 = arith.addf %851, %895 : vector<8x32xf32>
    %c0_635 = arith.constant 0 : index
    %c2_636 = arith.constant 2 : index
    %c0_637 = arith.constant 0 : index
    %c0_638 = arith.constant 0 : index
    %897 = vector.load %arg51[%c0_635, %c2_636, %c0_637, %c0_638] : memref<1x4x32x8xbf16, #tpu.memory_space<vmem>>, vector<1x1x32x8xbf16>
    %898 = vector.shape_cast %897 : vector<1x1x32x8xbf16> to vector<32x8xbf16>
    %899 = arith.truncf %807 : vector<8x32xf32> to vector<8x32xbf16>
    %cst_639 = arith.constant dense<0.000000e+00> : vector<8x8xf32>
    %900 = tpu.matmul %899, %898, %cst_639 {dimension_numbers = #tpu.dot_dimension_numbers<[1], [0], [0], [1], [0, 0, 1, 1], [], []>} : vector<8x32xbf16>, vector<32x8xbf16>, vector<8x8xf32> -> vector<8x8xf32>
    %c0_640 = arith.constant 0 : index
    %c2_641 = arith.constant 2 : index
    %c0_642 = arith.constant 0 : index
    %c0_643 = arith.constant 0 : index
    %901 = vector.load %arg52[%c0_640, %c2_641, %c0_642, %c0_643] : memref<1x4x1x8xf32, #tpu.memory_space<vmem>>, vector<1x1x1x8xf32>
    %902 = vector.shape_cast %901 : vector<1x1x1x8xf32> to vector<1x8xf32>
    %903 = vector.broadcast %902 : vector<1x8xf32> to vector<8x8xf32>
    %904 = arith.addf %900, %903 : vector<8x8xf32>
    %c0_644 = arith.constant 0 : index
    %c2_645 = arith.constant 2 : index
    %c0_646 = arith.constant 0 : index
    %c0_647 = arith.constant 0 : index
    %905 = vector.load %arg53[%c0_644, %c2_645, %c0_646, %c0_647] : memref<1x4x32x8xbf16, #tpu.memory_space<vmem>>, vector<1x1x32x8xbf16>
    %906 = vector.shape_cast %905 : vector<1x1x32x8xbf16> to vector<32x8xbf16>
    %907 = arith.truncf %807 : vector<8x32xf32> to vector<8x32xbf16>
    %cst_648 = arith.constant dense<0.000000e+00> : vector<8x8xf32>
    %908 = tpu.matmul %907, %906, %cst_648 {dimension_numbers = #tpu.dot_dimension_numbers<[1], [0], [0], [1], [0, 0, 1, 1], [], []>} : vector<8x32xbf16>, vector<32x8xbf16>, vector<8x8xf32> -> vector<8x8xf32>
    %c0_649 = arith.constant 0 : index
    %c2_650 = arith.constant 2 : index
    %c0_651 = arith.constant 0 : index
    %c0_652 = arith.constant 0 : index
    %909 = vector.load %arg54[%c0_649, %c2_650, %c0_651, %c0_652] : memref<1x4x1x8xf32, #tpu.memory_space<vmem>>, vector<1x1x1x8xf32>
    %910 = vector.shape_cast %909 : vector<1x1x1x8xf32> to vector<1x8xf32>
    %911 = vector.broadcast %910 : vector<1x8xf32> to vector<8x8xf32>
    %912 = arith.addf %908, %911 : vector<8x8xf32>
    %c0_653 = arith.constant 0 : index
    %c2_654 = arith.constant 2 : index
    %c0_655 = arith.constant 0 : index
    %c0_656 = arith.constant 0 : index
    %913 = vector.load %arg55[%c0_653, %c2_654, %c0_655, %c0_656] : memref<1x4x32x8xbf16, #tpu.memory_space<vmem>>, vector<1x1x32x8xbf16>
    %914 = vector.shape_cast %913 : vector<1x1x32x8xbf16> to vector<32x8xbf16>
    %915 = arith.truncf %807 : vector<8x32xf32> to vector<8x32xbf16>
    %cst_657 = arith.constant dense<0.000000e+00> : vector<8x8xf32>
    %916 = tpu.matmul %915, %914, %cst_657 {dimension_numbers = #tpu.dot_dimension_numbers<[1], [0], [0], [1], [0, 0, 1, 1], [], []>} : vector<8x32xbf16>, vector<32x8xbf16>, vector<8x8xf32> -> vector<8x8xf32>
    %c0_658 = arith.constant 0 : index
    %c2_659 = arith.constant 2 : index
    %c0_660 = arith.constant 0 : index
    %c0_661 = arith.constant 0 : index
    %917 = vector.load %arg56[%c0_658, %c2_659, %c0_660, %c0_661] : memref<1x4x1x8xf32, #tpu.memory_space<vmem>>, vector<1x1x1x8xf32>
    %918 = vector.shape_cast %917 : vector<1x1x1x8xf32> to vector<1x8xf32>
    %919 = vector.broadcast %918 : vector<1x8xf32> to vector<8x8xf32>
    %920 = arith.addf %916, %919 : vector<8x8xf32>
    %c0_662 = arith.constant 0 : index
    %c2_663 = arith.constant 2 : index
    %c0_664 = arith.constant 0 : index
    %c0_665 = arith.constant 0 : index
    %921 = vector.load %arg57[%c0_662, %c2_663, %c0_664, %c0_665] : memref<1x4x8x32xbf16, #tpu.memory_space<vmem>>, vector<1x1x8x32xbf16>
    %922 = vector.shape_cast %921 : vector<1x1x8x32xbf16> to vector<8x32xbf16>
    %923 = arith.truncf %904 : vector<8x8xf32> to vector<8x8xbf16>
    %924 = arith.truncf %912 : vector<8x8xf32> to vector<8x8xbf16>
    %cst_666 = arith.constant dense<0.000000e+00> : vector<8x8xf32>
    %925 = tpu.matmul %923, %924, %cst_666 {dimension_numbers = #tpu.dot_dimension_numbers<[1], [1], [0], [0], [0, 0, 1, 0], [], []>} : vector<8x8xbf16>, vector<8x8xbf16>, vector<8x8xf32> -> vector<8x8xf32>
    %cst_667 = arith.constant dense<0xFF800000> : vector<8xf32>
    %926 = vector.multi_reduction <maximumf>, %925, %cst_667 [1] : vector<8x8xf32> to vector<8xf32>
    %927 = vector.shape_cast %926 : vector<8xf32> to vector<8x1xf32>
    %928 = vector.broadcast %927 : vector<8x1xf32> to vector<8x8xf32>
    %929 = arith.subf %925, %928 : vector<8x8xf32>
    %930 = math.exp %929 : vector<8x8xf32>
    %cst_668 = arith.constant dense<0.000000e+00> : vector<8xf32>
    %931 = vector.multi_reduction <add>, %930, %cst_668 [1] : vector<8x8xf32> to vector<8xf32>
    %932 = vector.shape_cast %931 : vector<8xf32> to vector<8x1xf32>
    %933 = tpu.reciprocal %932 {approx = true} : vector<8x1xf32> -> vector<8x1xf32>
    %934 = vector.broadcast %933 : vector<8x1xf32> to vector<8x8xf32>
    %935 = arith.mulf %930, %934 : vector<8x8xf32>
    %936 = arith.truncf %935 : vector<8x8xf32> to vector<8x8xbf16>
    %937 = arith.truncf %920 : vector<8x8xf32> to vector<8x8xbf16>
    %cst_669 = arith.constant dense<0.000000e+00> : vector<8x8xf32>
    %938 = tpu.matmul %936, %937, %cst_669 {dimension_numbers = #tpu.dot_dimension_numbers<[1], [0], [0], [1], [0, 0, 1, 1], [], []>} : vector<8x8xbf16>, vector<8x8xbf16>, vector<8x8xf32> -> vector<8x8xf32>
    %939 = arith.truncf %938 : vector<8x8xf32> to vector<8x8xbf16>
    %cst_670 = arith.constant dense<0.000000e+00> : vector<8x32xf32>
    %940 = tpu.matmul %939, %922, %cst_670 {dimension_numbers = #tpu.dot_dimension_numbers<[1], [0], [0], [1], [0, 0, 1, 1], [], []>} : vector<8x8xbf16>, vector<8x32xbf16>, vector<8x32xf32> -> vector<8x32xf32>
    %941 = arith.addf %896, %940 : vector<8x32xf32>
    %c0_671 = arith.constant 0 : index
    %c3_672 = arith.constant 3 : index
    %c0_673 = arith.constant 0 : index
    %c0_674 = arith.constant 0 : index
    %942 = vector.load %arg51[%c0_671, %c3_672, %c0_673, %c0_674] : memref<1x4x32x8xbf16, #tpu.memory_space<vmem>>, vector<1x1x32x8xbf16>
    %943 = vector.shape_cast %942 : vector<1x1x32x8xbf16> to vector<32x8xbf16>
    %944 = arith.truncf %807 : vector<8x32xf32> to vector<8x32xbf16>
    %cst_675 = arith.constant dense<0.000000e+00> : vector<8x8xf32>
    %945 = tpu.matmul %944, %943, %cst_675 {dimension_numbers = #tpu.dot_dimension_numbers<[1], [0], [0], [1], [0, 0, 1, 1], [], []>} : vector<8x32xbf16>, vector<32x8xbf16>, vector<8x8xf32> -> vector<8x8xf32>
    %c0_676 = arith.constant 0 : index
    %c3_677 = arith.constant 3 : index
    %c0_678 = arith.constant 0 : index
    %c0_679 = arith.constant 0 : index
    %946 = vector.load %arg52[%c0_676, %c3_677, %c0_678, %c0_679] : memref<1x4x1x8xf32, #tpu.memory_space<vmem>>, vector<1x1x1x8xf32>
    %947 = vector.shape_cast %946 : vector<1x1x1x8xf32> to vector<1x8xf32>
    %948 = vector.broadcast %947 : vector<1x8xf32> to vector<8x8xf32>
    %949 = arith.addf %945, %948 : vector<8x8xf32>
    %c0_680 = arith.constant 0 : index
    %c3_681 = arith.constant 3 : index
    %c0_682 = arith.constant 0 : index
    %c0_683 = arith.constant 0 : index
    %950 = vector.load %arg53[%c0_680, %c3_681, %c0_682, %c0_683] : memref<1x4x32x8xbf16, #tpu.memory_space<vmem>>, vector<1x1x32x8xbf16>
    %951 = vector.shape_cast %950 : vector<1x1x32x8xbf16> to vector<32x8xbf16>
    %952 = arith.truncf %807 : vector<8x32xf32> to vector<8x32xbf16>
    %cst_684 = arith.constant dense<0.000000e+00> : vector<8x8xf32>
    %953 = tpu.matmul %952, %951, %cst_684 {dimension_numbers = #tpu.dot_dimension_numbers<[1], [0], [0], [1], [0, 0, 1, 1], [], []>} : vector<8x32xbf16>, vector<32x8xbf16>, vector<8x8xf32> -> vector<8x8xf32>
    %c0_685 = arith.constant 0 : index
    %c3_686 = arith.constant 3 : index
    %c0_687 = arith.constant 0 : index
    %c0_688 = arith.constant 0 : index
    %954 = vector.load %arg54[%c0_685, %c3_686, %c0_687, %c0_688] : memref<1x4x1x8xf32, #tpu.memory_space<vmem>>, vector<1x1x1x8xf32>
    %955 = vector.shape_cast %954 : vector<1x1x1x8xf32> to vector<1x8xf32>
    %956 = vector.broadcast %955 : vector<1x8xf32> to vector<8x8xf32>
    %957 = arith.addf %953, %956 : vector<8x8xf32>
    %c0_689 = arith.constant 0 : index
    %c3_690 = arith.constant 3 : index
    %c0_691 = arith.constant 0 : index
    %c0_692 = arith.constant 0 : index
    %958 = vector.load %arg55[%c0_689, %c3_690, %c0_691, %c0_692] : memref<1x4x32x8xbf16, #tpu.memory_space<vmem>>, vector<1x1x32x8xbf16>
    %959 = vector.shape_cast %958 : vector<1x1x32x8xbf16> to vector<32x8xbf16>
    %960 = arith.truncf %807 : vector<8x32xf32> to vector<8x32xbf16>
    %cst_693 = arith.constant dense<0.000000e+00> : vector<8x8xf32>
    %961 = tpu.matmul %960, %959, %cst_693 {dimension_numbers = #tpu.dot_dimension_numbers<[1], [0], [0], [1], [0, 0, 1, 1], [], []>} : vector<8x32xbf16>, vector<32x8xbf16>, vector<8x8xf32> -> vector<8x8xf32>
    %c0_694 = arith.constant 0 : index
    %c3_695 = arith.constant 3 : index
    %c0_696 = arith.constant 0 : index
    %c0_697 = arith.constant 0 : index
    %962 = vector.load %arg56[%c0_694, %c3_695, %c0_696, %c0_697] : memref<1x4x1x8xf32, #tpu.memory_space<vmem>>, vector<1x1x1x8xf32>
    %963 = vector.shape_cast %962 : vector<1x1x1x8xf32> to vector<1x8xf32>
    %964 = vector.broadcast %963 : vector<1x8xf32> to vector<8x8xf32>
    %965 = arith.addf %961, %964 : vector<8x8xf32>
    %c0_698 = arith.constant 0 : index
    %c3_699 = arith.constant 3 : index
    %c0_700 = arith.constant 0 : index
    %c0_701 = arith.constant 0 : index
    %966 = vector.load %arg57[%c0_698, %c3_699, %c0_700, %c0_701] : memref<1x4x8x32xbf16, #tpu.memory_space<vmem>>, vector<1x1x8x32xbf16>
    %967 = vector.shape_cast %966 : vector<1x1x8x32xbf16> to vector<8x32xbf16>
    %968 = arith.truncf %949 : vector<8x8xf32> to vector<8x8xbf16>
    %969 = arith.truncf %957 : vector<8x8xf32> to vector<8x8xbf16>
    %cst_702 = arith.constant dense<0.000000e+00> : vector<8x8xf32>
    %970 = tpu.matmul %968, %969, %cst_702 {dimension_numbers = #tpu.dot_dimension_numbers<[1], [1], [0], [0], [0, 0, 1, 0], [], []>} : vector<8x8xbf16>, vector<8x8xbf16>, vector<8x8xf32> -> vector<8x8xf32>
    %cst_703 = arith.constant dense<0xFF800000> : vector<8xf32>
    %971 = vector.multi_reduction <maximumf>, %970, %cst_703 [1] : vector<8x8xf32> to vector<8xf32>
    %972 = vector.shape_cast %971 : vector<8xf32> to vector<8x1xf32>
    %973 = vector.broadcast %972 : vector<8x1xf32> to vector<8x8xf32>
    %974 = arith.subf %970, %973 : vector<8x8xf32>
    %975 = math.exp %974 : vector<8x8xf32>
    %cst_704 = arith.constant dense<0.000000e+00> : vector<8xf32>
    %976 = vector.multi_reduction <add>, %975, %cst_704 [1] : vector<8x8xf32> to vector<8xf32>
    %977 = vector.shape_cast %976 : vector<8xf32> to vector<8x1xf32>
    %978 = tpu.reciprocal %977 {approx = true} : vector<8x1xf32> -> vector<8x1xf32>
    %979 = vector.broadcast %978 : vector<8x1xf32> to vector<8x8xf32>
    %980 = arith.mulf %975, %979 : vector<8x8xf32>
    %981 = arith.truncf %980 : vector<8x8xf32> to vector<8x8xbf16>
    %982 = arith.truncf %965 : vector<8x8xf32> to vector<8x8xbf16>
    %cst_705 = arith.constant dense<0.000000e+00> : vector<8x8xf32>
    %983 = tpu.matmul %981, %982, %cst_705 {dimension_numbers = #tpu.dot_dimension_numbers<[1], [0], [0], [1], [0, 0, 1, 1], [], []>} : vector<8x8xbf16>, vector<8x8xbf16>, vector<8x8xf32> -> vector<8x8xf32>
    %984 = arith.truncf %983 : vector<8x8xf32> to vector<8x8xbf16>
    %cst_706 = arith.constant dense<0.000000e+00> : vector<8x32xf32>
    %985 = tpu.matmul %984, %967, %cst_706 {dimension_numbers = #tpu.dot_dimension_numbers<[1], [0], [0], [1], [0, 0, 1, 1], [], []>} : vector<8x8xbf16>, vector<8x32xbf16>, vector<8x32xf32> -> vector<8x32xf32>
    %986 = arith.addf %941, %985 : vector<8x32xf32>
    %c0_707 = arith.constant 0 : index
    %c0_708 = arith.constant 0 : index
    %c0_709 = arith.constant 0 : index
    %987 = vector.load %arg58[%c0_707, %c0_708, %c0_709] : memref<1x1x32xf32, #tpu.memory_space<vmem>>, vector<1x1x32xf32>
    %988 = vector.shape_cast %987 : vector<1x1x32xf32> to vector<1x32xf32>
    %989 = vector.broadcast %988 : vector<1x32xf32> to vector<8x32xf32>
    %990 = arith.addf %986, %989 : vector<8x32xf32>
    %991 = arith.addf %807, %990 : vector<8x32xf32>
    %c0_710 = arith.constant 0 : index
    %c0_711 = arith.constant 0 : index
    %992 = vector.load %arg61[%c0_710, %c0_711] : memref<1x32xf32, #tpu.memory_space<vmem>>, vector<1x32xf32>
    %c0_712 = arith.constant 0 : index
    %c0_713 = arith.constant 0 : index
    %993 = vector.load %arg62[%c0_712, %c0_713] : memref<1x32xf32, #tpu.memory_space<vmem>>, vector<1x32xf32>
    %cst_714 = arith.constant dense<0.000000e+00> : vector<8xf32>
    %994 = vector.multi_reduction <add>, %991, %cst_714 [1] : vector<8x32xf32> to vector<8xf32>
    %995 = vector.shape_cast %994 : vector<8xf32> to vector<8x1xf32>
    %cst_715 = arith.constant 3.200000e+01 : f32
    %996 = vector.broadcast %cst_715 : f32 to vector<8x1xf32>
    %997 = arith.divf %995, %996 : vector<8x1xf32>
    %998 = vector.broadcast %997 : vector<8x1xf32> to vector<8x32xf32>
    %999 = arith.subf %991, %998 : vector<8x32xf32>
    %1000 = arith.mulf %999, %999 : vector<8x32xf32>
    %cst_716 = arith.constant dense<0.000000e+00> : vector<8xf32>
    %1001 = vector.multi_reduction <add>, %1000, %cst_716 [1] : vector<8x32xf32> to vector<8xf32>
    %1002 = vector.shape_cast %1001 : vector<8xf32> to vector<8x1xf32>
    %cst_717 = arith.constant 3.200000e+01 : f32
    %1003 = vector.broadcast %cst_717 : f32 to vector<8x1xf32>
    %1004 = arith.divf %1002, %1003 : vector<8x1xf32>
    %cst_718 = arith.constant 9.99999974E-6 : f32
    %1005 = vector.broadcast %cst_718 : f32 to vector<8x1xf32>
    %1006 = arith.addf %1004, %1005 : vector<8x1xf32>
    %1007 = math.rsqrt %1006 : vector<8x1xf32>
    %1008 = vector.broadcast %1007 : vector<8x1xf32> to vector<8x32xf32>
    %1009 = arith.mulf %999, %1008 : vector<8x32xf32>
    %1010 = vector.broadcast %992 : vector<1x32xf32> to vector<8x32xf32>
    %1011 = arith.mulf %1009, %1010 : vector<8x32xf32>
    %1012 = vector.broadcast %993 : vector<1x32xf32> to vector<8x32xf32>
    %1013 = arith.addf %1011, %1012 : vector<8x32xf32>
    %1014 = vector.extract_strided_slice %1013 {offsets = [0, 0], sizes = [4, 32], strides = [1, 1]} : vector<8x32xf32> to vector<4x32xf32>
    %c0_719 = arith.constant 0 : index
    %c0_720 = arith.constant 0 : index
    %1015 = vector.load %arg63[%c0_719, %c0_720] : memref<8x32xbf16, #tpu.memory_space<vmem>>, vector<8x32xbf16>
    %1016 = arith.truncf %1014 : vector<4x32xf32> to vector<4x32xbf16>
    %cst_721 = arith.constant dense<0.000000e+00> : vector<8x4xf32>
    %1017 = tpu.matmul %1015, %1016, %cst_721 {dimension_numbers = #tpu.dot_dimension_numbers<[1], [1], [0], [0], [0, 0, 1, 0], [], []>} : vector<8x32xbf16>, vector<4x32xbf16>, vector<8x4xf32> -> vector<8x4xf32>
    %c0_722 = arith.constant 0 : index
    %c0_723 = arith.constant 0 : index
    %1018 = vector.load %arg64[%c0_722, %c0_723] : memref<8x1xf32, #tpu.memory_space<vmem>>, vector<8x1xf32>
    %1019 = vector.broadcast %1018 : vector<8x1xf32> to vector<8x4xf32>
    %1020 = arith.addf %1017, %1019 : vector<8x4xf32>
    %1021 = vector.extract_strided_slice %15 {offsets = [0, 0], sizes = [1, 4], strides = [1, 1]} : vector<1x8xf32> to vector<1x4xf32>
    %1022 = vector.broadcast %1021 : vector<1x4xf32> to vector<8x4xf32>
    %1023 = arith.mulf %1020, %1022 : vector<8x4xf32>
    %1024 = vector.extract_strided_slice %5 {offsets = [0, 0], sizes = [1, 4], strides = [1, 1]} : vector<1x8xf32> to vector<1x4xf32>
    %1025 = vector.broadcast %1024 : vector<1x4xf32> to vector<8x4xf32>
    %1026 = arith.addf %1023, %1025 : vector<8x4xf32>
    %c0_724 = arith.constant 0 : index
    %c0_725 = arith.constant 0 : index
    %c0_726 = arith.constant 0 : index
    %1027 = vector.load %arg65[%c0_724, %c0_725, %c0_726] : memref<1x8x4xf32, #tpu.memory_space<vmem>>, vector<1x8x4xf32>
    %1028 = vector.shape_cast %1027 : vector<1x8x4xf32> to vector<8x4xf32>
    %1029 = vector.shape_cast %1026 : vector<8x4xf32> to vector<1x8x4xf32>
    tpu.vector_store %arg65[%c0_724, %c0_725, %c0_726], %1029 {strides = array<i32>} : memref<1x8x4xf32, #tpu.memory_space<vmem>>, vector<1x8x4xf32>,
    return
  }
  func.func @transform_0(%arg0: i32) -> (i32, i32, i32) {
    %c0_i32 = arith.constant 0 : i32
    %c0_i32_0 = arith.constant 0 : i32
    %c0_i32_1 = arith.constant 0 : i32
    return %arg0, %c0_i32, %c0_i32_0 : i32, i32, i32
  }
  func.func @transform_1(%arg0: i32) -> (i32, i32, i32) {
    %c0_i32 = arith.constant 0 : i32
    %c0_i32_0 = arith.constant 0 : i32
    %c0_i32_1 = arith.constant 0 : i32
    return %arg0, %c0_i32, %c0_i32_0 : i32, i32, i32
  }
  func.func @transform_2(%arg0: i32) -> (i32, i32) {
    %c0_i32 = arith.constant 0 : i32
    %c0_i32_0 = arith.constant 0 : i32
    %c0_i32_1 = arith.constant 0 : i32
    return %c0_i32, %c0_i32_0 : i32, i32
  }
  func.func @transform_3(%arg0: i32) -> (i32, i32) {
    %c0_i32 = arith.constant 0 : i32
    %c0_i32_0 = arith.constant 0 : i32
    %c0_i32_1 = arith.constant 0 : i32
    return %c0_i32, %c0_i32_0 : i32, i32
  }
  func.func @transform_4(%arg0: i32) -> (i32, i32) {
    %c0_i32 = arith.constant 0 : i32
    %c0_i32_0 = arith.constant 0 : i32
    %c0_i32_1 = arith.constant 0 : i32
    return %c0_i32, %c0_i32_0 : i32, i32
  }
  func.func @transform_5(%arg0: i32) -> (i32, i32) {
    %c0_i32 = arith.constant 0 : i32
    %c0_i32_0 = arith.constant 0 : i32
    %c0_i32_1 = arith.constant 0 : i32
    return %c0_i32, %c0_i32_0 : i32, i32
  }
  func.func @transform_6(%arg0: i32) -> (i32, i32, i32, i32) {
    %c0_i32 = arith.constant 0 : i32
    %c0_i32_0 = arith.constant 0 : i32
    %c0_i32_1 = arith.constant 0 : i32
    %c0_i32_2 = arith.constant 0 : i32
    %c0_i32_3 = arith.constant 0 : i32
    return %c0_i32, %c0_i32_0, %c0_i32_1, %c0_i32_2 : i32, i32, i32, i32
  }
  func.func @transform_7(%arg0: i32) -> (i32, i32, i32, i32) {
    %c0_i32 = arith.constant 0 : i32
    %c0_i32_0 = arith.constant 0 : i32
    %c0_i32_1 = arith.constant 0 : i32
    %c0_i32_2 = arith.constant 0 : i32
    %c0_i32_3 = arith.constant 0 : i32
    return %c0_i32, %c0_i32_0, %c0_i32_1, %c0_i32_2 : i32, i32, i32, i32
  }
  func.func @transform_8(%arg0: i32) -> (i32, i32, i32, i32) {
    %c0_i32 = arith.constant 0 : i32
    %c0_i32_0 = arith.constant 0 : i32
    %c0_i32_1 = arith.constant 0 : i32
    %c0_i32_2 = arith.constant 0 : i32
    %c0_i32_3 = arith.constant 0 : i32
    return %c0_i32, %c0_i32_0, %c0_i32_1, %c0_i32_2 : i32, i32, i32, i32
  }
  func.func @transform_9(%arg0: i32) -> (i32, i32, i32, i32) {
    %c0_i32 = arith.constant 0 : i32
    %c0_i32_0 = arith.constant 0 : i32
    %c0_i32_1 = arith.constant 0 : i32
    %c0_i32_2 = arith.constant 0 : i32
    %c0_i32_3 = arith.constant 0 : i32
    return %c0_i32, %c0_i32_0, %c0_i32_1, %c0_i32_2 : i32, i32, i32, i32
  }
  func.func @transform_10(%arg0: i32) -> (i32, i32, i32, i32) {
    %c0_i32 = arith.constant 0 : i32
    %c0_i32_0 = arith.constant 0 : i32
    %c0_i32_1 = arith.constant 0 : i32
    %c0_i32_2 = arith.constant 0 : i32
    %c0_i32_3 = arith.constant 0 : i32
    return %c0_i32, %c0_i32_0, %c0_i32_1, %c0_i32_2 : i32, i32, i32, i32
  }
  func.func @transform_11(%arg0: i32) -> (i32, i32, i32, i32) {
    %c0_i32 = arith.constant 0 : i32
    %c0_i32_0 = arith.constant 0 : i32
    %c0_i32_1 = arith.constant 0 : i32
    %c0_i32_2 = arith.constant 0 : i32
    %c0_i32_3 = arith.constant 0 : i32
    return %c0_i32, %c0_i32_0, %c0_i32_1, %c0_i32_2 : i32, i32, i32, i32
  }
  func.func @transform_12(%arg0: i32) -> (i32, i32, i32, i32) {
    %c0_i32 = arith.constant 0 : i32
    %c0_i32_0 = arith.constant 0 : i32
    %c0_i32_1 = arith.constant 0 : i32
    %c0_i32_2 = arith.constant 0 : i32
    %c0_i32_3 = arith.constant 0 : i32
    return %c0_i32, %c0_i32_0, %c0_i32_1, %c0_i32_2 : i32, i32, i32, i32
  }
  func.func @transform_13(%arg0: i32) -> (i32, i32, i32) {
    %c0_i32 = arith.constant 0 : i32
    %c0_i32_0 = arith.constant 0 : i32
    %c0_i32_1 = arith.constant 0 : i32
    %c0_i32_2 = arith.constant 0 : i32
    return %c0_i32, %c0_i32_0, %c0_i32_1 : i32, i32, i32
  }
  func.func @transform_14(%arg0: i32) -> (i32, i32, i32) {
    %c0_i32 = arith.constant 0 : i32
    %c0_i32_0 = arith.constant 0 : i32
    %c0_i32_1 = arith.constant 0 : i32
    %c0_i32_2 = arith.constant 0 : i32
    return %c0_i32, %c0_i32_0, %c0_i32_1 : i32, i32, i32
  }
  func.func @transform_15(%arg0: i32) -> (i32, i32, i32) {
    %c0_i32 = arith.constant 0 : i32
    %c0_i32_0 = arith.constant 0 : i32
    %c0_i32_1 = arith.constant 0 : i32
    %c0_i32_2 = arith.constant 0 : i32
    return %c0_i32, %c0_i32_0, %c0_i32_1 : i32, i32, i32
  }
  func.func @transform_16(%arg0: i32) -> (i32, i32, i32) {
    %c0_i32 = arith.constant 0 : i32
    %c0_i32_0 = arith.constant 0 : i32
    %c0_i32_1 = arith.constant 0 : i32
    %c0_i32_2 = arith.constant 0 : i32
    return %c0_i32, %c0_i32_0, %c0_i32_1 : i32, i32, i32
  }
  func.func @transform_17(%arg0: i32) -> (i32, i32, i32) {
    %c0_i32 = arith.constant 0 : i32
    %c0_i32_0 = arith.constant 0 : i32
    %c0_i32_1 = arith.constant 0 : i32
    %c0_i32_2 = arith.constant 0 : i32
    return %c0_i32, %c0_i32_0, %c0_i32_1 : i32, i32, i32
  }
  func.func @transform_18(%arg0: i32) -> (i32, i32, i32) {
    %c0_i32 = arith.constant 0 : i32
    %c0_i32_0 = arith.constant 0 : i32
    %c0_i32_1 = arith.constant 0 : i32
    %c0_i32_2 = arith.constant 0 : i32
    return %c0_i32, %c0_i32_0, %c0_i32_1 : i32, i32, i32
  }
  func.func @transform_19(%arg0: i32) -> (i32, i32, i32) {
    %c0_i32 = arith.constant 0 : i32
    %c0_i32_0 = arith.constant 0 : i32
    %c0_i32_1 = arith.constant 0 : i32
    %c0_i32_2 = arith.constant 0 : i32
    return %c0_i32, %c0_i32_0, %c0_i32_1 : i32, i32, i32
  }
  func.func @transform_20(%arg0: i32) -> (i32, i32, i32) {
    %c0_i32 = arith.constant 0 : i32
    %c0_i32_0 = arith.constant 0 : i32
    %c0_i32_1 = arith.constant 0 : i32
    %c0_i32_2 = arith.constant 0 : i32
    return %c0_i32, %c0_i32_0, %c0_i32_1 : i32, i32, i32
  }
  func.func @transform_21(%arg0: i32) -> (i32, i32, i32) {
    %c0_i32 = arith.constant 0 : i32
    %c0_i32_0 = arith.constant 0 : i32
    %c0_i32_1 = arith.constant 0 : i32
    %c0_i32_2 = arith.constant 0 : i32
    return %c0_i32, %c0_i32_0, %c0_i32_1 : i32, i32, i32
  }
  func.func @transform_22(%arg0: i32) -> (i32, i32) {
    %c0_i32 = arith.constant 0 : i32
    %c0_i32_0 = arith.constant 0 : i32
    %c0_i32_1 = arith.constant 0 : i32
    return %c0_i32, %c0_i32_0 : i32, i32
  }
  func.func @transform_23(%arg0: i32) -> (i32, i32) {
    %c0_i32 = arith.constant 0 : i32
    %c0_i32_0 = arith.constant 0 : i32
    %c0_i32_1 = arith.constant 0 : i32
    return %c0_i32, %c0_i32_0 : i32, i32
  }
  func.func @transform_24(%arg0: i32) -> (i32, i32, i32, i32) {
    %c0_i32 = arith.constant 0 : i32
    %c0_i32_0 = arith.constant 0 : i32
    %c0_i32_1 = arith.constant 0 : i32
    %c0_i32_2 = arith.constant 0 : i32
    %c0_i32_3 = arith.constant 0 : i32
    return %c0_i32, %c0_i32_0, %c0_i32_1, %c0_i32_2 : i32, i32, i32, i32
  }
  func.func @transform_25(%arg0: i32) -> (i32, i32, i32, i32) {
    %c0_i32 = arith.constant 0 : i32
    %c0_i32_0 = arith.constant 0 : i32
    %c0_i32_1 = arith.constant 0 : i32
    %c0_i32_2 = arith.constant 0 : i32
    %c0_i32_3 = arith.constant 0 : i32
    return %c0_i32, %c0_i32_0, %c0_i32_1, %c0_i32_2 : i32, i32, i32, i32
  }
  func.func @transform_26(%arg0: i32) -> (i32, i32, i32, i32) {
    %c0_i32 = arith.constant 0 : i32
    %c0_i32_0 = arith.constant 0 : i32
    %c0_i32_1 = arith.constant 0 : i32
    %c0_i32_2 = arith.constant 0 : i32
    %c0_i32_3 = arith.constant 0 : i32
    return %c0_i32, %c0_i32_0, %c0_i32_1, %c0_i32_2 : i32, i32, i32, i32
  }
  func.func @transform_27(%arg0: i32) -> (i32, i32, i32, i32) {
    %c0_i32 = arith.constant 0 : i32
    %c0_i32_0 = arith.constant 0 : i32
    %c0_i32_1 = arith.constant 0 : i32
    %c0_i32_2 = arith.constant 0 : i32
    %c0_i32_3 = arith.constant 0 : i32
    return %c0_i32, %c0_i32_0, %c0_i32_1, %c0_i32_2 : i32, i32, i32, i32
  }
  func.func @transform_28(%arg0: i32) -> (i32, i32, i32, i32) {
    %c0_i32 = arith.constant 0 : i32
    %c0_i32_0 = arith.constant 0 : i32
    %c0_i32_1 = arith.constant 0 : i32
    %c0_i32_2 = arith.constant 0 : i32
    %c0_i32_3 = arith.constant 0 : i32
    return %c0_i32, %c0_i32_0, %c0_i32_1, %c0_i32_2 : i32, i32, i32, i32
  }
  func.func @transform_29(%arg0: i32) -> (i32, i32, i32, i32) {
    %c0_i32 = arith.constant 0 : i32
    %c0_i32_0 = arith.constant 0 : i32
    %c0_i32_1 = arith.constant 0 : i32
    %c0_i32_2 = arith.constant 0 : i32
    %c0_i32_3 = arith.constant 0 : i32
    return %c0_i32, %c0_i32_0, %c0_i32_1, %c0_i32_2 : i32, i32, i32, i32
  }
  func.func @transform_30(%arg0: i32) -> (i32, i32, i32, i32) {
    %c0_i32 = arith.constant 0 : i32
    %c0_i32_0 = arith.constant 0 : i32
    %c0_i32_1 = arith.constant 0 : i32
    %c0_i32_2 = arith.constant 0 : i32
    %c0_i32_3 = arith.constant 0 : i32
    return %c0_i32, %c0_i32_0, %c0_i32_1, %c0_i32_2 : i32, i32, i32, i32
  }
  func.func @transform_31(%arg0: i32) -> (i32, i32, i32) {
    %c0_i32 = arith.constant 0 : i32
    %c0_i32_0 = arith.constant 0 : i32
    %c0_i32_1 = arith.constant 0 : i32
    %c0_i32_2 = arith.constant 0 : i32
    return %c0_i32, %c0_i32_0, %c0_i32_1 : i32, i32, i32
  }
  func.func @transform_32(%arg0: i32) -> (i32, i32, i32) {
    %c0_i32 = arith.constant 0 : i32
    %c0_i32_0 = arith.constant 0 : i32
    %c0_i32_1 = arith.constant 0 : i32
    %c0_i32_2 = arith.constant 0 : i32
    return %c0_i32, %c0_i32_0, %c0_i32_1 : i32, i32, i32
  }
  func.func @transform_33(%arg0: i32) -> (i32, i32, i32) {
    %c0_i32 = arith.constant 0 : i32
    %c0_i32_0 = arith.constant 0 : i32
    %c0_i32_1 = arith.constant 0 : i32
    %c0_i32_2 = arith.constant 0 : i32
    return %c0_i32, %c0_i32_0, %c0_i32_1 : i32, i32, i32
  }
  func.func @transform_34(%arg0: i32) -> (i32, i32, i32) {
    %c0_i32 = arith.constant 0 : i32
    %c0_i32_0 = arith.constant 0 : i32
    %c0_i32_1 = arith.constant 0 : i32
    %c0_i32_2 = arith.constant 0 : i32
    return %c0_i32, %c0_i32_0, %c0_i32_1 : i32, i32, i32
  }
  func.func @transform_35(%arg0: i32) -> (i32, i32, i32) {
    %c0_i32 = arith.constant 0 : i32
    %c0_i32_0 = arith.constant 0 : i32
    %c0_i32_1 = arith.constant 0 : i32
    %c0_i32_2 = arith.constant 0 : i32
    return %c0_i32, %c0_i32_0, %c0_i32_1 : i32, i32, i32
  }
  func.func @transform_36(%arg0: i32) -> (i32, i32, i32) {
    %c0_i32 = arith.constant 0 : i32
    %c0_i32_0 = arith.constant 0 : i32
    %c0_i32_1 = arith.constant 0 : i32
    %c0_i32_2 = arith.constant 0 : i32
    return %c0_i32, %c0_i32_0, %c0_i32_1 : i32, i32, i32
  }
  func.func @transform_37(%arg0: i32) -> (i32, i32, i32) {
    %c0_i32 = arith.constant 0 : i32
    %c0_i32_0 = arith.constant 0 : i32
    %c0_i32_1 = arith.constant 0 : i32
    %c0_i32_2 = arith.constant 0 : i32
    return %c0_i32, %c0_i32_0, %c0_i32_1 : i32, i32, i32
  }
  func.func @transform_38(%arg0: i32) -> (i32, i32, i32) {
    %c0_i32 = arith.constant 0 : i32
    %c0_i32_0 = arith.constant 0 : i32
    %c0_i32_1 = arith.constant 0 : i32
    %c0_i32_2 = arith.constant 0 : i32
    return %c0_i32, %c0_i32_0, %c0_i32_1 : i32, i32, i32
  }
  func.func @transform_39(%arg0: i32) -> (i32, i32, i32) {
    %c0_i32 = arith.constant 0 : i32
    %c0_i32_0 = arith.constant 0 : i32
    %c0_i32_1 = arith.constant 0 : i32
    %c0_i32_2 = arith.constant 0 : i32
    return %c0_i32, %c0_i32_0, %c0_i32_1 : i32, i32, i32
  }
  func.func @transform_40(%arg0: i32) -> (i32, i32) {
    %c0_i32 = arith.constant 0 : i32
    %c0_i32_0 = arith.constant 0 : i32
    %c0_i32_1 = arith.constant 0 : i32
    return %c0_i32, %c0_i32_0 : i32, i32
  }
  func.func @transform_41(%arg0: i32) -> (i32, i32) {
    %c0_i32 = arith.constant 0 : i32
    %c0_i32_0 = arith.constant 0 : i32
    %c0_i32_1 = arith.constant 0 : i32
    return %c0_i32, %c0_i32_0 : i32, i32
  }
  func.func @transform_42(%arg0: i32) -> (i32, i32, i32, i32) {
    %c0_i32 = arith.constant 0 : i32
    %c0_i32_0 = arith.constant 0 : i32
    %c0_i32_1 = arith.constant 0 : i32
    %c0_i32_2 = arith.constant 0 : i32
    %c0_i32_3 = arith.constant 0 : i32
    return %c0_i32, %c0_i32_0, %c0_i32_1, %c0_i32_2 : i32, i32, i32, i32
  }
  func.func @transform_43(%arg0: i32) -> (i32, i32, i32, i32) {
    %c0_i32 = arith.constant 0 : i32
    %c0_i32_0 = arith.constant 0 : i32
    %c0_i32_1 = arith.constant 0 : i32
    %c0_i32_2 = arith.constant 0 : i32
    %c0_i32_3 = arith.constant 0 : i32
    return %c0_i32, %c0_i32_0, %c0_i32_1, %c0_i32_2 : i32, i32, i32, i32
  }
  func.func @transform_44(%arg0: i32) -> (i32, i32, i32, i32) {
    %c0_i32 = arith.constant 0 : i32
    %c0_i32_0 = arith.constant 0 : i32
    %c0_i32_1 = arith.constant 0 : i32
    %c0_i32_2 = arith.constant 0 : i32
    %c0_i32_3 = arith.constant 0 : i32
    return %c0_i32, %c0_i32_0, %c0_i32_1, %c0_i32_2 : i32, i32, i32, i32
  }
  func.func @transform_45(%arg0: i32) -> (i32, i32, i32, i32) {
    %c0_i32 = arith.constant 0 : i32
    %c0_i32_0 = arith.constant 0 : i32
    %c0_i32_1 = arith.constant 0 : i32
    %c0_i32_2 = arith.constant 0 : i32
    %c0_i32_3 = arith.constant 0 : i32
    return %c0_i32, %c0_i32_0, %c0_i32_1, %c0_i32_2 : i32, i32, i32, i32
  }
  func.func @transform_46(%arg0: i32) -> (i32, i32, i32, i32) {
    %c0_i32 = arith.constant 0 : i32
    %c0_i32_0 = arith.constant 0 : i32
    %c0_i32_1 = arith.constant 0 : i32
    %c0_i32_2 = arith.constant 0 : i32
    %c0_i32_3 = arith.constant 0 : i32
    return %c0_i32, %c0_i32_0, %c0_i32_1, %c0_i32_2 : i32, i32, i32, i32
  }
  func.func @transform_47(%arg0: i32) -> (i32, i32, i32, i32) {
    %c0_i32 = arith.constant 0 : i32
    %c0_i32_0 = arith.constant 0 : i32
    %c0_i32_1 = arith.constant 0 : i32
    %c0_i32_2 = arith.constant 0 : i32
    %c0_i32_3 = arith.constant 0 : i32
    return %c0_i32, %c0_i32_0, %c0_i32_1, %c0_i32_2 : i32, i32, i32, i32
  }
  func.func @transform_48(%arg0: i32) -> (i32, i32, i32, i32) {
    %c0_i32 = arith.constant 0 : i32
    %c0_i32_0 = arith.constant 0 : i32
    %c0_i32_1 = arith.constant 0 : i32
    %c0_i32_2 = arith.constant 0 : i32
    %c0_i32_3 = arith.constant 0 : i32
    return %c0_i32, %c0_i32_0, %c0_i32_1, %c0_i32_2 : i32, i32, i32, i32
  }
  func.func @transform_49(%arg0: i32) -> (i32, i32, i32) {
    %c0_i32 = arith.constant 0 : i32
    %c0_i32_0 = arith.constant 0 : i32
    %c0_i32_1 = arith.constant 0 : i32
    %c0_i32_2 = arith.constant 0 : i32
    return %c0_i32, %c0_i32_0, %c0_i32_1 : i32, i32, i32
  }
  func.func @transform_50(%arg0: i32) -> (i32, i32, i32, i32) {
    %c0_i32 = arith.constant 0 : i32
    %c0_i32_0 = arith.constant 0 : i32
    %c0_i32_1 = arith.constant 0 : i32
    %c0_i32_2 = arith.constant 0 : i32
    %c0_i32_3 = arith.constant 0 : i32
    return %c0_i32, %c0_i32_0, %c0_i32_1, %c0_i32_2 : i32, i32, i32, i32
  }
  func.func @transform_51(%arg0: i32) -> (i32, i32, i32, i32) {
    %c0_i32 = arith.constant 0 : i32
    %c0_i32_0 = arith.constant 0 : i32
    %c0_i32_1 = arith.constant 0 : i32
    %c0_i32_2 = arith.constant 0 : i32
    %c0_i32_3 = arith.constant 0 : i32
    return %c0_i32, %c0_i32_0, %c0_i32_1, %c0_i32_2 : i32, i32, i32, i32
  }
  func.func @transform_52(%arg0: i32) -> (i32, i32, i32, i32) {
    %c0_i32 = arith.constant 0 : i32
    %c0_i32_0 = arith.constant 0 : i32
    %c0_i32_1 = arith.constant 0 : i32
    %c0_i32_2 = arith.constant 0 : i32
    %c0_i32_3 = arith.constant 0 : i32
    return %c0_i32, %c0_i32_0, %c0_i32_1, %c0_i32_2 : i32, i32, i32, i32
  }
  func.func @transform_53(%arg0: i32) -> (i32, i32, i32, i32) {
    %c0_i32 = arith.constant 0 : i32
    %c0_i32_0 = arith.constant 0 : i32
    %c0_i32_1 = arith.constant 0 : i32
    %c0_i32_2 = arith.constant 0 : i32
    %c0_i32_3 = arith.constant 0 : i32
    return %c0_i32, %c0_i32_0, %c0_i32_1, %c0_i32_2 : i32, i32, i32, i32
  }
  func.func @transform_54(%arg0: i32) -> (i32, i32, i32, i32) {
    %c0_i32 = arith.constant 0 : i32
    %c0_i32_0 = arith.constant 0 : i32
    %c0_i32_1 = arith.constant 0 : i32
    %c0_i32_2 = arith.constant 0 : i32
    %c0_i32_3 = arith.constant 0 : i32
    return %c0_i32, %c0_i32_0, %c0_i32_1, %c0_i32_2 : i32, i32, i32, i32
  }
  func.func @transform_55(%arg0: i32) -> (i32, i32, i32, i32) {
    %c0_i32 = arith.constant 0 : i32
    %c0_i32_0 = arith.constant 0 : i32
    %c0_i32_1 = arith.constant 0 : i32
    %c0_i32_2 = arith.constant 0 : i32
    %c0_i32_3 = arith.constant 0 : i32
    return %c0_i32, %c0_i32_0, %c0_i32_1, %c0_i32_2 : i32, i32, i32, i32
  }
  func.func @transform_56(%arg0: i32) -> (i32, i32, i32, i32) {
    %c0_i32 = arith.constant 0 : i32
    %c0_i32_0 = arith.constant 0 : i32
    %c0_i32_1 = arith.constant 0 : i32
    %c0_i32_2 = arith.constant 0 : i32
    %c0_i32_3 = arith.constant 0 : i32
    return %c0_i32, %c0_i32_0, %c0_i32_1, %c0_i32_2 : i32, i32, i32, i32
  }
  func.func @transform_57(%arg0: i32) -> (i32, i32, i32) {
    %c0_i32 = arith.constant 0 : i32
    %c0_i32_0 = arith.constant 0 : i32
    %c0_i32_1 = arith.constant 0 : i32
    %c0_i32_2 = arith.constant 0 : i32
    return %c0_i32, %c0_i32_0, %c0_i32_1 : i32, i32, i32
  }
  func.func @transform_58(%arg0: i32) -> (i32, i32) {
    %c0_i32 = arith.constant 0 : i32
    %c0_i32_0 = arith.constant 0 : i32
    %c0_i32_1 = arith.constant 0 : i32
    return %c0_i32, %c0_i32_0 : i32, i32
  }
  func.func @transform_59(%arg0: i32) -> (i32, i32) {
    %c0_i32 = arith.constant 0 : i32
    %c0_i32_0 = arith.constant 0 : i32
    %c0_i32_1 = arith.constant 0 : i32
    return %c0_i32, %c0_i32_0 : i32, i32
  }
  func.func @transform_60(%arg0: i32) -> (i32, i32) {
    %c0_i32 = arith.constant 0 : i32
    %c0_i32_0 = arith.constant 0 : i32
    %c0_i32_1 = arith.constant 0 : i32
    return %c0_i32, %c0_i32_0 : i32, i32
  }
  func.func @transform_61(%arg0: i32) -> (i32, i32) {
    %c0_i32 = arith.constant 0 : i32
    %c0_i32_0 = arith.constant 0 : i32
    %c0_i32_1 = arith.constant 0 : i32
    return %c0_i32, %c0_i32_0 : i32, i32
  }
  func.func @transform_62(%arg0: i32) -> (i32, i32) {
    %c0_i32 = arith.constant 0 : i32
    %c0_i32_0 = arith.constant 0 : i32
    %c0_i32_1 = arith.constant 0 : i32
    return %c0_i32, %c0_i32_0 : i32, i32
  }
  func.func @transform_63(%arg0: i32) -> (i32, i32) {
    %c0_i32 = arith.constant 0 : i32
    %c0_i32_0 = arith.constant 0 : i32
    %c0_i32_1 = arith.constant 0 : i32
    return %c0_i32, %c0_i32_0 : i32, i32
  }
  func.func @transform_64(%arg0: i32) -> (i32, i32, i32) {
    %c0_i32 = arith.constant 0 : i32
    %c0_i32_0 = arith.constant 0 : i32
    %c0_i32_1 = arith.constant 0 : i32
    return %arg0, %c0_i32, %c0_i32_0 : i32, i32, i32
  }
}

</mosaic_0001>

<bundles_post_ra>
// kernel: immtst_forward.1
= control target key start
LH: loop header
LB: loop body
LE: loop exit
PB: predicated region body
PF: predicated region fallthrough
CT: control target
= control target key end

     0   :  { %s10443_s6 = smov 1   ;;  %s10444_s10 = smov 2   ;;  %s11794_s0 = inlined_call_operand.smem [shape: u32[65], index: -1, kind: input, shape index: {}] }
   0x1   :  { %s10519_s5 = sld [smem:[%s11794_s0]]   ;;  %s10445_s14 = smov 3  }
   0x2   :  { %s10524_s9 = sld [smem:[%s11794_s0 + %s10443_s6]]   ;;  %s10446_s18 = smov 4  }
   0x3   :  { %s10529_s13 = sld [smem:[%s11794_s0 + %s10444_s10]]   ;;  %s10447_s22 = smov 5  }
   0x4   :  { %s10534_s17 = sld [smem:[%s11794_s0 + %s10445_s14]]   ;;  %s10448_s26 = smov 6  }
   0x5   :  { %s10539_s21 = sld [smem:[%s11794_s0 + %s10446_s18]]   ;;  %s10449_s30 = smov 7  }
   0x6   :  { %s10544_s25 = sld [smem:[%s11794_s0 + %s10447_s22]]   ;;  %s10450_s4 = smov 8  }
   0x7   :  { %11832 = sst [smem:[#allocation2_spill]] %s10519_s5  ;;  %s10451_s10 = smov 9  }
   0x8   :  { %s10549_s29 = sld [smem:[%s11794_s0 + %s10448_s26]]   ;;  %s10452_s15 = smov 10  }
   0x9   :  { %s10554_s3 = sld [smem:[%s11794_s0 + %s10449_s30]]   ;;  %s10453_s20 = smov 11  }
   0xa   :  { %s10559_s8 = sld [smem:[%s11794_s0 + %s10450_s4]]   ;;  %s10454_s26 = smov 12  }
   0xb   :  { %s10564_s14 = sld [smem:[%s11794_s0 + %s10451_s10]]   ;;  %s10455_s1 = smov 13  }
   0xc   :  { %11833 = sst [smem:[#allocation3_spill]] %s10544_s25  ;;  %s10456_s7 = smov 14  }
   0xd   :  { %s10569_s19 = sld [smem:[%s11794_s0 + %s10452_s15]]   ;;  %s10457_s15 = smov 15  }
   0xe   :  { %s10574_s24 = sld [smem:[%s11794_s0 + %s10453_s20]]   ;;  %s10458_s22 = smov 16  }
   0xf   :  { %11834 = sst [smem:[#allocation4_spill]] %s10554_s3  ;;  %s10459_s28 = smov 17  }
  0x10   :  { %11835 = sst [smem:[#allocation5_spill]] %s10559_s8 }
  0x11   :  { %s10579_s30 = sld [smem:[%s11794_s0 + %s10454_s26]]  }
  0x12   :  { %s10584_s6 = sld [smem:[%s11794_s0 + %s10455_s1]]  }
  0x13   :  { %s10589_s12 = sld [smem:[%s11794_s0 + %s10456_s7]]   ;;  %s10460_s7 = smov 18  }
  0x14   :  { %s10594_s20 = sld [smem:[%s11794_s0 + %s10457_s15]]   ;;  %s10461_s15 = smov 19  }
  0x15   :  { %s10599_s27 = sld [smem:[%s11794_s0 + %s10458_s22]]   ;;  %s10462_s22 = smov 20  }
  0x16   :  { %s10604_s4 = sld [smem:[%s11794_s0 + %s10459_s28]]   ;;  %s10463_s28 = smov 21  }
  0x17   :  { %s10609_s25 = sld [smem:[%s11794_s0 + %s10460_s7]]   ;;  %s10464_s7 = smov 22  }
  0x18   :  { %11836 = sst [smem:[#allocation6_spill]] %s10584_s6 }
  0x1a   :  { %11837 = sst [smem:[#allocation7_spill]] %s10594_s20 }
  0x1b   :  { %11838 = sst [smem:[#allocation8_spill]] %s10599_s27 }
  0x1c   :  { %11839 = sst [smem:[#allocation9_spill]] %s10604_s4 }
  0x1d   :  { %11840 = sst [smem:[#allocation10_spill]] %s10609_s25 }
  0x1e   :  { %s10614_s20 = sld [smem:[%s11794_s0 + %s10461_s15]]   ;;  %s10465_s15 = smov 23  }
  0x1f   :  { %s10619_s27 = sld [smem:[%s11794_s0 + %s10462_s22]]   ;;  %s10466_s22 = smov 24  }
  0x20   :  { %s10624_s4 = sld [smem:[%s11794_s0 + %s10463_s28]]   ;;  %s10467_s28 = smov 25  }
  0x21   :  { %s10629_s25 = sld [smem:[%s11794_s0 + %s10464_s7]]   ;;  %s10468_s7 = smov 26  }
  0x24   :  { %11841 = sst [smem:[#allocation11_spill]] %s10614_s20 }
  0x25   :  { %11842 = sst [smem:[#allocation12_spill]] %s10619_s27 }
  0x26   :  { %11843 = sst [smem:[#allocation13_spill]] %s10624_s4 }
  0x27   :  { %11844 = sst [smem:[#allocation14_spill]] %s10629_s25 }
  0x28   :  { %s10634_s20 = sld [smem:[%s11794_s0 + %s10465_s15]]   ;;  %s10469_s15 = smov 27  }
  0x29   :  { %s10639_s27 = sld [smem:[%s11794_s0 + %s10466_s22]]   ;;  %s10470_s22 = smov 28  }
  0x2a   :  { %s10644_s4 = sld [smem:[%s11794_s0 + %s10467_s28]]   ;;  %s10471_s28 = smov 29  }
  0x2b   :  { %s10649_s25 = sld [smem:[%s11794_s0 + %s10468_s7]]   ;;  %s10472_s7 = smov 30  }
  0x2e   :  { %11845 = sst [smem:[#allocation15_spill]] %s10634_s20 }
  0x2f   :  { %11846 = sst [smem:[#allocation16_spill]] %s10639_s27 }
  0x30   :  { %11847 = sst [smem:[#allocation17_spill]] %s10644_s4 }
  0x31   :  { %11848 = sst [smem:[#allocation18_spill]] %s10649_s25 }
  0x32   :  { %s10654_s20 = sld [smem:[%s11794_s0 + %s10469_s15]]   ;;  %s10473_s15 = smov 31  }
  0x33   :  { %s10659_s27 = sld [smem:[%s11794_s0 + %s10470_s22]]   ;;  %s10474_s22 = smov 32  }
  0x34   :  { %s10664_s4 = sld [smem:[%s11794_s0 + %s10471_s28]]   ;;  %s10475_s28 = smov 33  }
  0x35   :  { %s10669_s25 = sld [smem:[%s11794_s0 + %s10472_s7]]   ;;  %s10476_s7 = smov 34  }
  0x38   :  { %11849 = sst [smem:[#allocation19_spill]] %s10654_s20 }
  0x39   :  { %11850 = sst [smem:[#allocation20_spill]] %s10659_s27 }
  0x3a   :  { %11851 = sst [smem:[#allocation21_spill]] %s10664_s4 }
  0x3b   :  { %11852 = sst [smem:[#allocation22_spill]] %s10669_s25 }
  0x3c   :  { %s10674_s20 = sld [smem:[%s11794_s0 + %s10473_s15]]   ;;  %s10477_s15 = smov 35  }
  0x3d   :  { %s10679_s27 = sld [smem:[%s11794_s0 + %s10474_s22]]   ;;  %s10478_s22 = smov 36  }
  0x3e   :  { %s10684_s4 = sld [smem:[%s11794_s0 + %s10475_s28]]   ;;  %s10479_s28 = smov 37  }
  0x3f   :  { %s10689_s25 = sld [smem:[%s11794_s0 + %s10476_s7]]   ;;  %s10480_s7 = smov 38  }
  0x42   :  { %11853 = sst [smem:[#allocation23_spill]] %s10674_s20 }
  0x43   :  { %11854 = sst [smem:[#allocation24_spill]] %s10679_s27 }
  0x44   :  { %11855 = sst [smem:[#allocation25_spill]] %s10684_s4 }
  0x45   :  { %11856 = sst [smem:[#allocation26_spill]] %s10689_s25 }
  0x46   :  { %s10694_s20 = sld [smem:[%s11794_s0 + %s10477_s15]]   ;;  %s10481_s15 = smov 39  }
  0x47   :  { %s10699_s27 = sld [smem:[%s11794_s0 + %s10478_s22]]   ;;  %s10482_s22 = smov 40  }
  0x48   :  { %s10704_s4 = sld [smem:[%s11794_s0 + %s10479_s28]]   ;;  %s10483_s28 = smov 41  }
  0x49   :  { %s10709_s25 = sld [smem:[%s11794_s0 + %s10480_s7]]   ;;  %s10484_s7 = smov 42  }
  0x4c   :  { %11857 = sst [smem:[#allocation27_spill]] %s10694_s20 }
  0x4d   :  { %11858 = sst [smem:[#allocation28_spill]] %s10699_s27 }
  0x4e   :  { %11859 = sst [smem:[#allocation29_spill]] %s10704_s4 }
  0x4f   :  { %11860 = sst [smem:[#allocation30_spill]] %s10709_s25 }
  0x50   :  { %s10714_s20 = sld [smem:[%s11794_s0 + %s10481_s15]]   ;;  %s10485_s15 = smov 43  }
  0x51   :  { %s10719_s27 = sld [smem:[%s11794_s0 + %s10482_s22]]   ;;  %s10486_s22 = smov 44  }
  0x52   :  { %s10724_s4 = sld [smem:[%s11794_s0 + %s10483_s28]]   ;;  %s10487_s28 = smov 45  }
  0x53   :  { %s10729_s25 = sld [smem:[%s11794_s0 + %s10484_s7]]   ;;  %s10488_s7 = smov 46  }
  0x56   :  { %11861 = sst [smem:[#allocation31_spill]] %s10714_s20 }
  0x57   :  { %11862 = sst [smem:[#allocation32_spill]] %s10719_s27 }
  0x58   :  { %11863 = sst [smem:[#allocation33_spill]] %s10724_s4 }
  0x59   :  { %11864 = sst [smem:[#allocation34_spill]] %s10729_s25 }
  0x5a   :  { %s10734_s20 = sld [smem:[%s11794_s0 + %s10485_s15]]   ;;  %s10489_s15 = smov 47  }
  0x5b   :  { %s10739_s27 = sld [smem:[%s11794_s0 + %s10486_s22]]   ;;  %s10490_s22 = smov 48  }
  0x5c   :  { %s10744_s4 = sld [smem:[%s11794_s0 + %s10487_s28]]   ;;  %s10491_s28 = smov 49  }
  0x5d   :  { %s10749_s25 = sld [smem:[%s11794_s0 + %s10488_s7]]   ;;  %s10492_s7 = smov 50  }
  0x60   :  { %11865 = sst [smem:[#allocation35_spill]] %s10734_s20 }
  0x61   :  { %11866 = sst [smem:[#allocation36_spill]] %s10739_s27 }
  0x62   :  { %11867 = sst [smem:[#allocation37_spill]] %s10744_s4 }
  0x63   :  { %11868 = sst [smem:[#allocation38_spill]] %s10749_s25 }
  0x64   :  { %s10754_s20 = sld [smem:[%s11794_s0 + %s10489_s15]]   ;;  %s10493_s15 = smov 51  }
  0x65   :  { %s10759_s27 = sld [smem:[%s11794_s0 + %s10490_s22]]   ;;  %s10494_s22 = smov 52  }
  0x66   :  { %s10764_s4 = sld [smem:[%s11794_s0 + %s10491_s28]]   ;;  %s10495_s28 = smov 53  }
  0x67   :  { %s10769_s25 = sld [smem:[%s11794_s0 + %s10492_s7]]   ;;  %s10496_s7 = smov 54  }
  0x6a   :  { %11869 = sst [smem:[#allocation39_spill]] %s10754_s20 }
  0x6b   :  { %11870 = sst [smem:[#allocation40_spill]] %s10759_s27 }
  0x6c   :  { %11871 = sst [smem:[#allocation41_spill]] %s10764_s4 }
  0x6d   :  { %11872 = sst [smem:[#allocation42_spill]] %s10769_s25 }
  0x6e   :  { %s10774_s20 = sld [smem:[%s11794_s0 + %s10493_s15]]   ;;  %s10497_s15 = smov 55  }
  0x6f   :  { %s10779_s27 = sld [smem:[%s11794_s0 + %s10494_s22]]   ;;  %s10498_s22 = smov 56  }
  0x70   :  { %s10784_s4 = sld [smem:[%s11794_s0 + %s10495_s28]]   ;;  %s10499_s28 = smov 57  }
  0x71   :  { %s10789_s25 = sld [smem:[%s11794_s0 + %s10496_s7]]   ;;  %s10500_s7 = smov 58  }
  0x74   :  { %11873 = sst [smem:[#allocation43_spill]] %s10774_s20 }
  0x75   :  { %11874 = sst [smem:[#allocation44_spill]] %s10779_s27 }
  0x76   :  { %11875 = sst [smem:[#allocation45_spill]] %s10784_s4 }
  0x77   :  { %11876 = sst [smem:[#allocation46_spill]] %s10789_s25 }
  0x78   :  { %s10794_s20 = sld [smem:[%s11794_s0 + %s10497_s15]]   ;;  %s10501_s15 = smov 59  }
  0x79   :  { %s10799_s27 = sld [smem:[%s11794_s0 + %s10498_s22]]   ;;  %s10502_s22 = smov 60  }
  0x7a   :  { %s10804_s4 = sld [smem:[%s11794_s0 + %s10499_s28]]   ;;  %s10503_s28 = smov 61  }
  0x7b   :  { %s10809_s25 = sld [smem:[%s11794_s0 + %s10500_s7]]   ;;  %s10504_s7 = smov 62  }
  0x7e   :  { %11877 = sst [smem:[#allocation47_spill]] %s10794_s20 }
  0x7f   :  { %11878 = sst [smem:[#allocation48_spill]] %s10799_s27 }
  0x80   :  { %11879 = sst [smem:[#allocation49_spill]] %s10804_s4 }
  0x81   :  { %11880 = sst [smem:[#allocation50_spill]] %s10809_s25 }
  0x82   :  { %s10814_s20 = sld [smem:[%s11794_s0 + %s10501_s15]]   ;;  %s10505_s15 = smov 63  }
  0x83   :  { %s10819_s27 = sld [smem:[%s11794_s0 + %s10502_s22]]   ;;  %s10506_s22 = smov 64  }
  0x84   :  { %s10824_s4 = sld [smem:[%s11794_s0 + %s10503_s28]]   ;;  %s10841_s28 = smov 0  }
  0x85   :  { %s10829_s25 = sld [smem:[%s11794_s0 + %s10504_s7]]  }
  0x88   :  { %11881 = sst [smem:[#allocation51_spill]] %s10814_s20 }
  0x89   :  { %11882 = sst [smem:[#allocation52_spill]] %s10819_s27 }
  0x8a   :  { %s10834_s20 = sld [smem:[%s11794_s0 + %s10505_s15]]  }
  0x8b   :  { %s10839_s27 = sld [smem:[%s11794_s0 + %s10506_s22]]  }
  0x8c LB: > { %s11883_s8 = sld [smem:[#allocation5_spill]]  ;;  %s11884_s3 = sld [smem:[#allocation4_spill]]  ;;  %s10441_s28 = sphi %s10841_s28, %s139_s28  }
  0x8d   : > { %s8652_s1 = sadd.s32 4294967295, %s10441_s28   ;;  %p8656_p0 = scmp.ge.s32.totalorder %s10441_s28, 1 }
  0x8e   : > { %p1737_p1 = scmp.lt.s32.totalorder %s10441_s28, 3 }
  0x90   : > { %p1738_p2 = pnand %p8656_p0, %p1737_p1 }
  0x91   : > { %p1887_p3 = scmp.lt.s32.totalorder (!%p1738_p2), %s8652_s1, 1  ;;  %s11885_s5 = sld [smem:[#allocation2_spill]] (!%p1738_p2)  ;;  %v10215_v0 = vld [vmem:[%s10529_s13] sm:$0xff] (!%p1738_p2)   ;;  %v10507_v1 = vmov (!%p1738_p2), 0.0   ;;  %vm10508_vm0 = vmmov (!%p1738_p2), 0   ;;  %vm1904_vm1 = vcmask (!%p1738_p2), 64512   ;;  %v1938_v42 = vlaneseq (!%p1738_p2) }
  0x92   : > { %1741 = sbr.rel (%p1738_p2) target bundleno = 18682 (0x48fa), region = 276  ;;  %9407 = vmatprep.subr.bf16.mxu0 (!%p1738_p2), %v10507_v1  ;;  %9413 = vmatprep.subr.bf16.mxu1 (!%p1738_p2), %v10507_v1  ;;  %vm2024_vm2 = vcmask (!%p1738_p2), 72704   ;;  %v10216_v29 = vld [vmem:[%s10539_s21] sm:$0xff] (!%p1738_p2)   ;;  %vm1978_vm9 = vcmask (!%p1738_p2), 130048   ;;  %vm2163_vm10 = vcmask (!%p1738_p2), 261120   ;;  %vm2398_vm11 = vcmask (!%p1738_p2), 1043456  }
  0x93   : > { %9408 = vmatpush3.bf16.msra.mxu0 (!%p1738_p2), %v10215_v0  ;;  %9409 = vmatprep.mubr.msk.bf16.mxu0 (!%p1738_p2), %vm10508_vm0, %v10507_v1  ;;  %v1939_v45 = vand.u32 (!%p1738_p2), 127, %v1938_v42  ;;  %s11886_s6 = sld [smem:[#allocation6_spill]] (!%p1738_p2)  ;;  %s11887_s10 = sld [smem:[#allocation8_spill]] (!%p1738_p2)  ;;  %vm3691_vm12 = vcmask (!%p1738_p2), 523264   ;;  %vm4068_vm13 = vcmask (!%p1738_p2), 1044480   ;;  %vm4043_vm14 = vcmask (!%p1738_p2), 65536  }
  0x94   : > { %9415 = vmatprep.mubr.msk.bf16.mxu1 (!%p1738_p2), %vm10508_vm0, %v10507_v1  ;;  %9419 = vmatprep.subr.bf16.mxu0 (!%p1738_p2), %v10507_v1  ;;  %s11888_s11 = sld [smem:[#allocation10_spill]] (!%p1738_p2)  ;;  %s11889_s15 = sld [smem:[#allocation11_spill]] (!%p1738_p2)  ;;  %vm5287_vm15 = vcmask (!%p1738_p2), 253952  }
  0x95   : > { %9414 = vmatpush3.bf16.msra.mxu1 (!%p1738_p2), %v10216_v29  ;;  %vm1940_vm5 = vcmp.lt.s32.totalorder (!%p1738_p2), %v1939_v45, 4  ;;  %vm2057_vm8 = vcmp.lt.s32.totalorder (!%p1738_p2), %v1939_v45, 5  ;;  %s11890_s16 = sld [smem:[#allocation16_spill]] (!%p1738_p2)  ;;  %s11891_s18 = sld [smem:[#allocation3_spill]] (!%p1738_p2) }
  0x96   : > { %9427 = vmatprep.subr.bf16.mxu1 (!%p1738_p2), %v10507_v1  ;;  %s11892_s22 = sld [smem:[#allocation18_spill]] (!%p1738_p2)  ;;  %s11893_s23 = sld [smem:[#allocation7_spill]] (!%p1738_p2) }
  0x97   : > { %s11894_s26 = sld [smem:[#allocation20_spill]] (!%p1738_p2) }
  0x99   : > { %s11935_s1 = smov (!%p1887_p3, %s8652_s1), 1 }
  0x9a   : > { %s9143_s0 = sshll.u32 %s11935_s1, 4 }
  0x9b   : > { %s1891_s2 = scalar_lea.vmem %s11885_s5, %s9143_s0  ;;  %s1896_s7 = scalar_lea.vmem %s10524_s9, %s9143_s0 }
  0x9c   : > { %v10863_v2 = vld [vmem:[%s1891_s2] sm:$0xff]  ;;  %v10865_v3 = vld [vmem:[%s1891_s2 + $0x8] sm:$0xff]  ;;  %s11895_s0 = sld [smem:[#allocation17_spill]]  ;;  %s11896_s2 = sld [smem:[#allocation19_spill]] }
  0x9d   : > { %v1905_v4 = vsel %vm1904_vm1, %v10863_v2, 0.0  ;;  %v1906_v5 = vsel %vm1904_vm1, %v10865_v3, 0.0  ;;  %v2022_v31 = vld [vmem:[%s1896_s7] sm:$0xff]  ;;  %v2023_v32 = vld [vmem:[%s1896_s7 + $0x8] sm:$0xff]  ;;  %s11897_s7 = sld [smem:[#allocation21_spill]]  ;;  %s11915_s5 = sld [smem:[#allocation38_spill]] }
  0x9e   : > { %v1907_v6 = vadd.f32 %v1906_v5, %v1905_v4  ;;  %v2025_v33 = vsel %vm2024_vm2, %v2022_v31, 0.0  ;;  %v2026_v34 = vsel %vm2024_vm2, %v2023_v32, 0.0 }
  0x9f   : > { %v2027_v35 = vadd.f32 %v2026_v34, %v2025_v33  ;;  %v10222_v33 = vld [vmem:[%s10569_s19 + $0x8] sm:$0xff]  }
  0xa0   : > { %v1908_v7 = vrot.slane %v1907_v6, 4 }
  0xa1   : > { %v2028_v38 = vrot.slane %v2027_v35, 4 }
  0xa2   : > { %v1909_v8 = vadd.f32 %v1908_v7, %v1907_v6 }
  0xa3   : > { %v2029_v40 = vadd.f32 %v2028_v38, %v2027_v35  ;;  %v8672_v38 = vld [vmem:[%s10564_s14] ss:$0 sm:$0xff] }
  0xa4   : > { %v1910_v9 = vrot.slane %v1909_v8, 2 }
  0xa5   : > { %v2030_v43 = vrot.slane %v2029_v40, 2 }
  0xa6   : > { %v1911_v10 = vadd.f32 %v1910_v9, %v1909_v8 }
  0xa7   : > { %v2031_v44 = vadd.f32 %v2030_v43, %v2029_v40 }
  0xa8   : > { %v1912_v11 = vrot.slane %v1911_v10, 1 }
  0xa9   : > { %v2032_v46 = vrot.slane %v2031_v44, 1 }
  0xaa   : > { %v1913_v12 = vadd.f32 %v1912_v11, %v1911_v10 }
  0xab   : > { %v2033_v47 = vadd.f32 %v2032_v46, %v2031_v44 }
  0xac   : > { %v10871_v13 = vmul.f32 0.0625, %v1913_v12 }
  0xad   : > { %v2034_v48 = vmul.f32 0.0625, %v2033_v47 }
  0xae   : > { %v1916_v14 = vsub.f32 %v10863_v2, %v10871_v13  ;;  %v1917_v15 = vsub.f32 %v10865_v3, %v10871_v13 }
  0xaf   : > { %v2035_v50 = vsub.f32 %v2022_v31, %v2034_v48  ;;  %v2036_v51 = vsub.f32 %v2023_v32, %v2034_v48 }
  0xb0   : > { %v1918_v16 = vmul.f32 %v1916_v14, %v1916_v14  ;;  %v1919_v17 = vmul.f32 %v1917_v15, %v1917_v15 }
  0xb1   : > { %v2037_v54 = vmul.f32 %v2035_v50, %v2035_v50  ;;  %v2038_v55 = vmul.f32 %v2036_v51, %v2036_v51 }
  0xb2   : > { %v1920_v18 = vsel %vm1904_vm1, %v1918_v16, 0.0  ;;  %v1921_v19 = vsel %vm1904_vm1, %v1919_v17, 0.0 }
  0xb3   : > { %v1922_v20 = vadd.f32 %v1921_v19, %v1920_v18  ;;  %v2039_v59 = vsel %vm2024_vm2, %v2037_v54, 0.0  ;;  %v2040_v60 = vsel %vm2024_vm2, %v2038_v55, 0.0  ;;  %v10217_v19 = vld [vmem:[%s10549_s29] sm:$0xff]  }
  0xb4   : > { %v2041_v61 = vadd.f32 %v2040_v60, %v2039_v59 }
  0xb5   : > { %v1923_v21 = vrot.slane %v1922_v20, 4 }
  0xb6   : > { %v2042_v62 = vrot.slane %v2041_v61, 4 }
  0xb7   : > { %v1924_v22 = vadd.f32 %v1923_v21, %v1922_v20  ;;  %v10218_v21 = vld [vmem:[%s11883_s8] sm:$0xff]  }
  0xb8   : > { %v2043_v63 = vadd.f32 %v2042_v62, %v2041_v61 }
  0xb9   : > { %v1925_v23 = vrot.slane %v1924_v22, 2 }
  0xba   : > { %v2044_v0 = vrot.slane %v2043_v63, 2 }
  0xbb   : > { %v1926_v24 = vadd.f32 %v1925_v23, %v1924_v22  ;;  %v10219_v23 = vld [vmem:[%s10549_s29 + $0x8] sm:$0xff]  }
  0xbc   : > { %v2045_v4 = vadd.f32 %v2044_v0, %v2043_v63  ;;  %v10224_v63 = vld [vmem:[%s10549_s29 + $0x18] sm:$0xff]   ;;  %v10225_v0 = vld [vmem:[%s10569_s19 + $0x10] sm:$0xff]  }
  0xbd   : > { %v1927_v25 = vrot.slane %v1926_v24, 1 }
  0xbe   : > { %v2046_v5 = vrot.slane %v2045_v4, 1 }
  0xbf   : > { %v1928_v26 = vadd.f32 %v1927_v25, %v1926_v24  ;;  %v10220_v24 = vld [vmem:[%s11883_s8 + $0x8] sm:$0xff]   ;;  %v8662_v25 = vld [vmem:[%s10534_s17] ss:$0 sm:$0xff] }
  0xc0   : > { %v2047_v6 = vadd.f32 %v2046_v5, %v2045_v4  ;;  %v10226_v4 = vld [vmem:[%s10569_s19 + $0x18] sm:$0xff]  }
  0xc1   : > { %v1929_v27 = vmul.f32 0.0625, %v1928_v26 }
  0xc2   : > { %v2048_v7 = vmul.f32 0.0625, %v2047_v6 }
  0xc3   : > { %v1930_v28 = vadd.f32 1e-05, %v1929_v27 }
  0xc4   : > { %v2049_v8 = vadd.f32 1e-05, %v2048_v7 }
  0xc5   : > { %10325 = vrsqrt.f32 %v1930_v28  ;;  %vm1933_vm3 = vcmp.eq.f32.partialorder %v1930_v28, inf  ;;  %v1936_v30 = vand.u32 2147483648, %v1930_v28  ;;  %vm1935_vm4 = vcmp.eq.f32.partialorder %v1930_v28, 0.0 }
  0xc6   : > { %vm2052_vm6 = vcmp.eq.f32.partialorder %v2049_v8, inf  ;;  %vm2054_vm7 = vcmp.eq.f32.partialorder %v2049_v8, 0.0 }
  0xcf   : > { %v10326_v36 = vpop.eup %10325 }
  0xd0   : > { %v1932_v37 = vmul.f32 %v10326_v36, %v1930_v28 }
  0xd2   : > { %v1934_v39 = vsel %vm1933_vm3, %v1930_v28, %v1932_v37 }
  0xd3   : > { %v10886_v41 = vsel %vm1935_vm4, %v1936_v30, %v1934_v39  ;;  %v10221_v30 = vld [vmem:[%s10569_s19] sm:$0xff]  }
  0xd4   : > { %10327 = vrcp.f32 %v10886_v41 }
  0xd5   : > { %10329 = vrsqrt.f32 %v2049_v8 }
  0xde   : > { %v10328_v49 = vpop.eup %10327 }
  0xdf   : > { %v1942_v52 = vmul.f32 %v10328_v49, %v1916_v14  ;;  %v1943_v53 = vmul.f32 %v10328_v49, %v1917_v15  ;;  %v10330_v9 = vpop.eup %10329 }
  0xe1   : > { %v1944_v56 = vsel %vm1940_vm5, %v1942_v52, %v10863_v2  ;;  %v1945_v57 = vsel %vm1940_vm5, %v1943_v53, %v10865_v3  ;;  %v2055_v2 = vand.u32 2147483648, %v2049_v8  ;;  %v2051_v3 = vmul.f32 %v10330_v9, %v2049_v8  ;;  %v8676_v52 = vld [vmem:[%s10574_s24] ss:$0 sm:$0xff] }
  0xe2   : > { %v1948_v58 = vpack.c.bf16 %v1945_v57, %v1944_v56 }
  0xe3   : > { %v2053_v10 = vsel %vm2052_vm6, %v2049_v8, %v2051_v3 }
  0xe4   : > { %1956 = vxpose.xlu0.c.b16.start.end [1/1] (short) (narrow) %v1948_v58, 16  ;;  %v2056_v11 = vsel %vm2054_vm7, %v2055_v2, %v2053_v10  ;;  %v10223_v58 = vld [vmem:[%s10549_s29 + $0x10] sm:$0xff]  }
  0xe5   : > { %10331 = vrcp.f32 %v2056_v11 }
  0xef   : > { %v10332_v12 = vpop.eup %10331 }
  0xf0   : > { %v2059_v14 = vmul.f32 %v10332_v12, %v2035_v50  ;;  %v2060_v15 = vmul.f32 %v10332_v12, %v2036_v51  ;;  %v8668_v50 = vld [vmem:[%s11884_s3] ss:$0 sm:$0xff]  ;;  %v8705_v12 = vld [vmem:[%s10574_s24 + $0x1] ss:$0 sm:$0xff] }
  0xf2   : > { %v2061_v16 = vsel %vm2057_vm8, %v2059_v14, %v2022_v31  ;;  %v2062_v17 = vsel %vm2057_vm8, %v2060_v15, %v2023_v32 }
  0xf3   : > { %v2065_v18 = vpack.c.bf16 %v2062_v17, %v2061_v16 }
  0xf5   : > { %2073 = vxpose.xlu0.c.b16.start.end [1/1] (short) (narrow) %v2065_v18, 16 }
 0x14a   : > { %v1964_v20 = vpop.trf.xlu0 }
 0x14b   : > { %9410 = vmatmul.mubr.msk.bf16.vlgmr.msra.gmra.mrb[0].mxu0 %vm1978_vm9, %v1964_v20 }
 0x14c   : > { %9420 = vmatpush3.bf16.msra.mxu0 %v10217_v19  ;;  %9423 = vmatprep.mubr.msk.bf16.mxu0 %vm10508_vm0, %v10507_v1 }
 0x14d   : > { %9421 = vmatprep.subr.bf16.mxu0 %v10507_v1 }
 0x150   : > { %9422 = vmatpush3.bf16.msra.mxu0 %v10219_v23 }
 0x151   : > { %9435 = vmatprep.subr.bf16.mxu0 %v10507_v1 }
 0x15b   : > { %v2081_v22 = vpop.trf.xlu0 }
 0x15c   : > { %9416 = vmatmul.mubr.msk.bf16.vlgmr.msra.gmra.mrb[0].mxu1 %vm1978_vm9, %v2081_v22 }
 0x15d   : > { %9428 = vmatpush3.bf16.msra.mxu1 %v10218_v21  ;;  %9431 = vmatprep.mubr.msk.bf16.mxu1 %vm10508_vm0, %v10507_v1 }
 0x15e   : > { %9429 = vmatprep.subr.bf16.mxu1 %v10507_v1 }
 0x161   : > { %9430 = vmatpush3.bf16.msra.mxu1 %v10220_v24 }
 0x162   : > { %9443 = vmatprep.subr.bf16.mxu1 %v10507_v1 }
 0x21e   : > { %v2016_v26 = vpop.f32.mrb[0].mxu0 }
 0x21f   : > { %v10906_v27 = vadd.f32 %v8662_v25, %v2016_v26  ;;  %v9411_v28 = vpop.f32.mrb[1].mxu0 }
 0x220   : > { %v2019_v29 = vpop.f32.mrb[2].mxu0 }
 0x221   : > { %v10911_v31 = vpack.c.bf16 %v10906_v27, %v10906_v27  ;;  %v9412_v32 = vpop.f32.mrb[3].mxu0 }
 0x223   : > { %9424 = vmatmul.mubr.msk.bf16.vlgmr.msra.gmra.mrb[4].mxu0 %vm2163_vm10, %v10911_v31  ;;  %9432 = vmatmul.mubr.msk.bf16.vlgmr.msra.gmra.mrb[4].mxu1 %vm2163_vm10, %v10911_v31 }
 0x224   : > { %9436 = vmatpush3.bf16.msra.mxu0 %v10221_v30  ;;  %9439 = vmatprep.mubr.msk.bf16.mxu0 %vm10508_vm0, %v10507_v1  ;;  %v10227_v30 = vld [vmem:[%s11883_s8 + $0x10] sm:$0xff]  }
 0x225   : > { %9437 = vmatprep.subr.bf16.mxu0 %v10507_v1  ;;  %9445 = vmatprep.mubr.msk.bf16.mxu1 %vm10508_vm0, %v10507_v1 }
 0x228   : > { %9438 = vmatpush3.bf16.msra.mxu0 %v10222_v33  ;;  %v10228_v33 = vld [vmem:[%s11883_s8 + $0x18] sm:$0xff]  }
 0x229   : > { %9449 = vmatprep.subr.bf16.mxu0 %v10507_v1 }
 0x22b   : > { %9440 = vmatmul.mubr.msk.bf16.vlgmr.msra.gmra.mrb[8].mxu0 %vm2163_vm10, %v10911_v31 }
 0x22c   : > { %9451 = vmatprep.mubr.msk.bf16.mxu0 %vm10508_vm0, %v10507_v1 }
 0x22f   : > { %v10928_v34 = vpop.f32.mrb[0].mxu1 }
 0x230   : > { %v9417_v35 = vpop.f32.mrb[1].mxu1 }
 0x231   : > { %v10930_v36 = vpop.f32.mrb[2].mxu1 }
 0x232   : > { %v9418_v37 = vpop.f32.mrb[3].mxu1 }
 0x2f6   : > { %v2201_v39 = vpop.f32.mrb[4].mxu0  ;;  %v2264_v40 = vpop.f32.mrb[4].mxu1 }
 0x2f7   : > { %v2265_v42 = vadd.f32 %v8672_v38, %v2264_v40  ;;  %v9425_v43 = vpop.f32.mrb[5].mxu0  ;;  %v9433_v44 = vpop.f32.mrb[5].mxu1  ;;  %v2202_v53 = vadd.f32 %v8668_v50, %v2201_v39  ;;  %v8696_v40 = vld [vmem:[%s10564_s14 + $0x1] ss:$0 sm:$0xff] }
 0x2f8   : > { %v2204_v45 = vpop.f32.mrb[6].mxu0  ;;  %v2267_v46 = vpop.f32.mrb[6].mxu1 }
 0x2f9   : > { %v2335_v47 = vpack.c.bf16 %v2265_v42, %v2265_v42  ;;  %v9426_v48 = vpop.f32.mrb[7].mxu0  ;;  %v9434_v49 = vpop.f32.mrb[7].mxu1  ;;  %v2334_v59 = vpack.c.bf16 %v2202_v53, %v2202_v53 }
 0x2fa   : > { %v8687_v48 = vld [vmem:[%s11884_s3 + $0x1] ss:$0 sm:$0xff] }
 0x2fb   : > { %v2340_v51 = vsel %vm1904_vm1, %v2335_v47, 0 }
 0x2fc   : > { %9444 = vmatpush3.bf16.xpose.msra.mxu1 %v2340_v51 }
 0x2fd   : > { %9455 = vmatprep.subr.bf16.mxu1 %v10507_v1 }
 0x2fe   : > { %v2327_v54 = vpop.f32.mrb[8].mxu0 }
 0x2ff   : > { %v2328_v55 = vadd.f32 %v8676_v52, %v2327_v54  ;;  %v9441_v56 = vpop.f32.mrb[9].mxu0 }
 0x300   : > { %v2330_v57 = vpop.f32.mrb[10].mxu0 }
 0x301   : > { %v2394_v60 = vpack.c.bf16 %v2328_v55, %v2328_v55  ;;  %v9442_v61 = vpop.f32.mrb[11].mxu0 }
 0x303   : > { %v2400_v62 = vsel %vm2398_vm11, %v2394_v60, 0  ;;  %9446 = vmatmul.mubr.msk.bf16.vlgmr.msra.gmra.mrb[8].mxu1 %vm1904_vm1, %v2334_v59 }
 0x304   : > { %9450 = vmatpush3.bf16.msra.mxu0 %v2400_v62  ;;  %9456 = vmatpush3.bf16.msra.mxu1 %v10223_v58  ;;  %v8709_v62 = vld [vmem:[%s10579_s30 + $0x4] sm:$0xf] }
 0x305   : > { %9457 = vmatprep.subr.bf16.mxu1 %v10507_v1  ;;  %9459 = vmatprep.mubr.msk.bf16.mxu1 %vm10508_vm0, %v10507_v1 }
 0x306   : > { %9463 = vmatprep.subr.bf16.mxu0 %v10507_v1 }
 0x308   : > { %9458 = vmatpush3.bf16.msra.mxu1 %v10224_v63  ;;  %v2752_v63 = vsel %vm2398_vm11, %v8709_v62, 0 }
 0x309   : > { %9471 = vmatprep.subr.bf16.mxu1 %v10507_v1 }
 0x30b   : > { %9460 = vmatmul.mubr.msk.bf16.vlgmr.msra.gmra.mrb[12].mxu1 %vm2163_vm10, %v10911_v31 }
 0x30c   : > { %9472 = vmatpush3.bf16.msra.mxu1 %v10225_v0  ;;  %9475 = vmatprep.mubr.msk.bf16.mxu1 %vm10508_vm0, %v10507_v1 }
 0x30d   : > { %9473 = vmatprep.subr.bf16.mxu1 %v10507_v1 }
 0x310   : > { %9474 = vmatpush3.bf16.msra.mxu1 %v10226_v4 }
 0x311   : > { %9485 = vmatprep.subr.bf16.mxu1 %v10507_v1 }
 0x313   : > { %9476 = vmatmul.mubr.msk.bf16.vlgmr.msra.gmra.mrb[16].mxu1 %vm2163_vm10, %v10911_v31 }
 0x314   : > { %9487 = vmatprep.mubr.msk.bf16.mxu1 %vm10508_vm0, %v10507_v1 }
 0x3d6   : > { %v2376_v5 = vpop.f32.mrb[8].mxu1 }
 0x3d7   : > { %v9447_v6 = vpop.f32.mrb[9].mxu1  ;;  %v2382_v7 = vsel %vm1904_vm1, %v2376_v5, -inf }
 0x3d8   : > { %2383 = vmax.xlane.f32.xlu1 %v2382_v7  ;;  %v2379_v8 = vpop.f32.mrb[10].mxu1 }
 0x3d9   : > { %v9448_v9 = vpop.f32.mrb[11].mxu1 }
 0x3da   : > { %v10229_v9 = vld [vmem:[%s11883_s8 + $0x20] sm:$0xff]  }
 0x3de   : > { %v2502_v2 = vpop.f32.mrb[12].mxu1 }
 0x3df   : > { %v9461_v3 = vpop.f32.mrb[13].mxu1  ;;  %v2503_v50 = vadd.f32 %v8687_v48, %v2502_v2 }
 0x3e0   : > { %v2505_v10 = vpop.f32.mrb[14].mxu1  ;;  %v10230_v3 = vld [vmem:[%s11883_s8 + $0x28] sm:$0xff]  }
 0x3e1   : > { %v9462_v11 = vpop.f32.mrb[15].mxu1  ;;  %v2640_v51 = vpack.c.bf16 %v2503_v50, %v2503_v50 }
 0x3e2   : > { %v10231_v11 = vld [vmem:[%s10549_s29 + $0x20] sm:$0xff]  }
 0x3e6   : > { %v2632_v14 = vpop.f32.mrb[16].mxu1 }
 0x3e7   : > { %v2633_v15 = vadd.f32 %v8705_v12, %v2632_v14  ;;  %v9477_v16 = vpop.f32.mrb[17].mxu1 }
 0x3e8   : > { %v2635_v17 = vpop.f32.mrb[18].mxu1 }
 0x3e9   : > { %v2700_v18 = vpack.c.bf16 %v2633_v15, %v2633_v15  ;;  %v9478_v19 = vpop.f32.mrb[19].mxu1  ;;  %v10232_v17 = vld [vmem:[%s10549_s29 + $0x28] sm:$0xff]  }
 0x3ea   : > { %v10233_v19 = vld [vmem:[%s10569_s19 + $0x20] sm:$0xff]  }
 0x3eb   : > { %v2705_v20 = vsel %vm2398_vm11, %v2700_v18, 0 }
 0x3ec   : > { %9486 = vmatpush3.bf16.msra.mxu1 %v2705_v20 }
 0x3ed   : > { %9497 = vmatprep.subr.bf16.mxu1 %v10507_v1 }
 0x465   : > { %v2384_v21 = vpop.xlane.xlu1 %2383 }
 0x466   : > { %v2385_v22 = vsub.f32 %v2376_v5, %v2384_v21  ;;  %v2333_v5 = vld [vmem:[%s10579_s30] sm:$0xf] }
 0x467   : > { %v2798_v8 = vsel %vm2398_vm11, %v2333_v5, 0 }
 0x468   : > { %v2386_v23 = vmul.f32 1.442695, %v2385_v22 }
 0x46a   : > { %10333 = vpow2.f32 %v2386_v23  ;;  %v10234_v23 = vld [vmem:[%s10569_s19 + $0x28] sm:$0xff]  }
 0x474   : > { %v10334_v24 = vpop.eup %10333 }
 0x475   : > { %v2388_v25 = vsel %vm1904_vm1, %v10334_v24, 0.0 }
 0x476   : > { %2389 = vadd.xlane.f32.xlu1 %v2388_v25 }
 0x503   : > { %v2390_v26 = vpop.xlane.xlu1 %2389 }
 0x504   : > { %10335 = vrcp.f32 %v2390_v26 }
 0x50e   : > { %v10336_v28 = vpop.eup %10335 }
 0x50f   : > { %v2392_v29 = vmul.f32 %v10336_v28, %v10334_v24  ;;  %v8728_v24 = vld [vmem:[%s10564_s14 + $0x2] ss:$0 sm:$0xff] }
 0x511   : > { %v2393_v32 = vpack.c.bf16 %v2392_v29, %v2392_v29 }
 0x513   : > { %9452 = vmatmul.mubr.msk.bf16.vlgmr.msra.gmra.mrb[12].mxu0 %vm1904_vm1, %v2393_v32 }
 0x514   : > { %9464 = vmatpush3.bf16.msra.mxu0 %v10227_v30  ;;  %9467 = vmatprep.mubr.msk.bf16.mxu0 %vm10508_vm0, %v10507_v1 }
 0x515   : > { %9465 = vmatprep.subr.bf16.mxu0 %v10507_v1 }
 0x518   : > { %9466 = vmatpush3.bf16.msra.mxu0 %v10228_v33 }
 0x519   : > { %9479 = vmatprep.subr.bf16.mxu0 %v10507_v1 }
 0x51b   : > { %9468 = vmatmul.mubr.msk.bf16.vlgmr.msra.gmra.mrb[16].mxu0 %vm2163_vm10, %v10911_v31 }
 0x51c   : > { %9481 = vmatprep.mubr.msk.bf16.mxu0 %vm10508_vm0, %v10507_v1 }
 0x5e6   : > { %v2436_v35 = vpop.f32.mrb[12].mxu0 }
 0x5e7   : > { %v9453_v37 = vpop.f32.mrb[13].mxu0  ;;  %v2442_v2 = vpack.c.bf16 %v2436_v35, %v2436_v35 }
 0x5e8   : > { %v2439_v38 = vpop.f32.mrb[14].mxu0 }
 0x5e9   : > { %v9454_v39 = vpop.f32.mrb[15].mxu0 }
 0x5ee   : > { %v2567_v42 = vpop.f32.mrb[16].mxu0 }
 0x5ef   : > { %v2568_v43 = vadd.f32 %v8696_v40, %v2567_v42  ;;  %v9469_v44 = vpop.f32.mrb[17].mxu0  ;;  %v8719_v42 = vld [vmem:[%s11884_s3 + $0x2] ss:$0 sm:$0xff] }
 0x5f0   : > { %v2570_v45 = vpop.f32.mrb[18].mxu0 }
 0x5f1   : > { %v2641_v46 = vpack.c.bf16 %v2568_v43, %v2568_v43  ;;  %v9470_v47 = vpop.f32.mrb[19].mxu0 }
 0x5f3   : > { %v2646_v49 = vsel %vm1904_vm1, %v2641_v46, 0 }
 0x5f4   : > { %9480 = vmatpush3.bf16.xpose.msra.mxu0 %v2646_v49  ;;  %v8737_v49 = vld [vmem:[%s10574_s24 + $0x2] ss:$0 sm:$0xff] }
 0x5f5   : > { %9491 = vmatprep.subr.bf16.mxu0 %v10507_v1 }
 0x5fb   : > { %9482 = vmatmul.mubr.msk.bf16.vlgmr.msra.gmra.mrb[20].mxu0 %vm1904_vm1, %v2640_v51 }
 0x5fc   : > { %9493 = vmatprep.mubr.msk.bf16.mxu0 %vm10508_vm0, %v10507_v1  ;;  %9492 = vmatpush3.bf16.msra.mxu0 %v2752_v63 }
 0x5fd   : > { %9503 = vmatprep.subr.bf16.mxu0 %v10507_v1 }
 0x6ce   : > { %v2682_v52 = vpop.f32.mrb[20].mxu0 }
 0x6cf   : > { %v9483_v53 = vpop.f32.mrb[21].mxu0  ;;  %v2688_v54 = vsel %vm1904_vm1, %v2682_v52, -inf }
 0x6d0   : > { %2689 = vmax.xlane.f32.xlu0 %v2688_v54  ;;  %v2685_v55 = vpop.f32.mrb[22].mxu0 }
 0x6d1   : > { %v9484_v56 = vpop.f32.mrb[23].mxu0 }
 0x75d   : > { %v2690_v57 = vpop.xlane.xlu0 %2689 }
 0x75e   : > { %v2691_v58 = vsub.f32 %v2682_v52, %v2690_v57 }
 0x760   : > { %v2692_v59 = vmul.f32 1.442695, %v2691_v58 }
 0x762   : > { %10337 = vpow2.f32 %v2692_v59 }
 0x76c   : > { %v10338_v60 = vpop.eup %10337 }
 0x76d   : > { %v2694_v61 = vsel %vm1904_vm1, %v10338_v60, 0.0 }
 0x76e   : > { %2695 = vadd.xlane.f32.xlu1 %v2694_v61 }
 0x7fb   : > { %v2696_v0 = vpop.xlane.xlu1 %2695 }
 0x7fc   : > { %10339 = vrcp.f32 %v2696_v0 }
 0x806   : > { %v10340_v4 = vpop.eup %10339 }
 0x807   : > { %v2698_v6 = vmul.f32 %v10340_v4, %v10338_v60 }
 0x809   : > { %v2699_v7 = vpack.c.bf16 %v2698_v6, %v2698_v6  ;;  %v8741_v6 = vld [vmem:[%s10579_s30 + $0x8] sm:$0xf] }
 0x80b   : > { %9488 = vmatmul.mubr.msk.bf16.vlgmr.msra.gmra.mrb[20].mxu1 %vm1904_vm1, %v2699_v7  ;;  %v3149_v7 = vsel %vm2398_vm11, %v8741_v6, 0 }
 0x80c   : > { %9498 = vmatpush3.bf16.msra.mxu1 %v2798_v8  ;;  %9499 = vmatprep.mubr.msk.bf16.mxu1 %vm10508_vm0, %v10507_v1 }
 0x80d   : > { %9511 = vmatprep.subr.bf16.mxu1 %v10507_v1 }
 0x813   : > { %9500 = vmatmul.mubr.msk.bf16.vlgmr.msra.gmra.mrb[24].mxu1 %vm1904_vm1, %v2442_v2 }
 0x814   : > { %9512 = vmatpush3.bf16.msra.mxu1 %v10229_v9  ;;  %9515 = vmatprep.mubr.msk.bf16.mxu1 %vm10508_vm0, %v10507_v1 }
 0x815   : > { %9513 = vmatprep.subr.bf16.mxu1 %v10507_v1 }
 0x818   : > { %9514 = vmatpush3.bf16.msra.mxu1 %v10230_v3  ;;  %v10235_v3 = vld [vmem:[%s10549_s29 + $0x30] sm:$0xff]  }
 0x819   : > { %9527 = vmatprep.subr.bf16.mxu1 %v10507_v1 }
 0x81b   : > { %9516 = vmatmul.mubr.msk.bf16.vlgmr.msra.gmra.mrb[28].mxu1 %vm2163_vm10, %v10911_v31 }
 0x81c   : > { %9529 = vmatprep.mubr.msk.bf16.mxu1 %vm10508_vm0, %v10507_v1 }
 0x8de   : > { %v2741_v10 = vpop.f32.mrb[20].mxu1 }
 0x8df   : > { %v2747_v12 = vpack.c.bf16 %v2741_v10, %v2741_v10  ;;  %v9489_v14 = vpop.f32.mrb[21].mxu1 }
 0x8e0   : > { %v2744_v15 = vpop.f32.mrb[22].mxu1  ;;  %v10238_v14 = vld [vmem:[%s10569_s19 + $0x38] sm:$0xff]  }
 0x8e1   : > { %v9490_v16 = vpop.f32.mrb[23].mxu1  ;;  %9494 = vmatmul.mubr.msk.bf16.vlgmr.msra.gmra.mrb[24].mxu0 %vm1904_vm1, %v2747_v12  ;;  %v10237_v12 = vld [vmem:[%s10569_s19 + $0x30] sm:$0xff]  }
 0x8e2   : > { %9504 = vmatpush3.bf16.msra.mxu0 %v10231_v11  ;;  %9507 = vmatprep.mubr.msk.bf16.mxu0 %vm10508_vm0, %v10507_v1  ;;  %v10236_v11 = vld [vmem:[%s10549_s29 + $0x38] sm:$0xff]   ;;  %v10239_v16 = vld [vmem:[%s11883_s8 + $0x30] sm:$0xff]  }
 0x8e3   : > { %9505 = vmatprep.subr.bf16.mxu0 %v10507_v1 }
 0x8e6   : > { %v2834_v18 = vpop.f32.mrb[24].mxu1  ;;  %9506 = vmatpush3.bf16.msra.mxu0 %v10232_v17 }
 0x8e7   : > { %v9501_v20 = vpop.f32.mrb[25].mxu1  ;;  %9519 = vmatprep.subr.bf16.mxu0 %v10507_v1 }
 0x8e8   : > { %v2837_v21 = vpop.f32.mrb[26].mxu1 }
 0x8e9   : > { %v9502_v22 = vpop.f32.mrb[27].mxu1  ;;  %9508 = vmatmul.mubr.msk.bf16.vlgmr.msra.gmra.mrb[28].mxu0 %vm2163_vm10, %v10911_v31  ;;  %v10240_v21 = vld [vmem:[%s11883_s8 + $0x38] sm:$0xff]   ;;  %s11931_s8 = sld [smem:[#allocation48_spill]] }
 0x8ea   : > { %9520 = vmatpush3.bf16.msra.mxu0 %v10233_v19  ;;  %9523 = vmatprep.mubr.msk.bf16.mxu0 %vm10508_vm0, %v10507_v1 }
 0x8eb   : > { %9521 = vmatprep.subr.bf16.mxu0 %v10507_v1 }
 0x8ee   : > { %v2964_v25 = vpop.f32.mrb[28].mxu1  ;;  %9522 = vmatpush3.bf16.msra.mxu0 %v10234_v23 }
 0x8ef   : > { %v2965_v26 = vadd.f32 %v8728_v24, %v2964_v25  ;;  %v9517_v28 = vpop.f32.mrb[29].mxu1  ;;  %9533 = vmatprep.subr.bf16.mxu0 %v10507_v1 }
 0x8f0   : > { %v2967_v29 = vpop.f32.mrb[30].mxu1 }
 0x8f1   : > { %v3038_v30 = vpack.c.bf16 %v2965_v26, %v2965_v26  ;;  %v9518_v32 = vpop.f32.mrb[31].mxu1  ;;  %9524 = vmatmul.mubr.msk.bf16.vlgmr.msra.gmra.mrb[32].mxu0 %vm2163_vm10, %v10911_v31  ;;  %v8768_v26 = vld [vmem:[%s10574_s24 + $0x3] ss:$0 sm:$0xff] }
 0x8f2   : > { %9535 = vmatprep.mubr.msk.bf16.mxu0 %vm10508_vm0, %v10507_v1 }
 0x8f3   : > { %v3043_v33 = vsel %vm1904_vm1, %v3038_v30, 0 }
 0x8f4   : > { %9528 = vmatpush3.bf16.xpose.msra.mxu1 %v3043_v33 }
 0x8f5   : > { %9539 = vmatprep.subr.bf16.mxu1 %v10507_v1 }
 0x9b4   : > { %v2788_v35 = vpop.f32.mrb[24].mxu0 }
 0x9b5   : > { %v11025_v37 = vadd.f32 %v2834_v18, %v2788_v35  ;;  %v9495_v38 = vpop.f32.mrb[25].mxu0 }
 0x9b6   : > { %v2791_v39 = vpop.f32.mrb[26].mxu0 }
 0x9b7   : > { %v9496_v40 = vpop.f32.mrb[27].mxu0 }
 0x9bc   : > { %v2899_v43 = vpop.f32.mrb[28].mxu0 }
 0x9bd   : > { %v2900_v44 = vadd.f32 %v8719_v42, %v2899_v43  ;;  %v9509_v45 = vpop.f32.mrb[29].mxu0 }
 0x9be   : > { %v2902_v46 = vpop.f32.mrb[30].mxu0 }
 0x9bf   : > { %v3037_v47 = vpack.c.bf16 %v2900_v44, %v2900_v44  ;;  %v9510_v48 = vpop.f32.mrb[31].mxu0  ;;  %v8759_v44 = vld [vmem:[%s10564_s14 + $0x3] ss:$0 sm:$0xff] }
 0x9c1   : > { %9530 = vmatmul.mubr.msk.bf16.vlgmr.msra.gmra.mrb[32].mxu1 %vm1904_vm1, %v3037_v47 }
 0x9c2   : > { %9541 = vmatprep.mubr.msk.bf16.mxu1 %vm10508_vm0, %v10507_v1  ;;  %9540 = vmatpush3.bf16.msra.mxu1 %v3149_v7 }
 0x9c3   : > { %9553 = vmatprep.subr.bf16.mxu1 %v10507_v1 }
 0x9c4   : > { %v3029_v50 = vpop.f32.mrb[32].mxu0 }
 0x9c5   : > { %v3030_v51 = vadd.f32 %v8737_v49, %v3029_v50  ;;  %v9525_v52 = vpop.f32.mrb[33].mxu0 }
 0x9c6   : > { %v3032_v53 = vpop.f32.mrb[34].mxu0 }
 0x9c7   : > { %v3097_v54 = vpack.c.bf16 %v3030_v51, %v3030_v51  ;;  %v9526_v55 = vpop.f32.mrb[35].mxu0  ;;  %v8750_v51 = vld [vmem:[%s11884_s3 + $0x3] ss:$0 sm:$0xff]  ;;  %s11910_s3 = sld [smem:[#allocation31_spill]] }
 0x9c9   : > { %v3102_v56 = vsel %vm2398_vm11, %v3097_v54, 0 }
 0x9ca   : > { %9534 = vmatpush3.bf16.msra.mxu0 %v3102_v56 }
 0x9cb   : > { %9545 = vmatprep.subr.bf16.mxu0 %v10507_v1 }
 0xa94   : > { %v3079_v57 = vpop.f32.mrb[32].mxu1 }
 0xa95   : > { %v9531_v58 = vpop.f32.mrb[33].mxu1  ;;  %v3085_v59 = vsel %vm1904_vm1, %v3079_v57, -inf }
 0xa96   : > { %3086 = vmax.xlane.f32.xlu1 %v3085_v59  ;;  %v3082_v60 = vpop.f32.mrb[34].mxu1 }
 0xa97   : > { %v9532_v61 = vpop.f32.mrb[35].mxu1 }
 0xb23   : > { %v3087_v62 = vpop.xlane.xlu1 %3086 }
 0xb24   : > { %v3088_v63 = vsub.f32 %v3079_v57, %v3087_v62 }
 0xb26   : > { %v3089_v0 = vmul.f32 1.442695, %v3088_v63 }
 0xb28   : > { %10341 = vpow2.f32 %v3089_v0  ;;  %v8772_v0 = vld [vmem:[%s10579_s30 + $0xc] sm:$0xf] }
 0xb32   : > { %v10342_v4 = vpop.eup %10341 }
 0xb33   : > { %v3091_v5 = vsel %vm1904_vm1, %v10342_v4, 0.0 }
 0xb34   : > { %3092 = vadd.xlane.f32.xlu1 %v3091_v5 }
 0xbc1   : > { %v3093_v8 = vpop.xlane.xlu1 %3092 }
 0xbc2   : > { %10343 = vrcp.f32 %v3093_v8 }
 0xbcc   : > { %v10344_v9 = vpop.eup %10343 }
 0xbcd   : > { %v3095_v2 = vmul.f32 %v10344_v9, %v10342_v4  ;;  %v3501_v4 = vsel %vm2398_vm11, %v8772_v0, 0 }
 0xbcf   : > { %v3096_v10 = vpack.c.bf16 %v3095_v2, %v3095_v2 }
 0xbd1   : > { %9536 = vmatmul.mubr.msk.bf16.vlgmr.msra.gmra.mrb[36].mxu0 %vm1904_vm1, %v3096_v10 }
 0xbd2   : > { %9546 = vmatpush3.bf16.msra.mxu0 %v10235_v3  ;;  %9549 = vmatprep.mubr.msk.bf16.mxu0 %vm10508_vm0, %v10507_v1 }
 0xbd3   : > { %9547 = vmatprep.subr.bf16.mxu0 %v10507_v1 }
 0xbd6   : > { %9548 = vmatpush3.bf16.msra.mxu0 %v10236_v11 }
 0xbd7   : > { %9561 = vmatprep.subr.bf16.mxu0 %v10507_v1 }
 0xbd9   : > { %9550 = vmatmul.mubr.msk.bf16.vlgmr.msra.gmra.mrb[40].mxu0 %vm2163_vm10, %v10911_v31 }
 0xbda   : > { %9562 = vmatpush3.bf16.msra.mxu0 %v10237_v12  ;;  %9565 = vmatprep.mubr.msk.bf16.mxu0 %vm10508_vm0, %v10507_v1 }
 0xbdb   : > { %9563 = vmatprep.subr.bf16.mxu0 %v10507_v1 }
 0xbde   : > { %9564 = vmatpush3.bf16.msra.mxu0 %v10238_v14  ;;  %v8776_v14 = vld [vmem:[%s11886_s6] ss:$0 sm:$0xff]  ;;  %s11918_s6 = sld [smem:[#allocation37_spill]] }
 0xbdf   : > { %9575 = vmatprep.subr.bf16.mxu0 %v10507_v1 }
 0xbe1   : > { %9566 = vmatmul.mubr.msk.bf16.vlgmr.msra.gmra.mrb[44].mxu0 %vm2163_vm10, %v10911_v31 }
 0xbe2   : > { %9577 = vmatprep.mubr.msk.bf16.mxu0 %vm10508_vm0, %v10507_v1 }
 0xca4   : > { %v3138_v15 = vpop.f32.mrb[36].mxu0 }
 0xca5   : > { %v3144_v17 = vpack.c.bf16 %v3138_v15, %v3138_v15  ;;  %v9537_v18 = vpop.f32.mrb[37].mxu0 }
 0xca6   : > { %v3141_v19 = vpop.f32.mrb[38].mxu0 }
 0xca7   : > { %v9538_v20 = vpop.f32.mrb[39].mxu0  ;;  %9542 = vmatmul.mubr.msk.bf16.vlgmr.msra.gmra.mrb[36].mxu1 %vm1904_vm1, %v3144_v17 }
 0xca8   : > { %9554 = vmatpush3.bf16.msra.mxu1 %v10239_v16  ;;  %9557 = vmatprep.mubr.msk.bf16.mxu1 %vm10508_vm0, %v10507_v1 }
 0xca9   : > { %9555 = vmatprep.subr.bf16.mxu1 %v10507_v1 }
 0xcac   : > { %v3251_v22 = vpop.f32.mrb[40].mxu0  ;;  %9556 = vmatpush3.bf16.msra.mxu1 %v10240_v21 }
 0xcad   : > { %v9551_v23 = vpop.f32.mrb[41].mxu0  ;;  %9569 = vmatprep.subr.bf16.mxu1 %v10507_v1  ;;  %v3252_v53 = vadd.f32 %v8750_v51, %v3251_v22 }
 0xcae   : > { %v3254_v24 = vpop.f32.mrb[42].mxu0 }
 0xcaf   : > { %v9552_v25 = vpop.f32.mrb[43].mxu0  ;;  %9558 = vmatmul.mubr.msk.bf16.vlgmr.msra.gmra.mrb[40].mxu1 %vm2163_vm10, %v10911_v31  ;;  %v3389_v54 = vpack.c.bf16 %v3252_v53, %v3252_v53  ;;  %v8779_v53 = vld [vmem:[%s11893_s23] ss:$0 sm:$0xff]  ;;  %s11901_s23 = sld [smem:[#allocation24_spill]] }
 0xcb0   : > { %9571 = vmatprep.mubr.msk.bf16.mxu1 %vm10508_vm0, %v10507_v1 }
 0xcb4   : > { %v3381_v28 = vpop.f32.mrb[44].mxu0 }
 0xcb5   : > { %v3382_v29 = vadd.f32 %v8768_v26, %v3381_v28  ;;  %v9567_v30 = vpop.f32.mrb[45].mxu0  ;;  %v10241_v28 = vld [vmem:[%s10589_s12] sm:$0xff]  }
 0xcb6   : > { %v3384_v32 = vpop.f32.mrb[46].mxu0  ;;  %v10248_v30 = vld [vmem:[%s11887_s10 + $0x8] sm:$0xff]  }
 0xcb7   : > { %v3449_v33 = vpack.c.bf16 %v3382_v29, %v3382_v29  ;;  %v9568_v35 = vpop.f32.mrb[47].mxu0  ;;  %v10242_v29 = vld [vmem:[%s10589_s12 + $0x8] sm:$0xff]  }
 0xcb9   : > { %v3454_v38 = vsel %vm2398_vm11, %v3449_v33, 0 }
 0xcba   : > { %9576 = vmatpush3.bf16.msra.mxu0 %v3454_v38 }
 0xcbb   : > { %9587 = vmatprep.subr.bf16.mxu0 %v10507_v1 }
 0xd7a   : > { %v3185_v39 = vpop.f32.mrb[36].mxu1 }
 0xd7b   : > { %v3191_v31 = vadd.f32 %v3185_v39, %v11025_v37  ;;  %v9543_v40 = vpop.f32.mrb[37].mxu1  ;;  %v8777_v39 = vld [vmem:[%s11888_s11] ss:$0 sm:$0xff]  ;;  %s11898_s11 = sld [smem:[#allocation22_spill]] }
 0xd7c   : > { %v3188_v42 = vpop.f32.mrb[38].mxu1  ;;  %v8778_v40 = vld [vmem:[%s11889_s15] ss:$0 sm:$0xff]  ;;  %s11899_s15 = sld [smem:[#allocation23_spill]] }
 0xd7d   : > { %v9544_v43 = vpop.f32.mrb[39].mxu1 }
 0xd82   : > { %v3316_v45 = vpop.f32.mrb[40].mxu1 }
 0xd83   : > { %v3317_v46 = vadd.f32 %v8759_v44, %v3316_v45  ;;  %v9559_v47 = vpop.f32.mrb[41].mxu1  ;;  %v10243_v44 = vld [vmem:[%s11890_s16] sm:$0xff]  }
 0xd84   : > { %v3319_v48 = vpop.f32.mrb[42].mxu1  ;;  %v10244_v47 = vld [vmem:[%s11890_s16 + $0x8] sm:$0xff]  }
 0xd85   : > { %v3390_v49 = vpack.c.bf16 %v3317_v46, %v3317_v46  ;;  %v9560_v50 = vpop.f32.mrb[43].mxu1  ;;  %v8665_v46 = vld [vmem:[%s11891_s18] ss:$0 sm:$0xff]  ;;  %s11900_s18 = sld [smem:[#allocation9_spill]] }
 0xd86   : > { %v11116_v48 = vadd.f32 %v8665_v46, %v10928_v34  ;;  %v10245_v50 = vld [vmem:[%s11892_s22] sm:$0xff]   ;;  %v10246_v34 = vld [vmem:[%s11892_s22 + $0x8] sm:$0xff]  }
 0xd87   : > { %v3395_v52 = vsel %vm1904_vm1, %v3390_v49, 0  ;;  %v11119_v49 = vadd.f32 %v8665_v46, %v10930_v36  ;;  %v10249_v36 = vld [vmem:[%s11887_s10 + $0x10] sm:$0xff]  }
 0xd88   : > { %9570 = vmatpush3.bf16.xpose.msra.mxu1 %v3395_v52  ;;  %v10250_v52 = vld [vmem:[%s11887_s10 + $0x18] sm:$0xff]  }
 0xd89   : > { %9581 = vmatprep.subr.bf16.mxu1 %v10507_v1  ;;  %v11125_v51 = vpack.c.bf16 %v11119_v49, %v11116_v48 }
 0xd8f   : > { %9572 = vmatmul.mubr.msk.bf16.vlgmr.msra.gmra.mrb[44].mxu1 %vm1904_vm1, %v3389_v54 }
 0xd90   : > { %9583 = vmatprep.mubr.msk.bf16.mxu1 %vm10508_vm0, %v10507_v1  ;;  %9582 = vmatpush3.bf16.msra.mxu1 %v3501_v4 }
 0xd91   : > { %9595 = vmatprep.subr.bf16.mxu1 %v10507_v1 }
 0xe62   : > { %v3431_v37 = vpop.f32.mrb[44].mxu1 }
 0xe63   : > { %v9573_v55 = vpop.f32.mrb[45].mxu1  ;;  %v3437_v56 = vsel %vm1904_vm1, %v3431_v37, -inf }
 0xe64   : > { %3438 = vmax.xlane.f32.xlu1 %v3437_v56  ;;  %v3434_v57 = vpop.f32.mrb[46].mxu1 }
 0xe65   : > { %v9574_v58 = vpop.f32.mrb[47].mxu1 }
 0xef1   : > { %v3439_v59 = vpop.xlane.xlu1 %3438 }
 0xef2   : > { %v3440_v60 = vsub.f32 %v3431_v37, %v3439_v59  ;;  %v10251_v59 = vld [vmem:[%s11894_s26] sm:$0xff]  }
 0xef4   : > { %v3441_v61 = vmul.f32 1.442695, %v3440_v60 }
 0xef6   : > { %10345 = vpow2.f32 %v3441_v61  ;;  %v8793_v61 = vld [vmem:[%s11895_s0] ss:$0 sm:$0xff] }
 0xf00   : > { %v10346_v62 = vpop.eup %10345 }
 0xf01   : > { %v3443_v63 = vsel %vm1904_vm1, %v10346_v62, 0.0 }
 0xf02   : > { %3444 = vadd.xlane.f32.xlu0 %v3443_v63  ;;  %v10252_v63 = vld [vmem:[%s11894_s26 + $0x8] sm:$0xff]  }
 0xf8f   : > { %v3445_v5 = vpop.xlane.xlu0 %3444 }
 0xf90   : > { %10347 = vrcp.f32 %v3445_v5 }
 0xf9a   : > { %v10348_v6 = vpop.eup %10347 }
 0xf9b   : > { %v3447_v7 = vmul.f32 %v10348_v6, %v10346_v62 }
 0xf9d   : > { %v3448_v8 = vpack.c.bf16 %v3447_v7, %v3447_v7 }
 0xf9f   : > { %9578 = vmatmul.mubr.msk.bf16.vlgmr.msra.gmra.mrb[48].mxu0 %vm1904_vm1, %v3448_v8 }
 0xfa0   : > { %9591 = vmatprep.mubr.msk.bf16.mxu0 %vm10508_vm0, %v10507_v1  ;;  %9588 = vmatpush3.bf16.msra.mxu0 %v10241_v28 }
 0xfa1   : > { %9589 = vmatprep.subr.bf16.mxu0 %v10507_v1 }
 0xfa4   : > { %9590 = vmatpush3.bf16.msra.mxu0 %v10242_v29  ;;  %v10509_v29 = vmov 65535  }
 0xfa5   : > { %9607 = vmatprep.subr.bf16.mxu0 %v10507_v1 }
0x1072   : > { %v3490_v9 = vpop.f32.mrb[48].mxu0 }
0x1073   : > { %v3496_v2 = vpack.c.bf16 %v3490_v9, %v3490_v9  ;;  %v9579_v3 = vpop.f32.mrb[49].mxu0  ;;  %v8797_v9 = vld [vmem:[%s11896_s2] ss:$0 sm:$0xff] }
0x1074   : > { %v3493_v10 = vpop.f32.mrb[50].mxu0 }
0x1075   : > { %v9580_v11 = vpop.f32.mrb[51].mxu0  ;;  %9584 = vmatmul.mubr.msk.bf16.vlgmr.msra.gmra.mrb[48].mxu1 %vm1904_vm1, %v3496_v2 }
0x1076   : > { %9603 = vmatprep.mubr.msk.bf16.mxu1 %vm10508_vm0, %v10507_v1 }
0x1148   : > { %v3537_v12 = vpop.f32.mrb[48].mxu1 }
0x1149   : > { %v3543_v15 = vadd.f32 %v3537_v12, %v3191_v31  ;;  %v9585_v16 = vpop.f32.mrb[49].mxu1 }
0x114a   : > { %v3540_v17 = vpop.f32.mrb[50].mxu1 }
0x114b   : > { %v3551_v18 = vadd.f32 %v8776_v14, %v3543_v15  ;;  %v9586_v19 = vpop.f32.mrb[51].mxu1  ;;  %v10253_v17 = vld [vmem:[%s11890_s16 + $0x10] sm:$0xff]  }
0x114c   : > { %v10255_v19 = vld [vmem:[%s11894_s26 + $0x10] sm:$0xff]  }
0x114d   : > { %v3552_v20 = vadd.f32 %v3551_v18, %v10906_v27  ;;  %v10247_v27 = vld [vmem:[%s11887_s10] sm:$0xff]   ;;  %v10254_v18 = vld [vmem:[%s11890_s16 + $0x18] sm:$0xff]  }
0x114e   : > { %9596 = vmatpush3.bf16.msra.mxu1 %v10247_v27  ;;  %v4069_v27 = vsel %vm2398_vm11, 4294967295, %v10509_v29  ;;  %v8821_v29 = vld [vmem:[%s11896_s2 + $0x1] ss:$0 sm:$0xff] }
0x114f   : > { %v3555_v21 = vsel %vm2163_vm10, %v3552_v20, 0.0  ;;  %9597 = vmatprep.subr.bf16.mxu1 %v10507_v1 }
0x1150   : > { %3556 = vadd.xlane.f32.xlu1 %v3555_v21 }
0x1152   : > { %9598 = vmatpush3.bf16.msra.mxu1 %v10248_v30 }
0x1153   : > { %9599 = vmatprep.subr.bf16.mxu1 %v10507_v1 }
0x1156   : > { %9600 = vmatpush3.bf16.msra.mxu1 %v10249_v36 }
0x1157   : > { %9601 = vmatprep.subr.bf16.mxu1 %v10507_v1 }
0x115a   : > { %9602 = vmatpush3.bf16.msra.mxu1 %v10250_v52 }
0x115b   : > { %9623 = vmatprep.subr.bf16.mxu1 %v10507_v1 }
0x11dd   : > { %v3557_v22 = vpop.xlane.xlu1 %3556 }
0x11de   : > { %v3559_v23 = vmul.f32 0.03125, %v3557_v22 }
0x11e0   : > { %v3560_v24 = vsub.f32 %v3552_v20, %v3559_v23  ;;  %v10256_v20 = vld [vmem:[%s11894_s26 + $0x18] sm:$0xff]  }
0x11e2   : > { %v3561_v25 = vmul.f32 %v3560_v24, %v3560_v24 }
0x11e4   : > { %v3562_v26 = vsel %vm2163_vm10, %v3561_v25, 0.0  ;;  %v8801_v25 = vld [vmem:[%s11897_s7] ss:$0 sm:$0xff] }
0x11e5   : > { %3563 = vadd.xlane.f32.xlu0 %v3562_v26 }
0x1272   : > { %v3564_v32 = vpop.xlane.xlu0 %3563 }
0x1273   : > { %v3565_v33 = vmul.f32 0.03125, %v3564_v32 }
0x1275   : > { %v3566_v35 = vadd.f32 1e-05, %v3565_v33 }
0x1277   : > { %10349 = vrsqrt.f32 %v3566_v35 }
0x1281   : > { %v10350_v38 = vpop.eup %10349 }
0x1282   : > { %v3568_v31 = vmul.f32 %v10350_v38, %v3560_v24  ;;  %v11182_v38 = vsel %vm4068_vm13, %v4069_v27, 0 }
0x1284   : > { %v3575_v42 = vmul.f32 %v8777_v39, %v3568_v31 }
0x1286   : > { %v11105_v43 = vadd.f32 %v8778_v40, %v3575_v42 }
0x1288   : > { %v3587_v45 = vpack.c.bf16 %v11105_v43, %v11105_v43 }
0x128a   : > { %9592 = vmatmul.mubr.msk.bf16.vlgmr.msra.gmra.mrb[52].mxu0 %vm2163_vm10, %v3587_v45 }
0x128b   : > { %9608 = vmatpush3.bf16.msra.mxu0 %v10243_v44  ;;  %9611 = vmatprep.mubr.msk.bf16.mxu0 %vm10508_vm0, %v10507_v1 }
0x128c   : > { %9609 = vmatprep.subr.bf16.mxu0 %v10507_v1 }
0x128f   : > { %9610 = vmatpush3.bf16.msra.mxu0 %v10244_v47 }
0x1290   : > { %9615 = vmatprep.subr.bf16.mxu0 %v10507_v1 }
0x1292   : > { %9612 = vmatmul.mubr.msk.bf16.vlgmr.msra.gmra.mrb[56].mxu0 %vm2163_vm10, %v11125_v51 }
0x1293   : > { %9616 = vmatpush3.bf16.msra.mxu0 %v10245_v50  ;;  %9619 = vmatprep.mubr.msk.bf16.mxu0 %vm10508_vm0, %v10507_v1  ;;  %v8812_v50 = vld [vmem:[%s11895_s0 + $0x1] ss:$0 sm:$0xff] }
0x1294   : > { %9617 = vmatprep.subr.bf16.mxu0 %v10507_v1 }
0x1297   : > { %9618 = vmatpush3.bf16.msra.mxu0 %v10246_v34 }
0x1298   : > { %9631 = vmatprep.subr.bf16.mxu0 %v10507_v1 }
0x129a   : > { %9620 = vmatmul.mubr.msk.bf16.vlgmr.msra.gmra.mrb[60].mxu0 %vm2163_vm10, %v11125_v51 }
0x129b   : > { %9633 = vmatprep.mubr.msk.bf16.mxu0 %vm10508_vm0, %v10507_v1 }
0x135d   : > { %v3644_v54 = vpop.f32.mrb[52].mxu0 }
0x135e   : > { %v3645_v37 = vadd.f32 %v8779_v53, %v3644_v54  ;;  %v9593_v55 = vpop.f32.mrb[53].mxu0 }
0x135f   : > { %v3647_v56 = vpop.f32.mrb[54].mxu0 }
0x1360   : > { %v3650_v57 = vmax.f32 %v3645_v37, 0.0  ;;  %v9594_v58 = vpop.f32.mrb[55].mxu0  ;;  %v8830_v56 = vld [vmem:[%s11897_s7 + $0x1] ss:$0 sm:$0xff] }
0x1362   : > { %v3659_v60 = vpack.c.bf16 %v3650_v57, %v3650_v57 }
0x1364   : > { %9604 = vmatmul.mubr.msk.bf16.vlgmr.msra.gmra.mrb[52].mxu1 %vm3691_vm12, %v3659_v60 }
0x1365   : > { %v3855_v62 = vpop.f32.mrb[56].mxu0  ;;  %9624 = vmatpush3.bf16.msra.mxu1 %v10251_v59  ;;  %9627 = vmatprep.mubr.msk.bf16.mxu1 %vm10508_vm0, %v10507_v1 }
0x1366   : > { %v9613_v0 = vpop.f32.mrb[57].mxu0  ;;  %9625 = vmatprep.subr.bf16.mxu1 %v10507_v1  ;;  %v3856_v5 = vadd.f32 %v8793_v61, %v3855_v62 }
0x1367   : > { %v3858_v4 = vpop.f32.mrb[58].mxu0 }
0x1368   : > { %v3859_v6 = vadd.f32 %v8793_v61, %v3858_v4  ;;  %v9614_v7 = vpop.f32.mrb[59].mxu0 }
0x1369   : > { %9626 = vmatpush3.bf16.msra.mxu1 %v10252_v63 }
0x136a   : > { %v3991_v8 = vpack.c.bf16 %v3859_v6, %v3856_v5  ;;  %9637 = vmatprep.subr.bf16.mxu1 %v10507_v1 }
0x136c   : > { %9628 = vmatmul.mubr.msk.bf16.vlgmr.msra.gmra.mrb[56].mxu1 %vm2163_vm10, %v11125_v51 }
0x136d   : > { %v3919_v2 = vpop.f32.mrb[60].mxu0  ;;  %9639 = vmatprep.mubr.msk.bf16.mxu1 %vm10508_vm0, %v10507_v1 }
0x136e   : > { %v9621_v3 = vpop.f32.mrb[61].mxu0  ;;  %v3920_v11 = vadd.f32 %v8797_v9, %v3919_v2 }
0x136f   : > { %v3922_v10 = vpop.f32.mrb[62].mxu0 }
0x1370   : > { %v3923_v12 = vadd.f32 %v8797_v9, %v3922_v10  ;;  %v9622_v14 = vpop.f32.mrb[63].mxu0 }
0x1372   : > { %v3992_v15 = vpack.c.bf16 %v3923_v12, %v3920_v11 }
0x1374   : > { %v3997_v16 = vsel %vm1904_vm1, %v3992_v15, 0 }
0x1375   : > { %9632 = vmatpush3.bf16.xpose.msra.mxu0 %v3997_v16 }
0x1376   : > { %9643 = vmatprep.subr.bf16.mxu0 %v10507_v1 }
0x137c   : > { %9634 = vmatmul.mubr.msk.bf16.vlgmr.msra.gmra.mrb[64].mxu0 %vm1904_vm1, %v3991_v8 }
0x137d   : > { %9644 = vmatpush3.bf16.msra.mxu0 %v10253_v17  ;;  %9647 = vmatprep.mubr.msk.bf16.mxu0 %vm10508_vm0, %v10507_v1 }
0x137e   : > { %9645 = vmatprep.subr.bf16.mxu0 %v10507_v1 }
0x1381   : > { %9646 = vmatpush3.bf16.msra.mxu0 %v10254_v18 }
0x1382   : > { %9659 = vmatprep.subr.bf16.mxu0 %v10507_v1 }
0x1384   : > { %9648 = vmatmul.mubr.msk.bf16.vlgmr.msra.gmra.mrb[68].mxu0 %vm2163_vm10, %v11125_v51 }
0x1385   : > { %9660 = vmatpush3.bf16.msra.mxu0 %v10255_v19  ;;  %9663 = vmatprep.mubr.msk.bf16.mxu0 %vm10508_vm0, %v10507_v1  ;;  %v10257_v19 = vld [vmem:[%s11892_s22 + $0x10] sm:$0xff]  }
0x1386   : > { %9661 = vmatprep.subr.bf16.mxu0 %v10507_v1 }
0x1389   : > { %9662 = vmatpush3.bf16.msra.mxu0 %v10256_v20 }
0x138a   : > { %9673 = vmatprep.subr.bf16.mxu0 %v10507_v1 }
0x138c   : > { %9664 = vmatmul.mubr.msk.bf16.vlgmr.msra.gmra.mrb[72].mxu0 %vm2163_vm10, %v11125_v51 }
0x138d   : > { %9675 = vmatprep.mubr.msk.bf16.mxu0 %vm10508_vm0, %v10507_v1 }
0x1437   : > { %v11178_v21 = vpop.f32.mrb[52].mxu1 }
0x1438   : > { %v9605_v22 = vpop.f32.mrb[53].mxu1 }
0x1439   : > { %v3732_v23 = vpop.f32.mrb[54].mxu1  ;;  %v10258_v22 = vld [vmem:[%s11892_s22 + $0x18] sm:$0xff]  }
0x143a   : > { %v9606_v24 = vpop.f32.mrb[55].mxu1 }
0x143f   : > { %v3983_v26 = vpop.f32.mrb[56].mxu1 }
0x1440   : > { %v9629_v28 = vpop.f32.mrb[57].mxu1  ;;  %v3984_v32 = vadd.f32 %v8801_v25, %v3983_v26 }
0x1441   : > { %v3986_v30 = vpop.f32.mrb[58].mxu1 }
0x1442   : > { %v3987_v33 = vadd.f32 %v8801_v25, %v3986_v30  ;;  %v9630_v35 = vpop.f32.mrb[59].mxu1 }
0x1444   : > { %v4064_v39 = vpack.c.bf16 %v3987_v33, %v3984_v32 }
0x1446   : > { %v4072_v31 = vand.u32 %v11182_v38, %v4064_v39 }
0x1448   : > { %9638 = vmatpush3.bf16.msra.mxu1 %v4072_v31 }
0x1449   : > { %9651 = vmatprep.subr.bf16.mxu1 %v10507_v1 }
0x144f   : > { %v4033_v40 = vpop.f32.mrb[64].mxu0 }
0x1450   : > { %v9635_v42 = vpop.f32.mrb[65].mxu0  ;;  %v4040_v44 = vsel %vm2024_vm2, %v4033_v40, -inf }
0x1451   : > { %4041 = vmax.xlane.f32.xlu1 %v4040_v44  ;;  %v4036_v45 = vpop.f32.mrb[66].mxu0 }
0x1452   : > { %v9636_v46 = vpop.f32.mrb[67].mxu0  ;;  %v4044_v47 = vsel %vm4043_vm14, %v4036_v45, -inf }
0x1453   : > { %4045 = vmax.xlane.f32.xlu0 %v4044_v47 }
0x1457   : > { %v4175_v34 = vpop.f32.mrb[68].mxu0 }
0x1458   : > { %v9649_v36 = vpop.f32.mrb[69].mxu0  ;;  %v11189_v53 = vadd.f32 %v8812_v50, %v4175_v34 }
0x1459   : > { %v4178_v52 = vpop.f32.mrb[70].mxu0 }
0x145a   : > { %v11191_v54 = vadd.f32 %v8812_v50, %v4178_v52  ;;  %v9650_v37 = vpop.f32.mrb[71].mxu0 }
0x145c   : > { %v4316_v55 = vpack.c.bf16 %v11191_v54, %v11189_v53 }
0x145f   : > { %v4307_v57 = vpop.f32.mrb[72].mxu0 }
0x1460   : > { %v9665_v58 = vpop.f32.mrb[73].mxu0  ;;  %v4308_v60 = vadd.f32 %v8830_v56, %v4307_v57 }
0x1461   : > { %v4310_v59 = vpop.f32.mrb[74].mxu0 }
0x1462   : > { %v4311_v61 = vadd.f32 %v8830_v56, %v4310_v59  ;;  %v9666_v62 = vpop.f32.mrb[75].mxu0  ;;  %v8834_v59 = vld [vmem:[%s11898_s11 + $0x4] sm:$0xf] }
0x1464   : > { %v4388_v63 = vpack.c.bf16 %v4311_v61, %v4308_v60  ;;  %v4441_v60 = vsel %vm2398_vm11, %v8834_v59, 0 }
0x1466   : > { %v4393_v0 = vand.u32 %v4388_v63, %v11182_v38 }
0x1468   : > { %9674 = vmatpush3.bf16.msra.mxu0 %v4393_v0 }
0x1469   : > { %9685 = vmatprep.subr.bf16.mxu0 %v10507_v1 }
0x14de   : > { %v4042_v4 = vpop.xlane.xlu1 %4041 }
0x14df   : > { %v4047_v5 = vsub.f32 %v4033_v40, %v4042_v4  ;;  %v3990_v4 = vld [vmem:[%s11898_s11] sm:$0xf] }
0x14e0   : > { %v4046_v6 = vpop.xlane.xlu0 %4045 }
0x14e1   : > { %v4049_v7 = vmul.f32 1.442695, %v4047_v5  ;;  %v4048_v8 = vsub.f32 %v4036_v45, %v4046_v6 }
0x14e3   : > { %10351 = vpow2.f32 %v4049_v7  ;;  %v4051_v9 = vmul.f32 1.442695, %v4048_v8  ;;  %v4488_v8 = vsel %vm2398_vm11, %v3990_v4, 0 }
0x14e5   : > { %10353 = vpow2.f32 %v4051_v9  ;;  %v10259_v9 = vld [vmem:[%s11892_s22 + $0x20] sm:$0xff]  }
0x14ed   : > { %v10352_v2 = vpop.eup %10351 }
0x14ee   : > { %v4053_v3 = vsel %vm2024_vm2, %v10352_v2, 0.0 }
0x14ef   : > { %v10354_v10 = vpop.eup %10353  ;;  %4054 = vadd.xlane.f32.xlu1 %v4053_v3 }
0x14f0   : > { %v4056_v11 = vsel %vm4043_vm14, %v10354_v10, 0.0 }
0x14f1   : > { %4057 = vadd.xlane.f32.xlu0 %v4056_v11 }
0x157c   : > { %v4055_v12 = vpop.xlane.xlu1 %4054 }
0x157d   : > { %10355 = vrcp.f32 %v4055_v12  ;;  %v10261_v12 = vld [vmem:[%s11890_s16 + $0x20] sm:$0xff]  }
0x157e   : > { %v4058_v14 = vpop.xlane.xlu0 %4057 }
0x157f   : > { %10357 = vrcp.f32 %v4058_v14 }
0x1587   : > { %v10356_v15 = vpop.eup %10355 }
0x1588   : > { %v4061_v17 = vmul.f32 %v10356_v15, %v10352_v2  ;;  %v10260_v2 = vld [vmem:[%s11892_s22 + $0x28] sm:$0xff]  }
0x1589   : > { %v10358_v16 = vpop.eup %10357 }
0x158a   : > { %v4062_v18 = vmul.f32 %v10358_v16, %v10354_v10  ;;  %v10262_v16 = vld [vmem:[%s11890_s16 + $0x28] sm:$0xff]  }
0x158c   : > { %v4063_v20 = vpack.c.bf16 %v4062_v18, %v4061_v17 }
0x158e   : > { %9640 = vmatmul.mubr.msk.bf16.vlgmr.msra.gmra.mrb[60].mxu1 %vm2024_vm2, %v4063_v20  ;;  %v10263_v20 = vld [vmem:[%s11894_s26 + $0x20] sm:$0xff]  }
0x158f   : > { %9652 = vmatpush3.bf16.msra.mxu1 %v10257_v19  ;;  %9655 = vmatprep.mubr.msk.bf16.mxu1 %vm10508_vm0, %v10507_v1 }
0x1590   : > { %9653 = vmatprep.subr.bf16.mxu1 %v10507_v1 }
0x1593   : > { %9654 = vmatpush3.bf16.msra.mxu1 %v10258_v22 }
0x1594   : > { %9667 = vmatprep.subr.bf16.mxu1 %v10507_v1 }
0x1596   : > { %9656 = vmatmul.mubr.msk.bf16.vlgmr.msra.gmra.mrb[64].mxu1 %vm2163_vm10, %v11125_v51 }
0x1597   : > { %9669 = vmatprep.mubr.msk.bf16.mxu1 %vm10508_vm0, %v10507_v1 }
0x1661   : > { %v4108_v23 = vpop.f32.mrb[60].mxu1 }
0x1662   : > { %v9641_v24 = vpop.f32.mrb[61].mxu1 }
0x1663   : > { %v4111_v25 = vpop.f32.mrb[62].mxu1  ;;  %v8853_v24 = vld [vmem:[%s11896_s2 + $0x2] ss:$0 sm:$0xff] }
0x1664   : > { %v4115_v26 = vpack.c.bf16 %v4111_v25, %v4108_v23  ;;  %v9642_v28 = vpop.f32.mrb[63].mxu1  ;;  %v10264_v23 = vld [vmem:[%s11894_s26 + $0x28] sm:$0xff]  }
0x1669   : > { %v4241_v27 = vpop.f32.mrb[64].mxu1 }
0x166a   : > { %v9657_v30 = vpop.f32.mrb[65].mxu1  ;;  %v4242_v33 = vadd.f32 %v8821_v29, %v4241_v27 }
0x166b   : > { %v4244_v32 = vpop.f32.mrb[66].mxu1 }
0x166c   : > { %v4245_v35 = vadd.f32 %v8821_v29, %v4244_v32  ;;  %v9658_v39 = vpop.f32.mrb[67].mxu1 }
0x166e   : > { %v4317_v31 = vpack.c.bf16 %v4245_v35, %v4242_v33 }
0x1670   : > { %v4322_v40 = vsel %vm1904_vm1, %v4317_v31, 0 }
0x1671   : > { %9668 = vmatpush3.bf16.xpose.msra.mxu1 %v4322_v40 }
0x1672   : > { %9679 = vmatprep.subr.bf16.mxu1 %v10507_v1 }
0x1678   : > { %9670 = vmatmul.mubr.msk.bf16.vlgmr.msra.gmra.mrb[68].mxu1 %vm1904_vm1, %v4316_v55 }
0x1679   : > { %9681 = vmatprep.mubr.msk.bf16.mxu1 %vm10508_vm0, %v10507_v1  ;;  %9680 = vmatpush3.bf16.msra.mxu1 %v4441_v60 }
0x167a   : > { %9691 = vmatprep.subr.bf16.mxu1 %v10507_v1 }
0x174b   : > { %v4358_v42 = vpop.f32.mrb[68].mxu1 }
0x174c   : > { %v9671_v44 = vpop.f32.mrb[69].mxu1  ;;  %v4365_v45 = vsel %vm2024_vm2, %v4358_v42, -inf }
0x174d   : > { %4366 = vmax.xlane.f32.xlu1 %v4365_v45  ;;  %v4361_v46 = vpop.f32.mrb[70].mxu1  ;;  %v8844_v45 = vld [vmem:[%s11895_s0 + $0x2] ss:$0 sm:$0xff] }
0x174e   : > { %v9672_v47 = vpop.f32.mrb[71].mxu1  ;;  %v4368_v50 = vsel %vm4043_vm14, %v4361_v46, -inf }
0x174f   : > { %4369 = vmax.xlane.f32.xlu0 %v4368_v50 }
0x17da   : > { %v4367_v34 = vpop.xlane.xlu1 %4366 }
0x17db   : > { %v4371_v36 = vsub.f32 %v4358_v42, %v4367_v34 }
0x17dc   : > { %v4370_v52 = vpop.xlane.xlu0 %4369 }
0x17dd   : > { %v4373_v53 = vmul.f32 1.442695, %v4371_v36  ;;  %v4372_v54 = vsub.f32 %v4361_v46, %v4370_v52 }
0x17df   : > { %10359 = vpow2.f32 %v4373_v53  ;;  %v4375_v37 = vmul.f32 1.442695, %v4372_v54  ;;  %v8862_v54 = vld [vmem:[%s11897_s7 + $0x2] ss:$0 sm:$0xff] }
0x17e1   : > { %10361 = vpow2.f32 %v4375_v37 }
0x17e9   : > { %v10360_v55 = vpop.eup %10359 }
0x17ea   : > { %v4377_v56 = vsel %vm2024_vm2, %v10360_v55, 0.0 }
0x17eb   : > { %v10362_v57 = vpop.eup %10361  ;;  %4378 = vadd.xlane.f32.xlu1 %v4377_v56 }
0x17ec   : > { %v4380_v58 = vsel %vm4043_vm14, %v10362_v57, 0.0 }
0x17ed   : > { %4381 = vadd.xlane.f32.xlu0 %v4380_v58 }
0x1878   : > { %v4379_v61 = vpop.xlane.xlu1 %4378 }
0x1879   : > { %10363 = vrcp.f32 %v4379_v61 }
0x187a   : > { %v4382_v62 = vpop.xlane.xlu0 %4381 }
0x187b   : > { %10365 = vrcp.f32 %v4382_v62 }
0x1883   : > { %v10364_v63 = vpop.eup %10363 }
0x1884   : > { %v4385_v5 = vmul.f32 %v10364_v63, %v10360_v55 }
0x1885   : > { %v10366_v0 = vpop.eup %10365 }
0x1886   : > { %v4386_v6 = vmul.f32 %v10366_v0, %v10362_v57 }
0x1888   : > { %v4387_v7 = vpack.c.bf16 %v4386_v6, %v4385_v5 }
0x188a   : > { %9676 = vmatmul.mubr.msk.bf16.vlgmr.msra.gmra.mrb[76].mxu0 %vm2024_vm2, %v4387_v7 }
0x188b   : > { %9686 = vmatpush3.bf16.msra.mxu0 %v4488_v8  ;;  %9687 = vmatprep.mubr.msk.bf16.mxu0 %vm10508_vm0, %v10507_v1 }
0x188c   : > { %9699 = vmatprep.subr.bf16.mxu0 %v10507_v1 }
0x1892   : > { %9688 = vmatmul.mubr.msk.bf16.vlgmr.msra.gmra.mrb[80].mxu0 %vm1904_vm1, %v4115_v26 }
0x1893   : > { %9700 = vmatpush3.bf16.msra.mxu0 %v10259_v9  ;;  %9703 = vmatprep.mubr.msk.bf16.mxu0 %vm10508_vm0, %v10507_v1 }
0x1894   : > { %9701 = vmatprep.subr.bf16.mxu0 %v10507_v1 }
0x1897   : > { %9702 = vmatpush3.bf16.msra.mxu0 %v10260_v2 }
0x1898   : > { %9715 = vmatprep.subr.bf16.mxu0 %v10507_v1 }
0x189a   : > { %9704 = vmatmul.mubr.msk.bf16.vlgmr.msra.gmra.mrb[84].mxu0 %vm2163_vm10, %v11125_v51 }
0x189b   : > { %9717 = vmatprep.mubr.msk.bf16.mxu0 %vm10508_vm0, %v10507_v1 }
0x195d   : > { %v4429_v3 = vpop.f32.mrb[76].mxu0 }
0x195e   : > { %v9677_v10 = vpop.f32.mrb[77].mxu0 }
0x195f   : > { %v4432_v11 = vpop.f32.mrb[78].mxu0 }
0x1960   : > { %v4436_v14 = vpack.c.bf16 %v4432_v11, %v4429_v3  ;;  %v9678_v15 = vpop.f32.mrb[79].mxu0 }
0x1962   : > { %9682 = vmatmul.mubr.msk.bf16.vlgmr.msra.gmra.mrb[72].mxu1 %vm1904_vm1, %v4436_v14 }
0x1963   : > { %9692 = vmatpush3.bf16.msra.mxu1 %v10261_v12  ;;  %9695 = vmatprep.mubr.msk.bf16.mxu1 %vm10508_vm0, %v10507_v1 }
0x1964   : > { %9693 = vmatprep.subr.bf16.mxu1 %v10507_v1 }
0x1965   : > { %v4524_v17 = vpop.f32.mrb[80].mxu0 }
0x1966   : > { %v9689_v18 = vpop.f32.mrb[81].mxu0 }
0x1967   : > { %v4527_v19 = vpop.f32.mrb[82].mxu0  ;;  %9694 = vmatpush3.bf16.msra.mxu1 %v10262_v16  ;;  %v8866_v16 = vld [vmem:[%s11898_s11 + $0x8] sm:$0xf] }
0x1968   : > { %v9690_v22 = vpop.f32.mrb[83].mxu0  ;;  %9707 = vmatprep.subr.bf16.mxu1 %v10507_v1 }
0x196a   : > { %9696 = vmatmul.mubr.msk.bf16.vlgmr.msra.gmra.mrb[76].mxu1 %vm2163_vm10, %v11125_v51 }
0x196b   : > { %9708 = vmatpush3.bf16.msra.mxu1 %v10263_v20  ;;  %9711 = vmatprep.mubr.msk.bf16.mxu1 %vm10508_vm0, %v10507_v1 }
0x196c   : > { %9709 = vmatprep.subr.bf16.mxu1 %v10507_v1 }
0x196d   : > { %v4656_v25 = vpop.f32.mrb[84].mxu0 }
0x196e   : > { %v9705_v26 = vpop.f32.mrb[85].mxu0  ;;  %v4657_v29 = vadd.f32 %v8853_v24, %v4656_v25  ;;  %v10265_v25 = vld [vmem:[%s11890_s16 + $0x30] sm:$0xff]  }
0x196f   : > { %v4659_v28 = vpop.f32.mrb[86].mxu0  ;;  %9710 = vmatpush3.bf16.msra.mxu1 %v10264_v23 }
0x1970   : > { %v4660_v27 = vadd.f32 %v8853_v24, %v4659_v28  ;;  %v9706_v30 = vpop.f32.mrb[87].mxu0  ;;  %9721 = vmatprep.subr.bf16.mxu1 %v10507_v1  ;;  %v10266_v28 = vld [vmem:[%s11890_s16 + $0x38] sm:$0xff]  }
0x1972   : > { %v4732_v32 = vpack.c.bf16 %v4660_v27, %v4657_v29  ;;  %9712 = vmatmul.mubr.msk.bf16.vlgmr.msra.gmra.mrb[80].mxu1 %vm2163_vm10, %v11125_v51  ;;  %v10267_v29 = vld [vmem:[%s11894_s26 + $0x30] sm:$0xff]   ;;  %v10268_v27 = vld [vmem:[%s11894_s26 + $0x38] sm:$0xff]  }
0x1973   : > { %9723 = vmatprep.mubr.msk.bf16.mxu1 %vm10508_vm0, %v10507_v1 }
0x1974   : > { %v4737_v33 = vsel %vm1904_vm1, %v4732_v32, 0 }
0x1975   : > { %9716 = vmatpush3.bf16.xpose.msra.mxu0 %v4737_v33 }
0x1976   : > { %9727 = vmatprep.subr.bf16.mxu0 %v10507_v1 }
0x1a35   : > { %v4477_v35 = vpop.f32.mrb[72].mxu1 }
0x1a36   : > { %v11263_v39 = vadd.f32 %v4524_v17, %v4477_v35  ;;  %v9683_v31 = vpop.f32.mrb[73].mxu1  ;;  %v4856_v17 = vsel %vm2398_vm11, %v8866_v16, 0  ;;  %v10269_v35 = vld [vmem:[%s11892_s22 + $0x30] sm:$0xff]  }
0x1a37   : > { %v4480_v40 = vpop.f32.mrb[74].mxu1 }
0x1a38   : > { %v11265_v42 = vadd.f32 %v4527_v19, %v4480_v40  ;;  %v9684_v44 = vpop.f32.mrb[75].mxu1 }
0x1a39   : > { %v10270_v44 = vld [vmem:[%s11892_s22 + $0x38] sm:$0xff]  }
0x1a3d   : > { %v4590_v46 = vpop.f32.mrb[76].mxu1 }
0x1a3e   : > { %v9697_v47 = vpop.f32.mrb[77].mxu1  ;;  %v4591_v34 = vadd.f32 %v8844_v45, %v4590_v46 }
0x1a3f   : > { %v4593_v50 = vpop.f32.mrb[78].mxu1 }
0x1a40   : > { %v4594_v36 = vadd.f32 %v8844_v45, %v4593_v50  ;;  %v9698_v52 = vpop.f32.mrb[79].mxu1  ;;  %v8875_v45 = vld [vmem:[%s11895_s0 + $0x3] ss:$0 sm:$0xff]  ;;  %s11904_s0 = sld [smem:[#allocation29_spill]] }
0x1a42   : > { %v4731_v53 = vpack.c.bf16 %v4594_v36, %v4591_v34 }
0x1a44   : > { %9718 = vmatmul.mubr.msk.bf16.vlgmr.msra.gmra.mrb[88].mxu0 %vm1904_vm1, %v4731_v53 }
0x1a45   : > { %v4722_v37 = vpop.f32.mrb[80].mxu1  ;;  %9729 = vmatprep.mubr.msk.bf16.mxu0 %vm10508_vm0, %v10507_v1  ;;  %9728 = vmatpush3.bf16.msra.mxu0 %v4856_v17 }
0x1a46   : > { %v9713_v55 = vpop.f32.mrb[81].mxu1  ;;  %v4723_v57 = vadd.f32 %v8862_v54, %v4722_v37  ;;  %9741 = vmatprep.subr.bf16.mxu0 %v10507_v1 }
0x1a47   : > { %v4725_v56 = vpop.f32.mrb[82].mxu1 }
0x1a48   : > { %v4726_v58 = vadd.f32 %v8862_v54, %v4725_v56  ;;  %v9714_v59 = vpop.f32.mrb[83].mxu1  ;;  %v8893_v54 = vld [vmem:[%s11897_s7 + $0x3] ss:$0 sm:$0xff]  ;;  %s11919_s7 = sld [smem:[#allocation39_spill]] }
0x1a4a   : > { %v4803_v60 = vpack.c.bf16 %v4726_v58, %v4723_v57 }
0x1a4c   : > { %v4808_v61 = vand.u32 %v4803_v60, %v11182_v38 }
0x1a4e   : > { %9722 = vmatpush3.bf16.msra.mxu1 %v4808_v61 }
0x1a4f   : > { %9733 = vmatprep.subr.bf16.mxu1 %v10507_v1 }
0x1b17   : > { %v4773_v62 = vpop.f32.mrb[88].mxu0 }
0x1b18   : > { %v9719_v63 = vpop.f32.mrb[89].mxu0  ;;  %v4780_v0 = vsel %vm2024_vm2, %v4773_v62, -inf }
0x1b19   : > { %4781 = vmax.xlane.f32.xlu1 %v4780_v0  ;;  %v4776_v4 = vpop.f32.mrb[90].mxu0 }
0x1b1a   : > { %v9720_v5 = vpop.f32.mrb[91].mxu0  ;;  %v4783_v6 = vsel %vm4043_vm14, %v4776_v4, -inf }
0x1b1b   : > { %4784 = vmax.xlane.f32.xlu0 %v4783_v6  ;;  %v8884_v6 = vld [vmem:[%s11896_s2 + $0x3] ss:$0 sm:$0xff]  ;;  %s11905_s2 = sld [smem:[#allocation25_spill]] }
0x1ba6   : > { %v4782_v7 = vpop.xlane.xlu1 %4781 }
0x1ba7   : > { %v4786_v8 = vsub.f32 %v4773_v62, %v4782_v7 }
0x1ba8   : > { %v4785_v9 = vpop.xlane.xlu0 %4784 }
0x1ba9   : > { %v4788_v2 = vmul.f32 1.442695, %v4786_v8  ;;  %v4787_v3 = vsub.f32 %v4776_v4, %v4785_v9 }
0x1bab   : > { %10367 = vpow2.f32 %v4788_v2  ;;  %v4790_v10 = vmul.f32 1.442695, %v4787_v3 }
0x1bad   : > { %10369 = vpow2.f32 %v4790_v10 }
0x1bb5   : > { %v10368_v11 = vpop.eup %10367 }
0x1bb6   : > { %v4792_v12 = vsel %vm2024_vm2, %v10368_v11, 0.0 }
0x1bb7   : > { %v10370_v14 = vpop.eup %10369  ;;  %4793 = vadd.xlane.f32.xlu1 %v4792_v12 }
0x1bb8   : > { %v4795_v15 = vsel %vm4043_vm14, %v10370_v14, 0.0 }
0x1bb9   : > { %4796 = vadd.xlane.f32.xlu0 %v4795_v15 }
0x1c44   : > { %v4794_v18 = vpop.xlane.xlu1 %4793 }
0x1c45   : > { %10371 = vrcp.f32 %v4794_v18 }
0x1c46   : > { %v4797_v19 = vpop.xlane.xlu0 %4796 }
0x1c47   : > { %10373 = vrcp.f32 %v4797_v19 }
0x1c4f   : > { %v10372_v20 = vpop.eup %10371 }
0x1c50   : > { %v4800_v23 = vmul.f32 %v10372_v20, %v10368_v11 }
0x1c51   : > { %v10374_v22 = vpop.eup %10373 }
0x1c52   : > { %v4801_v24 = vmul.f32 %v10374_v22, %v10370_v14 }
0x1c54   : > { %v4802_v26 = vpack.c.bf16 %v4801_v24, %v4800_v23 }
0x1c56   : > { %9724 = vmatmul.mubr.msk.bf16.vlgmr.msra.gmra.mrb[84].mxu1 %vm2024_vm2, %v4802_v26 }
0x1c57   : > { %9734 = vmatpush3.bf16.msra.mxu1 %v10265_v25  ;;  %9737 = vmatprep.mubr.msk.bf16.mxu1 %vm10508_vm0, %v10507_v1 }
0x1c58   : > { %9735 = vmatprep.subr.bf16.mxu1 %v10507_v1 }
0x1c5b   : > { %9736 = vmatpush3.bf16.msra.mxu1 %v10266_v28 }
0x1c5c   : > { %9749 = vmatprep.subr.bf16.mxu1 %v10507_v1 }
0x1c5e   : > { %9738 = vmatmul.mubr.msk.bf16.vlgmr.msra.gmra.mrb[88].mxu1 %vm2163_vm10, %v11125_v51 }
0x1c5f   : > { %9750 = vmatpush3.bf16.msra.mxu1 %v10267_v29  ;;  %9753 = vmatprep.mubr.msk.bf16.mxu1 %vm10508_vm0, %v10507_v1 }
0x1c60   : > { %9751 = vmatprep.subr.bf16.mxu1 %v10507_v1 }
0x1c63   : > { %9752 = vmatpush3.bf16.msra.mxu1 %v10268_v27  ;;  %v8897_v27 = vld [vmem:[%s11898_s11 + $0xc] sm:$0xf] }
0x1c64   : > { %9763 = vmatprep.subr.bf16.mxu1 %v10507_v1 }
0x1c66   : > { %9754 = vmatmul.mubr.msk.bf16.vlgmr.msra.gmra.mrb[92].mxu1 %vm2163_vm10, %v11125_v51 }
0x1c67   : > { %9765 = vmatprep.mubr.msk.bf16.mxu1 %vm10508_vm0, %v10507_v1 }
0x1d29   : > { %v4844_v30 = vpop.f32.mrb[84].mxu1 }
0x1d2a   : > { %v9725_v32 = vpop.f32.mrb[85].mxu1 }
0x1d2b   : > { %v4847_v33 = vpop.f32.mrb[86].mxu1 }
0x1d2c   : > { %v4851_v31 = vpack.c.bf16 %v4847_v33, %v4844_v30  ;;  %v9726_v40 = vpop.f32.mrb[87].mxu1  ;;  %v5226_v30 = vsel %vm2398_vm11, %v8897_v27, 0 }
0x1d2e   : > { %9730 = vmatmul.mubr.msk.bf16.vlgmr.msra.gmra.mrb[92].mxu0 %vm1904_vm1, %v4851_v31 }
0x1d2f   : > { %9742 = vmatpush3.bf16.msra.mxu0 %v10269_v35  ;;  %9745 = vmatprep.mubr.msk.bf16.mxu0 %vm10508_vm0, %v10507_v1 }
0x1d30   : > { %9743 = vmatprep.subr.bf16.mxu0 %v10507_v1 }
0x1d31   : > { %v4960_v46 = vpop.f32.mrb[88].mxu1 }
0x1d32   : > { %v9739_v47 = vpop.f32.mrb[89].mxu1  ;;  %v4961_v34 = vadd.f32 %v8875_v45, %v4960_v46 }
0x1d33   : > { %v4963_v50 = vpop.f32.mrb[90].mxu1  ;;  %9744 = vmatpush3.bf16.msra.mxu0 %v10270_v44 }
0x1d34   : > { %v4964_v36 = vadd.f32 %v8875_v45, %v4963_v50  ;;  %v9740_v52 = vpop.f32.mrb[91].mxu1  ;;  %9757 = vmatprep.subr.bf16.mxu0 %v10507_v1 }
0x1d36   : > { %v5101_v53 = vpack.c.bf16 %v4964_v36, %v4961_v34  ;;  %9746 = vmatmul.mubr.msk.bf16.vlgmr.msra.gmra.mrb[96].mxu0 %vm2163_vm10, %v11125_v51 }
0x1d37   : > { %9759 = vmatprep.mubr.msk.bf16.mxu0 %vm10508_vm0, %v10507_v1 }
0x1d39   : > { %v5092_v37 = vpop.f32.mrb[92].mxu1 }
0x1d3a   : > { %v9755_v55 = vpop.f32.mrb[93].mxu1  ;;  %v5093_v57 = vadd.f32 %v8893_v54, %v5092_v37 }
0x1d3b   : > { %v5095_v56 = vpop.f32.mrb[94].mxu1 }
0x1d3c   : > { %v5096_v58 = vadd.f32 %v8893_v54, %v5095_v56  ;;  %v9756_v59 = vpop.f32.mrb[95].mxu1 }
0x1d3e   : > { %v5173_v60 = vpack.c.bf16 %v5096_v58, %v5093_v57 }
0x1d40   : > { %v5178_v61 = vand.u32 %v5173_v60, %v11182_v38 }
0x1d42   : > { %9764 = vmatpush3.bf16.msra.mxu1 %v5178_v61 }
0x1d43   : > { %9775 = vmatprep.subr.bf16.mxu1 %v10507_v1 }
0x1e01   : > { %v4892_v62 = vpop.f32.mrb[92].mxu0 }
0x1e02   : > { %v11316_v51 = vadd.f32 %v4892_v62, %v11263_v39  ;;  %v9731_v63 = vpop.f32.mrb[93].mxu0 }
0x1e03   : > { %v4895_v0 = vpop.f32.mrb[94].mxu0 }
0x1e04   : > { %v11319_v4 = vadd.f32 %v4895_v0, %v11265_v42  ;;  %v9732_v5 = vpop.f32.mrb[95].mxu0  ;;  %v8783_v0 = vld [vmem:[%s11900_s18] ss:$0 sm:$0xff]  ;;  %s11903_s18 = sld [smem:[#allocation28_spill]] }
0x1e09   : > { %v5026_v7 = vpop.f32.mrb[96].mxu0 }
0x1e0a   : > { %v9747_v8 = vpop.f32.mrb[97].mxu0  ;;  %v5027_v2 = vadd.f32 %v8884_v6, %v5026_v7 }
0x1e0b   : > { %v5029_v9 = vpop.f32.mrb[98].mxu0 }
0x1e0c   : > { %v5030_v3 = vadd.f32 %v8884_v6, %v5029_v9  ;;  %v9748_v10 = vpop.f32.mrb[99].mxu0 }
0x1e0e   : > { %v5102_v11 = vpack.c.bf16 %v5030_v3, %v5027_v2 }
0x1e10   : > { %v5107_v12 = vsel %vm1904_vm1, %v5102_v11, 0 }
0x1e11   : > { %9758 = vmatpush3.bf16.xpose.msra.mxu0 %v5107_v12  ;;  %v10272_v12 = vld [vmem:[%s11901_s23 + $0x8] sm:$0xff]  }
0x1e12   : > { %9769 = vmatprep.subr.bf16.mxu0 %v10507_v1 }
0x1e18   : > { %9760 = vmatmul.mubr.msk.bf16.vlgmr.msra.gmra.mrb[100].mxu0 %vm1904_vm1, %v5101_v53  ;;  %v8901_v53 = vld [vmem:[%s11899_s15] ss:$0 sm:$0xff]  ;;  %s11902_s15 = sld [smem:[#allocation26_spill]] }
0x1e19   : > { %9771 = vmatprep.mubr.msk.bf16.mxu0 %vm10508_vm0, %v10507_v1  ;;  %9770 = vmatpush3.bf16.msra.mxu0 %v5226_v30 }
0x1e1a   : > { %9783 = vmatprep.subr.bf16.mxu0 %v10507_v1 }
0x1eeb   : > { %v5143_v39 = vpop.f32.mrb[100].mxu0 }
0x1eec   : > { %v9761_v42 = vpop.f32.mrb[101].mxu0  ;;  %v5150_v14 = vsel %vm2024_vm2, %v5143_v39, -inf }
0x1eed   : > { %5151 = vmax.xlane.f32.xlu1 %v5150_v14  ;;  %v5146_v15 = vpop.f32.mrb[102].mxu0  ;;  %v10274_v42 = vld [vmem:[%s11902_s15 + $0x8] sm:$0xff]  }
0x1eee   : > { %v9762_v16 = vpop.f32.mrb[103].mxu0  ;;  %v5153_v17 = vsel %vm4043_vm14, %v5146_v15, -inf }
0x1eef   : > { %5154 = vmax.xlane.f32.xlu0 %v5153_v17 }
0x1f7a   : > { %v5152_v18 = vpop.xlane.xlu1 %5151 }
0x1f7b   : > { %v5156_v19 = vsub.f32 %v5143_v39, %v5152_v18  ;;  %v10273_v39 = vld [vmem:[%s11902_s15] sm:$0xff]  }
0x1f7c   : > { %v5155_v20 = vpop.xlane.xlu0 %5154 }
0x1f7d   : > { %v5158_v22 = vmul.f32 1.442695, %v5156_v19  ;;  %v5157_v23 = vsub.f32 %v5146_v15, %v5155_v20  ;;  %v8902_v20 = vld [vmem:[%s11903_s18] ss:$0 sm:$0xff]  ;;  %s11906_s18 = sld [smem:[#allocation27_spill]] }
0x1f7f   : > { %10375 = vpow2.f32 %v5158_v22  ;;  %v5160_v24 = vmul.f32 1.442695, %v5157_v23 }
0x1f81   : > { %10377 = vpow2.f32 %v5160_v24 }
0x1f89   : > { %v10376_v25 = vpop.eup %10375 }
0x1f8a   : > { %v5162_v26 = vsel %vm2024_vm2, %v10376_v25, 0.0 }
0x1f8b   : > { %v10378_v28 = vpop.eup %10377  ;;  %5163 = vadd.xlane.f32.xlu1 %v5162_v26  ;;  %v8903_v26 = vld [vmem:[%s11904_s0] ss:$0 sm:$0xff]  ;;  %s11907_s0 = sld [smem:[#allocation12_spill]] }
0x1f8c   : > { %v5165_v29 = vsel %vm4043_vm14, %v10378_v28, 0.0 }
0x1f8d   : > { %5166 = vadd.xlane.f32.xlu0 %v5165_v29 }
0x2018   : > { %v5164_v32 = vpop.xlane.xlu1 %5163 }
0x2019   : > { %10379 = vrcp.f32 %v5164_v32  ;;  %v10275_v32 = vld [vmem:[%s11902_s15 + $0x10] sm:$0xff]  }
0x201a   : > { %v5167_v33 = vpop.xlane.xlu0 %5166 }
0x201b   : > { %10381 = vrcp.f32 %v5167_v33  ;;  %v10276_v33 = vld [vmem:[%s11902_s15 + $0x18] sm:$0xff]  }
0x2023   : > { %v10380_v35 = vpop.eup %10379 }
0x2024   : > { %v5170_v40 = vmul.f32 %v10380_v35, %v10376_v25  ;;  %v8904_v35 = vld [vmem:[%s11905_s2] ss:$0 sm:$0xff]  ;;  %s11908_s2 = sld [smem:[#allocation13_spill]] }
0x2025   : > { %v10382_v31 = vpop.eup %10381 }
0x2026   : > { %v5171_v44 = vmul.f32 %v10382_v31, %v10378_v28 }
0x2028   : > { %v5172_v45 = vpack.c.bf16 %v5171_v44, %v5170_v40 }
0x202a   : > { %9766 = vmatmul.mubr.msk.bf16.vlgmr.msra.gmra.mrb[96].mxu1 %vm2024_vm2, %v5172_v45 }
0x202b   : > { %9779 = vmatprep.mubr.msk.bf16.mxu1 %vm10508_vm0, %v10507_v1 }
0x20fd   : > { %v5214_v46 = vpop.f32.mrb[96].mxu1 }
0x20fe   : > { %v9767_v47 = vpop.f32.mrb[97].mxu1 }
0x20ff   : > { %v5217_v50 = vpop.f32.mrb[98].mxu1 }
0x2100   : > { %v5221_v34 = vpack.c.bf16 %v5217_v50, %v5214_v46  ;;  %v9768_v36 = vpop.f32.mrb[99].mxu1 }
0x2102   : > { %9772 = vmatmul.mubr.msk.bf16.vlgmr.msra.gmra.mrb[104].mxu0 %vm1904_vm1, %v5221_v34 }
0x2103   : > { %9791 = vmatprep.mubr.msk.bf16.mxu0 %vm10508_vm0, %v10507_v1  ;;  %9784 = vmatpush3.bf16.msra.mxu0 %v10273_v39 }
0x2104   : > { %9785 = vmatprep.subr.bf16.mxu0 %v10507_v1 }
0x2107   : > { %9786 = vmatpush3.bf16.msra.mxu0 %v10274_v42  ;;  %v8789_v42 = vld [vmem:[%s11907_s0] ss:$0 sm:$0xff]  ;;  %s11911_s0 = sld [smem:[#allocation34_spill]] }
0x2108   : > { %9787 = vmatprep.subr.bf16.mxu0 %v10507_v1 }
0x210b   : > { %9788 = vmatpush3.bf16.msra.mxu0 %v10275_v32 }
0x210c   : > { %9789 = vmatprep.subr.bf16.mxu0 %v10507_v1 }
0x210f   : > { %9790 = vmatpush3.bf16.msra.mxu0 %v10276_v33 }
0x2110   : > { %9811 = vmatprep.subr.bf16.mxu0 %v10507_v1 }
0x21d5   : > { %v5262_v52 = vpop.f32.mrb[104].mxu0 }
0x21d6   : > { %v5269_v54 = vadd.f32 %v5262_v52, %v11316_v51  ;;  %v9773_v37 = vpop.f32.mrb[105].mxu0 }
0x21d7   : > { %v5265_v55 = vpop.f32.mrb[106].mxu0 }
0x21d8   : > { %v5278_v56 = vadd.f32 %v8901_v53, %v5269_v54  ;;  %v5270_v57 = vadd.f32 %v5265_v55, %v11319_v4  ;;  %v9774_v58 = vpop.f32.mrb[107].mxu0  ;;  %v3730_v4 = vadd.f32 %v8783_v0, %v11178_v21  ;;  %v10271_v21 = vld [vmem:[%s11901_s23] sm:$0xff]  }
0x21d9   : > { %9776 = vmatpush3.bf16.msra.mxu1 %v10271_v21  ;;  %v8908_v54 = vld [vmem:[%s11906_s18] ss:$0 sm:$0xff]  ;;  %s11909_s18 = sld [smem:[#allocation30_spill]] }
0x21da   : > { %v5279_v59 = vadd.f32 %v8901_v53, %v5270_v57  ;;  %v5280_v60 = vadd.f32 %v5278_v56, %v11116_v48  ;;  %v3735_v3 = vadd.f32 %v3730_v4, %v11105_v43  ;;  %9777 = vmatprep.subr.bf16.mxu1 %v10507_v1 }
0x21dc   : > { %v5284_v61 = vsel %vm2163_vm10, %v5280_v60, 0.0  ;;  %v5281_v62 = vadd.f32 %v5279_v59, %v11119_v49  ;;  %v3738_v11 = vsel %vm2163_vm10, %v3735_v3, 0.0 }
0x21dd   : > { %5285 = vadd.xlane.f32.xlu1 %v5284_v61  ;;  %9778 = vmatpush3.bf16.msra.mxu1 %v10272_v12 }
0x21de   : > { %v5288_v63 = vsel %vm5287_vm15, %v5281_v62, 0.0  ;;  %9795 = vmatprep.subr.bf16.mxu1 %v10507_v1 }
0x21df   : > { %5289 = vadd.xlane.f32.xlu0 %v5288_v63 }
0x226a   : > { %v5286_v51 = vpop.xlane.xlu1 %5285 }
0x226b   : > { %v5291_v5 = vmul.f32 0.03125, %v5286_v51 }
0x226c   : > { %v5290_v6 = vpop.xlane.xlu0 %5289 }
0x226d   : > { %v5293_v7 = vsub.f32 %v5280_v60, %v5291_v5  ;;  %v5292_v8 = vmul.f32 0.03125, %v5290_v6 }
0x226f   : > { %v5294_v48 = vsub.f32 %v5281_v62, %v5292_v8  ;;  %v5295_v9 = vmul.f32 %v5293_v7, %v5293_v7 }
0x2271   : > { %v5297_v2 = vsel %vm2163_vm10, %v5295_v9, 0.0  ;;  %v5296_v49 = vmul.f32 %v5294_v48, %v5294_v48 }
0x2272   : > { %5298 = vadd.xlane.f32.xlu1 %v5297_v2 }
0x2273   : > { %v5300_v10 = vsel %vm5287_vm15, %v5296_v49, 0.0 }
0x2274   : > { %5301 = vadd.xlane.f32.xlu0 %v5300_v10 }
0x2276   : > { %3739 = vadd.xlane.f32.xlu1 %v3738_v11 }
0x22ff   : > { %v5299_v43 = vpop.xlane.xlu1 %5298 }
0x2300   : > { %v5303_v14 = vmul.f32 0.03125, %v5299_v43 }
0x2301   : > { %v5302_v15 = vpop.xlane.xlu0 %5301 }
0x2302   : > { %v5305_v16 = vadd.f32 1e-05, %v5303_v14  ;;  %v5304_v17 = vmul.f32 0.03125, %v5302_v15  ;;  %v8790_v14 = vld [vmem:[%s11908_s2] ss:$0 sm:$0xff]  ;;  %s11913_s2 = sld [smem:[#allocation15_spill]] }
0x2303   : > { %v3740_v52 = vpop.xlane.xlu1 %3739 }
0x2304   : > { %10383 = vrsqrt.f32 %v5305_v16  ;;  %v5306_v18 = vadd.f32 1e-05, %v5304_v17  ;;  %v3741_v53 = vmul.f32 0.03125, %v3740_v52  ;;  %v10278_v52 = vld [vmem:[%s11911_s0 + $0x8] sm:$0xff]  }
0x2306   : > { %10385 = vrsqrt.f32 %v5306_v18  ;;  %v3742_v55 = vsub.f32 %v3735_v3, %v3741_v53 }
0x2308   : > { %v3743_v0 = vmul.f32 %v3742_v55, %v3742_v55 }
0x230a   : > { %v3744_v5 = vsel %vm2163_vm10, %v3743_v0, 0.0 }
0x230e   : > { %v10384_v19 = vpop.eup %10383 }
0x230f   : > { %v5309_v22 = vmul.f32 %v10384_v19, %v5293_v7 }
0x2310   : > { %v10386_v23 = vpop.eup %10385 }
0x2311   : > { %v5317_v24 = vmul.f32 %v8902_v20, %v5309_v22  ;;  %v5310_v25 = vmul.f32 %v10386_v23, %v5294_v48 }
0x2313   : > { %v5318_v28 = vmul.f32 %v8902_v20, %v5310_v25  ;;  %v5325_v29 = vadd.f32 %v8903_v26, %v5317_v24 }
0x2315   : > { %v5326_v27 = vadd.f32 %v8903_v26, %v5318_v28  ;;  %v8914_v26 = vld [vmem:[%s11909_s18] ss:$0 sm:$0xff]  ;;  %s11914_s18 = sld [smem:[#allocation36_spill]] }
0x2317   : > { %v5331_v30 = vpack.c.bf16 %v5326_v27, %v5325_v29 }
0x2319   : > { %9780 = vmatmul.mubr.msk.bf16.vlgmr.msra.gmra.mrb[100].mxu1 %vm2163_vm10, %v5331_v30 }
0x231a   : > { %9799 = vmatprep.mubr.msk.bf16.mxu1 %vm10508_vm0, %v10507_v1 }
0x23ec   : > { %v5388_v31 = vpop.f32.mrb[100].mxu1 }
0x23ed   : > { %v5389_v40 = vadd.f32 %v8904_v35, %v5388_v31  ;;  %v9781_v44 = vpop.f32.mrb[101].mxu1 }
0x23ee   : > { %v5391_v45 = vpop.f32.mrb[102].mxu1 }
0x23ef   : > { %v5392_v46 = vadd.f32 %v8904_v35, %v5391_v45  ;;  %v9782_v47 = vpop.f32.mrb[103].mxu1  ;;  %v5395_v50 = vmax.f32 %v5389_v40, 0.0 }
0x23f1   : > { %v5396_v34 = vmax.f32 %v5392_v46, 0.0 }
0x23f3   : > { %v5405_v36 = vpack.c.bf16 %v5396_v34, %v5395_v50 }
0x23f5   : > { %9792 = vmatmul.mubr.msk.bf16.vlgmr.msra.gmra.mrb[108].mxu0 %vm3691_vm12, %v5405_v36  ;;  %v10277_v36 = vld [vmem:[%s11911_s0] sm:$0xff]  }
0x23f6   : > { %9815 = vmatprep.mubr.msk.bf16.mxu0 %vm10508_vm0, %v10507_v1  ;;  %9796 = vmatpush3.bf16.msra.mxu1 %v10277_v36 }
0x23f7   : > { %9797 = vmatprep.subr.bf16.mxu1 %v10507_v1 }
0x23fa   : > { %9798 = vmatpush3.bf16.msra.mxu1 %v10278_v52 }
0x23fb   : > { %9803 = vmatprep.subr.bf16.mxu1 %v10507_v1 }
0x24c8   : > { %v5474_v37 = vpop.f32.mrb[108].mxu0 }
0x24c9   : > { %v5475_v56 = vadd.f32 %v8908_v54, %v5474_v37  ;;  %v9793_v57 = vpop.f32.mrb[109].mxu0 }
0x24ca   : > { %v5477_v58 = vpop.f32.mrb[110].mxu0 }
0x24cb   : > { %v5478_v59 = vadd.f32 %v8908_v54, %v5477_v58  ;;  %v9794_v60 = vpop.f32.mrb[111].mxu0  ;;  %v5481_v61 = vadd.f32 %v5475_v56, %v5325_v29 }
0x24cd   : > { %v5485_v62 = vsel %vm2163_vm10, %v5481_v61, 0.0  ;;  %v5482_v63 = vadd.f32 %v5478_v59, %v5326_v27  ;;  %v8915_v27 = vld [vmem:[%s11910_s3] ss:$0 sm:$0xff]  ;;  %s11912_s3 = sld [smem:[#allocation14_spill]] }
0x24ce   : > { %5486 = vadd.xlane.f32.xlu0 %v5485_v62 }
0x24cf   : > { %v5488_v51 = vsel %vm5287_vm15, %v5482_v63, 0.0 }
0x24d0   : > { %5489 = vadd.xlane.f32.xlu1 %v5488_v51 }
0x24d2   : > { %3745 = vadd.xlane.f32.xlu0 %v3744_v5 }
0x24d3   : > { %v8791_v5 = vld [vmem:[%s11912_s3] ss:$0 sm:$0xff]  ;;  %s11916_s3 = sld [smem:[#allocation32_spill]] }
0x255b   : > { %v5487_v6 = vpop.xlane.xlu0 %5486 }
0x255c   : > { %v5491_v4 = vmul.f32 0.03125, %v5487_v6 }
0x255d   : > { %v5490_v7 = vpop.xlane.xlu1 %5489 }
0x255e   : > { %v5493_v8 = vsub.f32 %v5481_v61, %v5491_v4  ;;  %v5492_v48 = vmul.f32 0.03125, %v5490_v7  ;;  %v8792_v4 = vld [vmem:[%s11913_s2] ss:$0 sm:$0xff]  ;;  %s11917_s2 = sld [smem:[#allocation33_spill]] }
0x255f   : > { %v3746_v9 = vpop.xlane.xlu0 %3745 }
0x2560   : > { %v5494_v2 = vsub.f32 %v5482_v63, %v5492_v48  ;;  %v3747_v49 = vmul.f32 0.03125, %v3746_v9  ;;  %v5495_v3 = vmul.f32 %v5493_v8, %v5493_v8  ;;  %v10279_v9 = vld [vmem:[%s11914_s18] sm:$0xff]  }
0x2562   : > { %v3748_v10 = vadd.f32 1e-05, %v3747_v49  ;;  %v5497_v11 = vsel %vm2163_vm10, %v5495_v3, 0.0  ;;  %v5496_v21 = vmul.f32 %v5494_v2, %v5494_v2  ;;  %v10281_v49 = vld [vmem:[%s11914_s18 + $0x8] sm:$0xff]  }
0x2563   : > { %5498 = vadd.xlane.f32.xlu1 %v5497_v11  ;;  %v10282_v3 = vld [vmem:[%s11915_s5 + $0x8] sm:$0xff]  }
0x2564   : > { %10387 = vrsqrt.f32 %v3748_v10  ;;  %v5500_v12 = vsel %vm5287_vm15, %v5496_v21, 0.0 }
0x2565   : > { %5501 = vadd.xlane.f32.xlu0 %v5500_v12 }
0x256e   : > { %v10388_v39 = vpop.eup %10387 }
0x256f   : > { %v3750_v43 = vmul.f32 %v10388_v39, %v3742_v55 }
0x2571   : > { %v3757_v15 = vmul.f32 %v8789_v42, %v3750_v43 }
0x2573   : > { %v3764_v16 = vadd.f32 %v8790_v14, %v3757_v15  ;;  %v8916_v14 = vld [vmem:[%s11916_s3] ss:$0 sm:$0xff]  ;;  %s11920_s3 = sld [smem:[#allocation35_spill]] }
0x2575   : > { %v3767_v17 = vsel %vm2163_vm10, %v3764_v16, 0.0 }
0x2576   : > { %3768 = vadd.xlane.f32.xlu1 %v3767_v17 }
0x25f0   : > { %v5499_v18 = vpop.xlane.xlu1 %5498 }
0x25f1   : > { %v5503_v19 = vmul.f32 0.03125, %v5499_v18 }
0x25f2   : > { %v5502_v20 = vpop.xlane.xlu0 %5501 }
0x25f3   : > { %v5505_v22 = vadd.f32 1e-05, %v5503_v19  ;;  %v5504_v23 = vmul.f32 0.03125, %v5502_v20  ;;  %v8917_v19 = vld [vmem:[%s11917_s2] ss:$0 sm:$0xff]  ;;  %s11921_s2 = sld [smem:[#allocation40_spill]] }
0x25f5   : > { %10389 = vrsqrt.f32 %v5505_v22  ;;  %v5506_v24 = vadd.f32 1e-05, %v5504_v23 }
0x25f7   : > { %10391 = vrsqrt.f32 %v5506_v24 }
0x25ff   : > { %v10390_v25 = vpop.eup %10389 }
0x2600   : > { %v5509_v28 = vmul.f32 %v10390_v25, %v5493_v8 }
0x2601   : > { %v10392_v29 = vpop.eup %10391 }
0x2602   : > { %v5517_v30 = vmul.f32 %v8914_v26, %v5509_v28  ;;  %v5510_v32 = vmul.f32 %v10392_v29, %v5494_v2  ;;  %v10280_v2 = vld [vmem:[%s11915_s5] sm:$0xff]  }
0x2603   : > { %v3769_v33 = vpop.xlane.xlu1 %3768  ;;  %9812 = vmatpush3.bf16.msra.mxu0 %v10280_v2  ;;  %v8955_v2 = vld [vmem:[%s11919_s7 + $0x1] ss:$0 sm:$0xff] }
0x2604   : > { %v3770_v35 = vmul.f32 0.03125, %v3769_v33  ;;  %v5525_v31 = vadd.f32 %v8915_v27, %v5517_v30  ;;  %v5518_v40 = vmul.f32 %v8914_v26, %v5510_v32  ;;  %9813 = vmatprep.subr.bf16.mxu0 %v10507_v1  ;;  %v8926_v32 = vld [vmem:[%s11919_s7] ss:$0 sm:$0xff] }
0x2606   : > { %v3771_v44 = vsub.f32 %v3764_v16, %v3770_v35  ;;  %v5529_v45 = vsel %vm2163_vm10, %v5525_v31, 0.0  ;;  %v5526_v46 = vadd.f32 %v8915_v27, %v5518_v40  ;;  %v8922_v27 = vld [vmem:[%s11918_s6] ss:$0 sm:$0xff] }
0x2607   : > { %5530 = vadd.xlane.f32.xlu0 %v5529_v45  ;;  %9814 = vmatpush3.bf16.msra.mxu0 %v10282_v3 }
0x2608   : > { %v5532_v47 = vsel %vm5287_vm15, %v5526_v46, 0.0  ;;  %v3772_v50 = vmul.f32 %v3771_v44, %v3771_v44  ;;  %9825 = vmatprep.subr.bf16.mxu0 %v10507_v1 }
0x2609   : > { %5533 = vadd.xlane.f32.xlu1 %v5532_v47 }
0x260a   : > { %v3773_v34 = vsel %vm2163_vm10, %v3772_v50, 0.0 }
0x260b   : > { %3774 = vadd.xlane.f32.xlu0 %v3773_v34 }
0x2694   : > { %v5531_v53 = vpop.xlane.xlu0 %5530 }
0x2695   : > { %v5535_v54 = vmul.f32 0.03125, %v5531_v53 }
0x2696   : > { %v5534_v37 = vpop.xlane.xlu1 %5533 }
0x2697   : > { %v5537_v55 = vsub.f32 %v5525_v31, %v5535_v54  ;;  %v5536_v56 = vmul.f32 0.03125, %v5534_v37  ;;  %v8918_v54 = vld [vmem:[%s11920_s3] ss:$0 sm:$0xff] }
0x2698   : > { %v3775_v57 = vpop.xlane.xlu0 %3774 }
0x2699   : > { %v5538_v58 = vsub.f32 %v5526_v46, %v5536_v56  ;;  %v3776_v59 = vmul.f32 0.03125, %v3775_v57  ;;  %v5539_v60 = vmul.f32 %v5537_v55, %v5537_v55  ;;  %v10283_v57 = vld [vmem:[%s11911_s0 + $0x10] sm:$0xff]  }
0x269b   : > { %v3777_v61 = vadd.f32 1e-05, %v3776_v59  ;;  %v5541_v62 = vsel %vm2163_vm10, %v5539_v60, 0.0  ;;  %v5540_v63 = vmul.f32 %v5538_v58, %v5538_v58  ;;  %v10284_v59 = vld [vmem:[%s11911_s0 + $0x18] sm:$0xff]   ;;  %v10285_v60 = vld [vmem:[%s11915_s5 + $0x10] sm:$0xff]  }
0x269c   : > { %5542 = vadd.xlane.f32.xlu1 %v5541_v62 }
0x269d   : > { %10393 = vrsqrt.f32 %v3777_v61  ;;  %v5544_v0 = vsel %vm5287_vm15, %v5540_v63, 0.0  ;;  %v10286_v61 = vld [vmem:[%s11915_s5 + $0x18] sm:$0xff]  }
0x269e   : > { %5545 = vadd.xlane.f32.xlu0 %v5544_v0 }
0x26a7   : > { %v10394_v51 = vpop.eup %10393 }
0x26a8   : > { %v3779_v6 = vmul.f32 %v10394_v51, %v3771_v44 }
0x26aa   : > { %v3786_v7 = vmul.f32 %v8791_v5, %v3779_v6 }
0x26ac   : > { %v11396_v8 = vadd.f32 %v8792_v4, %v3786_v7 }
0x26ae   : > { %v11400_v48 = vpack.c.bf16 %v11396_v8, %v11396_v8 }
0x26b0   : > { %9800 = vmatmul.mubr.msk.bf16.vlgmr.msra.gmra.mrb[104].mxu1 %vm2163_vm10, %v11400_v48 }
0x26b1   : > { %9807 = vmatprep.mubr.msk.bf16.mxu1 %vm10508_vm0, %v10507_v1  ;;  %9804 = vmatpush3.bf16.msra.mxu1 %v10279_v9 }
0x26b2   : > { %9805 = vmatprep.subr.bf16.mxu1 %v10507_v1 }
0x26b5   : > { %9806 = vmatpush3.bf16.msra.mxu1 %v10281_v49 }
0x26b6   : > { %9819 = vmatprep.subr.bf16.mxu1 %v10507_v1 }
0x2729   : > { %v5543_v10 = vpop.xlane.xlu1 %5542 }
0x272a   : > { %v5547_v11 = vmul.f32 0.03125, %v5543_v10 }
0x272b   : > { %v5546_v21 = vpop.xlane.xlu0 %5545 }
0x272c   : > { %v5549_v12 = vadd.f32 1e-05, %v5547_v11  ;;  %v5548_v39 = vmul.f32 0.03125, %v5546_v21 }
0x272e   : > { %10395 = vrsqrt.f32 %v5549_v12  ;;  %v5550_v42 = vadd.f32 1e-05, %v5548_v39 }
0x2730   : > { %10397 = vrsqrt.f32 %v5550_v42 }
0x2738   : > { %v10396_v43 = vpop.eup %10395 }
0x2739   : > { %v5553_v15 = vmul.f32 %v10396_v43, %v5537_v55 }
0x273a   : > { %v10398_v16 = vpop.eup %10397 }
0x273b   : > { %v5561_v17 = vmul.f32 %v8916_v14, %v5553_v15  ;;  %v5554_v18 = vmul.f32 %v10398_v16, %v5538_v58 }
0x273d   : > { %v5562_v20 = vmul.f32 %v8916_v14, %v5554_v18  ;;  %v5569_v22 = vadd.f32 %v8917_v19, %v5561_v17 }
0x273f   : > { %v5570_v23 = vadd.f32 %v8917_v19, %v5562_v20 }
0x2741   : > { %v11416_v24 = vpack.c.bf16 %v5570_v23, %v5569_v22  ;;  %v10287_v22 = vld [vmem:[%s11914_s18 + $0x10] sm:$0xff]  }
0x2743   : > { %9808 = vmatmul.mubr.msk.bf16.vlgmr.msra.gmra.mrb[108].mxu1 %vm2163_vm10, %v11416_v24  ;;  %9816 = vmatmul.mubr.msk.bf16.vlgmr.msra.gmra.mrb[112].mxu0 %vm2163_vm10, %v11416_v24 }
0x2744   : > { %9821 = vmatprep.mubr.msk.bf16.mxu1 %vm10508_vm0, %v10507_v1  ;;  %9827 = vmatprep.mubr.msk.bf16.mxu0 %vm10508_vm0, %v10507_v1 }
0x2783   : > { %v5632_v25 = vpop.f32.mrb[104].mxu1 }
0x2784   : > { %v9801_v26 = vpop.f32.mrb[105].mxu1  ;;  %v5633_v56 = vadd.f32 %v8918_v54, %v5632_v25  ;;  %v10288_v25 = vld [vmem:[%s11914_s18 + $0x18] sm:$0xff]  }
0x2785   : > { %v5635_v28 = vpop.f32.mrb[106].mxu1 }
0x2786   : > { %v9802_v29 = vpop.f32.mrb[107].mxu1  ;;  %v5771_v58 = vpack.c.bf16 %v5633_v56, %v5633_v56 }
0x2816   : > { %v5699_v30 = vpop.f32.mrb[108].mxu1  ;;  %v5763_v33 = vpop.f32.mrb[112].mxu0 }
0x2817   : > { %v9809_v35 = vpop.f32.mrb[109].mxu1  ;;  %v9817_v31 = vpop.f32.mrb[113].mxu0  ;;  %v5700_v45 = vadd.f32 %v8922_v27, %v5699_v30  ;;  %v5764_v46 = vadd.f32 %v8926_v32, %v5763_v33  ;;  %v8946_v30 = vld [vmem:[%s11918_s6 + $0x1] ss:$0 sm:$0xff] }
0x2818   : > { %v5702_v40 = vpop.f32.mrb[110].mxu1  ;;  %v5766_v44 = vpop.f32.mrb[114].mxu0 }
0x2819   : > { %v5703_v47 = vadd.f32 %v8922_v27, %v5702_v40  ;;  %v5767_v50 = vadd.f32 %v8926_v32, %v5766_v44  ;;  %v9810_v34 = vpop.f32.mrb[111].mxu1  ;;  %v9818_v36 = vpop.f32.mrb[115].mxu0 }
0x281b   : > { %v5772_v52 = vpack.c.bf16 %v5703_v47, %v5700_v45  ;;  %v5831_v53 = vpack.c.bf16 %v5767_v50, %v5764_v46  ;;  %v8937_v46 = vld [vmem:[%s11920_s3 + $0x1] ss:$0 sm:$0xff] }
0x281d   : > { %v5836_v37 = vand.u32 %v5831_v53, %v11182_v38  ;;  %v5777_v55 = vsel %vm1904_vm1, %v5772_v52, 0 }
0x281e   : > { %9820 = vmatpush3.bf16.xpose.msra.mxu1 %v5777_v55 }
0x281f   : > { %9826 = vmatpush3.bf16.msra.mxu0 %v5836_v37  ;;  %9831 = vmatprep.subr.bf16.mxu1 %v10507_v1 }
0x2820   : > { %9839 = vmatprep.subr.bf16.mxu0 %v10507_v1 }
0x2825   : > { %9822 = vmatmul.mubr.msk.bf16.vlgmr.msra.gmra.mrb[112].mxu1 %vm1904_vm1, %v5771_v58 }
0x2826   : > { %9832 = vmatpush3.bf16.msra.mxu1 %v10283_v57  ;;  %9835 = vmatprep.mubr.msk.bf16.mxu1 %vm10508_vm0, %v10507_v1 }
0x2827   : > { %9833 = vmatprep.subr.bf16.mxu1 %v10507_v1 }
0x282a   : > { %9834 = vmatpush3.bf16.msra.mxu1 %v10284_v59 }
0x282b   : > { %9847 = vmatprep.subr.bf16.mxu1 %v10507_v1 }
0x282d   : > { %9836 = vmatmul.mubr.msk.bf16.vlgmr.msra.gmra.mrb[116].mxu1 %vm2163_vm10, %v11400_v48 }
0x282e   : > { %9848 = vmatpush3.bf16.msra.mxu1 %v10285_v60  ;;  %9851 = vmatprep.mubr.msk.bf16.mxu1 %vm10508_vm0, %v10507_v1  ;;  %v8959_v60 = vld [vmem:[%s11921_s2 + $0x4] sm:$0xf] }
0x282f   : > { %9849 = vmatprep.subr.bf16.mxu1 %v10507_v1 }
0x2832   : > { %9850 = vmatpush3.bf16.msra.mxu1 %v10286_v61  ;;  %v6190_v61 = vsel %vm2398_vm11, %v8959_v60, 0 }
0x2833   : > { %9861 = vmatprep.subr.bf16.mxu1 %v10507_v1 }
0x2835   : > { %9852 = vmatmul.mubr.msk.bf16.vlgmr.msra.gmra.mrb[120].mxu1 %vm2163_vm10, %v11416_v24 }
0x2836   : > { %9863 = vmatprep.mubr.msk.bf16.mxu1 %vm10508_vm0, %v10507_v1 }
0x28f8   : > { %v5813_v62 = vpop.f32.mrb[112].mxu1 }
0x28f9   : > { %v9823_v63 = vpop.f32.mrb[113].mxu1  ;;  %v5819_v0 = vsel %vm2024_vm2, %v5813_v62, -inf }
0x28fa   : > { %5820 = vmax.xlane.f32.xlu1 %v5819_v0  ;;  %v5816_v51 = vpop.f32.mrb[114].mxu1  ;;  %v5770_v0 = vld [vmem:[%s11921_s2] sm:$0xf] }
0x28fb   : > { %v9824_v5 = vpop.f32.mrb[115].mxu1 }
0x2900   : > { %v5938_v6 = vpop.f32.mrb[116].mxu1 }
0x2901   : > { %v9837_v4 = vpop.f32.mrb[117].mxu1  ;;  %v5939_v50 = vadd.f32 %v8937_v46, %v5938_v6  ;;  %v6236_v6 = vsel %vm2398_vm11, %v5770_v0, 0 }
0x2902   : > { %v5941_v7 = vpop.f32.mrb[118].mxu1  ;;  %v10289_v4 = vld [vmem:[%s11914_s18 + $0x20] sm:$0xff]  }
0x2903   : > { %v9838_v9 = vpop.f32.mrb[119].mxu1  ;;  %v6078_v34 = vpack.c.bf16 %v5939_v50, %v5939_v50  ;;  %v8987_v50 = vld [vmem:[%s11919_s7 + $0x2] ss:$0 sm:$0xff] }
0x2904   : > { %v10290_v9 = vld [vmem:[%s11914_s18 + $0x28] sm:$0xff]  }
0x2908   : > { %v6069_v49 = vpop.f32.mrb[120].mxu1 }
0x2909   : > { %v9853_v3 = vpop.f32.mrb[121].mxu1  ;;  %v6070_v11 = vadd.f32 %v8955_v2, %v6069_v49  ;;  %v10291_v49 = vld [vmem:[%s11911_s0 + $0x20] sm:$0xff]  }
0x290a   : > { %v6072_v10 = vpop.f32.mrb[122].mxu1 }
0x290b   : > { %v6073_v21 = vadd.f32 %v8955_v2, %v6072_v10  ;;  %v9854_v12 = vpop.f32.mrb[123].mxu1 }
0x290c   : > { %v10292_v12 = vld [vmem:[%s11911_s0 + $0x28] sm:$0xff]  }
0x290d   : > { %v6138_v39 = vpack.c.bf16 %v6073_v21, %v6070_v11 }
0x290f   : > { %v6143_v42 = vand.u32 %v6138_v39, %v11182_v38 }
0x2911   : > { %9862 = vmatpush3.bf16.msra.mxu1 %v6143_v42  ;;  %v10293_v42 = vld [vmem:[%s11915_s5 + $0x20] sm:$0xff]  }
0x2912   : > { %9873 = vmatprep.subr.bf16.mxu1 %v10507_v1 }
0x2987   : > { %v5821_v43 = vpop.xlane.xlu1 %5820 }
0x2988   : > { %v5822_v14 = vsub.f32 %v5813_v62, %v5821_v43 }
0x298a   : > { %v5823_v15 = vmul.f32 1.442695, %v5822_v14 }
0x298c   : > { %10399 = vpow2.f32 %v5823_v15 }
0x2996   : > { %v10400_v16 = vpop.eup %10399 }
0x2997   : > { %v5825_v17 = vsel %vm2024_vm2, %v10400_v16, 0.0 }
0x2998   : > { %5826 = vadd.xlane.f32.xlu0 %v5825_v17  ;;  %v8978_v17 = vld [vmem:[%s11918_s6 + $0x2] ss:$0 sm:$0xff] }
0x2a25   : > { %v5827_v18 = vpop.xlane.xlu0 %5826 }
0x2a26   : > { %10401 = vrcp.f32 %v5827_v18 }
0x2a30   : > { %v10402_v19 = vpop.eup %10401 }
0x2a31   : > { %v5829_v20 = vmul.f32 %v10402_v19, %v10400_v16  ;;  %v10294_v16 = vld [vmem:[%s11915_s5 + $0x28] sm:$0xff]  }
0x2a33   : > { %v5830_v23 = vpack.c.bf16 %v5829_v20, %v5829_v20 }
0x2a35   : > { %9828 = vmatmul.mubr.msk.bf16.vlgmr.msra.gmra.mrb[116].mxu0 %vm2024_vm2, %v5830_v23 }
0x2a36   : > { %9840 = vmatpush3.bf16.msra.mxu0 %v10287_v22  ;;  %9843 = vmatprep.mubr.msk.bf16.mxu0 %vm10508_vm0, %v10507_v1 }
0x2a37   : > { %9841 = vmatprep.subr.bf16.mxu0 %v10507_v1 }
0x2a3a   : > { %9842 = vmatpush3.bf16.msra.mxu0 %v10288_v25 }
0x2a3b   : > { %9855 = vmatprep.subr.bf16.mxu0 %v10507_v1 }
0x2a3d   : > { %9844 = vmatmul.mubr.msk.bf16.vlgmr.msra.gmra.mrb[120].mxu0 %vm2163_vm10, %v11416_v24 }
0x2a3e   : > { %9857 = vmatprep.mubr.msk.bf16.mxu0 %vm10508_vm0, %v10507_v1 }
0x2b08   : > { %v5872_v26 = vpop.f32.mrb[116].mxu0 }
0x2b09   : > { %v9829_v28 = vpop.f32.mrb[117].mxu0  ;;  %v5878_v7 = vpack.c.bf16 %v5872_v26, %v5872_v26 }
0x2b0a   : > { %v5875_v29 = vpop.f32.mrb[118].mxu0 }
0x2b0b   : > { %v9830_v27 = vpop.f32.mrb[119].mxu0 }
0x2b10   : > { %v6003_v32 = vpop.f32.mrb[120].mxu0 }
0x2b11   : > { %v9845_v33 = vpop.f32.mrb[121].mxu0  ;;  %v6004_v31 = vadd.f32 %v8946_v30, %v6003_v32 }
0x2b12   : > { %v6006_v35 = vpop.f32.mrb[122].mxu0 }
0x2b13   : > { %v6007_v40 = vadd.f32 %v8946_v30, %v6006_v35  ;;  %v9846_v44 = vpop.f32.mrb[123].mxu0  ;;  %v8969_v35 = vld [vmem:[%s11920_s3 + $0x2] ss:$0 sm:$0xff] }
0x2b15   : > { %v6079_v45 = vpack.c.bf16 %v6007_v40, %v6004_v31 }
0x2b17   : > { %v6084_v47 = vsel %vm1904_vm1, %v6079_v45, 0 }
0x2b18   : > { %9856 = vmatpush3.bf16.xpose.msra.mxu0 %v6084_v47 }
0x2b19   : > { %9867 = vmatprep.subr.bf16.mxu0 %v10507_v1 }
0x2b1f   : > { %9858 = vmatmul.mubr.msk.bf16.vlgmr.msra.gmra.mrb[124].mxu0 %vm1904_vm1, %v6078_v34 }
0x2b20   : > { %9869 = vmatprep.mubr.msk.bf16.mxu0 %vm10508_vm0, %v10507_v1  ;;  %9868 = vmatpush3.bf16.msra.mxu0 %v6190_v61 }
0x2b21   : > { %9879 = vmatprep.subr.bf16.mxu0 %v10507_v1 }
0x2bf2   : > { %v6120_v36 = vpop.f32.mrb[124].mxu0 }
0x2bf3   : > { %v9859_v52 = vpop.f32.mrb[125].mxu0  ;;  %v6126_v53 = vsel %vm2024_vm2, %v6120_v36, -inf }
0x2bf4   : > { %6127 = vmax.xlane.f32.xlu1 %v6126_v53  ;;  %v6123_v54 = vpop.f32.mrb[126].mxu0 }
0x2bf5   : > { %v9860_v37 = vpop.f32.mrb[127].mxu0 }
0x2c81   : > { %v6128_v55 = vpop.xlane.xlu1 %6127 }
0x2c82   : > { %v6129_v56 = vsub.f32 %v6120_v36, %v6128_v55 }
0x2c84   : > { %v6130_v57 = vmul.f32 1.442695, %v6129_v56 }
0x2c86   : > { %10403 = vpow2.f32 %v6130_v57 }
0x2c90   : > { %v10404_v58 = vpop.eup %10403 }
0x2c91   : > { %v6132_v59 = vsel %vm2024_vm2, %v10404_v58, 0.0 }
0x2c92   : > { %6133 = vadd.xlane.f32.xlu0 %v6132_v59 }
0x2d1f   : > { %v6134_v62 = vpop.xlane.xlu0 %6133 }
0x2d20   : > { %10405 = vrcp.f32 %v6134_v62 }
0x2d2a   : > { %v10406_v63 = vpop.eup %10405 }
0x2d2b   : > { %v6136_v51 = vmul.f32 %v10406_v63, %v10404_v58 }
0x2d2d   : > { %v6137_v5 = vpack.c.bf16 %v6136_v51, %v6136_v51 }
0x2d2f   : > { %9864 = vmatmul.mubr.msk.bf16.vlgmr.msra.gmra.mrb[124].mxu1 %vm2024_vm2, %v6137_v5 }
0x2d30   : > { %9874 = vmatpush3.bf16.msra.mxu1 %v6236_v6  ;;  %9875 = vmatprep.mubr.msk.bf16.mxu1 %vm10508_vm0, %v10507_v1  ;;  %v8991_v6 = vld [vmem:[%s11921_s2 + $0x8] sm:$0xf] }
0x2d31   : > { %9887 = vmatprep.subr.bf16.mxu1 %v10507_v1 }
0x2d37   : > { %9876 = vmatmul.mubr.msk.bf16.vlgmr.msra.gmra.mrb[128].mxu1 %vm1904_vm1, %v5878_v7 }
0x2d38   : > { %9888 = vmatpush3.bf16.msra.mxu1 %v10289_v4  ;;  %9891 = vmatprep.mubr.msk.bf16.mxu1 %vm10508_vm0, %v10507_v1  ;;  %v6589_v4 = vsel %vm2398_vm11, %v8991_v6, 0 }
0x2d39   : > { %9889 = vmatprep.subr.bf16.mxu1 %v10507_v1 }
0x2d3c   : > { %9890 = vmatpush3.bf16.msra.mxu1 %v10290_v9 }
0x2d3d   : > { %9903 = vmatprep.subr.bf16.mxu1 %v10507_v1 }
0x2d3f   : > { %9892 = vmatmul.mubr.msk.bf16.vlgmr.msra.gmra.mrb[132].mxu1 %vm2163_vm10, %v11416_v24 }
0x2d40   : > { %9905 = vmatprep.mubr.msk.bf16.mxu1 %vm10508_vm0, %v10507_v1 }
0x2e02   : > { %v6179_v2 = vpop.f32.mrb[124].mxu1 }
0x2e03   : > { %v6185_v3 = vpack.c.bf16 %v6179_v2, %v6179_v2  ;;  %v9865_v10 = vpop.f32.mrb[125].mxu1 }
0x2e04   : > { %v6182_v11 = vpop.f32.mrb[126].mxu1  ;;  %v10296_v10 = vld [vmem:[%s11911_s0 + $0x38] sm:$0xff]  }
0x2e05   : > { %v9866_v21 = vpop.f32.mrb[127].mxu1  ;;  %9870 = vmatmul.mubr.msk.bf16.vlgmr.msra.gmra.mrb[128].mxu0 %vm1904_vm1, %v6185_v3  ;;  %v10297_v11 = vld [vmem:[%s11915_s5 + $0x30] sm:$0xff]  }
0x2e06   : > { %9880 = vmatpush3.bf16.msra.mxu0 %v10291_v49  ;;  %9883 = vmatprep.mubr.msk.bf16.mxu0 %vm10508_vm0, %v10507_v1  ;;  %v10295_v49 = vld [vmem:[%s11911_s0 + $0x30] sm:$0xff]   ;;  %v10298_v21 = vld [vmem:[%s11915_s5 + $0x38] sm:$0xff]   ;;  %s11922_s0 = sld [smem:[#allocation41_spill]]  ;;  %s11926_s5 = sld [smem:[#allocation51_spill]] }
0x2e07   : > { %9881 = vmatprep.subr.bf16.mxu0 %v10507_v1 }
0x2e0a   : > { %v6272_v39 = vpop.f32.mrb[128].mxu1  ;;  %9882 = vmatpush3.bf16.msra.mxu0 %v10292_v12 }
0x2e0b   : > { %v9877_v43 = vpop.f32.mrb[129].mxu1  ;;  %9895 = vmatprep.subr.bf16.mxu0 %v10507_v1 }
0x2e0c   : > { %v6275_v14 = vpop.f32.mrb[130].mxu1 }
0x2e0d   : > { %v9878_v15 = vpop.f32.mrb[131].mxu1  ;;  %9884 = vmatmul.mubr.msk.bf16.vlgmr.msra.gmra.mrb[132].mxu0 %vm2163_vm10, %v11400_v48 }
0x2e0e   : > { %9896 = vmatpush3.bf16.msra.mxu0 %v10293_v42  ;;  %9899 = vmatprep.mubr.msk.bf16.mxu0 %vm10508_vm0, %v10507_v1  ;;  %v10300_v15 = vld [vmem:[%s11914_s18 + $0x38] sm:$0xff]  }
0x2e0f   : > { %9897 = vmatprep.subr.bf16.mxu0 %v10507_v1 }
0x2e12   : > { %v6402_v18 = vpop.f32.mrb[132].mxu1  ;;  %9898 = vmatpush3.bf16.msra.mxu0 %v10294_v16 }
0x2e13   : > { %v9893_v19 = vpop.f32.mrb[133].mxu1  ;;  %9909 = vmatprep.subr.bf16.mxu0 %v10507_v1  ;;  %v6403_v22 = vadd.f32 %v8978_v17, %v6402_v18 }
0x2e14   : > { %v6405_v20 = vpop.f32.mrb[134].mxu1 }
0x2e15   : > { %v6406_v23 = vadd.f32 %v8978_v17, %v6405_v20  ;;  %v9894_v25 = vpop.f32.mrb[135].mxu1  ;;  %9900 = vmatmul.mubr.msk.bf16.vlgmr.msra.gmra.mrb[136].mxu0 %vm2163_vm10, %v11416_v24  ;;  %v9018_v20 = vld [vmem:[%s11919_s7 + $0x3] ss:$0 sm:$0xff]  ;;  %s11928_s7 = sld [smem:[#allocation45_spill]] }
0x2e16   : > { %9911 = vmatprep.mubr.msk.bf16.mxu0 %vm10508_vm0, %v10507_v1 }
0x2e17   : > { %v6478_v26 = vpack.c.bf16 %v6406_v23, %v6403_v22 }
0x2e19   : > { %v6483_v28 = vsel %vm1904_vm1, %v6478_v26, 0 }
0x2e1a   : > { %9904 = vmatpush3.bf16.xpose.msra.mxu1 %v6483_v28 }
0x2e1b   : > { %9915 = vmatprep.subr.bf16.mxu1 %v10507_v1 }
0x2ed8   : > { %v6226_v29 = vpop.f32.mrb[128].mxu0 }
0x2ed9   : > { %v11519_v27 = vadd.f32 %v6272_v39, %v6226_v29  ;;  %v9871_v30 = vpop.f32.mrb[129].mxu0  ;;  %v10299_v39 = vld [vmem:[%s11914_s18 + $0x30] sm:$0xff]  }
0x2eda   : > { %v6229_v32 = vpop.f32.mrb[130].mxu0 }
0x2edb   : > { %v9872_v33 = vpop.f32.mrb[131].mxu0 }
0x2ee0   : > { %v6337_v31 = vpop.f32.mrb[132].mxu0 }
0x2ee1   : > { %v6338_v40 = vadd.f32 %v8969_v35, %v6337_v31  ;;  %v9885_v44 = vpop.f32.mrb[133].mxu0 }
0x2ee2   : > { %v6340_v45 = vpop.f32.mrb[134].mxu0  ;;  %v9009_v44 = vld [vmem:[%s11918_s6 + $0x3] ss:$0 sm:$0xff]  ;;  %s11927_s6 = sld [smem:[#allocation46_spill]] }
0x2ee3   : > { %v6477_v46 = vpack.c.bf16 %v6338_v40, %v6338_v40  ;;  %v9886_v47 = vpop.f32.mrb[135].mxu0 }
0x2ee5   : > { %9906 = vmatmul.mubr.msk.bf16.vlgmr.msra.gmra.mrb[136].mxu1 %vm1904_vm1, %v6477_v46 }
0x2ee6   : > { %9917 = vmatprep.mubr.msk.bf16.mxu1 %vm10508_vm0, %v10507_v1  ;;  %9916 = vmatpush3.bf16.msra.mxu1 %v6589_v4 }
0x2ee7   : > { %9929 = vmatprep.subr.bf16.mxu1 %v10507_v1 }
0x2ee8   : > { %v6468_v34 = vpop.f32.mrb[136].mxu0 }
0x2ee9   : > { %v9901_v36 = vpop.f32.mrb[137].mxu0  ;;  %v6469_v53 = vadd.f32 %v8987_v50, %v6468_v34 }
0x2eea   : > { %v6471_v52 = vpop.f32.mrb[138].mxu0 }
0x2eeb   : > { %v6472_v54 = vadd.f32 %v8987_v50, %v6471_v52  ;;  %v9902_v37 = vpop.f32.mrb[139].mxu0 }
0x2eed   : > { %v6537_v55 = vpack.c.bf16 %v6472_v54, %v6469_v53  ;;  %v9000_v53 = vld [vmem:[%s11920_s3 + $0x3] ss:$0 sm:$0xff]  ;;  %s11924_s3 = sld [smem:[#allocation44_spill]] }
0x2eef   : > { %v6542_v56 = vand.u32 %v6537_v55, %v11182_v38 }
0x2ef1   : > { %9910 = vmatpush3.bf16.msra.mxu0 %v6542_v56 }
0x2ef2   : > { %9921 = vmatprep.subr.bf16.mxu0 %v10507_v1 }
0x2fb8   : > { %v6519_v57 = vpop.f32.mrb[136].mxu1 }
0x2fb9   : > { %v9907_v58 = vpop.f32.mrb[137].mxu1  ;;  %v6525_v59 = vsel %vm2024_vm2, %v6519_v57, -inf }
0x2fba   : > { %6526 = vmax.xlane.f32.xlu1 %v6525_v59  ;;  %v6522_v60 = vpop.f32.mrb[138].mxu1 }
0x2fbb   : > { %v9908_v61 = vpop.f32.mrb[139].mxu1 }
0x3047   : > { %v6527_v62 = vpop.xlane.xlu1 %6526 }
0x3048   : > { %v6528_v63 = vsub.f32 %v6519_v57, %v6527_v62 }
0x304a   : > { %v6529_v0 = vmul.f32 1.442695, %v6528_v63 }
0x304c   : > { %10407 = vpow2.f32 %v6529_v0  ;;  %v9022_v0 = vld [vmem:[%s11921_s2 + $0xc] sm:$0xf]  ;;  %s11923_s2 = sld [smem:[#allocation42_spill]] }
0x3056   : > { %v10408_v51 = vpop.eup %10407 }
0x3057   : > { %v6531_v5 = vsel %vm2024_vm2, %v10408_v51, 0.0 }
0x3058   : > { %6532 = vadd.xlane.f32.xlu0 %v6531_v5 }
0x30e5   : > { %v6533_v7 = vpop.xlane.xlu0 %6532 }
0x30e6   : > { %10409 = vrcp.f32 %v6533_v7 }
0x30f0   : > { %v10410_v9 = vpop.eup %10409 }
0x30f1   : > { %v6535_v2 = vmul.f32 %v10410_v9, %v10408_v51  ;;  %v6943_v51 = vsel %vm2398_vm11, %v9022_v0, 0 }
0x30f3   : > { %v6536_v3 = vpack.c.bf16 %v6535_v2, %v6535_v2 }
0x30f5   : > { %9912 = vmatmul.mubr.msk.bf16.vlgmr.msra.gmra.mrb[140].mxu0 %vm2024_vm2, %v6536_v3 }
0x30f6   : > { %9922 = vmatpush3.bf16.msra.mxu0 %v10295_v49  ;;  %9925 = vmatprep.mubr.msk.bf16.mxu0 %vm10508_vm0, %v10507_v1 }
0x30f7   : > { %9923 = vmatprep.subr.bf16.mxu0 %v10507_v1 }
0x30fa   : > { %9924 = vmatpush3.bf16.msra.mxu0 %v10296_v10 }
0x30fb   : > { %9937 = vmatprep.subr.bf16.mxu0 %v10507_v1 }
0x30fd   : > { %9926 = vmatmul.mubr.msk.bf16.vlgmr.msra.gmra.mrb[144].mxu0 %vm2163_vm10, %v11400_v48 }
0x30fe   : > { %9938 = vmatpush3.bf16.msra.mxu0 %v10297_v11  ;;  %9941 = vmatprep.mubr.msk.bf16.mxu0 %vm10508_vm0, %v10507_v1 }
0x30ff   : > { %9939 = vmatprep.subr.bf16.mxu0 %v10507_v1 }
0x3102   : > { %9940 = vmatpush3.bf16.msra.mxu0 %v10298_v21  ;;  %v9026_v21 = vld [vmem:[%s11922_s0] ss:$0 sm:$0xff]  ;;  %s11925_s0 = sld [smem:[#allocation50_spill]] }
0x3103   : > { %9951 = vmatprep.subr.bf16.mxu0 %v10507_v1 }
0x3105   : > { %9942 = vmatmul.mubr.msk.bf16.vlgmr.msra.gmra.mrb[148].mxu0 %vm2163_vm10, %v11416_v24 }
0x3106   : > { %9953 = vmatprep.mubr.msk.bf16.mxu0 %vm10508_vm0, %v10507_v1 }
0x31c8   : > { %v6578_v12 = vpop.f32.mrb[140].mxu0 }
0x31c9   : > { %v6584_v48 = vpack.c.bf16 %v6578_v12, %v6578_v12  ;;  %v9913_v42 = vpop.f32.mrb[141].mxu0 }
0x31ca   : > { %v6581_v43 = vpop.f32.mrb[142].mxu0 }
0x31cb   : > { %v9914_v14 = vpop.f32.mrb[143].mxu0  ;;  %9918 = vmatmul.mubr.msk.bf16.vlgmr.msra.gmra.mrb[140].mxu1 %vm1904_vm1, %v6584_v48 }
0x31cc   : > { %9930 = vmatpush3.bf16.msra.mxu1 %v10299_v39  ;;  %9933 = vmatprep.mubr.msk.bf16.mxu1 %vm10508_vm0, %v10507_v1 }
0x31cd   : > { %9931 = vmatprep.subr.bf16.mxu1 %v10507_v1 }
0x31d0   : > { %v6691_v16 = vpop.f32.mrb[144].mxu0  ;;  %9932 = vmatpush3.bf16.msra.mxu1 %v10300_v15 }
0x31d1   : > { %v9927_v17 = vpop.f32.mrb[145].mxu0  ;;  %9945 = vmatprep.subr.bf16.mxu1 %v10507_v1  ;;  %v6692_v54 = vadd.f32 %v9000_v53, %v6691_v16 }
0x31d2   : > { %v6694_v18 = vpop.f32.mrb[146].mxu0 }
0x31d3   : > { %v9928_v19 = vpop.f32.mrb[147].mxu0  ;;  %9934 = vmatmul.mubr.msk.bf16.vlgmr.msra.gmra.mrb[144].mxu1 %vm2163_vm10, %v11416_v24  ;;  %v6831_v37 = vpack.c.bf16 %v6692_v54, %v6692_v54 }
0x31d4   : > { %9947 = vmatprep.mubr.msk.bf16.mxu1 %vm10508_vm0, %v10507_v1 }
0x31d8   : > { %v6822_v22 = vpop.f32.mrb[148].mxu0 }
0x31d9   : > { %v9943_v23 = vpop.f32.mrb[149].mxu0  ;;  %v6823_v26 = vadd.f32 %v9018_v20, %v6822_v22  ;;  %v10301_v22 = vld [vmem:[%s11923_s2] sm:$0xff]  }
0x31da   : > { %v6825_v25 = vpop.f32.mrb[150].mxu0  ;;  %v10302_v23 = vld [vmem:[%s11924_s3] sm:$0xff]  }
0x31db   : > { %v6826_v28 = vadd.f32 %v9018_v20, %v6825_v25  ;;  %v9944_v29 = vpop.f32.mrb[151].mxu0  ;;  %v10304_v25 = vld [vmem:[%s11924_s3 + $0x8] sm:$0xff]  }
0x31dd   : > { %v6891_v30 = vpack.c.bf16 %v6826_v28, %v6823_v26 }
0x31df   : > { %v6896_v32 = vand.u32 %v6891_v30, %v11182_v38 }
0x31e1   : > { %9952 = vmatpush3.bf16.msra.mxu0 %v6896_v32  ;;  %v9027_v32 = vld [vmem:[%s11925_s0] ss:$0 sm:$0xff]  ;;  %s11930_s0 = sld [smem:[#allocation47_spill]] }
0x31e2   : > { %9963 = vmatprep.subr.bf16.mxu0 %v10507_v1 }
0x329e   : > { %v6625_v33 = vpop.f32.mrb[140].mxu1 }
0x329f   : > { %v6631_v24 = vadd.f32 %v6625_v33, %v11519_v27  ;;  %v9919_v35 = vpop.f32.mrb[141].mxu1 }
0x32a0   : > { %v6628_v31 = vpop.f32.mrb[142].mxu1 }
0x32a1   : > { %v9920_v40 = vpop.f32.mrb[143].mxu1 }
0x32a2   : > { %v10305_v40 = vld [vmem:[%s11927_s6] sm:$0xff]  }
0x32a6   : > { %v6756_v45 = vpop.f32.mrb[144].mxu1 }
0x32a7   : > { %v9935_v46 = vpop.f32.mrb[145].mxu1  ;;  %v6757_v50 = vadd.f32 %v9009_v44, %v6756_v45  ;;  %v10306_v45 = vld [vmem:[%s11927_s6 + $0x8] sm:$0xff]  }
0x32a8   : > { %v6759_v47 = vpop.f32.mrb[146].mxu1  ;;  %v9033_v46 = vld [vmem:[%s11928_s7] ss:$0 sm:$0xff] }
0x32a9   : > { %v6760_v34 = vadd.f32 %v9009_v44, %v6759_v47  ;;  %v9936_v36 = vpop.f32.mrb[147].mxu1 }
0x32ab   : > { %v6832_v52 = vpack.c.bf16 %v6760_v34, %v6757_v50 }
0x32ad   : > { %v6837_v38 = vsel %vm1904_vm1, %v6832_v52, 0 }
0x32ae   : > { %9946 = vmatpush3.bf16.xpose.msra.mxu1 %v6837_v38 }
0x32af   : > { %9957 = vmatprep.subr.bf16.mxu1 %v10507_v1 }
0x32b5   : > { %9948 = vmatmul.mubr.msk.bf16.vlgmr.msra.gmra.mrb[148].mxu1 %vm1904_vm1, %v6831_v37 }
0x32b6   : > { %9959 = vmatprep.mubr.msk.bf16.mxu1 %vm10508_vm0, %v10507_v1  ;;  %9958 = vmatpush3.bf16.msra.mxu1 %v6943_v51 }
0x32b7   : > { %9971 = vmatprep.subr.bf16.mxu1 %v10507_v1 }
0x3388   : > { %v6873_v27 = vpop.f32.mrb[148].mxu1 }
0x3389   : > { %v9949_v55 = vpop.f32.mrb[149].mxu1  ;;  %v6879_v56 = vsel %vm2024_vm2, %v6873_v27, -inf }
0x338a   : > { %6880 = vmax.xlane.f32.xlu1 %v6879_v56  ;;  %v6876_v57 = vpop.f32.mrb[150].mxu1 }
0x338b   : > { %v9950_v58 = vpop.f32.mrb[151].mxu1  ;;  %v9037_v57 = vld [vmem:[%s11930_s0] ss:$0 sm:$0xff] }
0x3417   : > { %v6881_v59 = vpop.xlane.xlu1 %6880 }
0x3418   : > { %v6882_v60 = vsub.f32 %v6873_v27, %v6881_v59 }
0x341a   : > { %v6883_v61 = vmul.f32 1.442695, %v6882_v60 }
0x341c   : > { %10411 = vpow2.f32 %v6883_v61 }
0x3426   : > { %v10412_v62 = vpop.eup %10411 }
0x3427   : > { %v6885_v63 = vsel %vm2024_vm2, %v10412_v62, 0.0 }
0x3428   : > { %6886 = vadd.xlane.f32.xlu0 %v6885_v63  ;;  %v10307_v63 = vld [vmem:[%s11923_s2 + $0x10] sm:$0xff]  }
0x34b5   : > { %v6887_v5 = vpop.xlane.xlu0 %6886 }
0x34b6   : > { %10413 = vrcp.f32 %v6887_v5 }
0x34c0   : > { %v10414_v6 = vpop.eup %10413 }
0x34c1   : > { %v6889_v4 = vmul.f32 %v10414_v6, %v10412_v62 }
0x34c3   : > { %v6890_v7 = vpack.c.bf16 %v6889_v4, %v6889_v4  ;;  %v10308_v4 = vld [vmem:[%s11923_s2 + $0x18] sm:$0xff]  }
0x34c5   : > { %9954 = vmatmul.mubr.msk.bf16.vlgmr.msra.gmra.mrb[152].mxu0 %vm2024_vm2, %v6890_v7  ;;  %v10309_v7 = vld [vmem:[%s11927_s6 + $0x10] sm:$0xff]  }
0x34c6   : > { %9967 = vmatprep.mubr.msk.bf16.mxu0 %vm10508_vm0, %v10507_v1  ;;  %9964 = vmatpush3.bf16.msra.mxu0 %v10301_v22 }
0x34c7   : > { %9965 = vmatprep.subr.bf16.mxu0 %v10507_v1 }
0x3598   : > { %v6932_v9 = vpop.f32.mrb[152].mxu0 }
0x3599   : > { %v6938_v2 = vpack.c.bf16 %v6932_v9, %v6932_v9  ;;  %v9955_v49 = vpop.f32.mrb[153].mxu0  ;;  %v10310_v9 = vld [vmem:[%s11927_s6 + $0x18] sm:$0xff]  }
0x359a   : > { %v6935_v3 = vpop.f32.mrb[154].mxu0 }
0x359b   : > { %v9956_v10 = vpop.f32.mrb[155].mxu0  ;;  %9960 = vmatmul.mubr.msk.bf16.vlgmr.msra.gmra.mrb[152].mxu1 %vm1904_vm1, %v6938_v2 }
0x359c   : > { %9975 = vmatprep.mubr.msk.bf16.mxu1 %vm10508_vm0, %v10507_v1  ;;  %9972 = vmatpush3.bf16.msra.mxu1 %v10302_v23 }
0x359d   : > { %9973 = vmatprep.subr.bf16.mxu1 %v10507_v1 }
0x35a0   : > { %9974 = vmatpush3.bf16.msra.mxu1 %v10304_v25 }
0x35a1   : > { %9987 = vmatprep.subr.bf16.mxu1 %v10507_v1 }
0x366e   : > { %v6979_v11 = vpop.f32.mrb[152].mxu1 }
0x366f   : > { %v6985_v12 = vadd.f32 %v6979_v11, %v6631_v24  ;;  %v9961_v39 = vpop.f32.mrb[153].mxu1  ;;  %v9028_v24 = vld [vmem:[%s11926_s5] ss:$0 sm:$0xff]  ;;  %s11929_s5 = sld [smem:[#allocation43_spill]] }
0x3670   : > { %v6982_v48 = vpop.f32.mrb[154].mxu1 }
0x3671   : > { %v6993_v42 = vadd.f32 %v9026_v21, %v6985_v12  ;;  %v9962_v43 = vpop.f32.mrb[155].mxu1 }
0x3673   : > { %v6994_v14 = vadd.f32 %v6993_v42, %v11396_v8  ;;  %v10303_v8 = vld [vmem:[%s11923_s2 + $0x8] sm:$0xff]   ;;  %v9066_v42 = vld [vmem:[%s11930_s0 + $0x1] ss:$0 sm:$0xff] }
0x3674   : > { %9966 = vmatpush3.bf16.msra.mxu0 %v10303_v8 }
0x3675   : > { %v6997_v15 = vsel %vm2163_vm10, %v6994_v14, 0.0  ;;  %9979 = vmatprep.subr.bf16.mxu0 %v10507_v1  ;;  %v9029_v55 = vld [vmem:[%s11929_s5] ss:$0 sm:$0xff] }
0x3676   : > { %6998 = vadd.xlane.f32.xlu1 %v6997_v15 }
0x3703   : > { %v6999_v16 = vpop.xlane.xlu1 %6998 }
0x3704   : > { %v7000_v17 = vmul.f32 0.03125, %v6999_v16 }
0x3706   : > { %v7001_v18 = vsub.f32 %v6994_v14, %v7000_v17 }
0x3708   : > { %v7002_v19 = vmul.f32 %v7001_v18, %v7001_v18 }
0x370a   : > { %v7003_v20 = vsel %vm2163_vm10, %v7002_v19, 0.0 }
0x370b   : > { %7004 = vadd.xlane.f32.xlu0 %v7003_v20 }
0x3798   : > { %v7005_v26 = vpop.xlane.xlu0 %7004 }
0x3799   : > { %v7006_v28 = vmul.f32 0.03125, %v7005_v26 }
0x379b   : > { %v7007_v29 = vadd.f32 1e-05, %v7006_v28 }
0x379d   : > { %10415 = vrsqrt.f32 %v7007_v29 }
0x37a7   : > { %v10416_v30 = vpop.eup %10415 }
0x37a8   : > { %v7009_v33 = vmul.f32 %v10416_v30, %v7001_v18  ;;  %v10311_v30 = vld [vmem:[%s11924_s3 + $0x10] sm:$0xff]  }
0x37aa   : > { %v7016_v35 = vmul.f32 %v9027_v32, %v7009_v33  ;;  %v10312_v33 = vld [vmem:[%s11924_s3 + $0x18] sm:$0xff]  }
0x37ac   : > { %v11599_v31 = vadd.f32 %v9028_v24, %v7016_v35 }
0x37ae   : > { %v11604_v44 = vpack.c.bf16 %v11599_v31, %v11599_v31 }
0x37b0   : > { %9968 = vmatmul.mubr.msk.bf16.vlgmr.msra.gmra.mrb[156].mxu0 %vm2163_vm10, %v11604_v44  ;;  %9976 = vmatmul.mubr.msk.bf16.vlgmr.msra.gmra.mrb[156].mxu1 %vm2163_vm10, %v11604_v44 }
0x37b1   : > { %9980 = vmatpush3.bf16.msra.mxu0 %v10305_v40  ;;  %9983 = vmatprep.mubr.msk.bf16.mxu0 %vm10508_vm0, %v10507_v1 }
0x37b2   : > { %9981 = vmatprep.subr.bf16.mxu0 %v10507_v1  ;;  %9989 = vmatprep.mubr.msk.bf16.mxu1 %vm10508_vm0, %v10507_v1 }
0x37b5   : > { %9982 = vmatpush3.bf16.msra.mxu0 %v10306_v45 }
0x37b6   : > { %9993 = vmatprep.subr.bf16.mxu0 %v10507_v1 }
0x37b8   : > { %9984 = vmatmul.mubr.msk.bf16.vlgmr.msra.gmra.mrb[160].mxu0 %vm2163_vm10, %v11604_v44 }
0x37b9   : > { %9995 = vmatprep.mubr.msk.bf16.mxu0 %vm10508_vm0, %v10507_v1 }
0x3883   : > { %v7085_v47 = vpop.f32.mrb[156].mxu0  ;;  %v7148_v50 = vpop.f32.mrb[156].mxu1 }
0x3884   : > { %v7149_v34 = vadd.f32 %v9033_v46, %v7148_v50  ;;  %v9969_v36 = vpop.f32.mrb[157].mxu0  ;;  %v9977_v52 = vpop.f32.mrb[157].mxu1  ;;  %v7086_v58 = vadd.f32 %v9029_v55, %v7085_v47  ;;  %v9057_v46 = vld [vmem:[%s11928_s7 + $0x1] ss:$0 sm:$0xff] }
0x3885   : > { %v7088_v53 = vpop.f32.mrb[158].mxu0  ;;  %v7151_v38 = vpop.f32.mrb[158].mxu1 }
0x3886   : > { %v7219_v54 = vpack.c.bf16 %v7149_v34, %v7149_v34  ;;  %v9970_v37 = vpop.f32.mrb[159].mxu0  ;;  %v9978_v27 = vpop.f32.mrb[159].mxu1  ;;  %v7218_v0 = vpack.c.bf16 %v7086_v58, %v7086_v58  ;;  %v9048_v38 = vld [vmem:[%s11929_s5 + $0x1] ss:$0 sm:$0xff] }
0x3888   : > { %v7224_v56 = vsel %vm1904_vm1, %v7219_v54, 0 }
0x3889   : > { %9988 = vmatpush3.bf16.xpose.msra.mxu1 %v7224_v56 }
0x388a   : > { %9999 = vmatprep.subr.bf16.mxu1 %v10507_v1 }
0x388b   : > { %v7211_v59 = vpop.f32.mrb[160].mxu0 }
0x388c   : > { %v7212_v60 = vadd.f32 %v9037_v57, %v7211_v59  ;;  %v9985_v61 = vpop.f32.mrb[161].mxu0 }
0x388d   : > { %v7214_v62 = vpop.f32.mrb[162].mxu0 }
0x388e   : > { %v7278_v51 = vpack.c.bf16 %v7212_v60, %v7212_v60  ;;  %v9986_v5 = vpop.f32.mrb[163].mxu0 }
0x3890   : > { %v7283_v6 = vsel %vm2398_vm11, %v7278_v51, 0  ;;  %9990 = vmatmul.mubr.msk.bf16.vlgmr.msra.gmra.mrb[160].mxu1 %vm1904_vm1, %v7218_v0  ;;  %v9070_v51 = vld [vmem:[%s11931_s8 + $0x4] sm:$0xf] }
0x3891   : > { %9994 = vmatpush3.bf16.msra.mxu0 %v7283_v6  ;;  %10000 = vmatpush3.bf16.msra.mxu1 %v10307_v63  ;;  %v7635_v5 = vsel %vm2398_vm11, %v9070_v51, 0 }
0x3892   : > { %10001 = vmatprep.subr.bf16.mxu1 %v10507_v1  ;;  %10003 = vmatprep.mubr.msk.bf16.mxu1 %vm10508_vm0, %v10507_v1 }
0x3893   : > { %10007 = vmatprep.subr.bf16.mxu0 %v10507_v1 }
0x3895   : > { %10002 = vmatpush3.bf16.msra.mxu1 %v10308_v4 }
0x3896   : > { %10015 = vmatprep.subr.bf16.mxu1 %v10507_v1 }
0x3898   : > { %10004 = vmatmul.mubr.msk.bf16.vlgmr.msra.gmra.mrb[164].mxu1 %vm2163_vm10, %v11604_v44 }
0x3899   : > { %10016 = vmatpush3.bf16.msra.mxu1 %v10309_v7  ;;  %10019 = vmatprep.mubr.msk.bf16.mxu1 %vm10508_vm0, %v10507_v1  ;;  %v7217_v7 = vld [vmem:[%s11931_s8] sm:$0xf] }
0x389a   : > { %10017 = vmatprep.subr.bf16.mxu1 %v10507_v1 }
0x389d   : > { %10018 = vmatpush3.bf16.msra.mxu1 %v10310_v9 }
0x389e   : > { %10029 = vmatprep.subr.bf16.mxu1 %v10507_v1 }
0x38a0   : > { %10020 = vmatmul.mubr.msk.bf16.vlgmr.msra.gmra.mrb[168].mxu1 %vm2163_vm10, %v11604_v44 }
0x38a1   : > { %10031 = vmatprep.mubr.msk.bf16.mxu1 %vm10508_vm0, %v10507_v1 }
0x3963   : > { %v7260_v2 = vpop.f32.mrb[160].mxu1 }
0x3964   : > { %v9991_v49 = vpop.f32.mrb[161].mxu1  ;;  %v7266_v3 = vsel %vm1904_vm1, %v7260_v2, -inf }
0x3965   : > { %7267 = vmax.xlane.f32.xlu1 %v7266_v3  ;;  %v7263_v10 = vpop.f32.mrb[162].mxu1  ;;  %v7681_v49 = vsel %vm2398_vm11, %v7217_v7, 0  ;;  %v10313_v3 = vld [vmem:[%s11924_s3 + $0x20] sm:$0xff]  }
0x3966   : > { %v9992_v11 = vpop.f32.mrb[163].mxu1 }
0x3967   : > { %v10314_v11 = vld [vmem:[%s11924_s3 + $0x28] sm:$0xff]  }
0x396b   : > { %v7385_v21 = vpop.f32.mrb[164].mxu1 }
0x396c   : > { %v10005_v12 = vpop.f32.mrb[165].mxu1  ;;  %v7386_v37 = vadd.f32 %v9048_v38, %v7385_v21 }
0x396d   : > { %v7388_v39 = vpop.f32.mrb[166].mxu1  ;;  %v10315_v12 = vld [vmem:[%s11923_s2 + $0x20] sm:$0xff]  }
0x396e   : > { %v10006_v48 = vpop.f32.mrb[167].mxu1  ;;  %v7523_v27 = vpack.c.bf16 %v7386_v37, %v7386_v37 }
0x3973   : > { %v7515_v43 = vpop.f32.mrb[168].mxu1 }
0x3974   : > { %v7516_v14 = vadd.f32 %v9066_v42, %v7515_v43  ;;  %v10021_v15 = vpop.f32.mrb[169].mxu1 }
0x3975   : > { %v7518_v16 = vpop.f32.mrb[170].mxu1 }
0x3976   : > { %v7583_v17 = vpack.c.bf16 %v7516_v14, %v7516_v14  ;;  %v10022_v18 = vpop.f32.mrb[171].mxu1  ;;  %v10316_v14 = vld [vmem:[%s11923_s2 + $0x28] sm:$0xff]   ;;  %v10317_v16 = vld [vmem:[%s11927_s6 + $0x20] sm:$0xff]  }
0x3978   : > { %v7588_v19 = vsel %vm2398_vm11, %v7583_v17, 0 }
0x3979   : > { %10030 = vmatpush3.bf16.msra.mxu1 %v7588_v19 }
0x397a   : > { %10041 = vmatprep.subr.bf16.mxu1 %v10507_v1 }
0x39f2   : > { %v7268_v20 = vpop.xlane.xlu1 %7267 }
0x39f3   : > { %v7269_v22 = vsub.f32 %v7260_v2, %v7268_v20  ;;  %v10318_v20 = vld [vmem:[%s11927_s6 + $0x28] sm:$0xff]  }
0x39f5   : > { %v7270_v23 = vmul.f32 1.442695, %v7269_v22  ;;  %v9089_v22 = vld [vmem:[%s11928_s7 + $0x2] ss:$0 sm:$0xff] }
0x39f7   : > { %10417 = vpow2.f32 %v7270_v23 }
0x3a01   : > { %v10418_v8 = vpop.eup %10417 }
0x3a02   : > { %v7272_v25 = vsel %vm1904_vm1, %v10418_v8, 0.0 }
0x3a03   : > { %7273 = vadd.xlane.f32.xlu0 %v7272_v25 }
0x3a90   : > { %v7274_v26 = vpop.xlane.xlu0 %7273 }
0x3a91   : > { %10419 = vrcp.f32 %v7274_v26 }
0x3a9b   : > { %v10420_v28 = vpop.eup %10419 }
0x3a9c   : > { %v7276_v29 = vmul.f32 %v10420_v28, %v10418_v8 }
0x3a9e   : > { %v7277_v32 = vpack.c.bf16 %v7276_v29, %v7276_v29 }
0x3aa0   : > { %9996 = vmatmul.mubr.msk.bf16.vlgmr.msra.gmra.mrb[164].mxu0 %vm1904_vm1, %v7277_v32 }
0x3aa1   : > { %10008 = vmatpush3.bf16.msra.mxu0 %v10311_v30  ;;  %10011 = vmatprep.mubr.msk.bf16.mxu0 %vm10508_vm0, %v10507_v1 }
0x3aa2   : > { %10009 = vmatprep.subr.bf16.mxu0 %v10507_v1 }
0x3aa5   : > { %10010 = vmatpush3.bf16.msra.mxu0 %v10312_v33 }
0x3aa6   : > { %10023 = vmatprep.subr.bf16.mxu0 %v10507_v1 }
0x3aa8   : > { %10012 = vmatmul.mubr.msk.bf16.vlgmr.msra.gmra.mrb[168].mxu0 %vm2163_vm10, %v11604_v44 }
0x3aa9   : > { %10025 = vmatprep.mubr.msk.bf16.mxu0 %vm10508_vm0, %v10507_v1 }
0x3b73   : > { %v7319_v24 = vpop.f32.mrb[164].mxu0 }
0x3b74   : > { %v9997_v35 = vpop.f32.mrb[165].mxu0  ;;  %v7325_v10 = vpack.c.bf16 %v7319_v24, %v7319_v24 }
0x3b75   : > { %v7322_v40 = vpop.f32.mrb[166].mxu0 }
0x3b76   : > { %v9998_v45 = vpop.f32.mrb[167].mxu0 }
0x3b77   : > { %v9080_v45 = vld [vmem:[%s11929_s5 + $0x2] ss:$0 sm:$0xff] }
0x3b7b   : > { %v7450_v47 = vpop.f32.mrb[168].mxu0 }
0x3b7c   : > { %v7451_v50 = vadd.f32 %v9057_v46, %v7450_v47  ;;  %v10013_v34 = vpop.f32.mrb[169].mxu0 }
0x3b7d   : > { %v7453_v36 = vpop.f32.mrb[170].mxu0 }
0x3b7e   : > { %v7524_v52 = vpack.c.bf16 %v7451_v50, %v7451_v50  ;;  %v10014_v53 = vpop.f32.mrb[171].mxu0 }
0x3b7f   : > { %v9098_v53 = vld [vmem:[%s11930_s0 + $0x2] ss:$0 sm:$0xff] }
0x3b80   : > { %v7529_v54 = vsel %vm1904_vm1, %v7524_v52, 0 }
0x3b81   : > { %10024 = vmatpush3.bf16.xpose.msra.mxu0 %v7529_v54 }
0x3b82   : > { %10035 = vmatprep.subr.bf16.mxu0 %v10507_v1 }
0x3b88   : > { %10026 = vmatmul.mubr.msk.bf16.vlgmr.msra.gmra.mrb[172].mxu0 %vm1904_vm1, %v7523_v27 }
0x3b89   : > { %10037 = vmatprep.mubr.msk.bf16.mxu0 %vm10508_vm0, %v10507_v1  ;;  %10036 = vmatpush3.bf16.msra.mxu0 %v7635_v5 }
0x3b8a   : > { %10047 = vmatprep.subr.bf16.mxu0 %v10507_v1 }
0x3c5b   : > { %v7565_v55 = vpop.f32.mrb[172].mxu0 }
0x3c5c   : > { %v10027_v56 = vpop.f32.mrb[173].mxu0  ;;  %v7571_v57 = vsel %vm1904_vm1, %v7565_v55, -inf }
0x3c5d   : > { %7572 = vmax.xlane.f32.xlu1 %v7571_v57  ;;  %v7568_v58 = vpop.f32.mrb[174].mxu0 }
0x3c5e   : > { %v10028_v59 = vpop.f32.mrb[175].mxu0 }
0x3cea   : > { %v7573_v60 = vpop.xlane.xlu1 %7572 }
0x3ceb   : > { %v7574_v61 = vsub.f32 %v7565_v55, %v7573_v60 }
0x3ced   : > { %v7575_v62 = vmul.f32 1.442695, %v7574_v61 }
0x3cef   : > { %10421 = vpow2.f32 %v7575_v62 }
0x3cf9   : > { %v10422_v63 = vpop.eup %10421 }
0x3cfa   : > { %v7577_v0 = vsel %vm1904_vm1, %v10422_v63, 0.0 }
0x3cfb   : > { %7578 = vadd.xlane.f32.xlu0 %v7577_v0 }
0x3d88   : > { %v7579_v6 = vpop.xlane.xlu0 %7578 }
0x3d89   : > { %10423 = vrcp.f32 %v7579_v6 }
0x3d93   : > { %v10424_v4 = vpop.eup %10423 }
0x3d94   : > { %v7581_v9 = vmul.f32 %v10424_v4, %v10422_v63  ;;  %v9102_v4 = vld [vmem:[%s11931_s8 + $0x8] sm:$0xf] }
0x3d95   : > { %v8032_v7 = vsel %vm2398_vm11, %v9102_v4, 0 }
0x3d96   : > { %v7582_v2 = vpack.c.bf16 %v7581_v9, %v7581_v9 }
0x3d98   : > { %10032 = vmatmul.mubr.msk.bf16.vlgmr.msra.gmra.mrb[172].mxu1 %vm1904_vm1, %v7582_v2 }
0x3d99   : > { %10042 = vmatpush3.bf16.msra.mxu1 %v7681_v49  ;;  %10043 = vmatprep.mubr.msk.bf16.mxu1 %vm10508_vm0, %v10507_v1 }
0x3d9a   : > { %10055 = vmatprep.subr.bf16.mxu1 %v10507_v1 }
0x3da0   : > { %10044 = vmatmul.mubr.msk.bf16.vlgmr.msra.gmra.mrb[176].mxu1 %vm1904_vm1, %v7325_v10 }
0x3da1   : > { %10056 = vmatpush3.bf16.msra.mxu1 %v10313_v3  ;;  %10059 = vmatprep.mubr.msk.bf16.mxu1 %vm10508_vm0, %v10507_v1  ;;  %v10319_v3 = vld [vmem:[%s11923_s2 + $0x30] sm:$0xff]  }
0x3da2   : > { %10057 = vmatprep.subr.bf16.mxu1 %v10507_v1 }
0x3da5   : > { %10058 = vmatpush3.bf16.msra.mxu1 %v10314_v11  ;;  %v10320_v11 = vld [vmem:[%s11923_s2 + $0x38] sm:$0xff]   ;;  %s11933_s2 = sld [smem:[#allocation52_spill]] }
0x3da6   : > { %10071 = vmatprep.subr.bf16.mxu1 %v10507_v1 }
0x3da8   : > { %10060 = vmatmul.mubr.msk.bf16.vlgmr.msra.gmra.mrb[180].mxu1 %vm2163_vm10, %v11604_v44 }
0x3da9   : > { %10073 = vmatprep.mubr.msk.bf16.mxu1 %vm10508_vm0, %v10507_v1 }
0x3e6b   : > { %v7624_v21 = vpop.f32.mrb[172].mxu1 }
0x3e6c   : > { %v7630_v39 = vpack.c.bf16 %v7624_v21, %v7624_v21  ;;  %v10033_v48 = vpop.f32.mrb[173].mxu1  ;;  %v10321_v21 = vld [vmem:[%s11927_s6 + $0x30] sm:$0xff]  }
0x3e6d   : > { %v7627_v42 = vpop.f32.mrb[174].mxu1  ;;  %v10323_v48 = vld [vmem:[%s11924_s3 + $0x30] sm:$0xff]  }
0x3e6e   : > { %v10034_v43 = vpop.f32.mrb[175].mxu1  ;;  %10038 = vmatmul.mubr.msk.bf16.vlgmr.msra.gmra.mrb[176].mxu0 %vm1904_vm1, %v7630_v39 }
0x3e6f   : > { %10048 = vmatpush3.bf16.msra.mxu0 %v10315_v12  ;;  %10051 = vmatprep.mubr.msk.bf16.mxu0 %vm10508_vm0, %v10507_v1  ;;  %v10322_v12 = vld [vmem:[%s11927_s6 + $0x38] sm:$0xff]  }
0x3e70   : > { %10049 = vmatprep.subr.bf16.mxu0 %v10507_v1 }
0x3e73   : > { %v7717_v15 = vpop.f32.mrb[176].mxu1  ;;  %10050 = vmatpush3.bf16.msra.mxu0 %v10316_v14 }
0x3e74   : > { %v10045_v17 = vpop.f32.mrb[177].mxu1  ;;  %10063 = vmatprep.subr.bf16.mxu0 %v10507_v1 }
0x3e75   : > { %v7720_v18 = vpop.f32.mrb[178].mxu1 }
0x3e76   : > { %v10046_v19 = vpop.f32.mrb[179].mxu1  ;;  %10052 = vmatmul.mubr.msk.bf16.vlgmr.msra.gmra.mrb[180].mxu0 %vm2163_vm10, %v11604_v44 }
0x3e77   : > { %10064 = vmatpush3.bf16.msra.mxu0 %v10317_v16  ;;  %10067 = vmatprep.mubr.msk.bf16.mxu0 %vm10508_vm0, %v10507_v1  ;;  %v10324_v16 = vld [vmem:[%s11924_s3 + $0x38] sm:$0xff]  }
0x3e78   : > { %10065 = vmatprep.subr.bf16.mxu0 %v10507_v1 }
0x3e7b   : > { %v7847_v23 = vpop.f32.mrb[180].mxu1  ;;  %10066 = vmatpush3.bf16.msra.mxu0 %v10318_v20 }
0x3e7c   : > { %v7848_v8 = vadd.f32 %v9089_v22, %v7847_v23  ;;  %v10061_v25 = vpop.f32.mrb[181].mxu1  ;;  %10077 = vmatprep.subr.bf16.mxu0 %v10507_v1  ;;  %v9129_v22 = vld [vmem:[%s11930_s0 + $0x3] ss:$0 sm:$0xff]  ;;  %s11932_s0 = sld [smem:[#allocation49_spill]] }
0x3e7d   : > { %v7850_v26 = vpop.f32.mrb[182].mxu1 }
0x3e7e   : > { %v7921_v28 = vpack.c.bf16 %v7848_v8, %v7848_v8  ;;  %v10062_v29 = vpop.f32.mrb[183].mxu1  ;;  %10068 = vmatmul.mubr.msk.bf16.vlgmr.msra.gmra.mrb[184].mxu0 %vm2163_vm10, %v11604_v44 }
0x3e7f   : > { %10079 = vmatprep.mubr.msk.bf16.mxu0 %vm10508_vm0, %v10507_v1 }
0x3e80   : > { %v7926_v30 = vsel %vm1904_vm1, %v7921_v28, 0 }
0x3e81   : > { %10072 = vmatpush3.bf16.xpose.msra.mxu1 %v7926_v30 }
0x3e82   : > { %10083 = vmatprep.subr.bf16.mxu1 %v10507_v1 }
0x3f41   : > { %v7671_v32 = vpop.f32.mrb[176].mxu0 }
0x3f42   : > { %v11714_v33 = vadd.f32 %v7717_v15, %v7671_v32  ;;  %v10039_v24 = vpop.f32.mrb[177].mxu0 }
0x3f43   : > { %v7674_v35 = vpop.f32.mrb[178].mxu0 }
0x3f44   : > { %v10040_v40 = vpop.f32.mrb[179].mxu0 }
0x3f49   : > { %v7782_v46 = vpop.f32.mrb[180].mxu0 }
0x3f4a   : > { %v7783_v47 = vadd.f32 %v9080_v45, %v7782_v46  ;;  %v10053_v50 = vpop.f32.mrb[181].mxu0  ;;  %v9120_v45 = vld [vmem:[%s11928_s7 + $0x3] ss:$0 sm:$0xff] }
0x3f4b   : > { %v7785_v34 = vpop.f32.mrb[182].mxu0 }
0x3f4c   : > { %v7920_v36 = vpack.c.bf16 %v7783_v47, %v7783_v47  ;;  %v10054_v52 = vpop.f32.mrb[183].mxu0 }
0x3f4e   : > { %10074 = vmatmul.mubr.msk.bf16.vlgmr.msra.gmra.mrb[184].mxu1 %vm1904_vm1, %v7920_v36 }
0x3f4f   : > { %10085 = vmatprep.mubr.msk.bf16.mxu1 %vm10508_vm0, %v10507_v1  ;;  %10084 = vmatpush3.bf16.msra.mxu1 %v8032_v7 }
0x3f50   : > { %10097 = vmatprep.subr.bf16.mxu1 %v10507_v1 }
0x3f51   : > { %v7912_v38 = vpop.f32.mrb[184].mxu0 }
0x3f52   : > { %v7913_v54 = vadd.f32 %v9098_v53, %v7912_v38  ;;  %v10069_v37 = vpop.f32.mrb[185].mxu0  ;;  %v9111_v53 = vld [vmem:[%s11929_s5 + $0x3] ss:$0 sm:$0xff] }
0x3f53   : > { %v7915_v27 = vpop.f32.mrb[186].mxu0 }
0x3f54   : > { %v7980_v55 = vpack.c.bf16 %v7913_v54, %v7913_v54  ;;  %v10070_v56 = vpop.f32.mrb[187].mxu0 }
0x3f56   : > { %v7985_v57 = vsel %vm2398_vm11, %v7980_v55, 0 }
0x3f57   : > { %10078 = vmatpush3.bf16.msra.mxu0 %v7985_v57 }
0x3f58   : > { %10089 = vmatprep.subr.bf16.mxu0 %v10507_v1 }
0x4021   : > { %v7962_v58 = vpop.f32.mrb[184].mxu1 }
0x4022   : > { %v10075_v59 = vpop.f32.mrb[185].mxu1  ;;  %v7968_v60 = vsel %vm1904_vm1, %v7962_v58, -inf }
0x4023   : > { %7969 = vmax.xlane.f32.xlu1 %v7968_v60  ;;  %v7965_v61 = vpop.f32.mrb[186].mxu1 }
0x4024   : > { %v10076_v62 = vpop.f32.mrb[187].mxu1 }
0x40b0   : > { %v7970_v63 = vpop.xlane.xlu1 %7969 }
0x40b1   : > { %v7971_v0 = vsub.f32 %v7962_v58, %v7970_v63  ;;  %v9133_v63 = vld [vmem:[%s11931_s8 + $0xc] sm:$0xf] }
0x40b3   : > { %v7972_v51 = vmul.f32 1.442695, %v7971_v0  ;;  %v8384_v0 = vsel %vm2398_vm11, %v9133_v63, 0 }
0x40b5   : > { %10425 = vpow2.f32 %v7972_v51 }
0x40bf   : > { %v10426_v5 = vpop.eup %10425 }
0x40c0   : > { %v7974_v6 = vsel %vm1904_vm1, %v10426_v5, 0.0 }
0x40c1   : > { %7975 = vadd.xlane.f32.xlu0 %v7974_v6 }
0x414e   : > { %v7976_v9 = vpop.xlane.xlu0 %7975 }
0x414f   : > { %10427 = vrcp.f32 %v7976_v9 }
0x4159   : > { %v10428_v2 = vpop.eup %10427 }
0x415a   : > { %v7978_v49 = vmul.f32 %v10428_v2, %v10426_v5 }
0x415c   : > { %v7979_v10 = vpack.c.bf16 %v7978_v49, %v7978_v49 }
0x415e   : > { %10080 = vmatmul.mubr.msk.bf16.vlgmr.msra.gmra.mrb[188].mxu0 %vm1904_vm1, %v7979_v10 }
0x415f   : > { %10090 = vmatpush3.bf16.msra.mxu0 %v10319_v3  ;;  %10093 = vmatprep.mubr.msk.bf16.mxu0 %vm10508_vm0, %v10507_v1 }
0x4160   : > { %10091 = vmatprep.subr.bf16.mxu0 %v10507_v1 }
0x4163   : > { %10092 = vmatpush3.bf16.msra.mxu0 %v10320_v11  ;;  %v9137_v11 = vld [vmem:[%s11932_s0] ss:$0 sm:$0xff]  ;;  %s8661_s0 = sshll.u32 %s11935_s1, 3 }
0x4164   : > { %10105 = vmatprep.subr.bf16.mxu0 %v10507_v1 }
0x4166   : > { %10094 = vmatmul.mubr.msk.bf16.vlgmr.msra.gmra.mrb[192].mxu0 %vm2163_vm10, %v11604_v44 }
0x4167   : > { %10106 = vmatpush3.bf16.msra.mxu0 %v10321_v21  ;;  %10109 = vmatprep.mubr.msk.bf16.mxu0 %vm10508_vm0, %v10507_v1 }
0x4168   : > { %10107 = vmatprep.subr.bf16.mxu0 %v10507_v1 }
0x416b   : > { %10108 = vmatpush3.bf16.msra.mxu0 %v10322_v12 }
0x416c   : > { %10119 = vmatprep.subr.bf16.mxu0 %v10507_v1 }
0x416e   : > { %10110 = vmatmul.mubr.msk.bf16.vlgmr.msra.gmra.mrb[196].mxu0 %vm2163_vm10, %v11604_v44 }
0x416f   : > { %10121 = vmatprep.mubr.msk.bf16.mxu0 %vm10508_vm0, %v10507_v1 }
0x4231   : > { %v8021_v39 = vpop.f32.mrb[188].mxu0 }
0x4232   : > { %v8027_v42 = vpack.c.bf16 %v8021_v39, %v8021_v39  ;;  %v10081_v43 = vpop.f32.mrb[189].mxu0 }
0x4233   : > { %v8024_v14 = vpop.f32.mrb[190].mxu0 }
0x4234   : > { %v10082_v15 = vpop.f32.mrb[191].mxu0  ;;  %10086 = vmatmul.mubr.msk.bf16.vlgmr.msra.gmra.mrb[188].mxu1 %vm1904_vm1, %v8027_v42 }
0x4235   : > { %10098 = vmatpush3.bf16.msra.mxu1 %v10323_v48  ;;  %10101 = vmatprep.mubr.msk.bf16.mxu1 %vm10508_vm0, %v10507_v1 }
0x4236   : > { %10099 = vmatprep.subr.bf16.mxu1 %v10507_v1 }
0x4239   : > { %v8134_v17 = vpop.f32.mrb[192].mxu0  ;;  %10100 = vmatpush3.bf16.msra.mxu1 %v10324_v16 }
0x423a   : > { %v10095_v18 = vpop.f32.mrb[193].mxu0  ;;  %10113 = vmatprep.subr.bf16.mxu1 %v10507_v1  ;;  %v8135_v54 = vadd.f32 %v9111_v53, %v8134_v17 }
0x423b   : > { %v8137_v19 = vpop.f32.mrb[194].mxu0 }
0x423c   : > { %v10096_v20 = vpop.f32.mrb[195].mxu0  ;;  %10102 = vmatmul.mubr.msk.bf16.vlgmr.msra.gmra.mrb[192].mxu1 %vm2163_vm10, %v11604_v44  ;;  %v8272_v37 = vpack.c.bf16 %v8135_v54, %v8135_v54  ;;  %v8467_v19 = vld [vmem:[%s10834_s20] sm:$0xff] }
0x423d   : > { %10115 = vmatprep.mubr.msk.bf16.mxu1 %vm10508_vm0, %v10507_v1  ;;  %v10510_v20 = vmov 0  }
0x423e   : > { %10213 = vset.pattern.permute.xlu1 %v10510_v20  ;;  %10214 = vset.pattern.permute.xlu0 %v10510_v20 }
0x4241   : > { %v8264_v23 = vpop.f32.mrb[196].mxu0 }
0x4242   : > { %v8265_v8 = vadd.f32 %v9129_v22, %v8264_v23  ;;  %v10111_v25 = vpop.f32.mrb[197].mxu0 }
0x4243   : > { %v8267_v26 = vpop.f32.mrb[198].mxu0  ;;  %v9138_v25 = vld [vmem:[%s11933_s2] ss:$0 sm:$0xff]  ;;  %s1900_s2 = scalar_lea.vmem %s10839_s27, %s8661_s0 }
0x4244   : > { %v8332_v28 = vpack.c.bf16 %v8265_v8, %v8265_v8  ;;  %v10112_v29 = vpop.f32.mrb[199].mxu0 }
0x4246   : > { %v8337_v30 = vsel %vm2398_vm11, %v8332_v28, 0  ;;  %v9139_v28 = vld [vmem:[%s10824_s4] ss:$0 sm:$0xff] }
0x4247   : > { %10120 = vmatpush3.bf16.msra.mxu0 %v8337_v30 }
0x4248   : > { %10131 = vmatprep.subr.bf16.mxu0 %v10507_v1 }
0x4307   : > { %v8068_v32 = vpop.f32.mrb[188].mxu1 }
0x4308   : > { %v8074_v44 = vadd.f32 %v8068_v32, %v11714_v33  ;;  %v10087_v24 = vpop.f32.mrb[189].mxu1 }
0x4309   : > { %v8071_v35 = vpop.f32.mrb[190].mxu1  ;;  %v8465_v24 = vld [vmem:[%s10829_s25] sm:$0xf] }
0x430a   : > { %v10088_v40 = vpop.f32.mrb[191].mxu1 }
0x430f   : > { %v8199_v46 = vpop.f32.mrb[192].mxu1 }
0x4310   : > { %v8200_v47 = vadd.f32 %v9120_v45, %v8199_v46  ;;  %v10103_v50 = vpop.f32.mrb[193].mxu1 }
0x4311   : > { %v8202_v34 = vpop.f32.mrb[194].mxu1 }
0x4312   : > { %v8273_v36 = vpack.c.bf16 %v8200_v47, %v8200_v47  ;;  %v10104_v52 = vpop.f32.mrb[195].mxu1 }
0x4314   : > { %v8278_v38 = vsel %vm1904_vm1, %v8273_v36, 0 }
0x4315   : > { %10114 = vmatpush3.bf16.xpose.msra.mxu1 %v8278_v38 }
0x4316   : > { %10125 = vmatprep.subr.bf16.mxu1 %v10507_v1 }
0x431c   : > { %10116 = vmatmul.mubr.msk.bf16.vlgmr.msra.gmra.mrb[196].mxu1 %vm1904_vm1, %v8272_v37 }
0x431d   : > { %10127 = vmatprep.mubr.msk.bf16.mxu1 %vm10508_vm0, %v10507_v1  ;;  %10126 = vmatpush3.bf16.msra.mxu1 %v8384_v0 }
0x43ef   : > { %v8314_v33 = vpop.f32.mrb[196].mxu1 }
0x43f0   : > { %v10117_v27 = vpop.f32.mrb[197].mxu1  ;;  %v8320_v55 = vsel %vm1904_vm1, %v8314_v33, -inf }
0x43f1   : > { %8321 = vmax.xlane.f32.xlu1 %v8320_v55  ;;  %v8317_v56 = vpop.f32.mrb[198].mxu1 }
0x43f2   : > { %v10118_v57 = vpop.f32.mrb[199].mxu1 }
0x447e   : > { %v8322_v58 = vpop.xlane.xlu1 %8321 }
0x447f   : > { %v8323_v59 = vsub.f32 %v8314_v33, %v8322_v58 }
0x4481   : > { %v8324_v60 = vmul.f32 1.442695, %v8323_v59 }
0x4483   : > { %10429 = vpow2.f32 %v8324_v60 }
0x448d   : > { %v10430_v61 = vpop.eup %10429 }
0x448e   : > { %v8326_v62 = vsel %vm1904_vm1, %v10430_v61, 0.0 }
0x448f   : > { %8327 = vadd.xlane.f32.xlu0 %v8326_v62 }
0x451c   : > { %v8328_v51 = vpop.xlane.xlu0 %8327 }
0x451d   : > { %10431 = vrcp.f32 %v8328_v51 }
0x4527   : > { %v10432_v5 = vpop.eup %10431 }
0x4528   : > { %v8330_v6 = vmul.f32 %v10432_v5, %v10430_v61 }
0x452a   : > { %v8331_v4 = vpack.c.bf16 %v8330_v6, %v8330_v6 }
0x452c   : > { %10122 = vmatmul.mubr.msk.bf16.vlgmr.msra.gmra.mrb[200].mxu0 %vm1904_vm1, %v8331_v4 }
0x452d   : > { %10133 = vmatprep.mubr.msk.bf16.mxu0 %vm10508_vm0, %v10507_v1  ;;  %vm8521_vm0 = vcmask 31744  }
0x45ff   : > { %v8373_v7 = vpop.f32.mrb[200].mxu0 }
0x4600   : > { %v8379_v9 = vpack.c.bf16 %v8373_v7, %v8373_v7  ;;  %v10123_v2 = vpop.f32.mrb[201].mxu0 }
0x4601   : > { %v8376_v49 = vpop.f32.mrb[202].mxu0 }
0x4602   : > { %v10124_v3 = vpop.f32.mrb[203].mxu0  ;;  %10128 = vmatmul.mubr.msk.bf16.vlgmr.msra.gmra.mrb[200].mxu1 %vm1904_vm1, %v8379_v9 }
0x46d5   : > { %v8420_v10 = vpop.f32.mrb[200].mxu1 }
0x46d6   : > { %v8426_v21 = vadd.f32 %v8420_v10, %v8074_v44  ;;  %v10129_v12 = vpop.f32.mrb[201].mxu1 }
0x46d7   : > { %v8423_v39 = vpop.f32.mrb[202].mxu1 }
0x46d8   : > { %v8434_v48 = vadd.f32 %v9137_v11, %v8426_v21  ;;  %v10130_v42 = vpop.f32.mrb[203].mxu1 }
0x46da   : > { %v8435_v43 = vadd.f32 %v8434_v48, %v11599_v31 }
0x46dc   : > { %v8438_v14 = vsel %vm2163_vm10, %v8435_v43, 0.0 }
0x46dd   : > { %8439 = vadd.xlane.f32.xlu1 %v8438_v14 }
0x46ee   : > { %8470 = vperm.xlu1 %10213, %v8467_v19  }
0x476a   : > { %v8440_v1 = vpop.xlane.xlu1 %8439 }
0x476b   : > { %v8441_v15 = vmul.f32 0.03125, %v8440_v1 }
0x476d   : > { %v8442_v16 = vsub.f32 %v8435_v43, %v8441_v15 }
0x476e   : > { %v8471_v35 = vpop.permute.xlu1 %8470 }
0x476f   : > { %v8443_v17 = vmul.f32 %v8442_v16, %v8442_v16 }
0x4771   : > { %v8444_v18 = vsel %vm2163_vm10, %v8443_v17, 0.0 }
0x4772   : > { %8445 = vadd.xlane.f32.xlu0 %v8444_v18 }
0x47ff   : > { %v8446_v22 = vpop.xlane.xlu0 %8445 }
0x4800   : > { %v8447_v31 = vmul.f32 0.03125, %v8446_v22 }
0x4802   : > { %v8448_v23 = vadd.f32 1e-05, %v8447_v31 }
0x4804   : > { %10433 = vrsqrt.f32 %v8448_v23 }
0x480e   : > { %v10434_v8 = vpop.eup %10433 }
0x480f   : > { %v8450_v26 = vmul.f32 %v10434_v8, %v8442_v16 }
0x4811   : > { %v8457_v29 = vmul.f32 %v9138_v25, %v8450_v26 }
0x4813   : > { %v8464_v30 = vadd.f32 %v9139_v28, %v8457_v29 }
0x4815   : > { %v8466_v32 = vpack.c.bf16 %v8464_v30, %v8464_v30 }
0x4817   : > { %v8477_v44 = vsel %vm2163_vm10, %v8466_v32, 0 }
0x4818   : > { %10132 = vmatpush3.bf16.xpose.msra.mxu0 %v8477_v44 }
0x481f   : > { %10134 = vmatmul.mubr.msk.bf16.vlgmr.msra.gmra.mrb[204].mxu0 %vm2163_vm10, %v8465_v24 }
0x48f2   : > { %v8513_v40 = vpop.f32.mrb[204].mxu0 }
0x48f3   : > { %v10135_v45 = vpop.f32.mrb[205].mxu0  ;;  %v8514_v46 = vadd.f32 %v8513_v40, %v8471_v35 }
0x48f4   : > { %v8516_v47 = vpop.f32.mrb[206].mxu0 }
0x48f5   : > { %v8519_v50 = vmul.f32 %v8514_v46, %v10886_v41  ;;  %v10136_v34 = vpop.f32.mrb[207].mxu0 }
0x48f7   : > { %v8520_v36 = vadd.f32 %v8519_v50, %v10871_v13 }
0x48f9   : > { %8522 = vst.msk [vmem:[%s1900_s2] sm:$0xff] %vm8521_vm0, %v8520_v36 }
0x48fa PF: > { %s139_s28 = sadd.s32 1, %s10441_s28  }
0x48fb   : > { %p136_p4 = scmp.ge.s32.totalorder %s139_s28, 4  }
0x48fd   :  { %138 = sbr.rel (!%p136_p4) target bundleno = 140 (0x8c), region = 457 }

</bundles_post_ra>
